<compile_context>
chip_gen: v6e
topology: v6e:2x2x1
jax: 0.10.0
libtpu: 0.0.40
codegen_flags: <defaults>
</compile_context>

<pallas_src>
import numpy as np

import jax
import jax.numpy as jnp
from jax.experimental import pallas as pl
from jax.experimental.pallas import tpu as pltpu

LANE = 128  # padded width of one kh2 column group of the layer-2 GEMM output


# ----------------------------------------------------------------------------
# Fused kernel: one grid step == TB batch elements, everything stays in VMEM.
# ----------------------------------------------------------------------------
def _make_kernel(tb):
    tb3 = tb * 3

    def kernel(x_ref, w1_ref, b1_ref, w2_ref, b2_ref, r3_ref, l3_ref, b3_ref,
               o_ref, m27_ref):
        # x rows are ordered (j, b, i): j = latent W, b = batch-in-block, i = latent H.
        x = x_ref[0]                                    # (tb*9, c0)   bf16
        b1 = b1_ref[...]                                # (1, c1)      f32
        b2 = b2_ref[...]                                # (1, 3*128)   f32 (pad lanes 0)
        w2 = w2_ref[...]                                # (c1, 3*128)  bf16

        # ---- layers 1+2 fused per (kh1, kw1) tap of the first ConvT ---------------
        # layer-1 tap: (tb*9, c0) @ (c0, c1)    -> +b1, ReLU     (pixel-shuffle GEMM)
        # layer-2    : (tb*9, c1) @ (c1, 3*128) -> +b2, ReLU, cols = (kh2 | kw2,c2,pad)
        # The (tb*3, 128) sub-blocks of the result go straight into the m27 scratch:
        # rows = (kh1,kh2 | b,i) carry the H27 info, lanes = (j,kw1 | kw2,c2) the W27
        # info.  Every copy is a full-vreg, 128-lane / 8-row aligned VMEM store.
        for kh1 in range(3):
            for kw1 in range(3):
                k = kh1 * 3 + kw1
                h1 = jnp.maximum(
                    jnp.dot(x, w1_ref[k], preferred_element_type=jnp.float32) + b1,
                    0.0)
                h2 = jnp.maximum(
                    jnp.dot(h1.astype(jnp.bfloat16), w2,
                            preferred_element_type=jnp.float32) + b2,
                    0.0)                                # (tb*9, 3*128) f32
                for kh2 in range(3):
                    r0 = (3 * kh1 + kh2) * tb3
                    for j in range(3):
                        lane0 = (j * 3 + kw1) * LANE
                        m27_ref[r0:r0 + tb3, lane0:lane0 + LANE] = \
                            h2[j * tb3:(j + 1) * tb3, kh2 * LANE:(kh2 + 1) * LANE]

        # ---- Upsample(28,28,'nearest') + zero-pad + ConvT(32->1, k=3, s=1, p=1) ----
        # folded into one hstacked right GEMM (W direction + taps + weights) and three
        # block-diagonal left GEMMs (H direction + taps + batch layout).
        t = jnp.dot(m27_ref[...], r3_ref[...],
                    preferred_element_type=jnp.float32)                   # (tb*27, 84)
        acc = jnp.dot(l3_ref[0], t[:, 0:28], preferred_element_type=jnp.float32)
        acc = acc + jnp.dot(l3_ref[1], t[:, 28:56], preferred_element_type=jnp.float32)
        acc = acc + jnp.dot(l3_ref[2], t[:, 56:84], preferred_element_type=jnp.float32)
        o_ref[0] = acc + b3_ref[0, 0]                                     # (tb*28, 28)

    return kernel


# ----------------------------------------------------------------------------
# One-time parameter packing (outside the per-step path).
# ----------------------------------------------------------------------------
def pack_params(params, tb):
    W1, b1, W2, b2, W3, b3 = params
    c0, c1 = W1.shape[0], W1.shape[1]
    c2 = W2.shape[1]
    assert W1.shape[2:] == (3, 3) and W2.shape[2:] == (3, 3) and W3.shape[2:] == (3, 3)

    # ConvT(stride==kernel==3) taps as GEMM right operands (one (c0,c1) per (kh1,kw1)).
    w1p = jnp.transpose(W1, (2, 3, 0, 1)).reshape(9, c0, c1).astype(jnp.bfloat16)
    b1p = b1.reshape(1, c1).astype(jnp.float32)

    # Second ConvT: cols = (kh2 | kw2, c2); each 3*c2 group zero-padded to 128 lanes so
    # the in-kernel copies are lane-aligned.  Pad bias lanes are 0 so ReLU(0+0)=0.
    w2t = jnp.transpose(W2, (0, 2, 3, 1)).reshape(c1, 3, 3 * c2)
    w2p = jnp.concatenate(
        [w2t, jnp.zeros((c1, 3, LANE - 3 * c2), w2t.dtype)], axis=-1
    ).reshape(c1, 3 * LANE).astype(jnp.bfloat16)
    b2g = jnp.concatenate([jnp.tile(b2, 3), jnp.zeros((LANE - 3 * c2,), b2.dtype)])
    b2p = jnp.tile(b2g, 3).reshape(1, 3 * LANE).astype(jnp.float32)

    # Last layer: ConvT(s=1, p=1, k=3) == 3x3 'same' conv with the flipped kernel.
    W3n = np.asarray(W3, np.float32)
    w3f = np.transpose(W3n[:, 0, ::-1, ::-1], (1, 2, 0))                  # (a, e, c2)

    # Nearest upsample 27->28: src = floor(dst*27/28).  U[tap, dst, src] also folds the
    # zero padding of the final conv (same matrix for the H and W directions).
    U = np.zeros((3, 28, 27), np.float32)
    for a in range(3):
        for d in range(28):
            q = d + a - 1
            if 0 <= q < 28:
                U[a, d, (q * 27) // 28] = 1.0

    # Right operand (9*128, 3*28): rows = m27 lanes (j,kw1 | kw2,c2,pad), cols = (a, w).
    r3core = np.einsum("aec,ewW->Wcaw", w3f, U).reshape(27 * c2, 3 * 28)
    r3core = r3core.reshape(9, 3 * c2, 3 * 28)
    r3h = np.zeros((9, LANE, 3 * 28), np.float32)
    r3h[:, :3 * c2, :] = r3core
    r3h = jnp.asarray(r3h.reshape(9 * LANE, 3 * 28))

    # Left operands (3, tb*28, tb*27): rows = (b, h), cols = m27 rows (kh1,kh2 | b,i).
    perm = np.zeros(27, np.int64)                                         # m27 row -> H27
    for kh1 in range(3):
        for kh2 in range(3):
            for i in range(3):
                perm[(3 * kh1 + kh2) * 3 + i] = 9 * i + 3 * kh1 + kh2
    Up = U[:, :, perm]                                                    # (3, 28, 27)
    l3 = np.zeros((3, tb * 28, tb * 27), np.float32)
    for b in range(tb):
        for g in range(9):
            l3[:, b * 28:(b + 1) * 28,
               g * tb * 3 + b * 3:g * tb * 3 + b * 3 + 3] = Up[:, :, g * 3:g * 3 + 3]
    l3 = jnp.asarray(l3)

    b3s = b3.reshape(1, 1).astype(jnp.float32)
    return (w1p, b1p, w2p, b2p, r3h, l3, b3s)


# ----------------------------------------------------------------------------
# Forward wrapper: NCHW in, NCHW out (matches the PyTorch module contract).
# ----------------------------------------------------------------------------
def decoding_cnn_forward(x_nchw, packed, *, tb):
    w1p, b1p, w2p, b2p, r3h, l3, b3s = packed
    B, c0 = x_nchw.shape[0], x_nchw.shape[1]
    assert x_nchw.shape[2:] == (3, 3), "decoder latent feature map must be 3x3"
    assert l3.shape == (3, tb * 28, tb * 27), "packed params built for a different tb"

    nsteps = -(-B // tb)
    bp = nsteps * tb
    if bp != B:
        x_nchw = jnp.pad(x_nchw, ((0, bp - B), (0, 0), (0, 0), (0, 0)))

    # Per-step rows ordered (j, b, i) so the in-kernel copies are aligned (tb*3, 128).
    x2d = jnp.transpose(
        x_nchw.reshape(nsteps, tb, c0, 3, 3), (0, 4, 1, 3, 2)
    ).reshape(nsteps, tb * 9, c0).astype(jnp.bfloat16)

    out = pl.pallas_call(
        _make_kernel(tb),
        out_shape=jax.ShapeDtypeStruct((nsteps, tb * 28, 28), jnp.float32),
        grid=(nsteps,),
        in_specs=[
            pl.BlockSpec((1, tb * 9, c0), lambda s: (s, 0, 0)),
            pl.BlockSpec(w1p.shape, lambda s: (0, 0, 0)),
            pl.BlockSpec(b1p.shape, lambda s: (0, 0)),
            pl.BlockSpec(w2p.shape, lambda s: (0, 0)),
            pl.BlockSpec(b2p.shape, lambda s: (0, 0)),
            pl.BlockSpec(r3h.shape, lambda s: (0, 0)),
            pl.BlockSpec(l3.shape, lambda s: (0, 0, 0)),
            pl.BlockSpec(memory_space=pltpu.MemorySpace.SMEM),
        ],
        out_specs=pl.BlockSpec((1, tb * 28, 28), lambda s: (s, 0, 0)),
        scratch_shapes=[pltpu.VMEM((tb * 27, 9 * LANE), jnp.float32)],
        compiler_params=pltpu.CompilerParams(dimension_semantics=("parallel",)),
    )(x2d, w1p, b1p, w2p, b2p, r3h, l3, b3s)

    return out.reshape(bp, 28, 28)[:B].reshape(B, 1, 28, 28)


# ----------------------------------------------------------------------------
# Pure-jnp reference (independent formulation) for the runtime sanity check.
# ----------------------------------------------------------------------------
def ref_forward(x_nchw, params):
    W1, b1, W2, b2, W3, b3 = params
    hi = jax.lax.Precision.HIGHEST
    x = jnp.transpose(x_nchw, (0, 2, 3, 1)).astype(jnp.float32)           # NHWC

    def convt_s3(x, W, b):
        B, H, Wd, Cin = x.shape
        _, Cout, K, _ = W.shape
        y = jnp.einsum("bijc,cokl->bikjlo", x, W, precision=hi)
        y = y.reshape(B, H * K, Wd * K, Cout) + b
        return jnp.maximum(y, 0.0)

    x = convt_s3(x, W1, b1)
    x = convt_s3(x, W2, b2)
    ih = (jnp.arange(28) * x.shape[1]) // 28                              # nearest
    iw = (jnp.arange(28) * x.shape[2]) // 28
    x = x[:, ih][:, :, iw]
    xp = jnp.pad(x, ((0, 0), (1, 1), (1, 1), (0, 0)))
    y = b3 + sum(
        jnp.einsum("bhwc,co->bhwo", xp[:, a:a + 28, e:e + 28, :],
                   W3[:, :, 2 - a, 2 - e], precision=hi)
        for a in range(3) for e in range(3))
    return jnp.transpose(y, (0, 3, 1, 2))


# ----------------------------------------------------------------------------
if __name__ == "__main__":
    key = jax.random.PRNGKey(0)
    k1, k2, k3, k4, k5, k6, kx = jax.random.split(key, 7)

    def uinit(k, shape, fan_in):
        bound = 1.0 / (fan_in ** 0.5)
        return jax.random.uniform(k, shape, jnp.float32, -bound, bound)

    # torch ConvTranspose2d weight layout: (in_channels, out_channels, kH, kW)
    W1 = uinit(k1, (16, 64, 3, 3), 16 * 9)
    b1 = uinit(k2, (64,), 16 * 9)
    W2 = uinit(k3, (64, 32, 3, 3), 64 * 9)
    b2 = uinit(k4, (32,), 64 * 9)
    W3 = uinit(k5, (32, 1, 3, 3), 32 * 9)
    b3 = uinit(k6, (1,), 32 * 9)
    params = (W1, b1, W2, b2, W3, b3)

    # decoder latent: B x channels[0] x 3 x 3   (3 -> 9 -> 27 -> upsample 28)
    B, TB = 16, 8                      # grid = (2,): keeps both v7x TensorCores busy
    x = jax.random.normal(kx, (B, 16, 3, 3), jnp.float32)

    packed = pack_params(params, tb=TB)                  # one-time weight packing
    fwd = jax.jit(decoding_cnn_forward, static_argnames=("tb",))
    out = jax.block_until_ready(fwd(x, packed, tb=TB))
    assert out.shape == (B, 1, 28, 28), out.shape

    ref = ref_forward(x, params)
    # bf16 MXU operands (x, w1, w2) with f32 accumulation -> rounding-level differences.
    if not jnp.allclose(out, ref, atol=3e-3, rtol=3e-3):
        err = float(jnp.max(jnp.abs(out - ref)))
        raise AssertionError(f"Pallas kernel output mismatch vs. reference (max err {err})")

    print("KERNEL_OK")
</pallas_src>

<mosaic_0001>
module attributes {stable_mosaic.version = 11 : i64} {
  func.func @kernel(%arg0: i32, %arg1: memref<1x72x16xbf16, #tpu.memory_space<vmem>>, %arg2: memref<9x16x64xbf16, #tpu.memory_space<vmem>>, %arg3: memref<1x64xf32, #tpu.memory_space<vmem>>, %arg4: memref<64x384xbf16, #tpu.memory_space<vmem>>, %arg5: memref<1x384xf32, #tpu.memory_space<vmem>>, %arg6: memref<1152x84xf32, #tpu.memory_space<vmem>>, %arg7: memref<3x224x216xf32, #tpu.memory_space<vmem>>, %arg8: memref<1x1xf32, #tpu.memory_space<smem>>, %arg9: memref<1x224x28xf32, #tpu.memory_space<vmem>>, %arg10: memref<216x1152xf32, #tpu.memory_space<vmem>>) attributes {dimension_semantics = [#tpu.dimension_semantics<parallel>], iteration_bounds = array<i64: 2>, scalar_prefetch = 0 : i64, scratch_operands = 1 : i64, tpu.core_type = #tpu.core_type<tc>, window_params = [{transform_indices = @transform_0, window_bounds = array<i64: 1, 72, 16>}, {pipeline_mode = #tpu.pipeline_mode<synchronous>, transform_indices = @transform_1, window_bounds = array<i64: 9, 16, 64>}, {pipeline_mode = #tpu.pipeline_mode<synchronous>, transform_indices = @transform_2, window_bounds = array<i64: 1, 64>}, {pipeline_mode = #tpu.pipeline_mode<synchronous>, transform_indices = @transform_3, window_bounds = array<i64: 64, 384>}, {pipeline_mode = #tpu.pipeline_mode<synchronous>, transform_indices = @transform_4, window_bounds = array<i64: 1, 384>}, {pipeline_mode = #tpu.pipeline_mode<synchronous>, transform_indices = @transform_5, window_bounds = array<i64: 1152, 84>}, {pipeline_mode = #tpu.pipeline_mode<synchronous>, transform_indices = @transform_6, window_bounds = array<i64: 3, 224, 216>}, {transform_indices = @transform_7, window_bounds = array<i64: 1, 1>}, {transform_indices = @transform_8, window_bounds = array<i64: 1, 224, 28>}]} {
    %c0 = arith.constant 0 : index
    %c0_0 = arith.constant 0 : index
    %c0_1 = arith.constant 0 : index
    %0 = vector.load %arg1[%c0, %c0_0, %c0_1] : memref<1x72x16xbf16, #tpu.memory_space<vmem>>, vector<1x72x16xbf16>
    %1 = vector.shape_cast %0 : vector<1x72x16xbf16> to vector<72x16xbf16>
    %c0_2 = arith.constant 0 : index
    %c0_3 = arith.constant 0 : index
    %2 = vector.load %arg3[%c0_2, %c0_3] : memref<1x64xf32, #tpu.memory_space<vmem>>, vector<1x64xf32>
    %c0_4 = arith.constant 0 : index
    %c0_5 = arith.constant 0 : index
    %3 = vector.load %arg5[%c0_4, %c0_5] : memref<1x384xf32, #tpu.memory_space<vmem>>, vector<1x384xf32>
    %c0_6 = arith.constant 0 : index
    %c0_7 = arith.constant 0 : index
    %4 = vector.load %arg4[%c0_6, %c0_7] : memref<64x384xbf16, #tpu.memory_space<vmem>>, vector<64x384xbf16>
    %c0_8 = arith.constant 0 : index
    %c0_9 = arith.constant 0 : index
    %c0_10 = arith.constant 0 : index
    %5 = vector.load %arg2[%c0_8, %c0_9, %c0_10] : memref<9x16x64xbf16, #tpu.memory_space<vmem>>, vector<1x16x64xbf16>
    %6 = vector.shape_cast %5 : vector<1x16x64xbf16> to vector<16x64xbf16>
    %cst = arith.constant dense<0.000000e+00> : vector<72x64xf32>
    %7 = tpu.matmul %1, %6, %cst {dimension_numbers = #tpu.dot_dimension_numbers<[1], [0], [0], [1], [0, 0, 1, 1], [], []>} : vector<72x16xbf16>, vector<16x64xbf16>, vector<72x64xf32> -> vector<72x64xf32>
    %8 = vector.broadcast %2 : vector<1x64xf32> to vector<72x64xf32>
    %9 = arith.addf %7, %8 : vector<72x64xf32>
    %cst_11 = arith.constant 0.000000e+00 : f32
    %10 = vector.broadcast %cst_11 : f32 to vector<72x64xf32>
    %11 = arith.maximumf %9, %10 : vector<72x64xf32>
    %12 = arith.truncf %11 : vector<72x64xf32> to vector<72x64xbf16>
    %cst_12 = arith.constant dense<0.000000e+00> : vector<72x384xf32>
    %13 = tpu.matmul %12, %4, %cst_12 {dimension_numbers = #tpu.dot_dimension_numbers<[1], [0], [0], [1], [0, 0, 1, 1], [], []>} : vector<72x64xbf16>, vector<64x384xbf16>, vector<72x384xf32> -> vector<72x384xf32>
    %14 = vector.broadcast %3 : vector<1x384xf32> to vector<72x384xf32>
    %15 = arith.addf %13, %14 : vector<72x384xf32>
    %cst_13 = arith.constant 0.000000e+00 : f32
    %16 = vector.broadcast %cst_13 : f32 to vector<72x384xf32>
    %17 = arith.maximumf %15, %16 : vector<72x384xf32>
    %18 = vector.extract_strided_slice %17 {offsets = [0, 0], sizes = [24, 128], strides = [1, 1]} : vector<72x384xf32> to vector<24x128xf32>
    %c0_14 = arith.constant 0 : index
    %c0_15 = arith.constant 0 : index
    %19 = vector.load %arg10[%c0_14, %c0_15] : memref<216x1152xf32, #tpu.memory_space<vmem>>, vector<24x128xf32>
    tpu.vector_store %arg10[%c0_14, %c0_15], %18 {strides = array<i32>} : memref<216x1152xf32, #tpu.memory_space<vmem>>, vector<24x128xf32>,
    %20 = vector.extract_strided_slice %17 {offsets = [24, 0], sizes = [24, 128], strides = [1, 1]} : vector<72x384xf32> to vector<24x128xf32>
    %c0_16 = arith.constant 0 : index
    %c384 = arith.constant 384 : index
    %21 = vector.load %arg10[%c0_16, %c384] : memref<216x1152xf32, #tpu.memory_space<vmem>>, vector<24x128xf32>
    tpu.vector_store %arg10[%c0_16, %c384], %20 {strides = array<i32>} : memref<216x1152xf32, #tpu.memory_space<vmem>>, vector<24x128xf32>,
    %22 = vector.extract_strided_slice %17 {offsets = [48, 0], sizes = [24, 128], strides = [1, 1]} : vector<72x384xf32> to vector<24x128xf32>
    %c0_17 = arith.constant 0 : index
    %c768 = arith.constant 768 : index
    %23 = vector.load %arg10[%c0_17, %c768] : memref<216x1152xf32, #tpu.memory_space<vmem>>, vector<24x128xf32>
    tpu.vector_store %arg10[%c0_17, %c768], %22 {strides = array<i32>} : memref<216x1152xf32, #tpu.memory_space<vmem>>, vector<24x128xf32>,
    %24 = vector.extract_strided_slice %17 {offsets = [0, 128], sizes = [24, 128], strides = [1, 1]} : vector<72x384xf32> to vector<24x128xf32>
    %c24 = arith.constant 24 : index
    %c0_18 = arith.constant 0 : index
    %25 = vector.load %arg10[%c24, %c0_18] : memref<216x1152xf32, #tpu.memory_space<vmem>>, vector<24x128xf32>
    tpu.vector_store %arg10[%c24, %c0_18], %24 {strides = array<i32>} : memref<216x1152xf32, #tpu.memory_space<vmem>>, vector<24x128xf32>,
    %26 = vector.extract_strided_slice %17 {offsets = [24, 128], sizes = [24, 128], strides = [1, 1]} : vector<72x384xf32> to vector<24x128xf32>
    %c24_19 = arith.constant 24 : index
    %c384_20 = arith.constant 384 : index
    %27 = vector.load %arg10[%c24_19, %c384_20] : memref<216x1152xf32, #tpu.memory_space<vmem>>, vector<24x128xf32>
    tpu.vector_store %arg10[%c24_19, %c384_20], %26 {strides = array<i32>} : memref<216x1152xf32, #tpu.memory_space<vmem>>, vector<24x128xf32>,
    %28 = vector.extract_strided_slice %17 {offsets = [48, 128], sizes = [24, 128], strides = [1, 1]} : vector<72x384xf32> to vector<24x128xf32>
    %c24_21 = arith.constant 24 : index
    %c768_22 = arith.constant 768 : index
    %29 = vector.load %arg10[%c24_21, %c768_22] : memref<216x1152xf32, #tpu.memory_space<vmem>>, vector<24x128xf32>
    tpu.vector_store %arg10[%c24_21, %c768_22], %28 {strides = array<i32>} : memref<216x1152xf32, #tpu.memory_space<vmem>>, vector<24x128xf32>,
    %30 = vector.extract_strided_slice %17 {offsets = [0, 256], sizes = [24, 128], strides = [1, 1]} : vector<72x384xf32> to vector<24x128xf32>
    %c48 = arith.constant 48 : index
    %c0_23 = arith.constant 0 : index
    %31 = vector.load %arg10[%c48, %c0_23] : memref<216x1152xf32, #tpu.memory_space<vmem>>, vector<24x128xf32>
    tpu.vector_store %arg10[%c48, %c0_23], %30 {strides = array<i32>} : memref<216x1152xf32, #tpu.memory_space<vmem>>, vector<24x128xf32>,
    %32 = vector.extract_strided_slice %17 {offsets = [24, 256], sizes = [24, 128], strides = [1, 1]} : vector<72x384xf32> to vector<24x128xf32>
    %c48_24 = arith.constant 48 : index
    %c384_25 = arith.constant 384 : index
    %33 = vector.load %arg10[%c48_24, %c384_25] : memref<216x1152xf32, #tpu.memory_space<vmem>>, vector<24x128xf32>
    tpu.vector_store %arg10[%c48_24, %c384_25], %32 {strides = array<i32>} : memref<216x1152xf32, #tpu.memory_space<vmem>>, vector<24x128xf32>,
    %34 = vector.extract_strided_slice %17 {offsets = [48, 256], sizes = [24, 128], strides = [1, 1]} : vector<72x384xf32> to vector<24x128xf32>
    %c48_26 = arith.constant 48 : index
    %c768_27 = arith.constant 768 : index
    %35 = vector.load %arg10[%c48_26, %c768_27] : memref<216x1152xf32, #tpu.memory_space<vmem>>, vector<24x128xf32>
    tpu.vector_store %arg10[%c48_26, %c768_27], %34 {strides = array<i32>} : memref<216x1152xf32, #tpu.memory_space<vmem>>, vector<24x128xf32>,
    %c1 = arith.constant 1 : index
    %c0_28 = arith.constant 0 : index
    %c0_29 = arith.constant 0 : index
    %36 = vector.load %arg2[%c1, %c0_28, %c0_29] : memref<9x16x64xbf16, #tpu.memory_space<vmem>>, vector<1x16x64xbf16>
    %37 = vector.shape_cast %36 : vector<1x16x64xbf16> to vector<16x64xbf16>
    %cst_30 = arith.constant dense<0.000000e+00> : vector<72x64xf32>
    %38 = tpu.matmul %1, %37, %cst_30 {dimension_numbers = #tpu.dot_dimension_numbers<[1], [0], [0], [1], [0, 0, 1, 1], [], []>} : vector<72x16xbf16>, vector<16x64xbf16>, vector<72x64xf32> -> vector<72x64xf32>
    %39 = vector.broadcast %2 : vector<1x64xf32> to vector<72x64xf32>
    %40 = arith.addf %38, %39 : vector<72x64xf32>
    %cst_31 = arith.constant 0.000000e+00 : f32
    %41 = vector.broadcast %cst_31 : f32 to vector<72x64xf32>
    %42 = arith.maximumf %40, %41 : vector<72x64xf32>
    %43 = arith.truncf %42 : vector<72x64xf32> to vector<72x64xbf16>
    %cst_32 = arith.constant dense<0.000000e+00> : vector<72x384xf32>
    %44 = tpu.matmul %43, %4, %cst_32 {dimension_numbers = #tpu.dot_dimension_numbers<[1], [0], [0], [1], [0, 0, 1, 1], [], []>} : vector<72x64xbf16>, vector<64x384xbf16>, vector<72x384xf32> -> vector<72x384xf32>
    %45 = vector.broadcast %3 : vector<1x384xf32> to vector<72x384xf32>
    %46 = arith.addf %44, %45 : vector<72x384xf32>
    %cst_33 = arith.constant 0.000000e+00 : f32
    %47 = vector.broadcast %cst_33 : f32 to vector<72x384xf32>
    %48 = arith.maximumf %46, %47 : vector<72x384xf32>
    %49 = vector.extract_strided_slice %48 {offsets = [0, 0], sizes = [24, 128], strides = [1, 1]} : vector<72x384xf32> to vector<24x128xf32>
    %c0_34 = arith.constant 0 : index
    %c128 = arith.constant 128 : index
    %50 = vector.load %arg10[%c0_34, %c128] : memref<216x1152xf32, #tpu.memory_space<vmem>>, vector<24x128xf32>
    tpu.vector_store %arg10[%c0_34, %c128], %49 {strides = array<i32>} : memref<216x1152xf32, #tpu.memory_space<vmem>>, vector<24x128xf32>,
    %51 = vector.extract_strided_slice %48 {offsets = [24, 0], sizes = [24, 128], strides = [1, 1]} : vector<72x384xf32> to vector<24x128xf32>
    %c0_35 = arith.constant 0 : index
    %c512 = arith.constant 512 : index
    %52 = vector.load %arg10[%c0_35, %c512] : memref<216x1152xf32, #tpu.memory_space<vmem>>, vector<24x128xf32>
    tpu.vector_store %arg10[%c0_35, %c512], %51 {strides = array<i32>} : memref<216x1152xf32, #tpu.memory_space<vmem>>, vector<24x128xf32>,
    %53 = vector.extract_strided_slice %48 {offsets = [48, 0], sizes = [24, 128], strides = [1, 1]} : vector<72x384xf32> to vector<24x128xf32>
    %c0_36 = arith.constant 0 : index
    %c896 = arith.constant 896 : index
    %54 = vector.load %arg10[%c0_36, %c896] : memref<216x1152xf32, #tpu.memory_space<vmem>>, vector<24x128xf32>
    tpu.vector_store %arg10[%c0_36, %c896], %53 {strides = array<i32>} : memref<216x1152xf32, #tpu.memory_space<vmem>>, vector<24x128xf32>,
    %55 = vector.extract_strided_slice %48 {offsets = [0, 128], sizes = [24, 128], strides = [1, 1]} : vector<72x384xf32> to vector<24x128xf32>
    %c24_37 = arith.constant 24 : index
    %c128_38 = arith.constant 128 : index
    %56 = vector.load %arg10[%c24_37, %c128_38] : memref<216x1152xf32, #tpu.memory_space<vmem>>, vector<24x128xf32>
    tpu.vector_store %arg10[%c24_37, %c128_38], %55 {strides = array<i32>} : memref<216x1152xf32, #tpu.memory_space<vmem>>, vector<24x128xf32>,
    %57 = vector.extract_strided_slice %48 {offsets = [24, 128], sizes = [24, 128], strides = [1, 1]} : vector<72x384xf32> to vector<24x128xf32>
    %c24_39 = arith.constant 24 : index
    %c512_40 = arith.constant 512 : index
    %58 = vector.load %arg10[%c24_39, %c512_40] : memref<216x1152xf32, #tpu.memory_space<vmem>>, vector<24x128xf32>
    tpu.vector_store %arg10[%c24_39, %c512_40], %57 {strides = array<i32>} : memref<216x1152xf32, #tpu.memory_space<vmem>>, vector<24x128xf32>,
    %59 = vector.extract_strided_slice %48 {offsets = [48, 128], sizes = [24, 128], strides = [1, 1]} : vector<72x384xf32> to vector<24x128xf32>
    %c24_41 = arith.constant 24 : index
    %c896_42 = arith.constant 896 : index
    %60 = vector.load %arg10[%c24_41, %c896_42] : memref<216x1152xf32, #tpu.memory_space<vmem>>, vector<24x128xf32>
    tpu.vector_store %arg10[%c24_41, %c896_42], %59 {strides = array<i32>} : memref<216x1152xf32, #tpu.memory_space<vmem>>, vector<24x128xf32>,
    %61 = vector.extract_strided_slice %48 {offsets = [0, 256], sizes = [24, 128], strides = [1, 1]} : vector<72x384xf32> to vector<24x128xf32>
    %c48_43 = arith.constant 48 : index
    %c128_44 = arith.constant 128 : index
    %62 = vector.load %arg10[%c48_43, %c128_44] : memref<216x1152xf32, #tpu.memory_space<vmem>>, vector<24x128xf32>
    tpu.vector_store %arg10[%c48_43, %c128_44], %61 {strides = array<i32>} : memref<216x1152xf32, #tpu.memory_space<vmem>>, vector<24x128xf32>,
    %63 = vector.extract_strided_slice %48 {offsets = [24, 256], sizes = [24, 128], strides = [1, 1]} : vector<72x384xf32> to vector<24x128xf32>
    %c48_45 = arith.constant 48 : index
    %c512_46 = arith.constant 512 : index
    %64 = vector.load %arg10[%c48_45, %c512_46] : memref<216x1152xf32, #tpu.memory_space<vmem>>, vector<24x128xf32>
    tpu.vector_store %arg10[%c48_45, %c512_46], %63 {strides = array<i32>} : memref<216x1152xf32, #tpu.memory_space<vmem>>, vector<24x128xf32>,
    %65 = vector.extract_strided_slice %48 {offsets = [48, 256], sizes = [24, 128], strides = [1, 1]} : vector<72x384xf32> to vector<24x128xf32>
    %c48_47 = arith.constant 48 : index
    %c896_48 = arith.constant 896 : index
    %66 = vector.load %arg10[%c48_47, %c896_48] : memref<216x1152xf32, #tpu.memory_space<vmem>>, vector<24x128xf32>
    tpu.vector_store %arg10[%c48_47, %c896_48], %65 {strides = array<i32>} : memref<216x1152xf32, #tpu.memory_space<vmem>>, vector<24x128xf32>,
    %c2 = arith.constant 2 : index
    %c0_49 = arith.constant 0 : index
    %c0_50 = arith.constant 0 : index
    %67 = vector.load %arg2[%c2, %c0_49, %c0_50] : memref<9x16x64xbf16, #tpu.memory_space<vmem>>, vector<1x16x64xbf16>
    %68 = vector.shape_cast %67 : vector<1x16x64xbf16> to vector<16x64xbf16>
    %cst_51 = arith.constant dense<0.000000e+00> : vector<72x64xf32>
    %69 = tpu.matmul %1, %68, %cst_51 {dimension_numbers = #tpu.dot_dimension_numbers<[1], [0], [0], [1], [0, 0, 1, 1], [], []>} : vector<72x16xbf16>, vector<16x64xbf16>, vector<72x64xf32> -> vector<72x64xf32>
    %70 = vector.broadcast %2 : vector<1x64xf32> to vector<72x64xf32>
    %71 = arith.addf %69, %70 : vector<72x64xf32>
    %cst_52 = arith.constant 0.000000e+00 : f32
    %72 = vector.broadcast %cst_52 : f32 to vector<72x64xf32>
    %73 = arith.maximumf %71, %72 : vector<72x64xf32>
    %74 = arith.truncf %73 : vector<72x64xf32> to vector<72x64xbf16>
    %cst_53 = arith.constant dense<0.000000e+00> : vector<72x384xf32>
    %75 = tpu.matmul %74, %4, %cst_53 {dimension_numbers = #tpu.dot_dimension_numbers<[1], [0], [0], [1], [0, 0, 1, 1], [], []>} : vector<72x64xbf16>, vector<64x384xbf16>, vector<72x384xf32> -> vector<72x384xf32>
    %76 = vector.broadcast %3 : vector<1x384xf32> to vector<72x384xf32>
    %77 = arith.addf %75, %76 : vector<72x384xf32>
    %cst_54 = arith.constant 0.000000e+00 : f32
    %78 = vector.broadcast %cst_54 : f32 to vector<72x384xf32>
    %79 = arith.maximumf %77, %78 : vector<72x384xf32>
    %80 = vector.extract_strided_slice %79 {offsets = [0, 0], sizes = [24, 128], strides = [1, 1]} : vector<72x384xf32> to vector<24x128xf32>
    %c0_55 = arith.constant 0 : index
    %c256 = arith.constant 256 : index
    %81 = vector.load %arg10[%c0_55, %c256] : memref<216x1152xf32, #tpu.memory_space<vmem>>, vector<24x128xf32>
    tpu.vector_store %arg10[%c0_55, %c256], %80 {strides = array<i32>} : memref<216x1152xf32, #tpu.memory_space<vmem>>, vector<24x128xf32>,
    %82 = vector.extract_strided_slice %79 {offsets = [24, 0], sizes = [24, 128], strides = [1, 1]} : vector<72x384xf32> to vector<24x128xf32>
    %c0_56 = arith.constant 0 : index
    %c640 = arith.constant 640 : index
    %83 = vector.load %arg10[%c0_56, %c640] : memref<216x1152xf32, #tpu.memory_space<vmem>>, vector<24x128xf32>
    tpu.vector_store %arg10[%c0_56, %c640], %82 {strides = array<i32>} : memref<216x1152xf32, #tpu.memory_space<vmem>>, vector<24x128xf32>,
    %84 = vector.extract_strided_slice %79 {offsets = [48, 0], sizes = [24, 128], strides = [1, 1]} : vector<72x384xf32> to vector<24x128xf32>
    %c0_57 = arith.constant 0 : index
    %c1024 = arith.constant 1024 : index
    %85 = vector.load %arg10[%c0_57, %c1024] : memref<216x1152xf32, #tpu.memory_space<vmem>>, vector<24x128xf32>
    tpu.vector_store %arg10[%c0_57, %c1024], %84 {strides = array<i32>} : memref<216x1152xf32, #tpu.memory_space<vmem>>, vector<24x128xf32>,
    %86 = vector.extract_strided_slice %79 {offsets = [0, 128], sizes = [24, 128], strides = [1, 1]} : vector<72x384xf32> to vector<24x128xf32>
    %c24_58 = arith.constant 24 : index
    %c256_59 = arith.constant 256 : index
    %87 = vector.load %arg10[%c24_58, %c256_59] : memref<216x1152xf32, #tpu.memory_space<vmem>>, vector<24x128xf32>
    tpu.vector_store %arg10[%c24_58, %c256_59], %86 {strides = array<i32>} : memref<216x1152xf32, #tpu.memory_space<vmem>>, vector<24x128xf32>,
    %88 = vector.extract_strided_slice %79 {offsets = [24, 128], sizes = [24, 128], strides = [1, 1]} : vector<72x384xf32> to vector<24x128xf32>
    %c24_60 = arith.constant 24 : index
    %c640_61 = arith.constant 640 : index
    %89 = vector.load %arg10[%c24_60, %c640_61] : memref<216x1152xf32, #tpu.memory_space<vmem>>, vector<24x128xf32>
    tpu.vector_store %arg10[%c24_60, %c640_61], %88 {strides = array<i32>} : memref<216x1152xf32, #tpu.memory_space<vmem>>, vector<24x128xf32>,
    %90 = vector.extract_strided_slice %79 {offsets = [48, 128], sizes = [24, 128], strides = [1, 1]} : vector<72x384xf32> to vector<24x128xf32>
    %c24_62 = arith.constant 24 : index
    %c1024_63 = arith.constant 1024 : index
    %91 = vector.load %arg10[%c24_62, %c1024_63] : memref<216x1152xf32, #tpu.memory_space<vmem>>, vector<24x128xf32>
    tpu.vector_store %arg10[%c24_62, %c1024_63], %90 {strides = array<i32>} : memref<216x1152xf32, #tpu.memory_space<vmem>>, vector<24x128xf32>,
    %92 = vector.extract_strided_slice %79 {offsets = [0, 256], sizes = [24, 128], strides = [1, 1]} : vector<72x384xf32> to vector<24x128xf32>
    %c48_64 = arith.constant 48 : index
    %c256_65 = arith.constant 256 : index
    %93 = vector.load %arg10[%c48_64, %c256_65] : memref<216x1152xf32, #tpu.memory_space<vmem>>, vector<24x128xf32>
    tpu.vector_store %arg10[%c48_64, %c256_65], %92 {strides = array<i32>} : memref<216x1152xf32, #tpu.memory_space<vmem>>, vector<24x128xf32>,
    %94 = vector.extract_strided_slice %79 {offsets = [24, 256], sizes = [24, 128], strides = [1, 1]} : vector<72x384xf32> to vector<24x128xf32>
    %c48_66 = arith.constant 48 : index
    %c640_67 = arith.constant 640 : index
    %95 = vector.load %arg10[%c48_66, %c640_67] : memref<216x1152xf32, #tpu.memory_space<vmem>>, vector<24x128xf32>
    tpu.vector_store %arg10[%c48_66, %c640_67], %94 {strides = array<i32>} : memref<216x1152xf32, #tpu.memory_space<vmem>>, vector<24x128xf32>,
    %96 = vector.extract_strided_slice %79 {offsets = [48, 256], sizes = [24, 128], strides = [1, 1]} : vector<72x384xf32> to vector<24x128xf32>
    %c48_68 = arith.constant 48 : index
    %c1024_69 = arith.constant 1024 : index
    %97 = vector.load %arg10[%c48_68, %c1024_69] : memref<216x1152xf32, #tpu.memory_space<vmem>>, vector<24x128xf32>
    tpu.vector_store %arg10[%c48_68, %c1024_69], %96 {strides = array<i32>} : memref<216x1152xf32, #tpu.memory_space<vmem>>, vector<24x128xf32>,
    %c3 = arith.constant 3 : index
    %c0_70 = arith.constant 0 : index
    %c0_71 = arith.constant 0 : index
    %98 = vector.load %arg2[%c3, %c0_70, %c0_71] : memref<9x16x64xbf16, #tpu.memory_space<vmem>>, vector<1x16x64xbf16>
    %99 = vector.shape_cast %98 : vector<1x16x64xbf16> to vector<16x64xbf16>
    %cst_72 = arith.constant dense<0.000000e+00> : vector<72x64xf32>
    %100 = tpu.matmul %1, %99, %cst_72 {dimension_numbers = #tpu.dot_dimension_numbers<[1], [0], [0], [1], [0, 0, 1, 1], [], []>} : vector<72x16xbf16>, vector<16x64xbf16>, vector<72x64xf32> -> vector<72x64xf32>
    %101 = vector.broadcast %2 : vector<1x64xf32> to vector<72x64xf32>
    %102 = arith.addf %100, %101 : vector<72x64xf32>
    %cst_73 = arith.constant 0.000000e+00 : f32
    %103 = vector.broadcast %cst_73 : f32 to vector<72x64xf32>
    %104 = arith.maximumf %102, %103 : vector<72x64xf32>
    %105 = arith.truncf %104 : vector<72x64xf32> to vector<72x64xbf16>
    %cst_74 = arith.constant dense<0.000000e+00> : vector<72x384xf32>
    %106 = tpu.matmul %105, %4, %cst_74 {dimension_numbers = #tpu.dot_dimension_numbers<[1], [0], [0], [1], [0, 0, 1, 1], [], []>} : vector<72x64xbf16>, vector<64x384xbf16>, vector<72x384xf32> -> vector<72x384xf32>
    %107 = vector.broadcast %3 : vector<1x384xf32> to vector<72x384xf32>
    %108 = arith.addf %106, %107 : vector<72x384xf32>
    %cst_75 = arith.constant 0.000000e+00 : f32
    %109 = vector.broadcast %cst_75 : f32 to vector<72x384xf32>
    %110 = arith.maximumf %108, %109 : vector<72x384xf32>
    %111 = vector.extract_strided_slice %110 {offsets = [0, 0], sizes = [24, 128], strides = [1, 1]} : vector<72x384xf32> to vector<24x128xf32>
    %c72 = arith.constant 72 : index
    %c0_76 = arith.constant 0 : index
    %112 = vector.load %arg10[%c72, %c0_76] : memref<216x1152xf32, #tpu.memory_space<vmem>>, vector<24x128xf32>
    tpu.vector_store %arg10[%c72, %c0_76], %111 {strides = array<i32>} : memref<216x1152xf32, #tpu.memory_space<vmem>>, vector<24x128xf32>,
    %113 = vector.extract_strided_slice %110 {offsets = [24, 0], sizes = [24, 128], strides = [1, 1]} : vector<72x384xf32> to vector<24x128xf32>
    %c72_77 = arith.constant 72 : index
    %c384_78 = arith.constant 384 : index
    %114 = vector.load %arg10[%c72_77, %c384_78] : memref<216x1152xf32, #tpu.memory_space<vmem>>, vector<24x128xf32>
    tpu.vector_store %arg10[%c72_77, %c384_78], %113 {strides = array<i32>} : memref<216x1152xf32, #tpu.memory_space<vmem>>, vector<24x128xf32>,
    %115 = vector.extract_strided_slice %110 {offsets = [48, 0], sizes = [24, 128], strides = [1, 1]} : vector<72x384xf32> to vector<24x128xf32>
    %c72_79 = arith.constant 72 : index
    %c768_80 = arith.constant 768 : index
    %116 = vector.load %arg10[%c72_79, %c768_80] : memref<216x1152xf32, #tpu.memory_space<vmem>>, vector<24x128xf32>
    tpu.vector_store %arg10[%c72_79, %c768_80], %115 {strides = array<i32>} : memref<216x1152xf32, #tpu.memory_space<vmem>>, vector<24x128xf32>,
    %117 = vector.extract_strided_slice %110 {offsets = [0, 128], sizes = [24, 128], strides = [1, 1]} : vector<72x384xf32> to vector<24x128xf32>
    %c96 = arith.constant 96 : index
    %c0_81 = arith.constant 0 : index
    %118 = vector.load %arg10[%c96, %c0_81] : memref<216x1152xf32, #tpu.memory_space<vmem>>, vector<24x128xf32>
    tpu.vector_store %arg10[%c96, %c0_81], %117 {strides = array<i32>} : memref<216x1152xf32, #tpu.memory_space<vmem>>, vector<24x128xf32>,
    %119 = vector.extract_strided_slice %110 {offsets = [24, 128], sizes = [24, 128], strides = [1, 1]} : vector<72x384xf32> to vector<24x128xf32>
    %c96_82 = arith.constant 96 : index
    %c384_83 = arith.constant 384 : index
    %120 = vector.load %arg10[%c96_82, %c384_83] : memref<216x1152xf32, #tpu.memory_space<vmem>>, vector<24x128xf32>
    tpu.vector_store %arg10[%c96_82, %c384_83], %119 {strides = array<i32>} : memref<216x1152xf32, #tpu.memory_space<vmem>>, vector<24x128xf32>,
    %121 = vector.extract_strided_slice %110 {offsets = [48, 128], sizes = [24, 128], strides = [1, 1]} : vector<72x384xf32> to vector<24x128xf32>
    %c96_84 = arith.constant 96 : index
    %c768_85 = arith.constant 768 : index
    %122 = vector.load %arg10[%c96_84, %c768_85] : memref<216x1152xf32, #tpu.memory_space<vmem>>, vector<24x128xf32>
    tpu.vector_store %arg10[%c96_84, %c768_85], %121 {strides = array<i32>} : memref<216x1152xf32, #tpu.memory_space<vmem>>, vector<24x128xf32>,
    %123 = vector.extract_strided_slice %110 {offsets = [0, 256], sizes = [24, 128], strides = [1, 1]} : vector<72x384xf32> to vector<24x128xf32>
    %c120 = arith.constant 120 : index
    %c0_86 = arith.constant 0 : index
    %124 = vector.load %arg10[%c120, %c0_86] : memref<216x1152xf32, #tpu.memory_space<vmem>>, vector<24x128xf32>
    tpu.vector_store %arg10[%c120, %c0_86], %123 {strides = array<i32>} : memref<216x1152xf32, #tpu.memory_space<vmem>>, vector<24x128xf32>,
    %125 = vector.extract_strided_slice %110 {offsets = [24, 256], sizes = [24, 128], strides = [1, 1]} : vector<72x384xf32> to vector<24x128xf32>
    %c120_87 = arith.constant 120 : index
    %c384_88 = arith.constant 384 : index
    %126 = vector.load %arg10[%c120_87, %c384_88] : memref<216x1152xf32, #tpu.memory_space<vmem>>, vector<24x128xf32>
    tpu.vector_store %arg10[%c120_87, %c384_88], %125 {strides = array<i32>} : memref<216x1152xf32, #tpu.memory_space<vmem>>, vector<24x128xf32>,
    %127 = vector.extract_strided_slice %110 {offsets = [48, 256], sizes = [24, 128], strides = [1, 1]} : vector<72x384xf32> to vector<24x128xf32>
    %c120_89 = arith.constant 120 : index
    %c768_90 = arith.constant 768 : index
    %128 = vector.load %arg10[%c120_89, %c768_90] : memref<216x1152xf32, #tpu.memory_space<vmem>>, vector<24x128xf32>
    tpu.vector_store %arg10[%c120_89, %c768_90], %127 {strides = array<i32>} : memref<216x1152xf32, #tpu.memory_space<vmem>>, vector<24x128xf32>,
    %c4 = arith.constant 4 : index
    %c0_91 = arith.constant 0 : index
    %c0_92 = arith.constant 0 : index
    %129 = vector.load %arg2[%c4, %c0_91, %c0_92] : memref<9x16x64xbf16, #tpu.memory_space<vmem>>, vector<1x16x64xbf16>
    %130 = vector.shape_cast %129 : vector<1x16x64xbf16> to vector<16x64xbf16>
    %cst_93 = arith.constant dense<0.000000e+00> : vector<72x64xf32>
    %131 = tpu.matmul %1, %130, %cst_93 {dimension_numbers = #tpu.dot_dimension_numbers<[1], [0], [0], [1], [0, 0, 1, 1], [], []>} : vector<72x16xbf16>, vector<16x64xbf16>, vector<72x64xf32> -> vector<72x64xf32>
    %132 = vector.broadcast %2 : vector<1x64xf32> to vector<72x64xf32>
    %133 = arith.addf %131, %132 : vector<72x64xf32>
    %cst_94 = arith.constant 0.000000e+00 : f32
    %134 = vector.broadcast %cst_94 : f32 to vector<72x64xf32>
    %135 = arith.maximumf %133, %134 : vector<72x64xf32>
    %136 = arith.truncf %135 : vector<72x64xf32> to vector<72x64xbf16>
    %cst_95 = arith.constant dense<0.000000e+00> : vector<72x384xf32>
    %137 = tpu.matmul %136, %4, %cst_95 {dimension_numbers = #tpu.dot_dimension_numbers<[1], [0], [0], [1], [0, 0, 1, 1], [], []>} : vector<72x64xbf16>, vector<64x384xbf16>, vector<72x384xf32> -> vector<72x384xf32>
    %138 = vector.broadcast %3 : vector<1x384xf32> to vector<72x384xf32>
    %139 = arith.addf %137, %138 : vector<72x384xf32>
    %cst_96 = arith.constant 0.000000e+00 : f32
    %140 = vector.broadcast %cst_96 : f32 to vector<72x384xf32>
    %141 = arith.maximumf %139, %140 : vector<72x384xf32>
    %142 = vector.extract_strided_slice %141 {offsets = [0, 0], sizes = [24, 128], strides = [1, 1]} : vector<72x384xf32> to vector<24x128xf32>
    %c72_97 = arith.constant 72 : index
    %c128_98 = arith.constant 128 : index
    %143 = vector.load %arg10[%c72_97, %c128_98] : memref<216x1152xf32, #tpu.memory_space<vmem>>, vector<24x128xf32>
    tpu.vector_store %arg10[%c72_97, %c128_98], %142 {strides = array<i32>} : memref<216x1152xf32, #tpu.memory_space<vmem>>, vector<24x128xf32>,
    %144 = vector.extract_strided_slice %141 {offsets = [24, 0], sizes = [24, 128], strides = [1, 1]} : vector<72x384xf32> to vector<24x128xf32>
    %c72_99 = arith.constant 72 : index
    %c512_100 = arith.constant 512 : index
    %145 = vector.load %arg10[%c72_99, %c512_100] : memref<216x1152xf32, #tpu.memory_space<vmem>>, vector<24x128xf32>
    tpu.vector_store %arg10[%c72_99, %c512_100], %144 {strides = array<i32>} : memref<216x1152xf32, #tpu.memory_space<vmem>>, vector<24x128xf32>,
    %146 = vector.extract_strided_slice %141 {offsets = [48, 0], sizes = [24, 128], strides = [1, 1]} : vector<72x384xf32> to vector<24x128xf32>
    %c72_101 = arith.constant 72 : index
    %c896_102 = arith.constant 896 : index
    %147 = vector.load %arg10[%c72_101, %c896_102] : memref<216x1152xf32, #tpu.memory_space<vmem>>, vector<24x128xf32>
    tpu.vector_store %arg10[%c72_101, %c896_102], %146 {strides = array<i32>} : memref<216x1152xf32, #tpu.memory_space<vmem>>, vector<24x128xf32>,
    %148 = vector.extract_strided_slice %141 {offsets = [0, 128], sizes = [24, 128], strides = [1, 1]} : vector<72x384xf32> to vector<24x128xf32>
    %c96_103 = arith.constant 96 : index
    %c128_104 = arith.constant 128 : index
    %149 = vector.load %arg10[%c96_103, %c128_104] : memref<216x1152xf32, #tpu.memory_space<vmem>>, vector<24x128xf32>
    tpu.vector_store %arg10[%c96_103, %c128_104], %148 {strides = array<i32>} : memref<216x1152xf32, #tpu.memory_space<vmem>>, vector<24x128xf32>,
    %150 = vector.extract_strided_slice %141 {offsets = [24, 128], sizes = [24, 128], strides = [1, 1]} : vector<72x384xf32> to vector<24x128xf32>
    %c96_105 = arith.constant 96 : index
    %c512_106 = arith.constant 512 : index
    %151 = vector.load %arg10[%c96_105, %c512_106] : memref<216x1152xf32, #tpu.memory_space<vmem>>, vector<24x128xf32>
    tpu.vector_store %arg10[%c96_105, %c512_106], %150 {strides = array<i32>} : memref<216x1152xf32, #tpu.memory_space<vmem>>, vector<24x128xf32>,
    %152 = vector.extract_strided_slice %141 {offsets = [48, 128], sizes = [24, 128], strides = [1, 1]} : vector<72x384xf32> to vector<24x128xf32>
    %c96_107 = arith.constant 96 : index
    %c896_108 = arith.constant 896 : index
    %153 = vector.load %arg10[%c96_107, %c896_108] : memref<216x1152xf32, #tpu.memory_space<vmem>>, vector<24x128xf32>
    tpu.vector_store %arg10[%c96_107, %c896_108], %152 {strides = array<i32>} : memref<216x1152xf32, #tpu.memory_space<vmem>>, vector<24x128xf32>,
    %154 = vector.extract_strided_slice %141 {offsets = [0, 256], sizes = [24, 128], strides = [1, 1]} : vector<72x384xf32> to vector<24x128xf32>
    %c120_109 = arith.constant 120 : index
    %c128_110 = arith.constant 128 : index
    %155 = vector.load %arg10[%c120_109, %c128_110] : memref<216x1152xf32, #tpu.memory_space<vmem>>, vector<24x128xf32>
    tpu.vector_store %arg10[%c120_109, %c128_110], %154 {strides = array<i32>} : memref<216x1152xf32, #tpu.memory_space<vmem>>, vector<24x128xf32>,
    %156 = vector.extract_strided_slice %141 {offsets = [24, 256], sizes = [24, 128], strides = [1, 1]} : vector<72x384xf32> to vector<24x128xf32>
    %c120_111 = arith.constant 120 : index
    %c512_112 = arith.constant 512 : index
    %157 = vector.load %arg10[%c120_111, %c512_112] : memref<216x1152xf32, #tpu.memory_space<vmem>>, vector<24x128xf32>
    tpu.vector_store %arg10[%c120_111, %c512_112], %156 {strides = array<i32>} : memref<216x1152xf32, #tpu.memory_space<vmem>>, vector<24x128xf32>,
    %158 = vector.extract_strided_slice %141 {offsets = [48, 256], sizes = [24, 128], strides = [1, 1]} : vector<72x384xf32> to vector<24x128xf32>
    %c120_113 = arith.constant 120 : index
    %c896_114 = arith.constant 896 : index
    %159 = vector.load %arg10[%c120_113, %c896_114] : memref<216x1152xf32, #tpu.memory_space<vmem>>, vector<24x128xf32>
    tpu.vector_store %arg10[%c120_113, %c896_114], %158 {strides = array<i32>} : memref<216x1152xf32, #tpu.memory_space<vmem>>, vector<24x128xf32>,
    %c5 = arith.constant 5 : index
    %c0_115 = arith.constant 0 : index
    %c0_116 = arith.constant 0 : index
    %160 = vector.load %arg2[%c5, %c0_115, %c0_116] : memref<9x16x64xbf16, #tpu.memory_space<vmem>>, vector<1x16x64xbf16>
    %161 = vector.shape_cast %160 : vector<1x16x64xbf16> to vector<16x64xbf16>
    %cst_117 = arith.constant dense<0.000000e+00> : vector<72x64xf32>
    %162 = tpu.matmul %1, %161, %cst_117 {dimension_numbers = #tpu.dot_dimension_numbers<[1], [0], [0], [1], [0, 0, 1, 1], [], []>} : vector<72x16xbf16>, vector<16x64xbf16>, vector<72x64xf32> -> vector<72x64xf32>
    %163 = vector.broadcast %2 : vector<1x64xf32> to vector<72x64xf32>
    %164 = arith.addf %162, %163 : vector<72x64xf32>
    %cst_118 = arith.constant 0.000000e+00 : f32
    %165 = vector.broadcast %cst_118 : f32 to vector<72x64xf32>
    %166 = arith.maximumf %164, %165 : vector<72x64xf32>
    %167 = arith.truncf %166 : vector<72x64xf32> to vector<72x64xbf16>
    %cst_119 = arith.constant dense<0.000000e+00> : vector<72x384xf32>
    %168 = tpu.matmul %167, %4, %cst_119 {dimension_numbers = #tpu.dot_dimension_numbers<[1], [0], [0], [1], [0, 0, 1, 1], [], []>} : vector<72x64xbf16>, vector<64x384xbf16>, vector<72x384xf32> -> vector<72x384xf32>
    %169 = vector.broadcast %3 : vector<1x384xf32> to vector<72x384xf32>
    %170 = arith.addf %168, %169 : vector<72x384xf32>
    %cst_120 = arith.constant 0.000000e+00 : f32
    %171 = vector.broadcast %cst_120 : f32 to vector<72x384xf32>
    %172 = arith.maximumf %170, %171 : vector<72x384xf32>
    %173 = vector.extract_strided_slice %172 {offsets = [0, 0], sizes = [24, 128], strides = [1, 1]} : vector<72x384xf32> to vector<24x128xf32>
    %c72_121 = arith.constant 72 : index
    %c256_122 = arith.constant 256 : index
    %174 = vector.load %arg10[%c72_121, %c256_122] : memref<216x1152xf32, #tpu.memory_space<vmem>>, vector<24x128xf32>
    tpu.vector_store %arg10[%c72_121, %c256_122], %173 {strides = array<i32>} : memref<216x1152xf32, #tpu.memory_space<vmem>>, vector<24x128xf32>,
    %175 = vector.extract_strided_slice %172 {offsets = [24, 0], sizes = [24, 128], strides = [1, 1]} : vector<72x384xf32> to vector<24x128xf32>
    %c72_123 = arith.constant 72 : index
    %c640_124 = arith.constant 640 : index
    %176 = vector.load %arg10[%c72_123, %c640_124] : memref<216x1152xf32, #tpu.memory_space<vmem>>, vector<24x128xf32>
    tpu.vector_store %arg10[%c72_123, %c640_124], %175 {strides = array<i32>} : memref<216x1152xf32, #tpu.memory_space<vmem>>, vector<24x128xf32>,
    %177 = vector.extract_strided_slice %172 {offsets = [48, 0], sizes = [24, 128], strides = [1, 1]} : vector<72x384xf32> to vector<24x128xf32>
    %c72_125 = arith.constant 72 : index
    %c1024_126 = arith.constant 1024 : index
    %178 = vector.load %arg10[%c72_125, %c1024_126] : memref<216x1152xf32, #tpu.memory_space<vmem>>, vector<24x128xf32>
    tpu.vector_store %arg10[%c72_125, %c1024_126], %177 {strides = array<i32>} : memref<216x1152xf32, #tpu.memory_space<vmem>>, vector<24x128xf32>,
    %179 = vector.extract_strided_slice %172 {offsets = [0, 128], sizes = [24, 128], strides = [1, 1]} : vector<72x384xf32> to vector<24x128xf32>
    %c96_127 = arith.constant 96 : index
    %c256_128 = arith.constant 256 : index
    %180 = vector.load %arg10[%c96_127, %c256_128] : memref<216x1152xf32, #tpu.memory_space<vmem>>, vector<24x128xf32>
    tpu.vector_store %arg10[%c96_127, %c256_128], %179 {strides = array<i32>} : memref<216x1152xf32, #tpu.memory_space<vmem>>, vector<24x128xf32>,
    %181 = vector.extract_strided_slice %172 {offsets = [24, 128], sizes = [24, 128], strides = [1, 1]} : vector<72x384xf32> to vector<24x128xf32>
    %c96_129 = arith.constant 96 : index
    %c640_130 = arith.constant 640 : index
    %182 = vector.load %arg10[%c96_129, %c640_130] : memref<216x1152xf32, #tpu.memory_space<vmem>>, vector<24x128xf32>
    tpu.vector_store %arg10[%c96_129, %c640_130], %181 {strides = array<i32>} : memref<216x1152xf32, #tpu.memory_space<vmem>>, vector<24x128xf32>,
    %183 = vector.extract_strided_slice %172 {offsets = [48, 128], sizes = [24, 128], strides = [1, 1]} : vector<72x384xf32> to vector<24x128xf32>
    %c96_131 = arith.constant 96 : index
    %c1024_132 = arith.constant 1024 : index
    %184 = vector.load %arg10[%c96_131, %c1024_132] : memref<216x1152xf32, #tpu.memory_space<vmem>>, vector<24x128xf32>
    tpu.vector_store %arg10[%c96_131, %c1024_132], %183 {strides = array<i32>} : memref<216x1152xf32, #tpu.memory_space<vmem>>, vector<24x128xf32>,
    %185 = vector.extract_strided_slice %172 {offsets = [0, 256], sizes = [24, 128], strides = [1, 1]} : vector<72x384xf32> to vector<24x128xf32>
    %c120_133 = arith.constant 120 : index
    %c256_134 = arith.constant 256 : index
    %186 = vector.load %arg10[%c120_133, %c256_134] : memref<216x1152xf32, #tpu.memory_space<vmem>>, vector<24x128xf32>
    tpu.vector_store %arg10[%c120_133, %c256_134], %185 {strides = array<i32>} : memref<216x1152xf32, #tpu.memory_space<vmem>>, vector<24x128xf32>,
    %187 = vector.extract_strided_slice %172 {offsets = [24, 256], sizes = [24, 128], strides = [1, 1]} : vector<72x384xf32> to vector<24x128xf32>
    %c120_135 = arith.constant 120 : index
    %c640_136 = arith.constant 640 : index
    %188 = vector.load %arg10[%c120_135, %c640_136] : memref<216x1152xf32, #tpu.memory_space<vmem>>, vector<24x128xf32>
    tpu.vector_store %arg10[%c120_135, %c640_136], %187 {strides = array<i32>} : memref<216x1152xf32, #tpu.memory_space<vmem>>, vector<24x128xf32>,
    %189 = vector.extract_strided_slice %172 {offsets = [48, 256], sizes = [24, 128], strides = [1, 1]} : vector<72x384xf32> to vector<24x128xf32>
    %c120_137 = arith.constant 120 : index
    %c1024_138 = arith.constant 1024 : index
    %190 = vector.load %arg10[%c120_137, %c1024_138] : memref<216x1152xf32, #tpu.memory_space<vmem>>, vector<24x128xf32>
    tpu.vector_store %arg10[%c120_137, %c1024_138], %189 {strides = array<i32>} : memref<216x1152xf32, #tpu.memory_space<vmem>>, vector<24x128xf32>,
    %c6 = arith.constant 6 : index
    %c0_139 = arith.constant 0 : index
    %c0_140 = arith.constant 0 : index
    %191 = vector.load %arg2[%c6, %c0_139, %c0_140] : memref<9x16x64xbf16, #tpu.memory_space<vmem>>, vector<1x16x64xbf16>
    %192 = vector.shape_cast %191 : vector<1x16x64xbf16> to vector<16x64xbf16>
    %cst_141 = arith.constant dense<0.000000e+00> : vector<72x64xf32>
    %193 = tpu.matmul %1, %192, %cst_141 {dimension_numbers = #tpu.dot_dimension_numbers<[1], [0], [0], [1], [0, 0, 1, 1], [], []>} : vector<72x16xbf16>, vector<16x64xbf16>, vector<72x64xf32> -> vector<72x64xf32>
    %194 = vector.broadcast %2 : vector<1x64xf32> to vector<72x64xf32>
    %195 = arith.addf %193, %194 : vector<72x64xf32>
    %cst_142 = arith.constant 0.000000e+00 : f32
    %196 = vector.broadcast %cst_142 : f32 to vector<72x64xf32>
    %197 = arith.maximumf %195, %196 : vector<72x64xf32>
    %198 = arith.truncf %197 : vector<72x64xf32> to vector<72x64xbf16>
    %cst_143 = arith.constant dense<0.000000e+00> : vector<72x384xf32>
    %199 = tpu.matmul %198, %4, %cst_143 {dimension_numbers = #tpu.dot_dimension_numbers<[1], [0], [0], [1], [0, 0, 1, 1], [], []>} : vector<72x64xbf16>, vector<64x384xbf16>, vector<72x384xf32> -> vector<72x384xf32>
    %200 = vector.broadcast %3 : vector<1x384xf32> to vector<72x384xf32>
    %201 = arith.addf %199, %200 : vector<72x384xf32>
    %cst_144 = arith.constant 0.000000e+00 : f32
    %202 = vector.broadcast %cst_144 : f32 to vector<72x384xf32>
    %203 = arith.maximumf %201, %202 : vector<72x384xf32>
    %204 = vector.extract_strided_slice %203 {offsets = [0, 0], sizes = [24, 128], strides = [1, 1]} : vector<72x384xf32> to vector<24x128xf32>
    %c144 = arith.constant 144 : index
    %c0_145 = arith.constant 0 : index
    %205 = vector.load %arg10[%c144, %c0_145] : memref<216x1152xf32, #tpu.memory_space<vmem>>, vector<24x128xf32>
    tpu.vector_store %arg10[%c144, %c0_145], %204 {strides = array<i32>} : memref<216x1152xf32, #tpu.memory_space<vmem>>, vector<24x128xf32>,
    %206 = vector.extract_strided_slice %203 {offsets = [24, 0], sizes = [24, 128], strides = [1, 1]} : vector<72x384xf32> to vector<24x128xf32>
    %c144_146 = arith.constant 144 : index
    %c384_147 = arith.constant 384 : index
    %207 = vector.load %arg10[%c144_146, %c384_147] : memref<216x1152xf32, #tpu.memory_space<vmem>>, vector<24x128xf32>
    tpu.vector_store %arg10[%c144_146, %c384_147], %206 {strides = array<i32>} : memref<216x1152xf32, #tpu.memory_space<vmem>>, vector<24x128xf32>,
    %208 = vector.extract_strided_slice %203 {offsets = [48, 0], sizes = [24, 128], strides = [1, 1]} : vector<72x384xf32> to vector<24x128xf32>
    %c144_148 = arith.constant 144 : index
    %c768_149 = arith.constant 768 : index
    %209 = vector.load %arg10[%c144_148, %c768_149] : memref<216x1152xf32, #tpu.memory_space<vmem>>, vector<24x128xf32>
    tpu.vector_store %arg10[%c144_148, %c768_149], %208 {strides = array<i32>} : memref<216x1152xf32, #tpu.memory_space<vmem>>, vector<24x128xf32>,
    %210 = vector.extract_strided_slice %203 {offsets = [0, 128], sizes = [24, 128], strides = [1, 1]} : vector<72x384xf32> to vector<24x128xf32>
    %c168 = arith.constant 168 : index
    %c0_150 = arith.constant 0 : index
    %211 = vector.load %arg10[%c168, %c0_150] : memref<216x1152xf32, #tpu.memory_space<vmem>>, vector<24x128xf32>
    tpu.vector_store %arg10[%c168, %c0_150], %210 {strides = array<i32>} : memref<216x1152xf32, #tpu.memory_space<vmem>>, vector<24x128xf32>,
    %212 = vector.extract_strided_slice %203 {offsets = [24, 128], sizes = [24, 128], strides = [1, 1]} : vector<72x384xf32> to vector<24x128xf32>
    %c168_151 = arith.constant 168 : index
    %c384_152 = arith.constant 384 : index
    %213 = vector.load %arg10[%c168_151, %c384_152] : memref<216x1152xf32, #tpu.memory_space<vmem>>, vector<24x128xf32>
    tpu.vector_store %arg10[%c168_151, %c384_152], %212 {strides = array<i32>} : memref<216x1152xf32, #tpu.memory_space<vmem>>, vector<24x128xf32>,
    %214 = vector.extract_strided_slice %203 {offsets = [48, 128], sizes = [24, 128], strides = [1, 1]} : vector<72x384xf32> to vector<24x128xf32>
    %c168_153 = arith.constant 168 : index
    %c768_154 = arith.constant 768 : index
    %215 = vector.load %arg10[%c168_153, %c768_154] : memref<216x1152xf32, #tpu.memory_space<vmem>>, vector<24x128xf32>
    tpu.vector_store %arg10[%c168_153, %c768_154], %214 {strides = array<i32>} : memref<216x1152xf32, #tpu.memory_space<vmem>>, vector<24x128xf32>,
    %216 = vector.extract_strided_slice %203 {offsets = [0, 256], sizes = [24, 128], strides = [1, 1]} : vector<72x384xf32> to vector<24x128xf32>
    %c192 = arith.constant 192 : index
    %c0_155 = arith.constant 0 : index
    %217 = vector.load %arg10[%c192, %c0_155] : memref<216x1152xf32, #tpu.memory_space<vmem>>, vector<24x128xf32>
    tpu.vector_store %arg10[%c192, %c0_155], %216 {strides = array<i32>} : memref<216x1152xf32, #tpu.memory_space<vmem>>, vector<24x128xf32>,
    %218 = vector.extract_strided_slice %203 {offsets = [24, 256], sizes = [24, 128], strides = [1, 1]} : vector<72x384xf32> to vector<24x128xf32>
    %c192_156 = arith.constant 192 : index
    %c384_157 = arith.constant 384 : index
    %219 = vector.load %arg10[%c192_156, %c384_157] : memref<216x1152xf32, #tpu.memory_space<vmem>>, vector<24x128xf32>
    tpu.vector_store %arg10[%c192_156, %c384_157], %218 {strides = array<i32>} : memref<216x1152xf32, #tpu.memory_space<vmem>>, vector<24x128xf32>,
    %220 = vector.extract_strided_slice %203 {offsets = [48, 256], sizes = [24, 128], strides = [1, 1]} : vector<72x384xf32> to vector<24x128xf32>
    %c192_158 = arith.constant 192 : index
    %c768_159 = arith.constant 768 : index
    %221 = vector.load %arg10[%c192_158, %c768_159] : memref<216x1152xf32, #tpu.memory_space<vmem>>, vector<24x128xf32>
    tpu.vector_store %arg10[%c192_158, %c768_159], %220 {strides = array<i32>} : memref<216x1152xf32, #tpu.memory_space<vmem>>, vector<24x128xf32>,
    %c7 = arith.constant 7 : index
    %c0_160 = arith.constant 0 : index
    %c0_161 = arith.constant 0 : index
    %222 = vector.load %arg2[%c7, %c0_160, %c0_161] : memref<9x16x64xbf16, #tpu.memory_space<vmem>>, vector<1x16x64xbf16>
    %223 = vector.shape_cast %222 : vector<1x16x64xbf16> to vector<16x64xbf16>
    %cst_162 = arith.constant dense<0.000000e+00> : vector<72x64xf32>
    %224 = tpu.matmul %1, %223, %cst_162 {dimension_numbers = #tpu.dot_dimension_numbers<[1], [0], [0], [1], [0, 0, 1, 1], [], []>} : vector<72x16xbf16>, vector<16x64xbf16>, vector<72x64xf32> -> vector<72x64xf32>
    %225 = vector.broadcast %2 : vector<1x64xf32> to vector<72x64xf32>
    %226 = arith.addf %224, %225 : vector<72x64xf32>
    %cst_163 = arith.constant 0.000000e+00 : f32
    %227 = vector.broadcast %cst_163 : f32 to vector<72x64xf32>
    %228 = arith.maximumf %226, %227 : vector<72x64xf32>
    %229 = arith.truncf %228 : vector<72x64xf32> to vector<72x64xbf16>
    %cst_164 = arith.constant dense<0.000000e+00> : vector<72x384xf32>
    %230 = tpu.matmul %229, %4, %cst_164 {dimension_numbers = #tpu.dot_dimension_numbers<[1], [0], [0], [1], [0, 0, 1, 1], [], []>} : vector<72x64xbf16>, vector<64x384xbf16>, vector<72x384xf32> -> vector<72x384xf32>
    %231 = vector.broadcast %3 : vector<1x384xf32> to vector<72x384xf32>
    %232 = arith.addf %230, %231 : vector<72x384xf32>
    %cst_165 = arith.constant 0.000000e+00 : f32
    %233 = vector.broadcast %cst_165 : f32 to vector<72x384xf32>
    %234 = arith.maximumf %232, %233 : vector<72x384xf32>
    %235 = vector.extract_strided_slice %234 {offsets = [0, 0], sizes = [24, 128], strides = [1, 1]} : vector<72x384xf32> to vector<24x128xf32>
    %c144_166 = arith.constant 144 : index
    %c128_167 = arith.constant 128 : index
    %236 = vector.load %arg10[%c144_166, %c128_167] : memref<216x1152xf32, #tpu.memory_space<vmem>>, vector<24x128xf32>
    tpu.vector_store %arg10[%c144_166, %c128_167], %235 {strides = array<i32>} : memref<216x1152xf32, #tpu.memory_space<vmem>>, vector<24x128xf32>,
    %237 = vector.extract_strided_slice %234 {offsets = [24, 0], sizes = [24, 128], strides = [1, 1]} : vector<72x384xf32> to vector<24x128xf32>
    %c144_168 = arith.constant 144 : index
    %c512_169 = arith.constant 512 : index
    %238 = vector.load %arg10[%c144_168, %c512_169] : memref<216x1152xf32, #tpu.memory_space<vmem>>, vector<24x128xf32>
    tpu.vector_store %arg10[%c144_168, %c512_169], %237 {strides = array<i32>} : memref<216x1152xf32, #tpu.memory_space<vmem>>, vector<24x128xf32>,
    %239 = vector.extract_strided_slice %234 {offsets = [48, 0], sizes = [24, 128], strides = [1, 1]} : vector<72x384xf32> to vector<24x128xf32>
    %c144_170 = arith.constant 144 : index
    %c896_171 = arith.constant 896 : index
    %240 = vector.load %arg10[%c144_170, %c896_171] : memref<216x1152xf32, #tpu.memory_space<vmem>>, vector<24x128xf32>
    tpu.vector_store %arg10[%c144_170, %c896_171], %239 {strides = array<i32>} : memref<216x1152xf32, #tpu.memory_space<vmem>>, vector<24x128xf32>,
    %241 = vector.extract_strided_slice %234 {offsets = [0, 128], sizes = [24, 128], strides = [1, 1]} : vector<72x384xf32> to vector<24x128xf32>
    %c168_172 = arith.constant 168 : index
    %c128_173 = arith.constant 128 : index
    %242 = vector.load %arg10[%c168_172, %c128_173] : memref<216x1152xf32, #tpu.memory_space<vmem>>, vector<24x128xf32>
    tpu.vector_store %arg10[%c168_172, %c128_173], %241 {strides = array<i32>} : memref<216x1152xf32, #tpu.memory_space<vmem>>, vector<24x128xf32>,
    %243 = vector.extract_strided_slice %234 {offsets = [24, 128], sizes = [24, 128], strides = [1, 1]} : vector<72x384xf32> to vector<24x128xf32>
    %c168_174 = arith.constant 168 : index
    %c512_175 = arith.constant 512 : index
    %244 = vector.load %arg10[%c168_174, %c512_175] : memref<216x1152xf32, #tpu.memory_space<vmem>>, vector<24x128xf32>
    tpu.vector_store %arg10[%c168_174, %c512_175], %243 {strides = array<i32>} : memref<216x1152xf32, #tpu.memory_space<vmem>>, vector<24x128xf32>,
    %245 = vector.extract_strided_slice %234 {offsets = [48, 128], sizes = [24, 128], strides = [1, 1]} : vector<72x384xf32> to vector<24x128xf32>
    %c168_176 = arith.constant 168 : index
    %c896_177 = arith.constant 896 : index
    %246 = vector.load %arg10[%c168_176, %c896_177] : memref<216x1152xf32, #tpu.memory_space<vmem>>, vector<24x128xf32>
    tpu.vector_store %arg10[%c168_176, %c896_177], %245 {strides = array<i32>} : memref<216x1152xf32, #tpu.memory_space<vmem>>, vector<24x128xf32>,
    %247 = vector.extract_strided_slice %234 {offsets = [0, 256], sizes = [24, 128], strides = [1, 1]} : vector<72x384xf32> to vector<24x128xf32>
    %c192_178 = arith.constant 192 : index
    %c128_179 = arith.constant 128 : index
    %248 = vector.load %arg10[%c192_178, %c128_179] : memref<216x1152xf32, #tpu.memory_space<vmem>>, vector<24x128xf32>
    tpu.vector_store %arg10[%c192_178, %c128_179], %247 {strides = array<i32>} : memref<216x1152xf32, #tpu.memory_space<vmem>>, vector<24x128xf32>,
    %249 = vector.extract_strided_slice %234 {offsets = [24, 256], sizes = [24, 128], strides = [1, 1]} : vector<72x384xf32> to vector<24x128xf32>
    %c192_180 = arith.constant 192 : index
    %c512_181 = arith.constant 512 : index
    %250 = vector.load %arg10[%c192_180, %c512_181] : memref<216x1152xf32, #tpu.memory_space<vmem>>, vector<24x128xf32>
    tpu.vector_store %arg10[%c192_180, %c512_181], %249 {strides = array<i32>} : memref<216x1152xf32, #tpu.memory_space<vmem>>, vector<24x128xf32>,
    %251 = vector.extract_strided_slice %234 {offsets = [48, 256], sizes = [24, 128], strides = [1, 1]} : vector<72x384xf32> to vector<24x128xf32>
    %c192_182 = arith.constant 192 : index
    %c896_183 = arith.constant 896 : index
    %252 = vector.load %arg10[%c192_182, %c896_183] : memref<216x1152xf32, #tpu.memory_space<vmem>>, vector<24x128xf32>
    tpu.vector_store %arg10[%c192_182, %c896_183], %251 {strides = array<i32>} : memref<216x1152xf32, #tpu.memory_space<vmem>>, vector<24x128xf32>,
    %c8 = arith.constant 8 : index
    %c0_184 = arith.constant 0 : index
    %c0_185 = arith.constant 0 : index
    %253 = vector.load %arg2[%c8, %c0_184, %c0_185] : memref<9x16x64xbf16, #tpu.memory_space<vmem>>, vector<1x16x64xbf16>
    %254 = vector.shape_cast %253 : vector<1x16x64xbf16> to vector<16x64xbf16>
    %cst_186 = arith.constant dense<0.000000e+00> : vector<72x64xf32>
    %255 = tpu.matmul %1, %254, %cst_186 {dimension_numbers = #tpu.dot_dimension_numbers<[1], [0], [0], [1], [0, 0, 1, 1], [], []>} : vector<72x16xbf16>, vector<16x64xbf16>, vector<72x64xf32> -> vector<72x64xf32>
    %256 = vector.broadcast %2 : vector<1x64xf32> to vector<72x64xf32>
    %257 = arith.addf %255, %256 : vector<72x64xf32>
    %cst_187 = arith.constant 0.000000e+00 : f32
    %258 = vector.broadcast %cst_187 : f32 to vector<72x64xf32>
    %259 = arith.maximumf %257, %258 : vector<72x64xf32>
    %260 = arith.truncf %259 : vector<72x64xf32> to vector<72x64xbf16>
    %cst_188 = arith.constant dense<0.000000e+00> : vector<72x384xf32>
    %261 = tpu.matmul %260, %4, %cst_188 {dimension_numbers = #tpu.dot_dimension_numbers<[1], [0], [0], [1], [0, 0, 1, 1], [], []>} : vector<72x64xbf16>, vector<64x384xbf16>, vector<72x384xf32> -> vector<72x384xf32>
    %262 = vector.broadcast %3 : vector<1x384xf32> to vector<72x384xf32>
    %263 = arith.addf %261, %262 : vector<72x384xf32>
    %cst_189 = arith.constant 0.000000e+00 : f32
    %264 = vector.broadcast %cst_189 : f32 to vector<72x384xf32>
    %265 = arith.maximumf %263, %264 : vector<72x384xf32>
    %266 = vector.extract_strided_slice %265 {offsets = [0, 0], sizes = [24, 128], strides = [1, 1]} : vector<72x384xf32> to vector<24x128xf32>
    %c144_190 = arith.constant 144 : index
    %c256_191 = arith.constant 256 : index
    %267 = vector.load %arg10[%c144_190, %c256_191] : memref<216x1152xf32, #tpu.memory_space<vmem>>, vector<24x128xf32>
    tpu.vector_store %arg10[%c144_190, %c256_191], %266 {strides = array<i32>} : memref<216x1152xf32, #tpu.memory_space<vmem>>, vector<24x128xf32>,
    %268 = vector.extract_strided_slice %265 {offsets = [24, 0], sizes = [24, 128], strides = [1, 1]} : vector<72x384xf32> to vector<24x128xf32>
    %c144_192 = arith.constant 144 : index
    %c640_193 = arith.constant 640 : index
    %269 = vector.load %arg10[%c144_192, %c640_193] : memref<216x1152xf32, #tpu.memory_space<vmem>>, vector<24x128xf32>
    tpu.vector_store %arg10[%c144_192, %c640_193], %268 {strides = array<i32>} : memref<216x1152xf32, #tpu.memory_space<vmem>>, vector<24x128xf32>,
    %270 = vector.extract_strided_slice %265 {offsets = [48, 0], sizes = [24, 128], strides = [1, 1]} : vector<72x384xf32> to vector<24x128xf32>
    %c144_194 = arith.constant 144 : index
    %c1024_195 = arith.constant 1024 : index
    %271 = vector.load %arg10[%c144_194, %c1024_195] : memref<216x1152xf32, #tpu.memory_space<vmem>>, vector<24x128xf32>
    tpu.vector_store %arg10[%c144_194, %c1024_195], %270 {strides = array<i32>} : memref<216x1152xf32, #tpu.memory_space<vmem>>, vector<24x128xf32>,
    %272 = vector.extract_strided_slice %265 {offsets = [0, 128], sizes = [24, 128], strides = [1, 1]} : vector<72x384xf32> to vector<24x128xf32>
    %c168_196 = arith.constant 168 : index
    %c256_197 = arith.constant 256 : index
    %273 = vector.load %arg10[%c168_196, %c256_197] : memref<216x1152xf32, #tpu.memory_space<vmem>>, vector<24x128xf32>
    tpu.vector_store %arg10[%c168_196, %c256_197], %272 {strides = array<i32>} : memref<216x1152xf32, #tpu.memory_space<vmem>>, vector<24x128xf32>,
    %274 = vector.extract_strided_slice %265 {offsets = [24, 128], sizes = [24, 128], strides = [1, 1]} : vector<72x384xf32> to vector<24x128xf32>
    %c168_198 = arith.constant 168 : index
    %c640_199 = arith.constant 640 : index
    %275 = vector.load %arg10[%c168_198, %c640_199] : memref<216x1152xf32, #tpu.memory_space<vmem>>, vector<24x128xf32>
    tpu.vector_store %arg10[%c168_198, %c640_199], %274 {strides = array<i32>} : memref<216x1152xf32, #tpu.memory_space<vmem>>, vector<24x128xf32>,
    %276 = vector.extract_strided_slice %265 {offsets = [48, 128], sizes = [24, 128], strides = [1, 1]} : vector<72x384xf32> to vector<24x128xf32>
    %c168_200 = arith.constant 168 : index
    %c1024_201 = arith.constant 1024 : index
    %277 = vector.load %arg10[%c168_200, %c1024_201] : memref<216x1152xf32, #tpu.memory_space<vmem>>, vector<24x128xf32>
    tpu.vector_store %arg10[%c168_200, %c1024_201], %276 {strides = array<i32>} : memref<216x1152xf32, #tpu.memory_space<vmem>>, vector<24x128xf32>,
    %278 = vector.extract_strided_slice %265 {offsets = [0, 256], sizes = [24, 128], strides = [1, 1]} : vector<72x384xf32> to vector<24x128xf32>
    %c192_202 = arith.constant 192 : index
    %c256_203 = arith.constant 256 : index
    %279 = vector.load %arg10[%c192_202, %c256_203] : memref<216x1152xf32, #tpu.memory_space<vmem>>, vector<24x128xf32>
    tpu.vector_store %arg10[%c192_202, %c256_203], %278 {strides = array<i32>} : memref<216x1152xf32, #tpu.memory_space<vmem>>, vector<24x128xf32>,
    %280 = vector.extract_strided_slice %265 {offsets = [24, 256], sizes = [24, 128], strides = [1, 1]} : vector<72x384xf32> to vector<24x128xf32>
    %c192_204 = arith.constant 192 : index
    %c640_205 = arith.constant 640 : index
    %281 = vector.load %arg10[%c192_204, %c640_205] : memref<216x1152xf32, #tpu.memory_space<vmem>>, vector<24x128xf32>
    tpu.vector_store %arg10[%c192_204, %c640_205], %280 {strides = array<i32>} : memref<216x1152xf32, #tpu.memory_space<vmem>>, vector<24x128xf32>,
    %282 = vector.extract_strided_slice %265 {offsets = [48, 256], sizes = [24, 128], strides = [1, 1]} : vector<72x384xf32> to vector<24x128xf32>
    %c192_206 = arith.constant 192 : index
    %c1024_207 = arith.constant 1024 : index
    %283 = vector.load %arg10[%c192_206, %c1024_207] : memref<216x1152xf32, #tpu.memory_space<vmem>>, vector<24x128xf32>
    tpu.vector_store %arg10[%c192_206, %c1024_207], %282 {strides = array<i32>} : memref<216x1152xf32, #tpu.memory_space<vmem>>, vector<24x128xf32>,
    %c0_208 = arith.constant 0 : index
    %c0_209 = arith.constant 0 : index
    %284 = vector.load %arg10[%c0_208, %c0_209] : memref<216x1152xf32, #tpu.memory_space<vmem>>, vector<216x1152xf32>
    %c0_210 = arith.constant 0 : index
    %c0_211 = arith.constant 0 : index
    %285 = vector.load %arg6[%c0_210, %c0_211] : memref<1152x84xf32, #tpu.memory_space<vmem>>, vector<1152x84xf32>
    %cst_212 = arith.constant dense<0.000000e+00> : vector<216x84xf32>
    %286 = tpu.matmul %284, %285, %cst_212 {dimension_numbers = #tpu.dot_dimension_numbers<[1], [0], [0], [1], [0, 0, 1, 1], [], []>} : vector<216x1152xf32>, vector<1152x84xf32>, vector<216x84xf32> -> vector<216x84xf32>
    %c0_213 = arith.constant 0 : index
    %c0_214 = arith.constant 0 : index
    %c0_215 = arith.constant 0 : index
    %287 = vector.load %arg7[%c0_213, %c0_214, %c0_215] : memref<3x224x216xf32, #tpu.memory_space<vmem>>, vector<1x224x216xf32>
    %288 = vector.shape_cast %287 : vector<1x224x216xf32> to vector<224x216xf32>
    %289 = vector.extract_strided_slice %286 {offsets = [0, 0], sizes = [216, 28], strides = [1, 1]} : vector<216x84xf32> to vector<216x28xf32>
    %cst_216 = arith.constant dense<0.000000e+00> : vector<224x28xf32>
    %290 = tpu.matmul %288, %289, %cst_216 {dimension_numbers = #tpu.dot_dimension_numbers<[1], [0], [0], [1], [0, 0, 1, 1], [], []>} : vector<224x216xf32>, vector<216x28xf32>, vector<224x28xf32> -> vector<224x28xf32>
    %c1_217 = arith.constant 1 : index
    %c0_218 = arith.constant 0 : index
    %c0_219 = arith.constant 0 : index
    %291 = vector.load %arg7[%c1_217, %c0_218, %c0_219] : memref<3x224x216xf32, #tpu.memory_space<vmem>>, vector<1x224x216xf32>
    %292 = vector.shape_cast %291 : vector<1x224x216xf32> to vector<224x216xf32>
    %293 = vector.extract_strided_slice %286 {offsets = [0, 28], sizes = [216, 28], strides = [1, 1]} : vector<216x84xf32> to vector<216x28xf32>
    %cst_220 = arith.constant dense<0.000000e+00> : vector<224x28xf32>
    %294 = tpu.matmul %292, %293, %cst_220 {dimension_numbers = #tpu.dot_dimension_numbers<[1], [0], [0], [1], [0, 0, 1, 1], [], []>} : vector<224x216xf32>, vector<216x28xf32>, vector<224x28xf32> -> vector<224x28xf32>
    %295 = arith.addf %290, %294 : vector<224x28xf32>
    %c2_221 = arith.constant 2 : index
    %c0_222 = arith.constant 0 : index
    %c0_223 = arith.constant 0 : index
    %296 = vector.load %arg7[%c2_221, %c0_222, %c0_223] : memref<3x224x216xf32, #tpu.memory_space<vmem>>, vector<1x224x216xf32>
    %297 = vector.shape_cast %296 : vector<1x224x216xf32> to vector<224x216xf32>
    %298 = vector.extract_strided_slice %286 {offsets = [0, 56], sizes = [216, 28], strides = [1, 1]} : vector<216x84xf32> to vector<216x28xf32>
    %cst_224 = arith.constant dense<0.000000e+00> : vector<224x28xf32>
    %299 = tpu.matmul %297, %298, %cst_224 {dimension_numbers = #tpu.dot_dimension_numbers<[1], [0], [0], [1], [0, 0, 1, 1], [], []>} : vector<224x216xf32>, vector<216x28xf32>, vector<224x28xf32> -> vector<224x28xf32>
    %300 = arith.addf %295, %299 : vector<224x28xf32>
    %c0_225 = arith.constant 0 : index
    %c0_226 = arith.constant 0 : index
    %301 = memref.load %arg8[%c0_225, %c0_226] : memref<1x1xf32, #tpu.memory_space<smem>>
    %302 = vector.broadcast %301 : f32 to vector<224x28xf32>
    %303 = arith.addf %300, %302 : vector<224x28xf32>
    %c0_227 = arith.constant 0 : index
    %c0_228 = arith.constant 0 : index
    %c0_229 = arith.constant 0 : index
    %304 = vector.load %arg9[%c0_227, %c0_228, %c0_229] : memref<1x224x28xf32, #tpu.memory_space<vmem>>, vector<1x224x28xf32>
    %305 = vector.shape_cast %304 : vector<1x224x28xf32> to vector<224x28xf32>
    %306 = vector.shape_cast %303 : vector<224x28xf32> to vector<1x224x28xf32>
    tpu.vector_store %arg9[%c0_227, %c0_228, %c0_229], %306 {strides = array<i32>} : memref<1x224x28xf32, #tpu.memory_space<vmem>>, vector<1x224x28xf32>,
    return
  }
  func.func @transform_0(%arg0: i32) -> (i32, i32, i32) {
    %c0_i32 = arith.constant 0 : i32
    %c0_i32_0 = arith.constant 0 : i32
    %c0_i32_1 = arith.constant 0 : i32
    return %arg0, %c0_i32, %c0_i32_0 : i32, i32, i32
  }
  func.func @transform_1(%arg0: i32) -> (i32, i32, i32) {
    %c0_i32 = arith.constant 0 : i32
    %c0_i32_0 = arith.constant 0 : i32
    %c0_i32_1 = arith.constant 0 : i32
    %c0_i32_2 = arith.constant 0 : i32
    return %c0_i32, %c0_i32_0, %c0_i32_1 : i32, i32, i32
  }
  func.func @transform_2(%arg0: i32) -> (i32, i32) {
    %c0_i32 = arith.constant 0 : i32
    %c0_i32_0 = arith.constant 0 : i32
    %c0_i32_1 = arith.constant 0 : i32
    return %c0_i32, %c0_i32_0 : i32, i32
  }
  func.func @transform_3(%arg0: i32) -> (i32, i32) {
    %c0_i32 = arith.constant 0 : i32
    %c0_i32_0 = arith.constant 0 : i32
    %c0_i32_1 = arith.constant 0 : i32
    return %c0_i32, %c0_i32_0 : i32, i32
  }
  func.func @transform_4(%arg0: i32) -> (i32, i32) {
    %c0_i32 = arith.constant 0 : i32
    %c0_i32_0 = arith.constant 0 : i32
    %c0_i32_1 = arith.constant 0 : i32
    return %c0_i32, %c0_i32_0 : i32, i32
  }
  func.func @transform_5(%arg0: i32) -> (i32, i32) {
    %c0_i32 = arith.constant 0 : i32
    %c0_i32_0 = arith.constant 0 : i32
    %c0_i32_1 = arith.constant 0 : i32
    return %c0_i32, %c0_i32_0 : i32, i32
  }
  func.func @transform_6(%arg0: i32) -> (i32, i32, i32) {
    %c0_i32 = arith.constant 0 : i32
    %c0_i32_0 = arith.constant 0 : i32
    %c0_i32_1 = arith.constant 0 : i32
    %c0_i32_2 = arith.constant 0 : i32
    return %c0_i32, %c0_i32_0, %c0_i32_1 : i32, i32, i32
  }
  func.func @transform_7(%arg0: i32) -> (i32, i32) {
    %c0_i32 = arith.constant 0 : i32
    %c0_i32_0 = arith.constant 0 : i32
    %c0_i32_1 = arith.constant 0 : i32
    return %c0_i32, %c0_i32_0 : i32, i32
  }
  func.func @transform_8(%arg0: i32) -> (i32, i32, i32) {
    %c0_i32 = arith.constant 0 : i32
    %c0_i32_0 = arith.constant 0 : i32
    %c0_i32_1 = arith.constant 0 : i32
    return %arg0, %c0_i32, %c0_i32_0 : i32, i32, i32
  }
}

</mosaic_0001>

<bundles_post_ra>
// kernel: decoding_cnn_forward.1
= control target key start
LH: loop header
LB: loop body
LE: loop exit
PB: predicated region body
PF: predicated region fallthrough
CT: control target
= control target key end

     0   :  { %s11386_s0 = inlined_call_operand.vmem [shape: bf16[2,72,16], index: 0, kind: input, shape index: {}]   ;;  %s11387_s1 = inlined_call_operand.vmem [shape: bf16[9,16,64], index: 1, kind: input, shape index: {}]   ;;  %s11388_s2 = inlined_call_operand.vmem [shape: f32[1,64], index: 2, kind: input, shape index: {}]   ;;  %s11389_s3 = inlined_call_operand.vmem [shape: bf16[64,384], index: 3, kind: input, shape index: {}]   ;;  %s11390_s4 = inlined_call_operand.vmem [shape: f32[1,384], index: 4, kind: input, shape index: {}]   ;;  %s11391_s5 = inlined_call_operand.vmem [shape: f32[1152,84], index: 5, kind: input, shape index: {}]   ;;  %s11392_s6 = inlined_call_operand.vmem [shape: f32[3,224,216], index: 6, kind: input, shape index: {}]   ;;  %s11393_s7 = inlined_call_operand.<no memory space> [shape: f32[1,1], index: 7, kind: input, shape index: {}]   ;;  %s11394_s8 = inlined_call_operand.hbm [shape: f32[2,224,28], index: 8, kind: output, shape index: {}]  }
   0x1   :  { %13 = sst [smem:[#allocation3]] %s11393_s7 }
   0x2   :  { %14 = vsyncpa [#allocation5], 0 }
   0x3   :  { %16 = vsyncpa [#allocation5 + $0x1], 0  ;;  %s7435_s29 = smov 0   ;;  %s7437_s30 = smov 0  }
   0x4   :  { %s7439_s9 = smov 0   ;;  %s7441_s10 = smov 0  }
   0x5 LB: > { %s7456_s7 = sadd.s32 4294967295, %s7377_s10   ;;  %s6088_s11 = sadd.s32 4294967294, %s7377_s10   ;;  %s7377_s10 = sphi %s7441_s10, %s11744_s10   ;;  %s7373_s9 = sphi %s7439_s9, %s11743_s9   ;;  %s7369_s30 = sphi %s7437_s30, %s11742_s30   ;;  %s7365_s29 = sphi %s7435_s29, %s11741_s29  }
   0x6   : > { %s7460_s12 = sadd.s32 1, %s7377_s10   ;;  %s202_s13 = sadd.s32 1, %s7373_s9 }
   0x7   : > { %s199_s14 = ssub.s32 %s7377_s10, %s7460_s12  ;;  %p212_p0 = scmp.ne.s32.totalorder %s7373_s9, %s7369_s30 }
   0x8   : > { %p200_p1 = scmp.eq.s32.totalorder %s199_s14, 0  ;;  %p213_p2 = scmp.eq.s32.totalorder %s7456_s7, 1 }
   0x9   : > { %p218_p3 = scmp.ne.s32.totalorder %s7369_s30, %s7365_s29  ;;  %p219_p4 = scmp.eq.s32.totalorder %s6088_s11, 1 }
   0xa   : > { %s7471_s15 = scalar_select %p200_p1, %s7373_s9, %s202_s13  }
   0xb   : > { %p7473_p5 = por %p213_p2, %p212_p0  ;;  %p7477_p6 = por %p219_p4, %p218_p3 }
   0xc   : > { %p6091_p7 = scmp.ge.s32.totalorder %s7377_s10, 1  ;;  %p266_p8 = scmp.lt.s32.totalorder %s7377_s10, 3 }
   0xe   : > { %p267_p9 = pnand %p6091_p7, %p266_p8 }
  0x10   : > { %270 = sbr.rel (%p267_p9) target bundleno = 3331 (0xd03), region = 52 }
  0x15   : > { %v7262_v0 = vld [vmem:[%s11387_s1] sm:$0xff]   ;;  %v11395_v1 = vmov 0.0   ;;  %p300_p10 = scmp.lt.s32.totalorder %s7456_s7, 1  ;;  %vm7380_vm0 = vmmov 0   ;;  %v7494_v2 = vld [vmem:[%s11389_s3 + $0x4c] ss:$12 sps:$4 sm:$0xff]  }
  0x16   : > { %6648 = vmatprep.subr.bf16.mxu0 %v11395_v1  ;;  %7211 = vmatprep.subr.bf16.mxu1 %v11395_v1  ;;  %v7504_v3 = vld [vmem:[%s11389_s3 + $0x50] ss:$12 sps:$4 sm:$0xff]   ;;  %vm370_vm1 = vcmask 130048   ;;  %v7514_v4 = vld [vmem:[%s11389_s3 + $0x48] ss:$12 sps:$4 sm:$0xff]   ;;  %v11397_v19 = vmov 0  }
  0x17   : > { %6649 = vmatpush3.bf16.msra.mxu0 %v7262_v0  ;;  %6650 = vmatprep.mubr.msk.bf16.mxu0 %vm7380_vm0, %v11395_v1  ;;  %s301_s22 = scalar_select %p300_p10, %s7456_s7, 1  ;;  %v7522_v6 = vld [vmem:[%s11389_s3 + $0x34] ss:$12 sps:$4 sm:$0xff]   ;;  %v7561_v11 = vld [vmem:[%s11389_s3 + $0x30] ss:$12 sps:$4 sm:$0xff]   ;;  %vm552_vm2 = vcmask 523264  }
  0x18   : > { %7212 = vmatpush3.bf16.msra.mxu1 %v7262_v0  ;;  %6658 = vmatprep.mubr.msk.bf16.mxu1 %vm7380_vm0, %v11395_v1  ;;  %v7566_v12 = vld [vmem:[%s11389_s3 + $0x38] ss:$12 sps:$4 sm:$0xff]   ;;  %v7573_v13 = vld [vmem:[%s11389_s3 + $0x1c] ss:$12 sps:$4 sm:$0xff]   ;;  %v7584_v15 = vld [vmem:[%s11389_s3 + $0x20] ss:$12 sps:$4 sm:$0xff]  }
  0x19   : > { %576 = vmatprep.subr.bf16.mxu1 %v7494_v2  ;;  %6670 = vmatprep.subr.bf16.mxu0 %v11395_v1  ;;  %s7214_s23 = smul.u32 36, %s301_s22  ;;  %v7579_v14 = vld [vmem:[%s11389_s3 + $0x18] ss:$12 sps:$4 sm:$0xff]   ;;  %v7598_v17 = vld [vmem:[%s11389_s3] ss:$12 sps:$4 sm:$0xff]   ;;  %s7382_s27 = smov 100  }
  0x1a   : > { %v7592_v16 = vld [vmem:[%s11389_s3 + $0x4] ss:$12 sps:$4 sm:$0xff]   ;;  %v7603_v18 = vld [vmem:[%s11389_s3 + $0x8] ss:$12 sps:$4 sm:$0xff]   ;;  %v7614_v20 = vld [vmem:[%s11388_s2] ss:$0 sm:$0xff] }
  0x1b   : > { %s7509_s28 = scalar_lea.vmem %s11386_s0, %s7214_s23  ;;  %v7284_v35 = vld [vmem:[%s11387_s1 + $0x8] sm:$0xff]   ;;  %vm4919_vm3 = vcmask 719872   ;;  %s7383_s18 = smov 72   ;;  %vm5983_vm4 = vcmask 228352  }
  0x1c   : > { %v7517_v5 = vld [vmem:[%s7509_s28] sm:$0xff]   ;;  %v7527_v7 = vld [vmem:[%s7509_s28 + $0x10] sm:$0xff]   ;;  %v7533_v8 = vld [vmem:[%s7509_s28 + $0x8] sm:$0xff]   ;;  %s5953_s19 = sld [smem:[#allocation3]]  ;;  %s297_s20 = sand.u32 1, %s7369_s30  }
  0x1d   : > { %6651 = vmatmul.mubr.msk.bf16.vlgmr.msra.gmra.mxu0 %vm370_vm1, %v7517_v5  ;;  %6659 = vmatmul.mubr.msk.bf16.vlgmr.msra.gmra.mxu1 %vm370_vm1, %v7527_v7  ;;  %v7542_v9 = vld [vmem:[%s7509_s28 + $0x18] sm:$0xff]   ;;  %v7554_v10 = vld [vmem:[%s7509_s28 + $0x20] ss:$0 sps:$4 sm:$0xff]   ;;  %s7213_s21 = smul.u32 224, %s297_s20  ;;  %s7384_s11 = smov [#allocation4]  }
  0x1e   : > { %6654 = vmatprep.mubr.msk.bf16.mxu0 %vm7380_vm0, %v11395_v1  ;;  %6671 = vmatpush3.bf16.msra.mxu0 %v7504_v3  ;;  %s7215_s23 = smul.u32 3584, %s7456_s7  ;;  %s11346_s7 = scalar_lea.sflag [#allocation5], %s297_s20 }
  0x1f   : > { %6672 = vmatprep.subr.bf16.mxu0 %v11395_v1  ;;  %6662 = vmatprep.mubr.msk.bf16.mxu1 %vm7380_vm0, %v11395_v1  ;;  %s11198_s22 = scalar_lea.vmem [#allocation4], %s7213_s21 }
  0x20   : > { %577 = vmatpush1.bf16.msra.mxu1 %v7514_v4  ;;  %s6026_s24 = sshll.u32 %s11198_s22, 4  ;;  %s11340_s24 = int_to_ptr.vmem [resolvable:$true] %s6026_s24 }
  0x21   : > { %578 = vmatprep.subr.bf16.mxu1 %v7522_v6 }
  0x22   : > { %6673 = vmatpush3.bf16.msra.mxu0 %v7566_v12 }
  0x23   : > { %6674 = vmatprep.subr.bf16.mxu0 %v11395_v1 }
  0x24   : > { %579 = vmatpush1.bf16.msra.mxu1 %v7561_v11 }
  0x25   : > { %6655 = vmatmul.mubr.msk.bf16.gmra.mxu0 %vm370_vm1, %v7533_v8  ;;  %6663 = vmatmul.mubr.msk.bf16.gmra.mxu1 %vm370_vm1, %v7542_v9 }
  0x26   : > { %6678 = vmatprep.mubr.msk.bf16.mxu0 %vm7380_vm0, %v11395_v1  ;;  %6666 = vmatprep.mubr.msk.bf16.mxu1 %vm7380_vm0, %v11395_v1 }
  0x27   : > { %580 = vmatprep.subr.bf16.mxu1 %v7573_v13  ;;  %6675 = vmatpush3.bf16.msra.mxu0 %v7584_v15 }
  0x28   : > { %581 = vmatpush1.bf16.msra.mxu1 %v7579_v14  ;;  %6676 = vmatprep.subr.bf16.mxu0 %v11395_v1 }
  0x29   : > { %582 = vmatprep.subr.bf16.mxu1 %v7592_v16 }
  0x2b   : > { %6677 = vmatpush3.bf16.msra.mxu0 %v7603_v18 }
  0x2c   : > { %583 = vmatpush1.bf16.msra.mxu1 %v7598_v17  ;;  %893 = vmatprep.subr.bf16.mxu0 %v7494_v2 }
  0x2d   : > { %6667 = vmatmul.mubr.msk.bf16.gmra.mxu1 %vm370_vm1, %v7554_v10  ;;  %6698 = vmatprep.subr.bf16.mxu1 %v11395_v1 }
  0x2e   : > { %600 = vmatprep.mubr.bf16.mxu1 %v11397_v19 }
  0xdd   : > { %v420_v21 = vpop.f32.mrf.mxu0  ;;  %v436_v23 = vpop.f32.mrf.mxu1 }
  0xde   : > { %v421_v24 = vadd.f32 %v7614_v20, %v420_v21  ;;  %v437_v47 = vadd.f32 %v7614_v20, %v436_v23 }
  0xdf   : > { %v6652_v22 = vpop.f32.mrf.mxu0  ;;  %v6660_v26 = vpop.f32.mrf.mxu1 }
  0xe0   : > { %v458_v30 = vmax.f32 %v421_v24, 0.0  ;;  %v462_v52 = vmax.f32 %v437_v47, 0.0 }
  0xe1   : > { %v423_v25 = vpop.f32.mrf.mxu0  ;;  %v439_v29 = vpop.f32.mrf.mxu1 }
  0xe2   : > { %v424_v27 = vadd.f32 %v7614_v20, %v423_v25  ;;  %v440_v49 = vadd.f32 %v7614_v20, %v439_v29 }
  0xe3   : > { %v6653_v28 = vpop.f32.mrf.mxu0  ;;  %v6661_v33 = vpop.f32.mrf.mxu1 }
  0xe4   : > { %v459_v31 = vmax.f32 %v424_v27, 0.0  ;;  %v463_v53 = vmax.f32 %v440_v49, 0.0 }
  0xe5   : > { %v428_v32 = vpop.f32.mrf.mxu0  ;;  %v444_v37 = vpop.f32.mrf.mxu1 }
  0xe6   : > { %v467_v34 = vpack.c.bf16 %v459_v31, %v458_v30  ;;  %v429_v38 = vadd.f32 %v7614_v20, %v428_v32  ;;  %v469_v56 = vpack.c.bf16 %v463_v53, %v462_v52  ;;  %v445_v57 = vadd.f32 %v7614_v20, %v444_v37 }
  0xe7   : > { %v6656_v36 = vpop.f32.mrf.mxu0  ;;  %v6664_v40 = vpop.f32.mrf.mxu1 }
  0xe8   : > { %6117 = vmatmul.mubr.msk.bf16.vlgmr.msra.gmra.mxu1 %vm552_vm2, %v467_v34  ;;  %6679 = vmatmul.mubr.msk.bf16.vlgmr.msra.gmra.mxu0 %vm552_vm2, %v467_v34  ;;  %v460_v44 = vmax.f32 %v429_v38, 0.0  ;;  %v464_v59 = vmax.f32 %v445_v57, 0.0 }
  0xe9   : > { %v431_v39 = vpop.f32.mrf.mxu0  ;;  %610 = vmatprep.mubr.bf16.mxu1 %v11397_v19  ;;  %6682 = vmatprep.mubr.msk.bf16.mxu0 %vm7380_vm0, %v11395_v1  ;;  %v447_v43 = vpop.f32.mrf.mxu1 }
  0xea   : > { %v432_v41 = vadd.f32 %v7614_v20, %v431_v39  ;;  %6699 = vmatpush3.bf16.msra.mxu1 %v7284_v35  ;;  %894 = vmatpush1.bf16.msra.mxu0 %v7514_v4  ;;  %v448_v58 = vadd.f32 %v7614_v20, %v447_v43 }
  0xeb   : > { %v6657_v42 = vpop.f32.mrf.mxu0  ;;  %6720 = vmatprep.subr.bf16.mxu1 %v11395_v1  ;;  %895 = vmatprep.subr.bf16.mxu0 %v7522_v6  ;;  %v6665_v46 = vpop.f32.mrf.mxu1 }
  0xec   : > { %v461_v45 = vmax.f32 %v432_v41, 0.0  ;;  %v465_v60 = vmax.f32 %v448_v58, 0.0 }
  0xed   : > { %v452_v50 = vpop.f32.mrf.mxu1 }
  0xee   : > { %v468_v48 = vpack.c.bf16 %v461_v45, %v460_v44  ;;  %896 = vmatpush1.bf16.msra.mxu0 %v7561_v11  ;;  %v453_v61 = vadd.f32 %v7614_v20, %v452_v50  ;;  %v470_v62 = vpack.c.bf16 %v465_v60, %v464_v59 }
  0xef   : > { %897 = vmatprep.subr.bf16.mxu0 %v7573_v13  ;;  %v6668_v51 = vpop.f32.mrf.mxu1 }
  0xf0   : > { %6118 = vmatmul.mubr.msk.bf16.gmra.mxu1 %vm552_vm2, %v468_v48  ;;  %6683 = vmatmul.mubr.msk.bf16.gmra.mxu0 %vm552_vm2, %v468_v48  ;;  %v466_v63 = vmax.f32 %v453_v61, 0.0 }
  0xf1   : > { %620 = vmatprep.mubr.bf16.mxu1 %v11397_v19  ;;  %6686 = vmatprep.mubr.msk.bf16.mxu0 %vm7380_vm0, %v11395_v1  ;;  %v455_v54 = vpop.f32.mrf.mxu1 }
  0xf2   : > { %898 = vmatpush1.bf16.msra.mxu0 %v7579_v14  ;;  %v471_v0 = vpack.c.bf16 %v466_v63, %v466_v63 }
  0xf3   : > { %899 = vmatprep.subr.bf16.mxu0 %v7592_v16  ;;  %v6669_v55 = vpop.f32.mrf.mxu1 }
  0xf6   : > { %900 = vmatpush1.bf16.msra.mxu0 %v7598_v17 }
  0xf7   : > { %6748 = vmatprep.subr.bf16.mxu0 %v11395_v1 }
  0xf8   : > { %6119 = vmatmul.mubr.msk.bf16.gmra.mxu1 %vm552_vm2, %v469_v56  ;;  %6687 = vmatmul.mubr.msk.bf16.gmra.mxu0 %vm552_vm2, %v469_v56 }
  0xf9   : > { %630 = vmatprep.mubr.bf16.mxu1 %v11397_v19  ;;  %6690 = vmatprep.mubr.msk.bf16.mxu0 %vm7380_vm0, %v11395_v1 }
 0x100   : > { %6120 = vmatmul.mubr.msk.bf16.gmra.mxu1 %vm552_vm2, %v470_v62  ;;  %6691 = vmatmul.mubr.msk.bf16.gmra.mxu0 %vm552_vm2, %v470_v62 }
 0x101   : > { %640 = vmatprep.mubr.bf16.mxu1 %v11397_v19  ;;  %6694 = vmatprep.mubr.msk.bf16.mxu0 %vm7380_vm0, %v11395_v1 }
 0x108   : > { %6121 = vmatmul.mubr.msk.bf16.gmra.mxu1 %vm552_vm2, %v471_v0  ;;  %6695 = vmatmul.mubr.msk.bf16.gmra.mxu0 %vm552_vm2, %v471_v0 }
 0x109   : > { %6700 = vmatprep.mubr.msk.bf16.mxu1 %vm7380_vm0, %v11395_v1  ;;  %917 = vmatprep.mubr.bf16.mxu0 %v11397_v19 }
 0x110   : > { %6701 = vmatmul.mubr.msk.bf16.vlgmr.msra.gmra.mxu1 %vm370_vm1, %v7517_v5 }
 0x111   : > { %6704 = vmatprep.mubr.msk.bf16.mxu1 %vm7380_vm0, %v11395_v1  ;;  %6721 = vmatpush3.bf16.msra.mxu1 %v7504_v3 }
 0x112   : > { %6722 = vmatprep.subr.bf16.mxu1 %v11395_v1 }
 0x115   : > { %6723 = vmatpush3.bf16.msra.mxu1 %v7566_v12 }
 0x116   : > { %6724 = vmatprep.subr.bf16.mxu1 %v11395_v1 }
 0x118   : > { %6705 = vmatmul.mubr.msk.bf16.gmra.mxu1 %vm370_vm1, %v7533_v8 }
 0x119   : > { %6708 = vmatprep.mubr.msk.bf16.mxu1 %vm7380_vm0, %v11395_v1  ;;  %6725 = vmatpush3.bf16.msra.mxu1 %v7584_v15 }
 0x11a   : > { %6726 = vmatprep.subr.bf16.mxu1 %v11395_v1 }
 0x11d   : > { %6727 = vmatpush3.bf16.msra.mxu1 %v7603_v18 }
 0x11e   : > { %1210 = vmatprep.subr.bf16.mxu1 %v7494_v2 }
 0x120   : > { %6709 = vmatmul.mubr.msk.bf16.gmra.mxu1 %vm370_vm1, %v7527_v7 }
 0x121   : > { %6712 = vmatprep.mubr.msk.bf16.mxu1 %vm7380_vm0, %v11395_v1 }
 0x128   : > { %6713 = vmatmul.mubr.msk.bf16.gmra.mxu1 %vm370_vm1, %v7542_v9 }
 0x129   : > { %6716 = vmatprep.mubr.msk.bf16.mxu1 %vm7380_vm0, %v11395_v1 }
 0x130   : > { %6717 = vmatmul.mubr.msk.bf16.gmra.mxu1 %vm370_vm1, %v7554_v10 }
 0x131   : > { %6728 = vmatprep.mubr.msk.bf16.mxu1 %vm7380_vm0, %v11395_v1 }
 0x1a8   : > { %v7690_v21 = vpop.f32.mrf.mxu1  ;;  %v7692_v22 = vpop.f32.mrf.mxu0 }
 0x1aa   : > { %v7694_v23 = vpop.f32.mrf.mxu1  ;;  %v6680_v24 = vpop.f32.mrf.mxu0 }
 0x1ac   : > { %v7696_v25 = vpop.f32.mrf.mxu1  ;;  %v7698_v26 = vpop.f32.mrf.mxu0 }
 0x1ad   : > { %11401 = vst [vmem:[#allocation7_spill] sm:$0xff] %v7698_v26 }
 0x1ae   : > { %v7700_v27 = vpop.f32.mrf.mxu1  ;;  %v6681_v28 = vpop.f32.mrf.mxu0 }
 0x1b0   : > { %v7702_v29 = vpop.f32.mrf.mxu1  ;;  %v7704_v30 = vpop.f32.mrf.mxu0 }
 0x1b1   : > { %11402 = vst [vmem:[#allocation8_spill] sm:$0xff] %v7704_v30 }
 0x1b2   : > { %v7706_v31 = vpop.f32.mrf.mxu1  ;;  %v6684_v32 = vpop.f32.mrf.mxu0 }
 0x1b4   : > { %v7708_v33 = vpop.f32.mrf.mxu1  ;;  %v7710_v34 = vpop.f32.mrf.mxu0 }
 0x1b6   : > { %v7712_v35 = vpop.f32.mrf.mxu1  ;;  %v6685_v36 = vpop.f32.mrf.mxu0 }
 0x1b8   : > { %v7714_v37 = vpop.f32.mrf.mxu1  ;;  %v7716_v38 = vpop.f32.mrf.mxu0 }
 0x1b9   : > { %11403 = vst [vmem:[#allocation9_spill] sm:$0xff] %v7716_v38 }
 0x1ba   : > { %v7718_v39 = vpop.f32.mrf.mxu1  ;;  %v6688_v40 = vpop.f32.mrf.mxu0 }
 0x1bc   : > { %v7720_v41 = vpop.f32.mrf.mxu1  ;;  %v7722_v42 = vpop.f32.mrf.mxu0 }
 0x1bd   : > { %11404 = vst [vmem:[#allocation10_spill] sm:$0xff] %v7722_v42 }
 0x1be   : > { %v7724_v43 = vpop.f32.mrf.mxu1  ;;  %v6689_v44 = vpop.f32.mrf.mxu0 }
 0x1c0   : > { %v7726_v45 = vpop.f32.mrf.mxu1  ;;  %v7728_v46 = vpop.f32.mrf.mxu0 }
 0x1c1   : > { %11405 = vst [vmem:[#allocation11_spill] sm:$0xff] %v7726_v45  ;;  %11406 = vst [vmem:[#allocation12_spill] sm:$0xff] %v7728_v46 }
 0x1c2   : > { %v7730_v47 = vpop.f32.mrf.mxu1  ;;  %v6692_v48 = vpop.f32.mrf.mxu0 }
 0x1c3   : > { %11407 = vst [vmem:[#allocation13_spill] sm:$0xff] %v7730_v47  ;;  %v7285_v48 = vld [vmem:[%s11387_s1 + $0x10] sm:$0xff]  }
 0x1c4   : > { %v7732_v49 = vpop.f32.mrf.mxu1  ;;  %v7734_v50 = vpop.f32.mrf.mxu0 }
 0x1c5   : > { %11408 = vst [vmem:[#allocation14_spill] sm:$0xff] %v7732_v49  ;;  %11409 = vst [vmem:[#allocation15_spill] sm:$0xff] %v7734_v50 }
 0x1c6   : > { %v7736_v51 = vpop.f32.mrf.mxu1  ;;  %v6693_v52 = vpop.f32.mrf.mxu0 }
 0x1c7   : > { %11410 = vst [vmem:[#allocation16_spill] sm:$0xff] %v7736_v51 }
 0x1c8   : > { %v7738_v53 = vpop.f32.mrf.mxu1  ;;  %v7740_v54 = vpop.f32.mrf.mxu0 }
 0x1c9   : > { %11411 = vst [vmem:[#allocation17_spill] sm:$0xff] %v7738_v53  ;;  %11412 = vst [vmem:[#allocation18_spill] sm:$0xff] %v7740_v54 }
 0x1ca   : > { %v7742_v55 = vpop.f32.mrf.mxu1  ;;  %v6696_v56 = vpop.f32.mrf.mxu0 }
 0x1cb   : > { %11413 = vst [vmem:[#allocation19_spill] sm:$0xff] %v7742_v55 }
 0x1cc   : > { %v646_v57 = vpop.f32.mrf.mxu1  ;;  %v718_v58 = vpop.f32.mrf.mxu0 }
 0x1ce   : > { %v647_v59 = vpop.f32.mrf.mxu1  ;;  %v6697_v60 = vpop.f32.mrf.mxu0 }
 0x1d0   : > { %v818_v61 = vpop.f32.mrf.mxu1 }
 0x1d1   : > { %v819_v63 = vadd.f32 %v7614_v20, %v818_v61 }
 0x1d2   : > { %v6702_v62 = vpop.f32.mrf.mxu1 }
 0x1d3   : > { %v856_v32 = vmax.f32 %v819_v63, 0.0 }
 0x1d4   : > { %v821_v0 = vpop.f32.mrf.mxu1 }
 0x1d5   : > { %v822_v24 = vadd.f32 %v7614_v20, %v821_v0 }
 0x1d6   : > { %v6703_v28 = vpop.f32.mrf.mxu1 }
 0x1d7   : > { %v857_v36 = vmax.f32 %v822_v24, 0.0 }
 0x1d8   : > { %v826_v40 = vpop.f32.mrf.mxu1 }
 0x1d9   : > { %v865_v44 = vpack.c.bf16 %v857_v36, %v856_v32  ;;  %v827_v56 = vadd.f32 %v7614_v20, %v826_v40 }
 0x1da   : > { %v6706_v52 = vpop.f32.mrf.mxu1 }
 0x1db   : > { %6135 = vmatmul.mubr.msk.bf16.vlgmr.msra.gmra.mxu0 %vm552_vm2, %v865_v44  ;;  %6729 = vmatmul.mubr.msk.bf16.vlgmr.msra.gmra.mxu1 %vm552_vm2, %v865_v44  ;;  %v858_v60 = vmax.f32 %v827_v56, 0.0 }
 0x1dc   : > { %v829_v57 = vpop.f32.mrf.mxu1  ;;  %927 = vmatprep.mubr.bf16.mxu0 %v11397_v19  ;;  %6732 = vmatprep.mubr.msk.bf16.mxu1 %vm7380_vm0, %v11395_v1 }
 0x1dd   : > { %v830_v58 = vadd.f32 %v7614_v20, %v829_v57  ;;  %6749 = vmatpush3.bf16.msra.mxu0 %v7285_v48  ;;  %1211 = vmatpush1.bf16.msra.mxu1 %v7514_v4 }
 0x1de   : > { %v6707_v59 = vpop.f32.mrf.mxu1  ;;  %6770 = vmatprep.subr.bf16.mxu0 %v11395_v1  ;;  %1212 = vmatprep.subr.bf16.mxu1 %v7522_v6 }
 0x1df   : > { %v859_v61 = vmax.f32 %v830_v58, 0.0 }
 0x1e0   : > { %v834_v62 = vpop.f32.mrf.mxu1 }
 0x1e1   : > { %v866_v63 = vpack.c.bf16 %v859_v61, %v858_v60  ;;  %1213 = vmatpush1.bf16.msra.mxu1 %v7561_v11  ;;  %v835_v24 = vadd.f32 %v7614_v20, %v834_v62 }
 0x1e2   : > { %v6710_v0 = vpop.f32.mrf.mxu1  ;;  %1214 = vmatprep.subr.bf16.mxu1 %v7573_v13 }
 0x1e3   : > { %6136 = vmatmul.mubr.msk.bf16.gmra.mxu0 %vm552_vm2, %v866_v63  ;;  %6733 = vmatmul.mubr.msk.bf16.gmra.mxu1 %vm552_vm2, %v866_v63  ;;  %v860_v40 = vmax.f32 %v835_v24, 0.0 }
 0x1e4   : > { %v837_v28 = vpop.f32.mrf.mxu1  ;;  %937 = vmatprep.mubr.bf16.mxu0 %v11397_v19  ;;  %6736 = vmatprep.mubr.msk.bf16.mxu1 %vm7380_vm0, %v11395_v1 }
 0x1e5   : > { %v838_v32 = vadd.f32 %v7614_v20, %v837_v28  ;;  %1215 = vmatpush1.bf16.msra.mxu1 %v7579_v14 }
 0x1e6   : > { %v6711_v36 = vpop.f32.mrf.mxu1  ;;  %1216 = vmatprep.subr.bf16.mxu1 %v7592_v16 }
 0x1e7   : > { %v861_v44 = vmax.f32 %v838_v32, 0.0 }
 0x1e8   : > { %v842_v48 = vpop.f32.mrf.mxu1 }
 0x1e9   : > { %v867_v52 = vpack.c.bf16 %v861_v44, %v860_v40  ;;  %1217 = vmatpush1.bf16.msra.mxu1 %v7598_v17  ;;  %v843_v57 = vadd.f32 %v7614_v20, %v842_v48 }
 0x1ea   : > { %v6714_v56 = vpop.f32.mrf.mxu1  ;;  %6798 = vmatprep.subr.bf16.mxu1 %v11395_v1 }
 0x1eb   : > { %6137 = vmatmul.mubr.msk.bf16.gmra.mxu0 %vm552_vm2, %v867_v52  ;;  %6737 = vmatmul.mubr.msk.bf16.gmra.mxu1 %vm552_vm2, %v867_v52  ;;  %v862_v61 = vmax.f32 %v843_v57, 0.0 }
 0x1ec   : > { %v845_v58 = vpop.f32.mrf.mxu1  ;;  %947 = vmatprep.mubr.bf16.mxu0 %v11397_v19  ;;  %6740 = vmatprep.mubr.msk.bf16.mxu1 %vm7380_vm0, %v11395_v1 }
 0x1ed   : > { %v846_v59 = vadd.f32 %v7614_v20, %v845_v58 }
 0x1ee   : > { %v6715_v60 = vpop.f32.mrf.mxu1 }
 0x1ef   : > { %v863_v62 = vmax.f32 %v846_v59, 0.0 }
 0x1f0   : > { %v850_v63 = vpop.f32.mrf.mxu1 }
 0x1f1   : > { %v868_v0 = vpack.c.bf16 %v863_v62, %v862_v61  ;;  %v851_v24 = vadd.f32 %v7614_v20, %v850_v63 }
 0x1f2   : > { %v6718_v28 = vpop.f32.mrf.mxu1 }
 0x1f3   : > { %v864_v32 = vmax.f32 %v851_v24, 0.0  ;;  %6138 = vmatmul.mubr.msk.bf16.gmra.mxu0 %vm552_vm2, %v868_v0  ;;  %6741 = vmatmul.mubr.msk.bf16.gmra.mxu1 %vm552_vm2, %v868_v0 }
 0x1f4   : > { %v853_v36 = vpop.f32.mrf.mxu1  ;;  %957 = vmatprep.mubr.bf16.mxu0 %v11397_v19  ;;  %6744 = vmatprep.mubr.msk.bf16.mxu1 %vm7380_vm0, %v11395_v1 }
 0x1f5   : > { %v869_v44 = vpack.c.bf16 %v864_v32, %v864_v32 }
 0x1f6   : > { %v6719_v40 = vpop.f32.mrf.mxu1 }
 0x1fb   : > { %6139 = vmatmul.mubr.msk.bf16.gmra.mxu0 %vm552_vm2, %v869_v44  ;;  %6745 = vmatmul.mubr.msk.bf16.gmra.mxu1 %vm552_vm2, %v869_v44 }
 0x1fc   : > { %6750 = vmatprep.mubr.msk.bf16.mxu0 %vm7380_vm0, %v11395_v1  ;;  %1234 = vmatprep.mubr.bf16.mxu1 %v11397_v19 }
 0x203   : > { %6751 = vmatmul.mubr.msk.bf16.vlgmr.msra.gmra.mxu0 %vm370_vm1, %v7517_v5 }
 0x204   : > { %6754 = vmatprep.mubr.msk.bf16.mxu0 %vm7380_vm0, %v11395_v1  ;;  %6771 = vmatpush3.bf16.msra.mxu0 %v7504_v3 }
 0x205   : > { %6772 = vmatprep.subr.bf16.mxu0 %v11395_v1 }
 0x208   : > { %6773 = vmatpush3.bf16.msra.mxu0 %v7566_v12 }
 0x209   : > { %6774 = vmatprep.subr.bf16.mxu0 %v11395_v1 }
 0x20b   : > { %6755 = vmatmul.mubr.msk.bf16.gmra.mxu0 %vm370_vm1, %v7533_v8 }
 0x20c   : > { %6758 = vmatprep.mubr.msk.bf16.mxu0 %vm7380_vm0, %v11395_v1  ;;  %6775 = vmatpush3.bf16.msra.mxu0 %v7584_v15 }
 0x20d   : > { %6776 = vmatprep.subr.bf16.mxu0 %v11395_v1 }
 0x210   : > { %6777 = vmatpush3.bf16.msra.mxu0 %v7603_v18 }
 0x211   : > { %1527 = vmatprep.subr.bf16.mxu0 %v7494_v2 }
 0x213   : > { %6759 = vmatmul.mubr.msk.bf16.gmra.mxu0 %vm370_vm1, %v7527_v7 }
 0x214   : > { %6762 = vmatprep.mubr.msk.bf16.mxu0 %vm7380_vm0, %v11395_v1 }
 0x21b   : > { %6763 = vmatmul.mubr.msk.bf16.gmra.mxu0 %vm370_vm1, %v7542_v9 }
 0x21c   : > { %6766 = vmatprep.mubr.msk.bf16.mxu0 %vm7380_vm0, %v11395_v1 }
 0x223   : > { %6767 = vmatmul.mubr.msk.bf16.gmra.mxu0 %vm370_vm1, %v7554_v10 }
 0x224   : > { %6778 = vmatprep.mubr.msk.bf16.mxu0 %vm7380_vm0, %v11395_v1 }
 0x29b   : > { %v7818_v48 = vpop.f32.mrf.mxu0  ;;  %v7820_v52 = vpop.f32.mrf.mxu1 }
 0x29d   : > { %v7822_v56 = vpop.f32.mrf.mxu0  ;;  %v6730_v57 = vpop.f32.mrf.mxu1 }
 0x29f   : > { %v7824_v58 = vpop.f32.mrf.mxu0  ;;  %v7826_v59 = vpop.f32.mrf.mxu1 }
 0x2a0   : > { %11414 = vst [vmem:[#allocation20_spill] sm:$0xff] %v7826_v59 }
 0x2a1   : > { %v7828_v60 = vpop.f32.mrf.mxu0  ;;  %v6731_v61 = vpop.f32.mrf.mxu1 }
 0x2a3   : > { %v7830_v62 = vpop.f32.mrf.mxu0  ;;  %v7832_v63 = vpop.f32.mrf.mxu1 }
 0x2a4   : > { %11415 = vst [vmem:[#allocation21_spill] sm:$0xff] %v7832_v63 }
 0x2a5   : > { %v7834_v0 = vpop.f32.mrf.mxu0  ;;  %v6734_v24 = vpop.f32.mrf.mxu1 }
 0x2a7   : > { %v7836_v28 = vpop.f32.mrf.mxu0  ;;  %v7838_v32 = vpop.f32.mrf.mxu1 }
 0x2a8   : > { %11416 = vst [vmem:[#allocation22_spill] sm:$0xff] %v7836_v28  ;;  %11417 = vst [vmem:[#allocation23_spill] sm:$0xff] %v7838_v32 }
 0x2a9   : > { %v7840_v36 = vpop.f32.mrf.mxu0  ;;  %v6735_v40 = vpop.f32.mrf.mxu1 }
 0x2aa   : > { %11418 = vst [vmem:[#allocation24_spill] sm:$0xff] %v7840_v36 }
 0x2ab   : > { %v7842_v44 = vpop.f32.mrf.mxu0  ;;  %v7844_v57 = vpop.f32.mrf.mxu1 }
 0x2ac   : > { %11419 = vst [vmem:[#allocation25_spill] sm:$0xff] %v7842_v44  ;;  %11420 = vst [vmem:[#allocation26_spill] sm:$0xff] %v7844_v57 }
 0x2ad   : > { %v7846_v1 = vpop.f32.mrf.mxu0  ;;  %v6738_v61 = vpop.f32.mrf.mxu1 }
 0x2ae   : > { %11421 = vst [vmem:[#allocation27_spill] sm:$0xff] %v7846_v1 }
 0x2af   : > { %v7848_v19 = vpop.f32.mrf.mxu0  ;;  %v7850_v54 = vpop.f32.mrf.mxu1 }
 0x2b0   : > { %11422 = vst [vmem:[#allocation28_spill] sm:$0xff] %v7848_v19  ;;  %11423 = vst [vmem:[#allocation29_spill] sm:$0xff] %v7850_v54 }
 0x2b1   : > { %v7852_v50 = vpop.f32.mrf.mxu0  ;;  %v6739_v24 = vpop.f32.mrf.mxu1 }
 0x2b2   : > { %11424 = vst [vmem:[#allocation30_spill] sm:$0xff] %v7852_v50 }
 0x2b3   : > { %v7854_v46 = vpop.f32.mrf.mxu0  ;;  %v7856_v55 = vpop.f32.mrf.mxu1 }
 0x2b4   : > { %11425 = vst [vmem:[#allocation31_spill] sm:$0xff] %v7854_v46  ;;  %11426 = vst [vmem:[#allocation32_spill] sm:$0xff] %v7856_v55 }
 0x2b5   : > { %v7858_v51 = vpop.f32.mrf.mxu0  ;;  %v6742_v40 = vpop.f32.mrf.mxu1 }
 0x2b6   : > { %11427 = vst [vmem:[#allocation33_spill] sm:$0xff] %v7858_v51 }
 0x2b7   : > { %v7860_v47 = vpop.f32.mrf.mxu0  ;;  %v7862_v53 = vpop.f32.mrf.mxu1 }
 0x2b8   : > { %11428 = vst [vmem:[#allocation34_spill] sm:$0xff] %v7860_v47  ;;  %11429 = vst [vmem:[#allocation35_spill] sm:$0xff] %v7862_v53 }
 0x2b9   : > { %v7864_v49 = vpop.f32.mrf.mxu0  ;;  %v6743_v61 = vpop.f32.mrf.mxu1 }
 0x2ba   : > { %11430 = vst [vmem:[#allocation36_spill] sm:$0xff] %v7864_v49 }
 0x2bb   : > { %v7866_v45 = vpop.f32.mrf.mxu0  ;;  %v7868_v54 = vpop.f32.mrf.mxu1 }
 0x2bc   : > { %11431 = vst [vmem:[#allocation37_spill] sm:$0xff] %v7866_v45  ;;  %11432 = vst [vmem:[#allocation38_spill] sm:$0xff] %v7868_v54 }
 0x2bd   : > { %v7870_v57 = vpop.f32.mrf.mxu0  ;;  %v6746_v24 = vpop.f32.mrf.mxu1 }
 0x2be   : > { %11433 = vst [vmem:[#allocation39_spill] sm:$0xff] %v7870_v57  ;;  %v7286_v24 = vld [vmem:[%s11387_s1 + $0x18] sm:$0xff]  }
 0x2bf   : > { %v963_v46 = vpop.f32.mrf.mxu0  ;;  %v1035_v32 = vpop.f32.mrf.mxu1 }
 0x2c1   : > { %v964_v55 = vpop.f32.mrf.mxu0  ;;  %v6747_v50 = vpop.f32.mrf.mxu1 }
 0x2c3   : > { %v1135_v51 = vpop.f32.mrf.mxu0 }
 0x2c4   : > { %v1136_v47 = vadd.f32 %v7614_v20, %v1135_v51  ;;  %v11434_v51 = vmov 0  }
 0x2c5   : > { %v6752_v40 = vpop.f32.mrf.mxu0 }
 0x2c6   : > { %v1173_v61 = vmax.f32 %v1136_v47, 0.0 }
 0x2c7   : > { %v1138_v1 = vpop.f32.mrf.mxu0 }
 0x2c8   : > { %v1139_v53 = vadd.f32 %v7614_v20, %v1138_v1  ;;  %v11435_v1 = vmov 0.0  }
 0x2c9   : > { %v6753_v49 = vpop.f32.mrf.mxu0 }
 0x2ca   : > { %v1174_v36 = vmax.f32 %v1139_v53, 0.0 }
 0x2cb   : > { %v1143_v45 = vpop.f32.mrf.mxu0 }
 0x2cc   : > { %v1182_v19 = vpack.c.bf16 %v1174_v36, %v1173_v61  ;;  %v1144_v55 = vadd.f32 %v7614_v20, %v1143_v45 }
 0x2cd   : > { %v6756_v46 = vpop.f32.mrf.mxu0 }
 0x2ce   : > { %6153 = vmatmul.mubr.msk.bf16.vlgmr.msra.gmra.mxu1 %vm552_vm2, %v1182_v19  ;;  %6779 = vmatmul.mubr.msk.bf16.vlgmr.msra.gmra.mxu0 %vm552_vm2, %v1182_v19  ;;  %v1175_v45 = vmax.f32 %v1144_v55, 0.0 }
 0x2cf   : > { %v1146_v50 = vpop.f32.mrf.mxu0  ;;  %1244 = vmatprep.mubr.bf16.mxu1 %v11434_v51  ;;  %6782 = vmatprep.mubr.msk.bf16.mxu0 %vm7380_vm0, %v11435_v1 }
 0x2d0   : > { %v1147_v47 = vadd.f32 %v7614_v20, %v1146_v50  ;;  %6799 = vmatpush3.bf16.msra.mxu1 %v7286_v24  ;;  %1528 = vmatpush1.bf16.msra.mxu0 %v7514_v4 }
 0x2d1   : > { %v6757_v49 = vpop.f32.mrf.mxu0  ;;  %6820 = vmatprep.subr.bf16.mxu1 %v11435_v1  ;;  %1529 = vmatprep.subr.bf16.mxu0 %v7522_v6 }
 0x2d2   : > { %v1176_v53 = vmax.f32 %v1147_v47, 0.0 }
 0x2d3   : > { %v1151_v32 = vpop.f32.mrf.mxu0 }
 0x2d4   : > { %v1183_v19 = vpack.c.bf16 %v1176_v53, %v1175_v45  ;;  %1530 = vmatpush1.bf16.msra.mxu0 %v7561_v11  ;;  %v1152_v40 = vadd.f32 %v7614_v20, %v1151_v32 }
 0x2d5   : > { %v6760_v36 = vpop.f32.mrf.mxu0  ;;  %1531 = vmatprep.subr.bf16.mxu0 %v7573_v13 }
 0x2d6   : > { %6154 = vmatmul.mubr.msk.bf16.gmra.mxu1 %vm552_vm2, %v1183_v19  ;;  %6783 = vmatmul.mubr.msk.bf16.gmra.mxu0 %vm552_vm2, %v1183_v19  ;;  %v1177_v55 = vmax.f32 %v1152_v40, 0.0 }
 0x2d7   : > { %v1154_v61 = vpop.f32.mrf.mxu0  ;;  %1254 = vmatprep.mubr.bf16.mxu1 %v11434_v51  ;;  %6786 = vmatprep.mubr.msk.bf16.mxu0 %vm7380_vm0, %v11435_v1 }
 0x2d8   : > { %v1155_v24 = vadd.f32 %v7614_v20, %v1154_v61  ;;  %1532 = vmatpush1.bf16.msra.mxu0 %v7579_v14 }
 0x2d9   : > { %v6761_v46 = vpop.f32.mrf.mxu0  ;;  %1533 = vmatprep.subr.bf16.mxu0 %v7592_v16 }
 0x2da   : > { %v1178_v50 = vmax.f32 %v1155_v24, 0.0 }
 0x2db   : > { %v1159_v47 = vpop.f32.mrf.mxu0 }
 0x2dc   : > { %v1184_v49 = vpack.c.bf16 %v1178_v50, %v1177_v55  ;;  %1534 = vmatpush1.bf16.msra.mxu0 %v7598_v17  ;;  %v1160_v53 = vadd.f32 %v7614_v20, %v1159_v47 }
 0x2dd   : > { %v6764_v45 = vpop.f32.mrf.mxu0  ;;  %6848 = vmatprep.subr.bf16.mxu0 %v11435_v1 }
 0x2de   : > { %6155 = vmatmul.mubr.msk.bf16.gmra.mxu1 %vm552_vm2, %v1184_v49  ;;  %6787 = vmatmul.mubr.msk.bf16.gmra.mxu0 %vm552_vm2, %v1184_v49  ;;  %v1179_v40 = vmax.f32 %v1160_v53, 0.0 }
 0x2df   : > { %v1162_v32 = vpop.f32.mrf.mxu0  ;;  %1264 = vmatprep.mubr.bf16.mxu1 %v11434_v51  ;;  %6790 = vmatprep.mubr.msk.bf16.mxu0 %vm7380_vm0, %v11435_v1 }
 0x2e0   : > { %v1163_v19 = vadd.f32 %v7614_v20, %v1162_v32 }
 0x2e1   : > { %v6765_v36 = vpop.f32.mrf.mxu0 }
 0x2e2   : > { %v1180_v61 = vmax.f32 %v1163_v19, 0.0 }
 0x2e3   : > { %v1167_v24 = vpop.f32.mrf.mxu0 }
 0x2e4   : > { %v1185_v46 = vpack.c.bf16 %v1180_v61, %v1179_v40  ;;  %v1168_v55 = vadd.f32 %v7614_v20, %v1167_v24 }
 0x2e5   : > { %v6768_v50 = vpop.f32.mrf.mxu0 }
 0x2e6   : > { %v1181_v47 = vmax.f32 %v1168_v55, 0.0  ;;  %6156 = vmatmul.mubr.msk.bf16.gmra.mxu1 %vm552_vm2, %v1185_v46  ;;  %6791 = vmatmul.mubr.msk.bf16.gmra.mxu0 %vm552_vm2, %v1185_v46 }
 0x2e7   : > { %v1170_v49 = vpop.f32.mrf.mxu0  ;;  %1274 = vmatprep.mubr.bf16.mxu1 %v11434_v51  ;;  %6794 = vmatprep.mubr.msk.bf16.mxu0 %vm7380_vm0, %v11435_v1 }
 0x2e8   : > { %v1186_v32 = vpack.c.bf16 %v1181_v47, %v1181_v47 }
 0x2e9   : > { %v6769_v45 = vpop.f32.mrf.mxu0 }
 0x2ee   : > { %6157 = vmatmul.mubr.msk.bf16.gmra.mxu1 %vm552_vm2, %v1186_v32  ;;  %6795 = vmatmul.mubr.msk.bf16.gmra.mxu0 %vm552_vm2, %v1186_v32 }
 0x2ef   : > { %6800 = vmatprep.mubr.msk.bf16.mxu1 %vm7380_vm0, %v11435_v1  ;;  %1551 = vmatprep.mubr.bf16.mxu0 %v11434_v51 }
 0x2f6   : > { %6801 = vmatmul.mubr.msk.bf16.vlgmr.msra.gmra.mxu1 %vm370_vm1, %v7517_v5 }
 0x2f7   : > { %6804 = vmatprep.mubr.msk.bf16.mxu1 %vm7380_vm0, %v11435_v1  ;;  %6821 = vmatpush3.bf16.msra.mxu1 %v7504_v3 }
 0x2f8   : > { %6822 = vmatprep.subr.bf16.mxu1 %v11435_v1 }
 0x2fb   : > { %6823 = vmatpush3.bf16.msra.mxu1 %v7566_v12 }
 0x2fc   : > { %6824 = vmatprep.subr.bf16.mxu1 %v11435_v1 }
 0x2fe   : > { %6805 = vmatmul.mubr.msk.bf16.gmra.mxu1 %vm370_vm1, %v7533_v8 }
 0x2ff   : > { %6808 = vmatprep.mubr.msk.bf16.mxu1 %vm7380_vm0, %v11435_v1  ;;  %6825 = vmatpush3.bf16.msra.mxu1 %v7584_v15 }
 0x300   : > { %6826 = vmatprep.subr.bf16.mxu1 %v11435_v1 }
 0x303   : > { %6827 = vmatpush3.bf16.msra.mxu1 %v7603_v18 }
 0x304   : > { %1844 = vmatprep.subr.bf16.mxu1 %v7494_v2 }
 0x306   : > { %6809 = vmatmul.mubr.msk.bf16.gmra.mxu1 %vm370_vm1, %v7527_v7 }
 0x307   : > { %6812 = vmatprep.mubr.msk.bf16.mxu1 %vm7380_vm0, %v11435_v1 }
 0x30e   : > { %6813 = vmatmul.mubr.msk.bf16.gmra.mxu1 %vm370_vm1, %v7542_v9 }
 0x30f   : > { %6816 = vmatprep.mubr.msk.bf16.mxu1 %vm7380_vm0, %v11435_v1 }
 0x316   : > { %6817 = vmatmul.mubr.msk.bf16.gmra.mxu1 %vm370_vm1, %v7554_v10 }
 0x317   : > { %6828 = vmatprep.mubr.msk.bf16.mxu1 %vm7380_vm0, %v11435_v1 }
 0x38e   : > { %v7946_v3 = vpop.f32.mrf.mxu1  ;;  %v7948_v2 = vpop.f32.mrf.mxu0 }
 0x38f   : > { %11436 = vst [vmem:[#allocation40_spill] sm:$0xff] %v7948_v2 }
 0x390   : > { %v7950_v5 = vpop.f32.mrf.mxu1  ;;  %v6780_v7 = vpop.f32.mrf.mxu0 }
 0x392   : > { %v7952_v8 = vpop.f32.mrf.mxu1  ;;  %v7954_v53 = vpop.f32.mrf.mxu0 }
 0x393   : > { %11437 = vst [vmem:[#allocation41_spill] sm:$0xff] %v7954_v53 }
 0x394   : > { %v7956_v9 = vpop.f32.mrf.mxu1  ;;  %v6781_v19 = vpop.f32.mrf.mxu0 }
 0x396   : > { %v7958_v36 = vpop.f32.mrf.mxu1  ;;  %v7960_v10 = vpop.f32.mrf.mxu0 }
 0x397   : > { %11438 = vst [vmem:[#allocation42_spill] sm:$0xff] %v7960_v10 }
 0x398   : > { %v7962_v40 = vpop.f32.mrf.mxu1  ;;  %v6784_v61 = vpop.f32.mrf.mxu0 }
 0x39a   : > { %v7964_v24 = vpop.f32.mrf.mxu1  ;;  %v7966_v46 = vpop.f32.mrf.mxu0 }
 0x39b   : > { %11439 = vst [vmem:[#allocation43_spill] sm:$0xff] %v7964_v24  ;;  %11440 = vst [vmem:[#allocation44_spill] sm:$0xff] %v7966_v46 }
 0x39c   : > { %v7968_v55 = vpop.f32.mrf.mxu1  ;;  %v6785_v50 = vpop.f32.mrf.mxu0 }
 0x39d   : > { %11441 = vst [vmem:[#allocation45_spill] sm:$0xff] %v7968_v55 }
 0x39e   : > { %v7970_v47 = vpop.f32.mrf.mxu1  ;;  %v7972_v49 = vpop.f32.mrf.mxu0 }
 0x39f   : > { %11442 = vst [vmem:[#allocation46_spill] sm:$0xff] %v7970_v47  ;;  %11443 = vst [vmem:[#allocation47_spill] sm:$0xff] %v7972_v49 }
 0x3a0   : > { %v7974_v45 = vpop.f32.mrf.mxu1  ;;  %v6788_v32 = vpop.f32.mrf.mxu0 }
 0x3a1   : > { %11444 = vst [vmem:[#allocation48_spill] sm:$0xff] %v7974_v45 }
 0x3a2   : > { %v7976_v7 = vpop.f32.mrf.mxu1  ;;  %v7978_v19 = vpop.f32.mrf.mxu0 }
 0x3a3   : > { %11445 = vst [vmem:[#allocation49_spill] sm:$0xff] %v7976_v7  ;;  %11446 = vst [vmem:[#allocation50_spill] sm:$0xff] %v7978_v19 }
 0x3a4   : > { %v7980_v54 = vpop.f32.mrf.mxu1  ;;  %v6789_v61 = vpop.f32.mrf.mxu0 }
 0x3a5   : > { %11447 = vst [vmem:[#allocation51_spill] sm:$0xff] %v7980_v54 }
 0x3a6   : > { %v7982_v57 = vpop.f32.mrf.mxu1  ;;  %v7984_v46 = vpop.f32.mrf.mxu0 }
 0x3a7   : > { %11448 = vst [vmem:[#allocation52_spill] sm:$0xff] %v7982_v57  ;;  %11449 = vst [vmem:[#allocation53_spill] sm:$0xff] %v7984_v46 }
 0x3a8   : > { %v7986_v55 = vpop.f32.mrf.mxu1  ;;  %v6792_v50 = vpop.f32.mrf.mxu0 }
 0x3a9   : > { %11450 = vst [vmem:[#allocation54_spill] sm:$0xff] %v7986_v55 }
 0x3aa   : > { %v7988_v44 = vpop.f32.mrf.mxu1  ;;  %v7990_v49 = vpop.f32.mrf.mxu0 }
 0x3ab   : > { %11451 = vst [vmem:[#allocation55_spill] sm:$0xff] %v7988_v44  ;;  %11452 = vst [vmem:[#allocation56_spill] sm:$0xff] %v7990_v49 }
 0x3ac   : > { %v7992_v45 = vpop.f32.mrf.mxu1  ;;  %v6793_v32 = vpop.f32.mrf.mxu0 }
 0x3ad   : > { %11453 = vst [vmem:[#allocation57_spill] sm:$0xff] %v7992_v45 }
 0x3ae   : > { %v7994_v7 = vpop.f32.mrf.mxu1  ;;  %v7996_v19 = vpop.f32.mrf.mxu0 }
 0x3af   : > { %11454 = vst [vmem:[#allocation58_spill] sm:$0xff] %v7994_v7  ;;  %11455 = vst [vmem:[#allocation59_spill] sm:$0xff] %v7996_v19 }
 0x3b0   : > { %v7998_v54 = vpop.f32.mrf.mxu1  ;;  %v6796_v61 = vpop.f32.mrf.mxu0 }
 0x3b1   : > { %11456 = vst [vmem:[#allocation60_spill] sm:$0xff] %v7998_v54  ;;  %v7287_v61 = vld [vmem:[%s11387_s1 + $0x20] sm:$0xff]  }
 0x3b2   : > { %v1280_v57 = vpop.f32.mrf.mxu1  ;;  %v1352_v47 = vpop.f32.mrf.mxu0 }
 0x3b4   : > { %v1281_v46 = vpop.f32.mrf.mxu1  ;;  %v6797_v28 = vpop.f32.mrf.mxu0 }
 0x3b6   : > { %v1452_v55 = vpop.f32.mrf.mxu1 }
 0x3b7   : > { %v1453_v44 = vadd.f32 %v7614_v20, %v1452_v55 }
 0x3b8   : > { %v6802_v50 = vpop.f32.mrf.mxu1 }
 0x3b9   : > { %v1490_v32 = vmax.f32 %v1453_v44, 0.0 }
 0x3ba   : > { %v1455_v24 = vpop.f32.mrf.mxu1 }
 0x3bb   : > { %v1456_v49 = vadd.f32 %v7614_v20, %v1455_v24 }
 0x3bc   : > { %v6803_v45 = vpop.f32.mrf.mxu1 }
 0x3bd   : > { %v1491_v10 = vmax.f32 %v1456_v49, 0.0 }
 0x3be   : > { %v1460_v7 = vpop.f32.mrf.mxu1 }
 0x3bf   : > { %v1499_v30 = vpack.c.bf16 %v1491_v10, %v1490_v32  ;;  %v1461_v46 = vadd.f32 %v7614_v20, %v1460_v7 }
 0x3c0   : > { %v6806_v57 = vpop.f32.mrf.mxu1 }
 0x3c1   : > { %6171 = vmatmul.mubr.msk.bf16.vlgmr.msra.gmra.mxu0 %vm552_vm2, %v1499_v30  ;;  %6829 = vmatmul.mubr.msk.bf16.vlgmr.msra.gmra.mxu1 %vm552_vm2, %v1499_v30  ;;  %v1492_v24 = vmax.f32 %v1461_v46, 0.0 }
 0x3c2   : > { %v1463_v28 = vpop.f32.mrf.mxu1  ;;  %1561 = vmatprep.mubr.bf16.mxu0 %v11434_v51  ;;  %6832 = vmatprep.mubr.msk.bf16.mxu1 %vm7380_vm0, %v11435_v1 }
 0x3c3   : > { %v1464_v44 = vadd.f32 %v7614_v20, %v1463_v28  ;;  %6849 = vmatpush3.bf16.msra.mxu0 %v7287_v61  ;;  %1845 = vmatpush1.bf16.msra.mxu1 %v7514_v4 }
 0x3c4   : > { %v6807_v10 = vpop.f32.mrf.mxu1  ;;  %6870 = vmatprep.subr.bf16.mxu0 %v11435_v1  ;;  %1846 = vmatprep.subr.bf16.mxu1 %v7522_v6 }
 0x3c5   : > { %v1493_v55 = vmax.f32 %v1464_v44, 0.0 }
 0x3c6   : > { %v1468_v47 = vpop.f32.mrf.mxu1 }
 0x3c7   : > { %v1500_v30 = vpack.c.bf16 %v1493_v55, %v1492_v24  ;;  %1847 = vmatpush1.bf16.msra.mxu1 %v7561_v11  ;;  %v1469_v45 = vadd.f32 %v7614_v20, %v1468_v47 }
 0x3c8   : > { %v6810_v49 = vpop.f32.mrf.mxu1  ;;  %1848 = vmatprep.subr.bf16.mxu1 %v7573_v13 }
 0x3c9   : > { %6172 = vmatmul.mubr.msk.bf16.gmra.mxu0 %vm552_vm2, %v1500_v30  ;;  %6833 = vmatmul.mubr.msk.bf16.gmra.mxu1 %vm552_vm2, %v1500_v30  ;;  %v1494_v13 = vmax.f32 %v1469_v45, 0.0 }
 0x3ca   : > { %v1471_v4 = vpop.f32.mrf.mxu1  ;;  %1571 = vmatprep.mubr.bf16.mxu0 %v11434_v51  ;;  %6836 = vmatprep.mubr.msk.bf16.mxu1 %vm7380_vm0, %v11435_v1 }
 0x3cb   : > { %v1472_v6 = vadd.f32 %v7614_v20, %v1471_v4  ;;  %1849 = vmatpush1.bf16.msra.mxu1 %v7579_v14  ;;  %v8056_v4 = vld [vmem:[%s11389_s3 + $0x50] ss:$12 sps:$4 sm:$0xff]  }
 0x3cc   : > { %v6811_v11 = vpop.f32.mrf.mxu1  ;;  %1850 = vmatprep.subr.bf16.mxu1 %v7592_v16 }
 0x3cd   : > { %v1495_v7 = vmax.f32 %v1472_v6, 0.0  ;;  %v8063_v6 = vld [vmem:[%s7509_s28 + $0x8] sm:$0xff]   ;;  %v8079_v11 = vld [vmem:[%s7509_s28 + $0x10] sm:$0xff]  }
 0x3ce   : > { %v1476_v50 = vpop.f32.mrf.mxu1 }
 0x3cf   : > { %v1501_v32 = vpack.c.bf16 %v1495_v7, %v1494_v13  ;;  %1851 = vmatpush1.bf16.msra.mxu1 %v7598_v17  ;;  %v1477_v57 = vadd.f32 %v7614_v20, %v1476_v50 }
 0x3d0   : > { %v6814_v61 = vpop.f32.mrf.mxu1  ;;  %6898 = vmatprep.subr.bf16.mxu1 %v11435_v1 }
 0x3d1   : > { %6173 = vmatmul.mubr.msk.bf16.gmra.mxu0 %vm552_vm2, %v1501_v32  ;;  %6837 = vmatmul.mubr.msk.bf16.gmra.mxu1 %vm552_vm2, %v1501_v32  ;;  %v1496_v28 = vmax.f32 %v1477_v57, 0.0 }
 0x3d2   : > { %v1479_v46 = vpop.f32.mrf.mxu1  ;;  %1581 = vmatprep.mubr.bf16.mxu0 %v11434_v51  ;;  %6840 = vmatprep.mubr.msk.bf16.mxu1 %vm7380_vm0, %v11435_v1 }
 0x3d3   : > { %v1480_v14 = vadd.f32 %v7614_v20, %v1479_v46 }
 0x3d4   : > { %v6815_v16 = vpop.f32.mrf.mxu1 }
 0x3d5   : > { %v1497_v17 = vmax.f32 %v1480_v14, 0.0 }
 0x3d6   : > { %v1484_v44 = vpop.f32.mrf.mxu1 }
 0x3d7   : > { %v1502_v10 = vpack.c.bf16 %v1497_v17, %v1496_v28  ;;  %v1485_v24 = vadd.f32 %v7614_v20, %v1484_v44  ;;  %v8047_v20 = vld [vmem:[%s7509_s28] sm:$0xff]  }
 0x3d8   : > { %v6818_v55 = vpop.f32.mrf.mxu1 }
 0x3d9   : > { %v1498_v47 = vmax.f32 %v1485_v24, 0.0  ;;  %6174 = vmatmul.mubr.msk.bf16.gmra.mxu0 %vm552_vm2, %v1502_v10  ;;  %6841 = vmatmul.mubr.msk.bf16.gmra.mxu1 %vm552_vm2, %v1502_v10 }
 0x3da   : > { %v1487_v30 = vpop.f32.mrf.mxu1  ;;  %1591 = vmatprep.mubr.bf16.mxu0 %v11434_v51  ;;  %6844 = vmatprep.mubr.msk.bf16.mxu1 %vm7380_vm0, %v11435_v1 }
 0x3db   : > { %v1503_v45 = vpack.c.bf16 %v1498_v47, %v1498_v47 }
 0x3dc   : > { %v6819_v49 = vpop.f32.mrf.mxu1 }
 0x3e1   : > { %6175 = vmatmul.mubr.msk.bf16.gmra.mxu0 %vm552_vm2, %v1503_v45  ;;  %6845 = vmatmul.mubr.msk.bf16.gmra.mxu1 %vm552_vm2, %v1503_v45 }
 0x3e2   : > { %6850 = vmatprep.mubr.msk.bf16.mxu0 %vm7380_vm0, %v11435_v1  ;;  %1868 = vmatprep.mubr.bf16.mxu1 %v11434_v51 }
 0x3e9   : > { %6851 = vmatmul.mubr.msk.bf16.vlgmr.msra.gmra.mxu0 %vm370_vm1, %v8047_v20 }
 0x3ea   : > { %6854 = vmatprep.mubr.msk.bf16.mxu0 %vm7380_vm0, %v11435_v1  ;;  %6871 = vmatpush3.bf16.msra.mxu0 %v8056_v4 }
 0x3eb   : > { %6872 = vmatprep.subr.bf16.mxu0 %v11435_v1 }
 0x3ee   : > { %6873 = vmatpush3.bf16.msra.mxu0 %v7566_v12  ;;  %v8075_v12 = vld [vmem:[%s11389_s3 + $0x4c] ss:$12 sps:$4 sm:$0xff]  }
 0x3ef   : > { %6874 = vmatprep.subr.bf16.mxu0 %v11435_v1 }
 0x3f1   : > { %6855 = vmatmul.mubr.msk.bf16.gmra.mxu0 %vm370_vm1, %v8063_v6 }
 0x3f2   : > { %6858 = vmatprep.mubr.msk.bf16.mxu0 %vm7380_vm0, %v11435_v1  ;;  %6875 = vmatpush3.bf16.msra.mxu0 %v7584_v15  ;;  %v8086_v15 = vld [vmem:[%s7509_s28 + $0x18] sm:$0xff]  }
 0x3f3   : > { %6876 = vmatprep.subr.bf16.mxu0 %v11435_v1 }
 0x3f6   : > { %6877 = vmatpush3.bf16.msra.mxu0 %v7603_v18  ;;  %v8093_v18 = vld [vmem:[%s7509_s28 + $0x20] ss:$0 sps:$4 sm:$0xff]  }
 0x3f7   : > { %2161 = vmatprep.subr.bf16.mxu0 %v8075_v12 }
 0x3f9   : > { %6859 = vmatmul.mubr.msk.bf16.gmra.mxu0 %vm370_vm1, %v8079_v11 }
 0x3fa   : > { %6862 = vmatprep.mubr.msk.bf16.mxu0 %vm7380_vm0, %v11435_v1 }
 0x401   : > { %6863 = vmatmul.mubr.msk.bf16.gmra.mxu0 %vm370_vm1, %v8086_v15 }
 0x402   : > { %6866 = vmatprep.mubr.msk.bf16.mxu0 %vm7380_vm0, %v11435_v1 }
 0x409   : > { %6867 = vmatmul.mubr.msk.bf16.gmra.mxu0 %vm370_vm1, %v8093_v18 }
 0x40a   : > { %6878 = vmatprep.mubr.msk.bf16.mxu0 %vm7380_vm0, %v11435_v1 }
 0x481   : > { %v8099_v13 = vpop.f32.mrf.mxu0  ;;  %v8101_v7 = vpop.f32.mrf.mxu1 }
 0x482   : > { %11457 = vst [vmem:[#allocation61_spill] sm:$0xff] %v8099_v13  ;;  %11458 = vst [vmem:[#allocation62_spill] sm:$0xff] %v8101_v7 }
 0x483   : > { %v8103_v50 = vpop.f32.mrf.mxu0  ;;  %v6830_v32 = vpop.f32.mrf.mxu1 }
 0x484   : > { %11459 = vst [vmem:[#allocation63_spill] sm:$0xff] %v8103_v50 }
 0x485   : > { %v8105_v61 = vpop.f32.mrf.mxu0  ;;  %v8107_v57 = vpop.f32.mrf.mxu1 }
 0x486   : > { %11460 = vst [vmem:[#allocation64_spill] sm:$0xff] %v8105_v61  ;;  %11461 = vst [vmem:[#allocation65_spill] sm:$0xff] %v8107_v57 }
 0x487   : > { %v8109_v46 = vpop.f32.mrf.mxu0  ;;  %v6831_v14 = vpop.f32.mrf.mxu1 }
 0x488   : > { %11462 = vst [vmem:[#allocation66_spill] sm:$0xff] %v8109_v46 }
 0x489   : > { %v8111_v16 = vpop.f32.mrf.mxu0  ;;  %v8113_v28 = vpop.f32.mrf.mxu1 }
 0x48a   : > { %11463 = vst [vmem:[#allocation67_spill] sm:$0xff] %v8111_v16  ;;  %11464 = vst [vmem:[#allocation68_spill] sm:$0xff] %v8113_v28 }
 0x48b   : > { %v8115_v17 = vpop.f32.mrf.mxu0  ;;  %v6834_v44 = vpop.f32.mrf.mxu1 }
 0x48c   : > { %11465 = vst [vmem:[#allocation69_spill] sm:$0xff] %v8115_v17 }
 0x48d   : > { %v8117_v10 = vpop.f32.mrf.mxu0  ;;  %v8119_v24 = vpop.f32.mrf.mxu1 }
 0x48e   : > { %11466 = vst [vmem:[#allocation70_spill] sm:$0xff] %v8117_v10  ;;  %11467 = vst [vmem:[#allocation71_spill] sm:$0xff] %v8119_v24 }
 0x48f   : > { %v8121_v55 = vpop.f32.mrf.mxu0  ;;  %v6835_v47 = vpop.f32.mrf.mxu1 }
 0x490   : > { %11468 = vst [vmem:[#allocation72_spill] sm:$0xff] %v8121_v55 }
 0x491   : > { %v8123_v30 = vpop.f32.mrf.mxu0  ;;  %v8125_v49 = vpop.f32.mrf.mxu1 }
 0x492   : > { %11469 = vst [vmem:[#allocation73_spill] sm:$0xff] %v8123_v30  ;;  %11470 = vst [vmem:[#allocation74_spill] sm:$0xff] %v8125_v49 }
 0x493   : > { %v8127_v45 = vpop.f32.mrf.mxu0  ;;  %v6838_v32 = vpop.f32.mrf.mxu1 }
 0x494   : > { %11471 = vst [vmem:[#allocation75_spill] sm:$0xff] %v8127_v45 }
 0x495   : > { %v8129_v14 = vpop.f32.mrf.mxu0  ;;  %v8131_v19 = vpop.f32.mrf.mxu1 }
 0x496   : > { %11472 = vst [vmem:[#allocation76_spill] sm:$0xff] %v8129_v14  ;;  %11473 = vst [vmem:[#allocation77_spill] sm:$0xff] %v8131_v19 }
 0x497   : > { %v8133_v54 = vpop.f32.mrf.mxu0  ;;  %v6839_v44 = vpop.f32.mrf.mxu1 }
 0x498   : > { %11474 = vst [vmem:[#allocation78_spill] sm:$0xff] %v8133_v54 }
 0x499   : > { %v8135_v28 = vpop.f32.mrf.mxu0  ;;  %v8137_v57 = vpop.f32.mrf.mxu1 }
 0x49a   : > { %11475 = vst [vmem:[#allocation79_spill] sm:$0xff] %v8135_v28  ;;  %11476 = vst [vmem:[#allocation80_spill] sm:$0xff] %v8137_v57 }
 0x49b   : > { %v8139_v7 = vpop.f32.mrf.mxu0  ;;  %v6842_v47 = vpop.f32.mrf.mxu1 }
 0x49c   : > { %11477 = vst [vmem:[#allocation81_spill] sm:$0xff] %v8139_v7 }
 0x49d   : > { %v8141_v24 = vpop.f32.mrf.mxu0  ;;  %v8143_v49 = vpop.f32.mrf.mxu1 }
 0x49e   : > { %11478 = vst [vmem:[#allocation82_spill] sm:$0xff] %v8141_v24  ;;  %11479 = vst [vmem:[#allocation83_spill] sm:$0xff] %v8143_v49  ;;  %v8156_v49 = vld [vmem:[%s11388_s2] ss:$0 sm:$0xff] }
 0x49f   : > { %v8145_v17 = vpop.f32.mrf.mxu0  ;;  %v6843_v32 = vpop.f32.mrf.mxu1 }
 0x4a0   : > { %11480 = vst [vmem:[#allocation84_spill] sm:$0xff] %v8145_v17 }
 0x4a1   : > { %v8147_v46 = vpop.f32.mrf.mxu0  ;;  %v8149_v19 = vpop.f32.mrf.mxu1 }
 0x4a2   : > { %11481 = vst [vmem:[#allocation85_spill] sm:$0xff] %v8147_v46  ;;  %11482 = vst [vmem:[#allocation86_spill] sm:$0xff] %v8149_v19 }
 0x4a3   : > { %v8151_v54 = vpop.f32.mrf.mxu0  ;;  %v6846_v44 = vpop.f32.mrf.mxu1 }
 0x4a4   : > { %11483 = vst [vmem:[#allocation87_spill] sm:$0xff] %v8151_v54 }
 0x4a5   : > { %v1597_v28 = vpop.f32.mrf.mxu0  ;;  %v1669_v45 = vpop.f32.mrf.mxu1 }
 0x4a7   : > { %v1598_v57 = vpop.f32.mrf.mxu0  ;;  %v6847_v50 = vpop.f32.mrf.mxu1 }
 0x4a8   : > { %v7288_v50 = vld [vmem:[%s11387_s1 + $0x28] sm:$0xff]  }
 0x4a9   : > { %v1769_v7 = vpop.f32.mrf.mxu0 }
 0x4aa   : > { %v1770_v32 = vadd.f32 %v8156_v49, %v1769_v7 }
 0x4ab   : > { %v6852_v47 = vpop.f32.mrf.mxu0 }
 0x4ac   : > { %v1807_v24 = vmax.f32 %v1770_v32, 0.0 }
 0x4ad   : > { %v1772_v17 = vpop.f32.mrf.mxu0 }
 0x4ae   : > { %v1773_v46 = vadd.f32 %v8156_v49, %v1772_v17  ;;  %v8180_v17 = vld [vmem:[%s11389_s3 + $0x34] ss:$12 sps:$4 sm:$0xff]  }
 0x4af   : > { %v6853_v19 = vpop.f32.mrf.mxu0 }
 0x4b0   : > { %v1808_v54 = vmax.f32 %v1773_v46, 0.0 }
 0x4b1   : > { %v1777_v44 = vpop.f32.mrf.mxu0 }
 0x4b2   : > { %v1816_v28 = vpack.c.bf16 %v1808_v54, %v1807_v24  ;;  %v1778_v45 = vadd.f32 %v8156_v49, %v1777_v44  ;;  %v8173_v54 = vld [vmem:[%s11389_s3 + $0x48] ss:$12 sps:$4 sm:$0xff]  }
 0x4b3   : > { %v6856_v57 = vpop.f32.mrf.mxu0 }
 0x4b4   : > { %6189 = vmatmul.mubr.msk.bf16.vlgmr.msra.gmra.mxu1 %vm552_vm2, %v1816_v28  ;;  %6879 = vmatmul.mubr.msk.bf16.vlgmr.msra.gmra.mxu0 %vm552_vm2, %v1816_v28  ;;  %v1809_v24 = vmax.f32 %v1778_v45, 0.0  ;;  %v8186_v28 = vld [vmem:[%s11389_s3 + $0x30] ss:$12 sps:$4 sm:$0xff]  }
 0x4b5   : > { %v1780_v7 = vpop.f32.mrf.mxu0  ;;  %1878 = vmatprep.mubr.bf16.mxu1 %v11434_v51  ;;  %6882 = vmatprep.mubr.msk.bf16.mxu0 %vm7380_vm0, %v11435_v1  ;;  %v8192_v57 = vld [vmem:[%s11389_s3 + $0x1c] ss:$12 sps:$4 sm:$0xff]  }
 0x4b6   : > { %v1781_v19 = vadd.f32 %v8156_v49, %v1780_v7  ;;  %6899 = vmatpush3.bf16.msra.mxu1 %v7288_v50  ;;  %2162 = vmatpush1.bf16.msra.mxu0 %v8173_v54 }
 0x4b7   : > { %v6857_v46 = vpop.f32.mrf.mxu0  ;;  %6920 = vmatprep.subr.bf16.mxu1 %v11435_v1  ;;  %2163 = vmatprep.subr.bf16.mxu0 %v8180_v17 }
 0x4b8   : > { %v1810_v47 = vmax.f32 %v1781_v19, 0.0  ;;  %v8205_v46 = vld [vmem:[%s11389_s3 + $0x18] ss:$12 sps:$4 sm:$0xff]  }
 0x4b9   : > { %v1785_v32 = vpop.f32.mrf.mxu0 }
 0x4ba   : > { %v1817_v44 = vpack.c.bf16 %v1810_v47, %v1809_v24  ;;  %2164 = vmatpush1.bf16.msra.mxu0 %v8186_v28  ;;  %v1786_v45 = vadd.f32 %v8156_v49, %v1785_v32  ;;  %v8211_v47 = vld [vmem:[%s11389_s3 + $0x4] ss:$12 sps:$4 sm:$0xff]  }
 0x4bb   : > { %v6860_v50 = vpop.f32.mrf.mxu0  ;;  %2165 = vmatprep.subr.bf16.mxu0 %v8192_v57 }
 0x4bc   : > { %6190 = vmatmul.mubr.msk.bf16.gmra.mxu1 %vm552_vm2, %v1817_v44  ;;  %6883 = vmatmul.mubr.msk.bf16.gmra.mxu0 %vm552_vm2, %v1817_v44  ;;  %v1811_v32 = vmax.f32 %v1786_v45, 0.0 }
 0x4bd   : > { %v1788_v7 = vpop.f32.mrf.mxu0  ;;  %1888 = vmatprep.mubr.bf16.mxu1 %v11434_v51  ;;  %6886 = vmatprep.mubr.msk.bf16.mxu0 %vm7380_vm0, %v11435_v1 }
 0x4be   : > { %v1789_v19 = vadd.f32 %v8156_v49, %v1788_v7  ;;  %2166 = vmatpush1.bf16.msra.mxu0 %v8205_v46  ;;  %v8217_v7 = vld [vmem:[%s11389_s3] ss:$12 sps:$4 sm:$0xff]  }
 0x4bf   : > { %v6861_v24 = vpop.f32.mrf.mxu0  ;;  %2167 = vmatprep.subr.bf16.mxu0 %v8211_v47 }
 0x4c0   : > { %v1812_v44 = vmax.f32 %v1789_v19, 0.0 }
 0x4c1   : > { %v1793_v50 = vpop.f32.mrf.mxu0 }
 0x4c2   : > { %v1818_v55 = vpack.c.bf16 %v1812_v44, %v1811_v32  ;;  %2168 = vmatpush1.bf16.msra.mxu0 %v8217_v7  ;;  %v1794_v24 = vadd.f32 %v8156_v49, %v1793_v50 }
 0x4c3   : > { %v6864_v16 = vpop.f32.mrf.mxu0  ;;  %6948 = vmatprep.subr.bf16.mxu0 %v11435_v1 }
 0x4c4   : > { %6191 = vmatmul.mubr.msk.bf16.gmra.mxu1 %vm552_vm2, %v1818_v55  ;;  %6887 = vmatmul.mubr.msk.bf16.gmra.mxu0 %vm552_vm2, %v1818_v55  ;;  %v1813_v44 = vmax.f32 %v1794_v24, 0.0 }
 0x4c5   : > { %v1796_v45 = vpop.f32.mrf.mxu0  ;;  %1898 = vmatprep.mubr.bf16.mxu1 %v11434_v51  ;;  %6890 = vmatprep.mubr.msk.bf16.mxu0 %vm7380_vm0, %v11435_v1 }
 0x4c6   : > { %v1797_v19 = vadd.f32 %v8156_v49, %v1796_v45 }
 0x4c7   : > { %v6865_v32 = vpop.f32.mrf.mxu0 }
 0x4c8   : > { %v1814_v14 = vmax.f32 %v1797_v19, 0.0 }
 0x4c9   : > { %v1801_v16 = vpop.f32.mrf.mxu0 }
 0x4ca   : > { %v1819_v61 = vpack.c.bf16 %v1814_v14, %v1813_v44  ;;  %v1802_v30 = vadd.f32 %v8156_v49, %v1801_v16 }
 0x4cb   : > { %v6868_v50 = vpop.f32.mrf.mxu0 }
 0x4cc   : > { %v1815_v13 = vmax.f32 %v1802_v30, 0.0  ;;  %6192 = vmatmul.mubr.msk.bf16.gmra.mxu1 %vm552_vm2, %v1819_v61  ;;  %6891 = vmatmul.mubr.msk.bf16.gmra.mxu0 %vm552_vm2, %v1819_v61  ;;  %v8259_v61 = vld [vmem:[%s11389_s3 + $0x20] ss:$12 sps:$4 sm:$0xff]   ;;  %v8266_v30 = vld [vmem:[%s11389_s3 + $0x8] ss:$12 sps:$4 sm:$0xff]  }
 0x4cd   : > { %v1804_v55 = vpop.f32.mrf.mxu0  ;;  %1908 = vmatprep.mubr.bf16.mxu1 %v11434_v51  ;;  %6894 = vmatprep.mubr.msk.bf16.mxu0 %vm7380_vm0, %v11435_v1 }
 0x4ce   : > { %v1820_v32 = vpack.c.bf16 %v1815_v13, %v1815_v13  ;;  %v8248_v13 = vld [vmem:[%s11389_s3 + $0x38] ss:$12 sps:$4 sm:$0xff]  }
 0x4cf   : > { %v6869_v45 = vpop.f32.mrf.mxu0 }
 0x4d4   : > { %6193 = vmatmul.mubr.msk.bf16.gmra.mxu1 %vm552_vm2, %v1820_v32  ;;  %6895 = vmatmul.mubr.msk.bf16.gmra.mxu0 %vm552_vm2, %v1820_v32 }
 0x4d5   : > { %6900 = vmatprep.mubr.msk.bf16.mxu1 %vm7380_vm0, %v11435_v1  ;;  %2185 = vmatprep.mubr.bf16.mxu0 %v11434_v51 }
 0x4dc   : > { %6901 = vmatmul.mubr.msk.bf16.vlgmr.msra.gmra.mxu1 %vm370_vm1, %v8047_v20 }
 0x4dd   : > { %6904 = vmatprep.mubr.msk.bf16.mxu1 %vm7380_vm0, %v11435_v1  ;;  %6921 = vmatpush3.bf16.msra.mxu1 %v8056_v4 }
 0x4de   : > { %6922 = vmatprep.subr.bf16.mxu1 %v11435_v1 }
 0x4e1   : > { %6923 = vmatpush3.bf16.msra.mxu1 %v8248_v13 }
 0x4e2   : > { %6924 = vmatprep.subr.bf16.mxu1 %v11435_v1 }
 0x4e4   : > { %6905 = vmatmul.mubr.msk.bf16.gmra.mxu1 %vm370_vm1, %v8063_v6 }
 0x4e5   : > { %6908 = vmatprep.mubr.msk.bf16.mxu1 %vm7380_vm0, %v11435_v1  ;;  %6925 = vmatpush3.bf16.msra.mxu1 %v8259_v61 }
 0x4e6   : > { %6926 = vmatprep.subr.bf16.mxu1 %v11435_v1 }
 0x4e9   : > { %6927 = vmatpush3.bf16.msra.mxu1 %v8266_v30 }
 0x4ea   : > { %2478 = vmatprep.subr.bf16.mxu1 %v8075_v12 }
 0x4ec   : > { %6909 = vmatmul.mubr.msk.bf16.gmra.mxu1 %vm370_vm1, %v8079_v11 }
 0x4ed   : > { %6912 = vmatprep.mubr.msk.bf16.mxu1 %vm7380_vm0, %v11435_v1 }
 0x4f4   : > { %6913 = vmatmul.mubr.msk.bf16.gmra.mxu1 %vm370_vm1, %v8086_v15 }
 0x4f5   : > { %6916 = vmatprep.mubr.msk.bf16.mxu1 %vm7380_vm0, %v11435_v1 }
 0x4fc   : > { %6917 = vmatmul.mubr.msk.bf16.gmra.mxu1 %vm370_vm1, %v8093_v18 }
 0x4fd   : > { %6928 = vmatprep.mubr.msk.bf16.mxu1 %vm7380_vm0, %v11435_v1 }
 0x574   : > { %v8282_v14 = vpop.f32.mrf.mxu1  ;;  %v8284_v24 = vpop.f32.mrf.mxu0 }
 0x575   : > { %11484 = vst [vmem:[#allocation88_spill] sm:$0xff] %v8282_v14  ;;  %11485 = vst [vmem:[#allocation89_spill] sm:$0xff] %v8284_v24 }
 0x576   : > { %v8286_v19 = vpop.f32.mrf.mxu1  ;;  %v6880_v44 = vpop.f32.mrf.mxu0 }
 0x577   : > { %11486 = vst [vmem:[#allocation90_spill] sm:$0xff] %v8286_v19 }
 0x578   : > { %v8288_v16 = vpop.f32.mrf.mxu1  ;;  %v8290_v50 = vpop.f32.mrf.mxu0 }
 0x579   : > { %11487 = vst [vmem:[#allocation91_spill] sm:$0xff] %v8288_v16  ;;  %11488 = vst [vmem:[#allocation92_spill] sm:$0xff] %v8290_v50 }
 0x57a   : > { %v8292_v55 = vpop.f32.mrf.mxu1  ;;  %v6881_v45 = vpop.f32.mrf.mxu0 }
 0x57b   : > { %11489 = vst [vmem:[#allocation93_spill] sm:$0xff] %v8292_v55 }
 0x57c   : > { %v8294_v32 = vpop.f32.mrf.mxu1  ;;  %v8296_v10 = vpop.f32.mrf.mxu0 }
 0x57d   : > { %11490 = vst [vmem:[#allocation94_spill] sm:$0xff] %v8294_v32  ;;  %11491 = vst [vmem:[#allocation95_spill] sm:$0xff] %v8296_v10 }
 0x57e   : > { %v8298_v63 = vpop.f32.mrf.mxu1  ;;  %v6884_v42 = vpop.f32.mrf.mxu0 }
 0x57f   : > { %11492 = vst [vmem:[#allocation96_spill] sm:$0xff] %v8298_v63 }
 0x580   : > { %v8300_v14 = vpop.f32.mrf.mxu1  ;;  %v8302_v24 = vpop.f32.mrf.mxu0 }
 0x581   : > { %11493 = vst [vmem:[#allocation97_spill] sm:$0xff] %v8300_v14  ;;  %11494 = vst [vmem:[#allocation98_spill] sm:$0xff] %v8302_v24 }
 0x582   : > { %v8304_v19 = vpop.f32.mrf.mxu1  ;;  %v6885_v44 = vpop.f32.mrf.mxu0 }
 0x583   : > { %11495 = vst [vmem:[#allocation99_spill] sm:$0xff] %v8304_v19 }
 0x584   : > { %v8306_v16 = vpop.f32.mrf.mxu1  ;;  %v8308_v50 = vpop.f32.mrf.mxu0 }
 0x585   : > { %11496 = vst [vmem:[#allocation100_spill] sm:$0xff] %v8306_v16  ;;  %11497 = vst [vmem:[#allocation101_spill] sm:$0xff] %v8308_v50 }
 0x586   : > { %v8310_v55 = vpop.f32.mrf.mxu1  ;;  %v6888_v45 = vpop.f32.mrf.mxu0 }
 0x587   : > { %11498 = vst [vmem:[#allocation102_spill] sm:$0xff] %v8310_v55 }
 0x588   : > { %v8312_v32 = vpop.f32.mrf.mxu1  ;;  %v8314_v10 = vpop.f32.mrf.mxu0 }
 0x589   : > { %11499 = vst [vmem:[#allocation103_spill] sm:$0xff] %v8312_v32  ;;  %11500 = vst [vmem:[#allocation104_spill] sm:$0xff] %v8314_v10 }
 0x58a   : > { %v8316_v63 = vpop.f32.mrf.mxu1  ;;  %v6889_v42 = vpop.f32.mrf.mxu0 }
 0x58b   : > { %11501 = vst [vmem:[#allocation105_spill] sm:$0xff] %v8316_v63 }
 0x58c   : > { %v8318_v14 = vpop.f32.mrf.mxu1  ;;  %v8320_v24 = vpop.f32.mrf.mxu0 }
 0x58d   : > { %11502 = vst [vmem:[#allocation106_spill] sm:$0xff] %v8318_v14  ;;  %11503 = vst [vmem:[#allocation107_spill] sm:$0xff] %v8320_v24 }
 0x58e   : > { %v8322_v19 = vpop.f32.mrf.mxu1  ;;  %v6892_v44 = vpop.f32.mrf.mxu0 }
 0x58f   : > { %11504 = vst [vmem:[#allocation108_spill] sm:$0xff] %v8322_v19 }
 0x590   : > { %v8324_v16 = vpop.f32.mrf.mxu1  ;;  %v8326_v50 = vpop.f32.mrf.mxu0 }
 0x591   : > { %11505 = vst [vmem:[#allocation109_spill] sm:$0xff] %v8324_v16  ;;  %11506 = vst [vmem:[#allocation110_spill] sm:$0xff] %v8326_v50 }
 0x592   : > { %v8328_v55 = vpop.f32.mrf.mxu1  ;;  %v6893_v45 = vpop.f32.mrf.mxu0 }
 0x593   : > { %11507 = vst [vmem:[#allocation111_spill] sm:$0xff] %v8328_v55 }
 0x594   : > { %v8330_v32 = vpop.f32.mrf.mxu1  ;;  %v8332_v10 = vpop.f32.mrf.mxu0 }
 0x595   : > { %11508 = vst [vmem:[#allocation112_spill] sm:$0xff] %v8330_v32  ;;  %11509 = vst [vmem:[#allocation113_spill] sm:$0xff] %v8332_v10 }
 0x596   : > { %v8334_v63 = vpop.f32.mrf.mxu1  ;;  %v6896_v42 = vpop.f32.mrf.mxu0 }
 0x597   : > { %11510 = vst [vmem:[#allocation114_spill] sm:$0xff] %v8334_v63  ;;  %v7289_v42 = vld [vmem:[%s11387_s1 + $0x30] sm:$0xff]  }
 0x598   : > { %v1914_v14 = vpop.f32.mrf.mxu1  ;;  %v1986_v53 = vpop.f32.mrf.mxu0 }
 0x59a   : > { %v1915_v24 = vpop.f32.mrf.mxu1  ;;  %v6897_v26 = vpop.f32.mrf.mxu0 }
 0x59c   : > { %v2086_v19 = vpop.f32.mrf.mxu1 }
 0x59d   : > { %v2087_v16 = vadd.f32 %v8156_v49, %v2086_v19 }
 0x59e   : > { %v6902_v44 = vpop.f32.mrf.mxu1 }
 0x59f   : > { %v2124_v45 = vmax.f32 %v2087_v16, 0.0 }
 0x5a0   : > { %v2089_v59 = vpop.f32.mrf.mxu1 }
 0x5a1   : > { %v2090_v50 = vadd.f32 %v8156_v49, %v2089_v59 }
 0x5a2   : > { %v6903_v55 = vpop.f32.mrf.mxu1 }
 0x5a3   : > { %v2125_v38 = vmax.f32 %v2090_v50, 0.0 }
 0x5a4   : > { %v2094_v32 = vpop.f32.mrf.mxu1 }
 0x5a5   : > { %v2133_v2 = vpack.c.bf16 %v2125_v38, %v2124_v45  ;;  %v2095_v53 = vadd.f32 %v8156_v49, %v2094_v32 }
 0x5a6   : > { %v6906_v14 = vpop.f32.mrf.mxu1 }
 0x5a7   : > { %6207 = vmatmul.mubr.msk.bf16.vlgmr.msra.gmra.mxu0 %vm552_vm2, %v2133_v2  ;;  %6929 = vmatmul.mubr.msk.bf16.vlgmr.msra.gmra.mxu1 %vm552_vm2, %v2133_v2  ;;  %v2126_v24 = vmax.f32 %v2095_v53, 0.0 }
 0x5a8   : > { %v2097_v26 = vpop.f32.mrf.mxu1  ;;  %2195 = vmatprep.mubr.bf16.mxu0 %v11434_v51  ;;  %6932 = vmatprep.mubr.msk.bf16.mxu1 %vm7380_vm0, %v11435_v1 }
 0x5a9   : > { %v2098_v59 = vadd.f32 %v8156_v49, %v2097_v26  ;;  %6949 = vmatpush3.bf16.msra.mxu0 %v7289_v42  ;;  %2479 = vmatpush1.bf16.msra.mxu1 %v8173_v54 }
 0x5aa   : > { %v6907_v38 = vpop.f32.mrf.mxu1  ;;  %6970 = vmatprep.subr.bf16.mxu0 %v11435_v1  ;;  %2480 = vmatprep.subr.bf16.mxu1 %v8180_v17 }
 0x5ab   : > { %v2127_v19 = vmax.f32 %v2098_v59, 0.0 }
 0x5ac   : > { %v2102_v16 = vpop.f32.mrf.mxu1 }
 0x5ad   : > { %v2134_v2 = vpack.c.bf16 %v2127_v19, %v2126_v24  ;;  %2481 = vmatpush1.bf16.msra.mxu1 %v8186_v28  ;;  %v2103_v55 = vadd.f32 %v8156_v49, %v2102_v16 }
 0x5ae   : > { %v6910_v50 = vpop.f32.mrf.mxu1  ;;  %2482 = vmatprep.subr.bf16.mxu1 %v8192_v57 }
 0x5af   : > { %6208 = vmatmul.mubr.msk.bf16.gmra.mxu0 %vm552_vm2, %v2134_v2  ;;  %6933 = vmatmul.mubr.msk.bf16.gmra.mxu1 %vm552_vm2, %v2134_v2  ;;  %v2128_v42 = vmax.f32 %v2103_v55, 0.0 }
 0x5b0   : > { %v2105_v32 = vpop.f32.mrf.mxu1  ;;  %2205 = vmatprep.mubr.bf16.mxu0 %v11434_v51  ;;  %6936 = vmatprep.mubr.msk.bf16.mxu1 %vm7380_vm0, %v11435_v1 }
 0x5b1   : > { %v2106_v44 = vadd.f32 %v8156_v49, %v2105_v32  ;;  %2483 = vmatpush1.bf16.msra.mxu1 %v8205_v46 }
 0x5b2   : > { %v6911_v45 = vpop.f32.mrf.mxu1  ;;  %2484 = vmatprep.subr.bf16.mxu1 %v8211_v47 }
 0x5b3   : > { %v2129_v14 = vmax.f32 %v2106_v44, 0.0 }
 0x5b4   : > { %v2110_v53 = vpop.f32.mrf.mxu1 }
 0x5b5   : > { %v2135_v26 = vpack.c.bf16 %v2129_v14, %v2128_v42  ;;  %2485 = vmatpush1.bf16.msra.mxu1 %v8217_v7  ;;  %v2111_v38 = vadd.f32 %v8156_v49, %v2110_v53 }
 0x5b6   : > { %v6914_v59 = vpop.f32.mrf.mxu1  ;;  %6998 = vmatprep.subr.bf16.mxu1 %v11435_v1 }
 0x5b7   : > { %6209 = vmatmul.mubr.msk.bf16.gmra.mxu0 %vm552_vm2, %v2135_v26  ;;  %6937 = vmatmul.mubr.msk.bf16.gmra.mxu1 %vm552_vm2, %v2135_v26  ;;  %v2130_v2 = vmax.f32 %v2111_v38, 0.0 }
 0x5b8   : > { %v2113_v24 = vpop.f32.mrf.mxu1  ;;  %2215 = vmatprep.mubr.bf16.mxu0 %v11434_v51  ;;  %6940 = vmatprep.mubr.msk.bf16.mxu1 %vm7380_vm0, %v11435_v1 }
 0x5b9   : > { %v2114_v19 = vadd.f32 %v8156_v49, %v2113_v24 }
 0x5ba   : > { %v6915_v16 = vpop.f32.mrf.mxu1 }
 0x5bb   : > { %v2131_v50 = vmax.f32 %v2114_v19, 0.0 }
 0x5bc   : > { %v2118_v55 = vpop.f32.mrf.mxu1 }
 0x5bd   : > { %v2136_v32 = vpack.c.bf16 %v2131_v50, %v2130_v2  ;;  %v2119_v44 = vadd.f32 %v8156_v49, %v2118_v55 }
 0x5be   : > { %v6918_v45 = vpop.f32.mrf.mxu1 }
 0x5bf   : > { %v2132_v42 = vmax.f32 %v2119_v44, 0.0  ;;  %6210 = vmatmul.mubr.msk.bf16.gmra.mxu0 %vm552_vm2, %v2136_v32  ;;  %6941 = vmatmul.mubr.msk.bf16.gmra.mxu1 %vm552_vm2, %v2136_v32 }
 0x5c0   : > { %v2121_v14 = vpop.f32.mrf.mxu1  ;;  %2225 = vmatprep.mubr.bf16.mxu0 %v11434_v51  ;;  %6944 = vmatprep.mubr.msk.bf16.mxu1 %vm7380_vm0, %v11435_v1 }
 0x5c1   : > { %v2137_v26 = vpack.c.bf16 %v2132_v42, %v2132_v42 }
 0x5c2   : > { %v6919_v53 = vpop.f32.mrf.mxu1 }
 0x5c7   : > { %6211 = vmatmul.mubr.msk.bf16.gmra.mxu0 %vm552_vm2, %v2137_v26  ;;  %6945 = vmatmul.mubr.msk.bf16.gmra.mxu1 %vm552_vm2, %v2137_v26 }
 0x5c8   : > { %6950 = vmatprep.mubr.msk.bf16.mxu0 %vm7380_vm0, %v11435_v1  ;;  %2502 = vmatprep.mubr.bf16.mxu1 %v11434_v51 }
 0x5cf   : > { %6951 = vmatmul.mubr.msk.bf16.vlgmr.msra.gmra.mxu0 %vm370_vm1, %v8047_v20 }
 0x5d0   : > { %6954 = vmatprep.mubr.msk.bf16.mxu0 %vm7380_vm0, %v11435_v1  ;;  %6971 = vmatpush3.bf16.msra.mxu0 %v8056_v4 }
 0x5d1   : > { %6972 = vmatprep.subr.bf16.mxu0 %v11435_v1 }
 0x5d4   : > { %6973 = vmatpush3.bf16.msra.mxu0 %v8248_v13 }
 0x5d5   : > { %6974 = vmatprep.subr.bf16.mxu0 %v11435_v1 }
 0x5d7   : > { %6955 = vmatmul.mubr.msk.bf16.gmra.mxu0 %vm370_vm1, %v8063_v6 }
 0x5d8   : > { %6958 = vmatprep.mubr.msk.bf16.mxu0 %vm7380_vm0, %v11435_v1  ;;  %6975 = vmatpush3.bf16.msra.mxu0 %v8259_v61 }
 0x5d9   : > { %6976 = vmatprep.subr.bf16.mxu0 %v11435_v1 }
 0x5dc   : > { %6977 = vmatpush3.bf16.msra.mxu0 %v8266_v30 }
 0x5dd   : > { %2795 = vmatprep.subr.bf16.mxu0 %v8075_v12 }
 0x5df   : > { %6959 = vmatmul.mubr.msk.bf16.gmra.mxu0 %vm370_vm1, %v8079_v11 }
 0x5e0   : > { %6962 = vmatprep.mubr.msk.bf16.mxu0 %vm7380_vm0, %v11435_v1 }
 0x5e7   : > { %6963 = vmatmul.mubr.msk.bf16.gmra.mxu0 %vm370_vm1, %v8086_v15 }
 0x5e8   : > { %6966 = vmatprep.mubr.msk.bf16.mxu0 %vm7380_vm0, %v11435_v1 }
 0x5ef   : > { %6967 = vmatmul.mubr.msk.bf16.gmra.mxu0 %vm370_vm1, %v8093_v18 }
 0x5f0   : > { %6978 = vmatprep.mubr.msk.bf16.mxu0 %vm7380_vm0, %v11435_v1 }
 0x667   : > { %v8410_v59 = vpop.f32.mrf.mxu0  ;;  %v8412_v38 = vpop.f32.mrf.mxu1 }
 0x668   : > { %11511 = vst [vmem:[#allocation115_spill] sm:$0xff] %v8410_v59  ;;  %11512 = vst [vmem:[#allocation116_spill] sm:$0xff] %v8412_v38 }
 0x669   : > { %v8414_v24 = vpop.f32.mrf.mxu0  ;;  %v6930_v19 = vpop.f32.mrf.mxu1 }
 0x66a   : > { %11513 = vst [vmem:[#allocation117_spill] sm:$0xff] %v8414_v24 }
 0x66b   : > { %v8416_v16 = vpop.f32.mrf.mxu0  ;;  %v8418_v2 = vpop.f32.mrf.mxu1 }
 0x66c   : > { %11514 = vst [vmem:[#allocation118_spill] sm:$0xff] %v8416_v16  ;;  %11515 = vst [vmem:[#allocation119_spill] sm:$0xff] %v8418_v2 }
 0x66d   : > { %v8420_v50 = vpop.f32.mrf.mxu0  ;;  %v6931_v55 = vpop.f32.mrf.mxu1 }
 0x66e   : > { %11516 = vst [vmem:[#allocation120_spill] sm:$0xff] %v8420_v50 }
 0x66f   : > { %v8422_v32 = vpop.f32.mrf.mxu0  ;;  %v8424_v44 = vpop.f32.mrf.mxu1 }
 0x670   : > { %11517 = vst [vmem:[#allocation121_spill] sm:$0xff] %v8422_v32  ;;  %11518 = vst [vmem:[#allocation122_spill] sm:$0xff] %v8424_v44 }
 0x671   : > { %v8426_v45 = vpop.f32.mrf.mxu0  ;;  %v6934_v42 = vpop.f32.mrf.mxu1 }
 0x672   : > { %11519 = vst [vmem:[#allocation123_spill] sm:$0xff] %v8426_v45 }
 0x673   : > { %v8428_v14 = vpop.f32.mrf.mxu0  ;;  %v8430_v53 = vpop.f32.mrf.mxu1 }
 0x674   : > { %11520 = vst [vmem:[#allocation124_spill] sm:$0xff] %v8428_v14  ;;  %11521 = vst [vmem:[#allocation125_spill] sm:$0xff] %v8430_v53 }
 0x675   : > { %v8432_v26 = vpop.f32.mrf.mxu0  ;;  %v6935_v19 = vpop.f32.mrf.mxu1 }
 0x676   : > { %11522 = vst [vmem:[#allocation126_spill] sm:$0xff] %v8432_v26 }
 0x677   : > { %v8434_v10 = vpop.f32.mrf.mxu0  ;;  %v8436_v63 = vpop.f32.mrf.mxu1 }
 0x678   : > { %11523 = vst [vmem:[#allocation127_spill] sm:$0xff] %v8434_v10  ;;  %11524 = vst [vmem:[#allocation128_spill] sm:$0xff] %v8436_v63 }
 0x679   : > { %v8438_v2 = vpop.f32.mrf.mxu0  ;;  %v6938_v55 = vpop.f32.mrf.mxu1 }
 0x67a   : > { %11525 = vst [vmem:[#allocation129_spill] sm:$0xff] %v8438_v2 }
 0x67b   : > { %v8440_v38 = vpop.f32.mrf.mxu0  ;;  %v8442_v44 = vpop.f32.mrf.mxu1 }
 0x67c   : > { %11526 = vst [vmem:[#allocation130_spill] sm:$0xff] %v8440_v38  ;;  %11527 = vst [vmem:[#allocation131_spill] sm:$0xff] %v8442_v44 }
 0x67d   : > { %v8444_v45 = vpop.f32.mrf.mxu0  ;;  %v6939_v42 = vpop.f32.mrf.mxu1 }
 0x67e   : > { %11528 = vst [vmem:[#allocation132_spill] sm:$0xff] %v8444_v45 }
 0x67f   : > { %v8446_v14 = vpop.f32.mrf.mxu0  ;;  %v8448_v53 = vpop.f32.mrf.mxu1 }
 0x680   : > { %11529 = vst [vmem:[#allocation133_spill] sm:$0xff] %v8446_v14  ;;  %11530 = vst [vmem:[#allocation134_spill] sm:$0xff] %v8448_v53 }
 0x681   : > { %v8450_v26 = vpop.f32.mrf.mxu0  ;;  %v6942_v19 = vpop.f32.mrf.mxu1 }
 0x682   : > { %11531 = vst [vmem:[#allocation135_spill] sm:$0xff] %v8450_v26 }
 0x683   : > { %v8452_v10 = vpop.f32.mrf.mxu0  ;;  %v8454_v63 = vpop.f32.mrf.mxu1 }
 0x684   : > { %11532 = vst [vmem:[#allocation136_spill] sm:$0xff] %v8452_v10  ;;  %11533 = vst [vmem:[#allocation137_spill] sm:$0xff] %v8454_v63 }
 0x685   : > { %v8456_v2 = vpop.f32.mrf.mxu0  ;;  %v6943_v55 = vpop.f32.mrf.mxu1 }
 0x686   : > { %11534 = vst [vmem:[#allocation138_spill] sm:$0xff] %v8456_v2 }
 0x687   : > { %v8458_v38 = vpop.f32.mrf.mxu0  ;;  %v8460_v44 = vpop.f32.mrf.mxu1 }
 0x688   : > { %11535 = vst [vmem:[#allocation139_spill] sm:$0xff] %v8458_v38  ;;  %11536 = vst [vmem:[#allocation140_spill] sm:$0xff] %v8460_v44 }
 0x689   : > { %v8462_v45 = vpop.f32.mrf.mxu0  ;;  %v6946_v42 = vpop.f32.mrf.mxu1 }
 0x68a   : > { %11537 = vst [vmem:[#allocation141_spill] sm:$0xff] %v8462_v45  ;;  %v7290_v42 = vld [vmem:[%s11387_s1 + $0x38] sm:$0xff]  }
 0x68b   : > { %v2231_v14 = vpop.f32.mrf.mxu0  ;;  %v2303_v50 = vpop.f32.mrf.mxu1 }
 0x68d   : > { %v2232_v53 = vpop.f32.mrf.mxu0  ;;  %v6947_v24 = vpop.f32.mrf.mxu1 }
 0x68f   : > { %v2403_v26 = vpop.f32.mrf.mxu0 }
 0x690   : > { %v2404_v10 = vadd.f32 %v8156_v49, %v2403_v26 }
 0x691   : > { %v6952_v19 = vpop.f32.mrf.mxu0 }
 0x692   : > { %v2441_v55 = vmax.f32 %v2404_v10, 0.0 }
 0x693   : > { %v2406_v32 = vpop.f32.mrf.mxu0 }
 0x694   : > { %v2407_v63 = vadd.f32 %v8156_v49, %v2406_v32 }
 0x695   : > { %v6953_v2 = vpop.f32.mrf.mxu0 }
 0x696   : > { %v2442_v16 = vmax.f32 %v2407_v63, 0.0 }
 0x697   : > { %v2411_v38 = vpop.f32.mrf.mxu0 }
 0x698   : > { %v2450_v59 = vpack.c.bf16 %v2442_v16, %v2441_v55  ;;  %v2412_v50 = vadd.f32 %v8156_v49, %v2411_v38 }
 0x699   : > { %v6956_v14 = vpop.f32.mrf.mxu0 }
 0x69a   : > { %6225 = vmatmul.mubr.msk.bf16.vlgmr.msra.gmra.mxu1 %vm552_vm2, %v2450_v59  ;;  %6979 = vmatmul.mubr.msk.bf16.vlgmr.msra.gmra.mxu0 %vm552_vm2, %v2450_v59  ;;  %v2443_v38 = vmax.f32 %v2412_v50, 0.0 }
 0x69b   : > { %v2414_v24 = vpop.f32.mrf.mxu0  ;;  %2512 = vmatprep.mubr.bf16.mxu1 %v11434_v51  ;;  %6982 = vmatprep.mubr.msk.bf16.mxu0 %vm7380_vm0, %v11435_v1 }
 0x69c   : > { %v2415_v63 = vadd.f32 %v8156_v49, %v2414_v24  ;;  %6999 = vmatpush3.bf16.msra.mxu1 %v7290_v42  ;;  %2796 = vmatpush1.bf16.msra.mxu0 %v8173_v54 }
 0x69d   : > { %v6957_v10 = vpop.f32.mrf.mxu0  ;;  %7020 = vmatprep.subr.bf16.mxu1 %v11435_v1  ;;  %2797 = vmatprep.subr.bf16.mxu0 %v8180_v17 }
 0x69e   : > { %v2444_v16 = vmax.f32 %v2415_v63, 0.0 }
 0x69f   : > { %v2419_v2 = vpop.f32.mrf.mxu0 }
 0x6a0   : > { %v2451_v59 = vpack.c.bf16 %v2444_v16, %v2443_v38  ;;  %2798 = vmatpush1.bf16.msra.mxu0 %v8186_v28  ;;  %v2420_v53 = vadd.f32 %v8156_v49, %v2419_v2 }
 0x6a1   : > { %v6960_v32 = vpop.f32.mrf.mxu0  ;;  %2799 = vmatprep.subr.bf16.mxu0 %v8192_v57 }
 0x6a2   : > { %6226 = vmatmul.mubr.msk.bf16.gmra.mxu1 %vm552_vm2, %v2451_v59  ;;  %6983 = vmatmul.mubr.msk.bf16.gmra.mxu0 %vm552_vm2, %v2451_v59  ;;  %v2445_v42 = vmax.f32 %v2420_v53, 0.0 }
 0x6a3   : > { %v2422_v26 = vpop.f32.mrf.mxu0  ;;  %2522 = vmatprep.mubr.bf16.mxu1 %v11434_v51  ;;  %6986 = vmatprep.mubr.msk.bf16.mxu0 %vm7380_vm0, %v11435_v1 }
 0x6a4   : > { %v2423_v19 = vadd.f32 %v8156_v49, %v2422_v26  ;;  %2800 = vmatpush1.bf16.msra.mxu0 %v8205_v46 }
 0x6a5   : > { %v6961_v55 = vpop.f32.mrf.mxu0  ;;  %2801 = vmatprep.subr.bf16.mxu0 %v8211_v47 }
 0x6a6   : > { %v2446_v14 = vmax.f32 %v2423_v19, 0.0 }
 0x6a7   : > { %v2427_v50 = vpop.f32.mrf.mxu0 }
 0x6a8   : > { %v2452_v24 = vpack.c.bf16 %v2446_v14, %v2445_v42  ;;  %2802 = vmatpush1.bf16.msra.mxu0 %v8217_v7  ;;  %v2428_v10 = vadd.f32 %v8156_v49, %v2427_v50 }
 0x6a9   : > { %v6964_v63 = vpop.f32.mrf.mxu0  ;;  %7048 = vmatprep.subr.bf16.mxu0 %v11435_v1 }
 0x6aa   : > { %6227 = vmatmul.mubr.msk.bf16.gmra.mxu1 %vm552_vm2, %v2452_v24  ;;  %6987 = vmatmul.mubr.msk.bf16.gmra.mxu0 %vm552_vm2, %v2452_v24  ;;  %v2447_v59 = vmax.f32 %v2428_v10, 0.0 }
 0x6ab   : > { %v2430_v38 = vpop.f32.mrf.mxu0  ;;  %2532 = vmatprep.mubr.bf16.mxu1 %v11434_v51  ;;  %6990 = vmatprep.mubr.msk.bf16.mxu0 %vm7380_vm0, %v11435_v1 }
 0x6ac   : > { %v2431_v16 = vadd.f32 %v8156_v49, %v2430_v38 }
 0x6ad   : > { %v6965_v2 = vpop.f32.mrf.mxu0 }
 0x6ae   : > { %v2448_v32 = vmax.f32 %v2431_v16, 0.0 }
 0x6af   : > { %v2435_v53 = vpop.f32.mrf.mxu0 }
 0x6b0   : > { %v2453_v26 = vpack.c.bf16 %v2448_v32, %v2447_v59  ;;  %v2436_v19 = vadd.f32 %v8156_v49, %v2435_v53 }
 0x6b1   : > { %v6968_v55 = vpop.f32.mrf.mxu0 }
 0x6b2   : > { %v2449_v42 = vmax.f32 %v2436_v19, 0.0  ;;  %6228 = vmatmul.mubr.msk.bf16.gmra.mxu1 %vm552_vm2, %v2453_v26  ;;  %6991 = vmatmul.mubr.msk.bf16.gmra.mxu0 %vm552_vm2, %v2453_v26 }
 0x6b3   : > { %v2438_v14 = vpop.f32.mrf.mxu0  ;;  %2542 = vmatprep.mubr.bf16.mxu1 %v11434_v51  ;;  %6994 = vmatprep.mubr.msk.bf16.mxu0 %vm7380_vm0, %v11435_v1 }
 0x6b4   : > { %v2454_v24 = vpack.c.bf16 %v2449_v42, %v2449_v42 }
 0x6b5   : > { %v6969_v50 = vpop.f32.mrf.mxu0 }
 0x6ba   : > { %6229 = vmatmul.mubr.msk.bf16.gmra.mxu1 %vm552_vm2, %v2454_v24  ;;  %6995 = vmatmul.mubr.msk.bf16.gmra.mxu0 %vm552_vm2, %v2454_v24 }
 0x6bb   : > { %7000 = vmatprep.mubr.msk.bf16.mxu1 %vm7380_vm0, %v11435_v1  ;;  %2819 = vmatprep.mubr.bf16.mxu0 %v11434_v51 }
 0x6c2   : > { %7001 = vmatmul.mubr.msk.bf16.vlgmr.msra.gmra.mxu1 %vm370_vm1, %v8047_v20 }
 0x6c3   : > { %7004 = vmatprep.mubr.msk.bf16.mxu1 %vm7380_vm0, %v11435_v1  ;;  %7021 = vmatpush3.bf16.msra.mxu1 %v8056_v4 }
 0x6c4   : > { %7022 = vmatprep.subr.bf16.mxu1 %v11435_v1 }
 0x6c7   : > { %7023 = vmatpush3.bf16.msra.mxu1 %v8248_v13 }
 0x6c8   : > { %7024 = vmatprep.subr.bf16.mxu1 %v11435_v1 }
 0x6ca   : > { %7005 = vmatmul.mubr.msk.bf16.gmra.mxu1 %vm370_vm1, %v8063_v6 }
 0x6cb   : > { %7008 = vmatprep.mubr.msk.bf16.mxu1 %vm7380_vm0, %v11435_v1  ;;  %7025 = vmatpush3.bf16.msra.mxu1 %v8259_v61 }
 0x6cc   : > { %7026 = vmatprep.subr.bf16.mxu1 %v11435_v1 }
 0x6cf   : > { %7027 = vmatpush3.bf16.msra.mxu1 %v8266_v30 }
 0x6d0   : > { %3112 = vmatprep.subr.bf16.mxu1 %v8075_v12 }
 0x6d2   : > { %7009 = vmatmul.mubr.msk.bf16.gmra.mxu1 %vm370_vm1, %v8079_v11 }
 0x6d3   : > { %7012 = vmatprep.mubr.msk.bf16.mxu1 %vm7380_vm0, %v11435_v1 }
 0x6da   : > { %7013 = vmatmul.mubr.msk.bf16.gmra.mxu1 %vm370_vm1, %v8086_v15 }
 0x6db   : > { %7016 = vmatprep.mubr.msk.bf16.mxu1 %vm7380_vm0, %v11435_v1 }
 0x6e2   : > { %7017 = vmatmul.mubr.msk.bf16.gmra.mxu1 %vm370_vm1, %v8093_v18 }
 0x6e3   : > { %7028 = vmatprep.mubr.msk.bf16.mxu1 %vm7380_vm0, %v11435_v1 }
 0x75a   : > { %v8538_v20 = vpop.f32.mrf.mxu1  ;;  %v8540_v4 = vpop.f32.mrf.mxu0 }
 0x75b   : > { %11538 = vst [vmem:[#allocation142_spill] sm:$0xff] %v8540_v4 }
 0x75c   : > { %v8542_v6 = vpop.f32.mrf.mxu1  ;;  %v6980_v12 = vpop.f32.mrf.mxu0 }
 0x75e   : > { %v8544_v11 = vpop.f32.mrf.mxu1  ;;  %v8546_v63 = vpop.f32.mrf.mxu0 }
 0x75f   : > { %11539 = vst [vmem:[#allocation143_spill] sm:$0xff] %v8546_v63 }
 0x760   : > { %v8548_v15 = vpop.f32.mrf.mxu1  ;;  %v6981_v10 = vpop.f32.mrf.mxu0 }
 0x762   : > { %v8550_v38 = vpop.f32.mrf.mxu1  ;;  %v8552_v18 = vpop.f32.mrf.mxu0 }
 0x763   : > { %11540 = vst [vmem:[#allocation144_spill] sm:$0xff] %v8552_v18 }
 0x764   : > { %v8554_v16 = vpop.f32.mrf.mxu1  ;;  %v6984_v2 = vpop.f32.mrf.mxu0 }
 0x766   : > { %v8556_v59 = vpop.f32.mrf.mxu1  ;;  %v8558_v32 = vpop.f32.mrf.mxu0 }
 0x767   : > { %11541 = vst [vmem:[#allocation145_spill] sm:$0xff] %v8558_v32 }
 0x768   : > { %v8560_v53 = vpop.f32.mrf.mxu1  ;;  %v6985_v26 = vpop.f32.mrf.mxu0 }
 0x769   : > { %11542 = vst [vmem:[#allocation146_spill] sm:$0xff] %v8560_v53 }
 0x76a   : > { %v8562_v19 = vpop.f32.mrf.mxu1  ;;  %v8564_v55 = vpop.f32.mrf.mxu0 }
 0x76b   : > { %11543 = vst [vmem:[#allocation147_spill] sm:$0xff] %v8562_v19  ;;  %11544 = vst [vmem:[#allocation148_spill] sm:$0xff] %v8564_v55 }
 0x76c   : > { %v8566_v42 = vpop.f32.mrf.mxu1  ;;  %v6988_v14 = vpop.f32.mrf.mxu0 }
 0x76d   : > { %11545 = vst [vmem:[#allocation149_spill] sm:$0xff] %v8566_v42 }
 0x76e   : > { %v8568_v50 = vpop.f32.mrf.mxu1  ;;  %v8570_v24 = vpop.f32.mrf.mxu0 }
 0x76f   : > { %11546 = vst [vmem:[#allocation150_spill] sm:$0xff] %v8568_v50  ;;  %11547 = vst [vmem:[#allocation151_spill] sm:$0xff] %v8570_v24 }
 0x770   : > { %v8572_v12 = vpop.f32.mrf.mxu1  ;;  %v6989_v10 = vpop.f32.mrf.mxu0 }
 0x771   : > { %11548 = vst [vmem:[#allocation152_spill] sm:$0xff] %v8572_v12 }
 0x772   : > { %v8574_v2 = vpop.f32.mrf.mxu1  ;;  %v8576_v44 = vpop.f32.mrf.mxu0 }
 0x773   : > { %11549 = vst [vmem:[#allocation153_spill] sm:$0xff] %v8574_v2  ;;  %11550 = vst [vmem:[#allocation154_spill] sm:$0xff] %v8576_v44 }
 0x774   : > { %v8578_v45 = vpop.f32.mrf.mxu1  ;;  %v6992_v26 = vpop.f32.mrf.mxu0 }
 0x775   : > { %11551 = vst [vmem:[#allocation155_spill] sm:$0xff] %v8578_v45 }
 0x776   : > { %v8580_v32 = vpop.f32.mrf.mxu1  ;;  %v8582_v55 = vpop.f32.mrf.mxu0 }
 0x777   : > { %11552 = vst [vmem:[#allocation156_spill] sm:$0xff] %v8580_v32  ;;  %11553 = vst [vmem:[#allocation157_spill] sm:$0xff] %v8582_v55 }
 0x778   : > { %v8584_v42 = vpop.f32.mrf.mxu1  ;;  %v6993_v14 = vpop.f32.mrf.mxu0 }
 0x779   : > { %11554 = vst [vmem:[#allocation158_spill] sm:$0xff] %v8584_v42 }
 0x77a   : > { %v8586_v53 = vpop.f32.mrf.mxu1  ;;  %v8588_v24 = vpop.f32.mrf.mxu0 }
 0x77b   : > { %11555 = vst [vmem:[#allocation159_spill] sm:$0xff] %v8586_v53  ;;  %11556 = vst [vmem:[#allocation160_spill] sm:$0xff] %v8588_v24 }
 0x77c   : > { %v8590_v12 = vpop.f32.mrf.mxu1  ;;  %v6996_v10 = vpop.f32.mrf.mxu0 }
 0x77d   : > { %11557 = vst [vmem:[#allocation161_spill] sm:$0xff] %v8590_v12  ;;  %v7291_v10 = vld [vmem:[%s11387_s1 + $0x40] sm:$0xff]  }
 0x77e   : > { %v2548_v2 = vpop.f32.mrf.mxu1  ;;  %v2620_v50 = vpop.f32.mrf.mxu0 }
 0x780   : > { %v2549_v44 = vpop.f32.mrf.mxu1  ;;  %v6997_v19 = vpop.f32.mrf.mxu0 }
 0x782   : > { %v2720_v45 = vpop.f32.mrf.mxu1 }
 0x783   : > { %v2721_v32 = vadd.f32 %v8156_v49, %v2720_v45 }
 0x784   : > { %v7002_v26 = vpop.f32.mrf.mxu1 }
 0x785   : > { %v2758_v14 = vmax.f32 %v2721_v32, 0.0 }
 0x786   : > { %v2723_v18 = vpop.f32.mrf.mxu1 }
 0x787   : > { %v2724_v55 = vadd.f32 %v8156_v49, %v2723_v18 }
 0x788   : > { %v7003_v42 = vpop.f32.mrf.mxu1 }
 0x789   : > { %v2759_v63 = vmax.f32 %v2724_v55, 0.0 }
 0x78a   : > { %v2728_v53 = vpop.f32.mrf.mxu1 }
 0x78b   : > { %v2767_v4 = vpack.c.bf16 %v2759_v63, %v2758_v14  ;;  %v2729_v44 = vadd.f32 %v8156_v49, %v2728_v53 }
 0x78c   : > { %v7006_v2 = vpop.f32.mrf.mxu1 }
 0x78d   : > { %6243 = vmatmul.mubr.msk.bf16.vlgmr.msra.gmra.mxu0 %vm552_vm2, %v2767_v4  ;;  %7029 = vmatmul.mubr.msk.bf16.vlgmr.msra.gmra.mxu1 %vm552_vm2, %v2767_v4  ;;  %v2760_v32 = vmax.f32 %v2729_v44, 0.0 }
 0x78e   : > { %v2731_v45 = vpop.f32.mrf.mxu1  ;;  %2829 = vmatprep.mubr.bf16.mxu0 %v11434_v51  ;;  %7032 = vmatprep.mubr.msk.bf16.mxu1 %vm7380_vm0, %v11435_v1 }
 0x78f   : > { %v2732_v18 = vadd.f32 %v8156_v49, %v2731_v45  ;;  %7049 = vmatpush3.bf16.msra.mxu0 %v7291_v10  ;;  %3113 = vmatpush1.bf16.msra.mxu1 %v8173_v54 }
 0x790   : > { %v7007_v63 = vpop.f32.mrf.mxu1  ;;  %7070 = vmatprep.subr.bf16.mxu0 %v11435_v1  ;;  %3114 = vmatprep.subr.bf16.mxu1 %v8180_v17 }
 0x791   : > { %v2761_v53 = vmax.f32 %v2732_v18, 0.0 }
 0x792   : > { %v2736_v19 = vpop.f32.mrf.mxu1 }
 0x793   : > { %v2768_v4 = vpack.c.bf16 %v2761_v53, %v2760_v32  ;;  %3115 = vmatpush1.bf16.msra.mxu1 %v8186_v28  ;;  %v2737_v42 = vadd.f32 %v8156_v49, %v2736_v19 }
 0x794   : > { %v7010_v55 = vpop.f32.mrf.mxu1  ;;  %3116 = vmatprep.subr.bf16.mxu1 %v8192_v57 }
 0x795   : > { %6244 = vmatmul.mubr.msk.bf16.gmra.mxu0 %vm552_vm2, %v2768_v4  ;;  %7033 = vmatmul.mubr.msk.bf16.gmra.mxu1 %vm552_vm2, %v2768_v4  ;;  %v2762_v57 = vmax.f32 %v2737_v42, 0.0 }
 0x796   : > { %v2739_v54 = vpop.f32.mrf.mxu1  ;;  %2839 = vmatprep.mubr.bf16.mxu0 %v11434_v51  ;;  %7036 = vmatprep.mubr.msk.bf16.mxu1 %vm7380_vm0, %v11435_v1 }
 0x797   : > { %v2740_v17 = vadd.f32 %v8156_v49, %v2739_v54  ;;  %3117 = vmatpush1.bf16.msra.mxu1 %v8205_v46  ;;  %v7311_v54 = vld [vmem:[%s11389_s3 + $0x50] ss:$12 sps:$4 sm:$0xff]  }
 0x798   : > { %v7011_v28 = vpop.f32.mrf.mxu1  ;;  %3118 = vmatprep.subr.bf16.mxu1 %v8211_v47 }
 0x799   : > { %v2763_v50 = vmax.f32 %v2740_v17, 0.0  ;;  %v7312_v17 = vld [vmem:[%s7509_s28 + $0x8] sm:$0xff]   ;;  %v7313_v28 = vld [vmem:[%s7509_s28 + $0x10] sm:$0xff]  }
 0x79a   : > { %v2744_v26 = vpop.f32.mrf.mxu1 }
 0x79b   : > { %v2769_v14 = vpack.c.bf16 %v2763_v50, %v2762_v57  ;;  %3119 = vmatpush1.bf16.msra.mxu1 %v8217_v7  ;;  %v2745_v2 = vadd.f32 %v8156_v49, %v2744_v26  ;;  %v7315_v57 = vld [vmem:[%s7509_s28 + $0x20] ss:$0 sps:$4 sm:$0xff]  }
 0x79c   : > { %v7014_v10 = vpop.f32.mrf.mxu1  ;;  %3698 = vmatprep.subr.mxu1 %v11435_v1 }
 0x79d   : > { %6245 = vmatmul.mubr.msk.bf16.gmra.mxu0 %vm552_vm2, %v2769_v14  ;;  %7037 = vmatmul.mubr.msk.bf16.gmra.mxu1 %vm552_vm2, %v2769_v14  ;;  %v2764_v45 = vmax.f32 %v2745_v2, 0.0 }
 0x79e   : > { %v2747_v44 = vpop.f32.mrf.mxu1  ;;  %2849 = vmatprep.mubr.bf16.mxu0 %v11434_v51  ;;  %7040 = vmatprep.mubr.msk.bf16.mxu1 %vm7380_vm0, %v11435_v1 }
 0x79f   : > { %v2748_v46 = vadd.f32 %v8156_v49, %v2747_v44 }
 0x7a0   : > { %v7015_v47 = vpop.f32.mrf.mxu1 }
 0x7a1   : > { %v2765_v7 = vmax.f32 %v2748_v46, 0.0 }
 0x7a2   : > { %v2752_v18 = vpop.f32.mrf.mxu1 }
 0x7a3   : > { %v2770_v63 = vpack.c.bf16 %v2765_v7, %v2764_v45  ;;  %v2753_v32 = vadd.f32 %v8156_v49, %v2752_v18  ;;  %v7310_v49 = vld [vmem:[%s7509_s28] sm:$0xff]  }
 0x7a4   : > { %v7018_v53 = vpop.f32.mrf.mxu1 }
 0x7a5   : > { %v2766_v19 = vmax.f32 %v2753_v32, 0.0  ;;  %6246 = vmatmul.mubr.msk.bf16.gmra.mxu0 %vm552_vm2, %v2770_v63  ;;  %7041 = vmatmul.mubr.msk.bf16.gmra.mxu1 %vm552_vm2, %v2770_v63 }
 0x7a6   : > { %v2755_v4 = vpop.f32.mrf.mxu1  ;;  %2859 = vmatprep.mubr.bf16.mxu0 %v11434_v51  ;;  %7044 = vmatprep.mubr.msk.bf16.mxu1 %vm7380_vm0, %v11435_v1 }
 0x7a7   : > { %v2771_v42 = vpack.c.bf16 %v2766_v19, %v2766_v19 }
 0x7a8   : > { %v7019_v55 = vpop.f32.mrf.mxu1 }
 0x7ad   : > { %6247 = vmatmul.mubr.msk.bf16.gmra.mxu0 %vm552_vm2, %v2771_v42  ;;  %7045 = vmatmul.mubr.msk.bf16.gmra.mxu1 %vm552_vm2, %v2771_v42 }
 0x7ae   : > { %7050 = vmatprep.mubr.msk.bf16.mxu0 %vm7380_vm0, %v11435_v1  ;;  %3136 = vmatprep.mubr.bf16.mxu1 %v11434_v51 }
 0x7b5   : > { %7051 = vmatmul.mubr.msk.bf16.vlgmr.msra.gmra.mxu0 %vm370_vm1, %v7310_v49 }
 0x7b6   : > { %7054 = vmatprep.mubr.msk.bf16.mxu0 %vm7380_vm0, %v11435_v1  ;;  %7071 = vmatpush3.bf16.msra.mxu0 %v7311_v54 }
 0x7b7   : > { %7072 = vmatprep.subr.bf16.mxu0 %v11435_v1 }
 0x7ba   : > { %7073 = vmatpush3.bf16.msra.mxu0 %v8248_v13  ;;  %v7314_v13 = vld [vmem:[%s7509_s28 + $0x18] sm:$0xff]   ;;  %s7321_s28 = sshll.u32 %s7384_s11, 4  ;;  %s7322_s28 = int_to_ptr.vmem [resolvable:$false] %s7321_s28 }
 0x7bb   : > { %7074 = vmatprep.subr.bf16.mxu0 %v11435_v1  ;;  %s7323_s13 = scalar_lea.vmem %s7322_s28, 7168  ;;  %p7324_p0 = scmp.lt.s32.totalorder %s11340_s24, %s7322_s28 }
 0x7bd   : > { %7055 = vmatmul.mubr.msk.bf16.gmra.mxu0 %vm370_vm1, %v7312_v17 }
 0x7be   : > { %7058 = vmatprep.mubr.msk.bf16.mxu0 %vm7380_vm0, %v11435_v1  ;;  %7075 = vmatpush3.bf16.msra.mxu0 %v8259_v61 }
 0x7bf   : > { %7076 = vmatprep.subr.bf16.mxu0 %v11435_v1 }
 0x7c2   : > { %7077 = vmatpush3.bf16.msra.mxu0 %v8266_v30 }
 0x7c3   : > { %3898 = vmatprep.subr.mxu0 %v11435_v1 }
 0x7c5   : > { %7059 = vmatmul.mubr.msk.bf16.gmra.mxu0 %vm370_vm1, %v7313_v28 }
 0x7c6   : > { %7062 = vmatprep.mubr.msk.bf16.mxu0 %vm7380_vm0, %v11435_v1 }
 0x7cd   : > { %7063 = vmatmul.mubr.msk.bf16.gmra.mxu0 %vm370_vm1, %v7314_v13 }
 0x7ce   : > { %7066 = vmatprep.mubr.msk.bf16.mxu0 %vm7380_vm0, %v11435_v1 }
 0x7d5   : > { %7067 = vmatmul.mubr.msk.bf16.gmra.mxu0 %vm370_vm1, %v7315_v57 }
 0x7d6   : > { %7078 = vmatprep.mubr.msk.bf16.mxu0 %vm7380_vm0, %v11435_v1 }
 0x84d   : > { %v8668_v61 = vpop.f32.mrf.mxu0  ;;  %v8670_v30 = vpop.f32.mrf.mxu1 }
 0x84f   : > { %v8672_v50 = vpop.f32.mrf.mxu0  ;;  %v7030_v26 = vpop.f32.mrf.mxu1 }
 0x851   : > { %v8674_v14 = vpop.f32.mrf.mxu0  ;;  %v8676_v10 = vpop.f32.mrf.mxu1 }
 0x853   : > { %v8678_v2 = vpop.f32.mrf.mxu0  ;;  %v7031_v44 = vpop.f32.mrf.mxu1 }
 0x855   : > { %v8680_v46 = vpop.f32.mrf.mxu0  ;;  %v8682_v47 = vpop.f32.mrf.mxu1 }
 0x857   : > { %v8684_v45 = vpop.f32.mrf.mxu0  ;;  %v7034_v7 = vpop.f32.mrf.mxu1 }
 0x859   : > { %v8686_v18 = vpop.f32.mrf.mxu0  ;;  %v8688_v63 = vpop.f32.mrf.mxu1 }
 0x85a   : > { %11558 = vst [vmem:[#allocation162_spill] sm:$0xff] %v8688_v63 }
 0x85b   : > { %v8690_v32 = vpop.f32.mrf.mxu0  ;;  %v7035_v53 = vpop.f32.mrf.mxu1 }
 0x85d   : > { %v8692_v19 = vpop.f32.mrf.mxu0  ;;  %v8694_v4 = vpop.f32.mrf.mxu1 }
 0x85e   : > { %11559 = vst [vmem:[#allocation163_spill] sm:$0xff] %v8694_v4 }
 0x85f   : > { %v8696_v55 = vpop.f32.mrf.mxu0  ;;  %v7038_v42 = vpop.f32.mrf.mxu1 }
 0x861   : > { %v8698_v49 = vpop.f32.mrf.mxu0  ;;  %v8700_v54 = vpop.f32.mrf.mxu1 }
 0x862   : > { %11560 = vst [vmem:[#allocation164_spill] sm:$0xff] %v8700_v54 }
 0x863   : > { %v8702_v17 = vpop.f32.mrf.mxu0  ;;  %v7039_v28 = vpop.f32.mrf.mxu1 }
 0x864   : > { %11561 = vst [vmem:[#allocation165_spill] sm:$0xff] %v8702_v17 }
 0x865   : > { %v8704_v13 = vpop.f32.mrf.mxu0  ;;  %v8706_v57 = vpop.f32.mrf.mxu1 }
 0x866   : > { %11562 = vst [vmem:[#allocation166_spill] sm:$0xff] %v8704_v13  ;;  %11563 = vst [vmem:[#allocation167_spill] sm:$0xff] %v8706_v57 }
 0x867   : > { %v8708_v26 = vpop.f32.mrf.mxu0  ;;  %v7042_v44 = vpop.f32.mrf.mxu1 }
 0x868   : > { %11564 = vst [vmem:[#allocation168_spill] sm:$0xff] %v8708_v26 }
 0x869   : > { %v8710_v7 = vpop.f32.mrf.mxu0  ;;  %v8712_v53 = vpop.f32.mrf.mxu1 }
 0x86a   : > { %11565 = vst [vmem:[#allocation169_spill] sm:$0xff] %v8710_v7  ;;  %11566 = vst [vmem:[#allocation170_spill] sm:$0xff] %v8712_v53  ;;  %v8725_v53 = vld [vmem:[%s11388_s2] ss:$0 sm:$0xff] }
 0x86b   : > { %v8714_v24 = vpop.f32.mrf.mxu0  ;;  %v7043_v42 = vpop.f32.mrf.mxu1 }
 0x86c   : > { %11567 = vst [vmem:[#allocation171_spill] sm:$0xff] %v8714_v24 }
 0x86d   : > { %v8716_v12 = vpop.f32.mrf.mxu0  ;;  %v8718_v54 = vpop.f32.mrf.mxu1 }
 0x86e   : > { %11568 = vst [vmem:[#allocation172_spill] sm:$0xff] %v8716_v12  ;;  %11569 = vst [vmem:[#allocation173_spill] sm:$0xff] %v8718_v54 }
 0x86f   : > { %v8720_v4 = vpop.f32.mrf.mxu0  ;;  %v7046_v28 = vpop.f32.mrf.mxu1 }
 0x870   : > { %11570 = vst [vmem:[#allocation174_spill] sm:$0xff] %v8720_v4 }
 0x871   : > { %v2865_v13 = vpop.f32.mrf.mxu0  ;;  %v2937_v63 = vpop.f32.mrf.mxu1 }
 0x873   : > { %v2866_v57 = vpop.f32.mrf.mxu0  ;;  %v7047_v17 = vpop.f32.mrf.mxu1 }
 0x874   : > { %v3569_v17 = vld [vmem:[%s11391_s5 + $0x78] sm:$0xff] }
 0x875   : > { %v3037_v26 = vpop.f32.mrf.mxu0  ;;  %v3601_v57 = vld [vmem:[%s11391_s5 + $0x178] sm:$0xff] }
 0x876   : > { %v3038_v42 = vadd.f32 %v8725_v53, %v3037_v26 }
 0x877   : > { %v7052_v44 = vpop.f32.mrf.mxu0 }
 0x878   : > { %v3075_v7 = vmax.f32 %v3038_v42, 0.0  ;;  %v3599_v42 = vld [vmem:[%s11391_s5 + $0x168] sm:$0xff] }
 0x879   : > { %v3040_v24 = vpop.f32.mrf.mxu0 }
 0x87a   : > { %v3041_v12 = vadd.f32 %v8725_v53, %v3040_v24  ;;  %v3568_v24 = vld [vmem:[%s11391_s5 + $0x70] sm:$0xff] }
 0x87b   : > { %v7053_v54 = vpop.f32.mrf.mxu0 }
 0x87c   : > { %v3076_v4 = vmax.f32 %v3041_v12, 0.0  ;;  %v3600_v12 = vld [vmem:[%s11391_s5 + $0x170] sm:$0xff] }
 0x87d   : > { %v3045_v28 = vpop.f32.mrf.mxu0 }
 0x87e   : > { %v3084_v13 = vpack.c.bf16 %v3076_v4, %v3075_v7  ;;  %v3046_v63 = vadd.f32 %v8725_v53, %v3045_v28  ;;  %v3567_v7 = vld [vmem:[%s11391_s5 + $0x68] sm:$0xff] }
 0x87f   : > { %v7056_v44 = vpop.f32.mrf.mxu0 }
 0x880   : > { %6261 = vmatmul.mubr.msk.bf16.vlgmr.msra.gmra.mxu1 %vm552_vm2, %v3084_v13  ;;  %7079 = vmatmul.mubr.msk.bf16.vlgmr.msra.gmra.mxu0 %vm552_vm2, %v3084_v13  ;;  %v3077_v54 = vmax.f32 %v3046_v63, 0.0  ;;  %v3566_v63 = vld [vmem:[%s11391_s5 + $0x60] sm:$0xff] }
 0x881   : > { %3699 = vmatpush1.msra.mxu1 %v3569_v17  ;;  %3899 = vmatpush1.msra.mxu0 %v3601_v57  ;;  %v3048_v4 = vpop.f32.mrf.mxu0  ;;  %v3598_v17 = vld [vmem:[%s11391_s5 + $0x160] sm:$0xff] }
 0x882   : > { %v3049_v26 = vadd.f32 %v8725_v53, %v3048_v4  ;;  %3700 = vmatprep.subr.mxu1 %v11435_v1  ;;  %3900 = vmatprep.subr.mxu0 %v11435_v1  ;;  %v3565_v4 = vld [vmem:[%s11391_s5 + $0x58] sm:$0xff] }
 0x883   : > { %3701 = vmatpush1.msra.mxu1 %v3568_v24  ;;  %3901 = vmatpush1.msra.mxu0 %v3600_v12  ;;  %v7057_v28 = vpop.f32.mrf.mxu0 }
 0x884   : > { %v3078_v13 = vmax.f32 %v3049_v26, 0.0  ;;  %3702 = vmatprep.subr.mxu1 %v11435_v1  ;;  %3902 = vmatprep.subr.mxu0 %v11435_v1  ;;  %v3596_v28 = vld [vmem:[%s11391_s5 + $0x150] sm:$0xff] }
 0x885   : > { %3703 = vmatpush1.msra.mxu1 %v3567_v7  ;;  %3903 = vmatpush1.msra.mxu0 %v3599_v42  ;;  %v3053_v57 = vpop.f32.mrf.mxu0  ;;  %v3564_v42 = vld [vmem:[%s11391_s5 + $0x50] sm:$0xff] }
 0x886   : > { %v3085_v44 = vpack.c.bf16 %v3078_v13, %v3077_v54  ;;  %3704 = vmatprep.subr.mxu1 %v11435_v1  ;;  %3904 = vmatprep.subr.mxu0 %v11435_v1  ;;  %v3054_v12 = vadd.f32 %v8725_v53, %v3053_v57  ;;  %v3597_v54 = vld [vmem:[%s11391_s5 + $0x158] sm:$0xff]  ;;  %v3563_v57 = vld [vmem:[%s11391_s5 + $0x48] sm:$0xff] }
 0x887   : > { %3705 = vmatpush1.msra.mxu1 %v3566_v63  ;;  %3905 = vmatpush1.msra.mxu0 %v3598_v17  ;;  %v7060_v24 = vpop.f32.mrf.mxu0 }
 0x888   : > { %3146 = vmatprep.mubr.bf16.mxu1 %v11434_v51  ;;  %7082 = vmatprep.mubr.msk.bf16.mxu0 %vm7380_vm0, %v11435_v1  ;;  %v3079_v63 = vmax.f32 %v3054_v12, 0.0  ;;  %v3562_v12 = vld [vmem:[%s11391_s5 + $0x40] sm:$0xff] }
 0x889   : > { %3706 = vmatprep.subr.mxu1 %v11435_v1  ;;  %3906 = vmatprep.subr.mxu0 %v11435_v1  ;;  %v3056_v26 = vpop.f32.mrf.mxu0 }
 0x88a   : > { %6262 = vmatmul.mubr.msk.bf16.gmra.mxu1 %vm552_vm2, %v3085_v44  ;;  %7083 = vmatmul.mubr.msk.bf16.gmra.mxu0 %vm552_vm2, %v3085_v44  ;;  %v3057_v7 = vadd.f32 %v8725_v53, %v3056_v26  ;;  %v3595_v44 = vld [vmem:[%s11391_s5 + $0x148] sm:$0xff] }
 0x88b   : > { %3707 = vmatpush1.msra.mxu1 %v3565_v4  ;;  %3907 = vmatpush1.msra.mxu0 %v3597_v54  ;;  %v7061_v13 = vpop.f32.mrf.mxu0  ;;  %v3594_v4 = vld [vmem:[%s11391_s5 + $0x140] sm:$0xff] }
 0x88c   : > { %v3080_v17 = vmax.f32 %v3057_v7, 0.0  ;;  %3708 = vmatprep.subr.mxu1 %v11435_v1  ;;  %3908 = vmatprep.subr.mxu0 %v11435_v1  ;;  %v3593_v13 = vld [vmem:[%s11391_s5 + $0x138] sm:$0xff] }
 0x88d   : > { %3709 = vmatpush1.msra.mxu1 %v3564_v42  ;;  %3909 = vmatpush1.msra.mxu0 %v3596_v28  ;;  %v3061_v24 = vpop.f32.mrf.mxu0  ;;  %v3561_v28 = vld [vmem:[%s11391_s5 + $0x38] sm:$0xff] }
 0x88e   : > { %3710 = vmatprep.subr.mxu1 %v11435_v1  ;;  %3910 = vmatprep.subr.mxu0 %v11435_v1  ;;  %v3086_v26 = vpack.c.bf16 %v3080_v17, %v3079_v63  ;;  %v3062_v42 = vadd.f32 %v8725_v53, %v3061_v24 }
 0x88f   : > { %3711 = vmatpush1.msra.mxu1 %v3563_v57  ;;  %3911 = vmatpush1.msra.mxu0 %v3595_v44  ;;  %v7064_v54 = vpop.f32.mrf.mxu0  ;;  %v3560_v57 = vld [vmem:[%s11391_s5 + $0x30] sm:$0xff] }
 0x890   : > { %3712 = vmatprep.subr.mxu1 %v11435_v1  ;;  %3912 = vmatprep.subr.mxu0 %v11435_v1  ;;  %v3592_v44 = vld [vmem:[%s11391_s5 + $0x130] sm:$0xff] }
 0x891   : > { %3713 = vmatpush1.msra.mxu1 %v3562_v12  ;;  %3913 = vmatpush1.msra.mxu0 %v3594_v4  ;;  %v3064_v7 = vpop.f32.mrf.mxu0  ;;  %v473_v12 = vlaneseq  ;;  %v3081_v4 = vmax.f32 %v3062_v42, 0.0  ;;  %v3558_v42 = vld [vmem:[%s11391_s5 + $0x20] sm:$0xff] }
 0x892   : > { %3156 = vmatprep.mubr.bf16.mxu1 %v11434_v51  ;;  %7086 = vmatprep.mubr.msk.bf16.mxu0 %vm7380_vm0, %v11435_v1  ;;  %v3065_v63 = vadd.f32 %v8725_v53, %v3064_v7  ;;  %v3591_v7 = vld [vmem:[%s11391_s5 + $0x128] sm:$0xff] }
 0x893   : > { %3714 = vmatprep.subr.mxu1 %v11435_v1  ;;  %3914 = vmatprep.subr.mxu0 %v11435_v1  ;;  %v7065_v17 = vpop.f32.mrf.mxu0 }
 0x894   : > { %6263 = vmatmul.mubr.msk.bf16.gmra.mxu1 %vm552_vm2, %v3086_v26  ;;  %7087 = vmatmul.mubr.msk.bf16.gmra.mxu0 %vm552_vm2, %v3086_v26  ;;  %v3082_v54 = vmax.f32 %v3065_v63, 0.0  ;;  %v3559_v26 = vld [vmem:[%s11391_s5 + $0x28] sm:$0xff]  ;;  %v8839_v17 = vshrl.u32 %v473_v12, 7  ;;  %v3589_v12 = vld [vmem:[%s11391_s5 + $0x118] sm:$0xff] }
 0x895   : > { %3715 = vmatpush1.msra.mxu1 %v3561_v28  ;;  %3915 = vmatpush1.msra.mxu0 %v3593_v13  ;;  %v3069_v24 = vpop.f32.mrf.mxu0  ;;  %v3590_v13 = vld [vmem:[%s11391_s5 + $0x120] sm:$0xff] }
 0x896   : > { %3716 = vmatprep.subr.mxu1 %v11435_v1  ;;  %3916 = vmatprep.subr.mxu0 %v11435_v1 }
 0x897   : > { %3717 = vmatpush1.msra.mxu1 %v3560_v57  ;;  %3917 = vmatpush1.msra.mxu0 %v3592_v44  ;;  %v7068_v28 = vpop.f32.mrf.mxu0  ;;  %v3087_v57 = vpack.c.bf16 %v3082_v54, %v3081_v4  ;;  %v3070_v4 = vadd.f32 %v8725_v53, %v3069_v24  ;;  %v475_v54 = vsub.s32 0, %v8839_v17  ;;  %v8867_v53 = vld [vmem:[%s11390_s4] sm:$0x7] }
 0x898   : > { %3718 = vmatprep.subr.mxu1 %v11435_v1  ;;  %3918 = vmatprep.subr.mxu0 %v11435_v1  ;;  %v3588_v28 = vld [vmem:[%s11391_s5 + $0x110] sm:$0xff] }
 0x899   : > { %3719 = vmatpush1.msra.mxu1 %v3559_v26  ;;  %3919 = vmatpush1.msra.mxu0 %v3591_v7  ;;  %v3072_v63 = vpop.f32.mrf.mxu0  ;;  %v3557_v26 = vld [vmem:[%s11391_s5 + $0x18] sm:$0xff]  ;;  %v3556_v7 = vld [vmem:[%s11391_s5 + $0x10] sm:$0xff]  ;;  %v3083_v24 = vmax.f32 %v3070_v4, 0.0 }
 0x89a   : > { %3720 = vmatprep.subr.mxu1 %v11435_v1  ;;  %3920 = vmatprep.subr.mxu0 %v11435_v1  ;;  %v8878_v63 = vrot.slane %v8867_v53, %v475_v54  ;;  %v3585_v54 = vld [vmem:[%s11391_s5 + $0xf8] sm:$0xff] }
 0x89b   : > { %3721 = vmatpush1.msra.mxu1 %v3558_v42  ;;  %3921 = vmatpush1.msra.mxu0 %v3590_v13  ;;  %v7069_v44 = vpop.f32.mrf.mxu0  ;;  %v3555_v42 = vld [vmem:[%s11391_s5 + $0x8] sm:$0xff] }
 0x89c   : > { %3166 = vmatprep.mubr.bf16.mxu1 %v11434_v51  ;;  %7090 = vmatprep.mubr.msk.bf16.mxu0 %vm7380_vm0, %v11435_v1  ;;  %v3587_v13 = vld [vmem:[%s11391_s5 + $0x108] sm:$0xff]  ;;  %v3586_v44 = vld [vmem:[%s11391_s5 + $0x100] sm:$0xff]  ;;  %v617_v4 = vadd.f32 %v7708_v33, %v8878_v63 }
 0x89d   : > { %3722 = vmatprep.subr.mxu1 %v11435_v1  ;;  %3922 = vmatprep.subr.mxu0 %v11435_v1 }
 0x89e   : > { %6264 = vmatmul.mubr.msk.bf16.gmra.mxu1 %vm552_vm2, %v3087_v57  ;;  %7091 = vmatmul.mubr.msk.bf16.gmra.mxu0 %vm552_vm2, %v3087_v57  ;;  %v3554_v57 = vld [vmem:[%s11391_s5] sm:$0xff] }
 0x89f   : > { %3723 = vmatpush1.msra.mxu1 %v3557_v26  ;;  %3923 = vmatpush1.msra.mxu0 %v3589_v12  ;;  %v920_v26 = vadd.f32 %v7818_v48, %v8878_v63  ;;  %v3088_v12 = vpack.c.bf16 %v3083_v24, %v3083_v24  ;;  %v3617_v48 = vld [vmem:[%s11391_s5 + $0x1f8] sm:$0xff]  ;;  %v3583_v24 = vld [vmem:[%s11391_s5 + $0xe8] sm:$0xff] }
 0x8a0   : > { %3724 = vmatprep.subr.mxu1 %v11435_v1  ;;  %3924 = vmatprep.subr.mxu0 %v11435_v1 }
 0x8a1   : > { %3725 = vmatpush1.msra.mxu1 %v3556_v7  ;;  %3925 = vmatpush1.msra.mxu0 %v3588_v28  ;;  %v1038_v33 = vmax.f32 %v920_v26, 0.0  ;;  %v3584_v7 = vld [vmem:[%s11391_s5 + $0xf0] sm:$0xff]  ;;  %v3613_v26 = vld [vmem:[%s11391_s5 + $0x1d8] sm:$0xff] }
 0x8a2   : > { %3726 = vmatprep.subr.mxu1 %v11435_v1  ;;  %3926 = vmatprep.subr.mxu0 %v11435_v1  ;;  %v3616_v28 = vld [vmem:[%s11391_s5 + $0x1f0] sm:$0xff] }
 0x8a3   : > { %3727 = vmatpush1.msra.mxu1 %v3555_v42  ;;  %3927 = vmatpush1.msra.mxu0 %v3587_v13  ;;  %v3615_v42 = vld [vmem:[%s11391_s5 + $0x1e8] sm:$0xff]  ;;  %v3582_v13 = vld [vmem:[%s11391_s5 + $0xe0] sm:$0xff] }
 0x8a4   : > { %3728 = vmatprep.subr.mxu1 %v11435_v1  ;;  %3928 = vmatprep.subr.mxu0 %v11435_v1 }
 0x8a5   : > { %3729 = vmatpush1.msra.mxu1 %v3554_v57  ;;  %3929 = vmatpush1.msra.mxu0 %v3586_v44  ;;  %v3614_v57 = vld [vmem:[%s11391_s5 + $0x1e0] sm:$0xff]  ;;  %v3581_v44 = vld [vmem:[%s11391_s5 + $0xd8] sm:$0xff] }
 0x8a6   : > { %3176 = vmatprep.mubr.bf16.mxu1 %v11434_v51  ;;  %7094 = vmatprep.mubr.msk.bf16.mxu0 %vm7380_vm0, %v11435_v1  ;;  %v730_v51 = vmax.f32 %v617_v4, 0.0  ;;  %v3612_v4 = vld [vmem:[%s11391_s5 + $0x1d0] sm:$0xff] }
 0x8a7   : > { %3730 = vmatprep.subr.mxu1 %v11435_v1  ;;  %3930 = vmatprep.subr.mxu0 %v11435_v1 }
 0x8a8   : > { %6265 = vmatmul.mubr.msk.bf16.gmra.mxu1 %vm552_vm2, %v3088_v12  ;;  %7095 = vmatmul.mubr.msk.bf16.gmra.mxu0 %vm552_vm2, %v3088_v12  ;;  %v3580_v12 = vld [vmem:[%s11391_s5 + $0xd0] sm:$0xff] }
 0x8a9   : > { %3731 = vmatpush2.msra.mxu1 %v3585_v54  ;;  %3931 = vmatpush2.msra.mxu0 %v3617_v48  ;;  %v3579_v54 = vld [vmem:[%s11391_s5 + $0xc8] sm:$0xff] }
 0x8aa   : > { %3732 = vmatprep.subr.mxu1 %v11435_v1  ;;  %3762 = vmatprep.mubr.f32.mxu1 %v1038_v33  ;;  %v3611_v48 = vld [vmem:[%s11391_s5 + $0x1c8] sm:$0xff]  ;;  %v3578_v33 = vld [vmem:[%s11391_s5 + $0xc0] sm:$0xff] }
 0x8ab   : > { %3932 = vmatprep.subr.mxu0 %v11435_v1  ;;  %3962 = vmatprep.mubr.f32.mxu0 %v730_v51  ;;  %v3610_v51 = vld [vmem:[%s11391_s5 + $0x1c0] sm:$0xff] }
 0x8ac   : > { %3733 = vmatpush2.msra.mxu1 %v3584_v7  ;;  %3933 = vmatpush2.msra.mxu0 %v3616_v28  ;;  %v3577_v7 = vld [vmem:[%s11391_s5 + $0xb8] sm:$0xff] }
 0x8ad   : > { %3734 = vmatprep.subr.mxu1 %v11435_v1  ;;  %3934 = vmatprep.subr.mxu0 %v11435_v1  ;;  %v3609_v28 = vld [vmem:[%s11391_s5 + $0x1b8] sm:$0xff] }
 0x8ae   : > { %3735 = vmatpush2.msra.mxu1 %v3583_v24  ;;  %3935 = vmatpush2.msra.mxu0 %v3615_v42  ;;  %v3576_v24 = vld [vmem:[%s11391_s5 + $0xb0] sm:$0xff] }
 0x8af   : > { %3736 = vmatprep.subr.mxu1 %v11435_v1  ;;  %3936 = vmatprep.subr.mxu0 %v11435_v1  ;;  %v3608_v42 = vld [vmem:[%s11391_s5 + $0x1b0] sm:$0xff] }
 0x8b0   : > { %3737 = vmatpush2.msra.mxu1 %v3582_v13  ;;  %3937 = vmatpush2.msra.mxu0 %v3614_v57  ;;  %v3575_v13 = vld [vmem:[%s11391_s5 + $0xa8] sm:$0xff] }
 0x8b1   : > { %3738 = vmatprep.subr.mxu1 %v11435_v1  ;;  %3938 = vmatprep.subr.mxu0 %v11435_v1  ;;  %v3607_v57 = vld [vmem:[%s11391_s5 + $0x1a8] sm:$0xff] }
 0x8b2   : > { %3739 = vmatpush2.msra.mxu1 %v3581_v44  ;;  %3939 = vmatpush2.msra.mxu0 %v3613_v26  ;;  %v3574_v44 = vld [vmem:[%s11391_s5 + $0xa0] sm:$0xff] }
 0x8b3   : > { %3740 = vmatprep.subr.mxu1 %v11435_v1  ;;  %3940 = vmatprep.subr.mxu0 %v11435_v1  ;;  %v3606_v26 = vld [vmem:[%s11391_s5 + $0x1a0] sm:$0xff] }
 0x8b4   : > { %3741 = vmatpush2.msra.mxu1 %v3580_v12  ;;  %3941 = vmatpush2.msra.mxu0 %v3612_v4  ;;  %v3573_v12 = vld [vmem:[%s11391_s5 + $0x98] sm:$0xff] }
 0x8b5   : > { %3742 = vmatprep.subr.mxu1 %v11435_v1  ;;  %3942 = vmatprep.subr.mxu0 %v11435_v1  ;;  %v3605_v4 = vld [vmem:[%s11391_s5 + $0x198] sm:$0xff] }
 0x8b6   : > { %3743 = vmatpush2.msra.mxu1 %v3579_v54  ;;  %3943 = vmatpush2.msra.mxu0 %v3611_v48  ;;  %v3572_v54 = vld [vmem:[%s11391_s5 + $0x90] sm:$0xff] }
 0x8b7   : > { %3744 = vmatprep.subr.mxu1 %v11435_v1  ;;  %3944 = vmatprep.subr.mxu0 %v11435_v1  ;;  %v3604_v48 = vld [vmem:[%s11391_s5 + $0x190] sm:$0xff] }
 0x8b8   : > { %3745 = vmatpush2.msra.mxu1 %v3578_v33  ;;  %3945 = vmatpush2.msra.mxu0 %v3610_v51  ;;  %v603_v33 = vadd.f32 %v7690_v21, %v8878_v63  ;;  %v1237_v51 = vadd.f32 %v7946_v3, %v8878_v63  ;;  %v924_v21 = vadd.f32 %v7824_v58, %v8878_v63  ;;  %v3570_v3 = vld [vmem:[%s11391_s5 + $0x80] sm:$0xff] }
 0x8b9   : > { %3746 = vmatprep.subr.mxu1 %v11435_v1  ;;  %3946 = vmatprep.subr.mxu0 %v11435_v1  ;;  %v607_v58 = vadd.f32 %v7696_v25, %v8878_v63  ;;  %v3633_v25 = vld [vmem:[%s11391_s5 + $0x278] sm:$0xff] }
 0x8ba   : > { %3747 = vmatpush2.msra.mxu1 %v3577_v7  ;;  %3947 = vmatpush2.msra.mxu0 %v3609_v28  ;;  %v3571_v7 = vld [vmem:[%s11391_s5 + $0x88] sm:$0xff] }
 0x8bb   : > { %3748 = vmatprep.subr.mxu1 %v11435_v1  ;;  %3948 = vmatprep.subr.mxu0 %v11435_v1  ;;  %v3603_v28 = vld [vmem:[%s11391_s5 + $0x188] sm:$0xff] }
 0x8bc   : > { %3749 = vmatpush2.msra.mxu1 %v3576_v24  ;;  %3949 = vmatpush2.msra.mxu0 %v3608_v42  ;;  %v623_v24 = vadd.f32 %v7714_v37, %v8878_v63  ;;  %v3602_v42 = vld [vmem:[%s11391_s5 + $0x180] sm:$0xff]  ;;  %v721_v37 = vmax.f32 %v603_v33, 0.0 }
 0x8bd   : > { %3750 = vmatprep.subr.mxu1 %v11435_v1  ;;  %3950 = vmatprep.subr.mxu0 %v11435_v1 }
 0x8be   : > { %3751 = vmatpush2.msra.mxu1 %v3575_v13  ;;  %3951 = vmatpush2.msra.mxu0 %v3607_v57  ;;  %v479_v13 = vsub.s32 1, %v8839_v17  ;;  %v1355_v57 = vmax.f32 %v1237_v51, 0.0  ;;  %v1247_v51 = vadd.f32 %v7958_v36, %v8878_v63  ;;  %v3664_v36 = vld [vmem:[%s11391_s5 + $0x370] sm:$0xff] }
 0x8bf   : > { %3752 = vmatprep.subr.mxu1 %v11435_v1  ;;  %3952 = vmatprep.subr.mxu0 %v11435_v1 }
 0x8c0   : > { %3753 = vmatpush2.msra.mxu1 %v3574_v44  ;;  %3953 = vmatpush2.msra.mxu0 %v3606_v26  ;;  %v1241_v44 = vadd.f32 %v7952_v8, %v8878_v63  ;;  %v733_v26 = vmax.f32 %v623_v24, 0.0  ;;  %v3665_v8 = vld [vmem:[%s11391_s5 + $0x378] sm:$0xff] }
 0x8c1   : > { %3754 = vmatprep.subr.mxu1 %v11435_v1  ;;  %3954 = vmatprep.subr.mxu0 %v11435_v1 }
 0x8c2   : > { %3755 = vmatpush2.msra.mxu1 %v3573_v12  ;;  %3955 = vmatpush2.msra.mxu0 %v3605_v4  ;;  %v627_v12 = vadd.f32 %v7720_v41, %v8878_v63  ;;  %v1041_v4 = vmax.f32 %v924_v21, 0.0  ;;  %v724_v41 = vmax.f32 %v607_v58, 0.0  ;;  %v1358_v33 = vmax.f32 %v1241_v44, 0.0 }
 0x8c3   : > { %3756 = vmatprep.subr.mxu1 %v11435_v1  ;;  %3956 = vmatprep.subr.mxu0 %v11435_v1  ;;  %v483_v44 = vsub.s32 2, %v8839_v17 }
 0x8c4   : > { %3757 = vmatpush2.msra.mxu1 %v3572_v54  ;;  %3957 = vmatpush2.msra.mxu0 %v3604_v48  ;;  %v930_v54 = vadd.f32 %v7830_v62, %v8878_v63  ;;  %v9051_v48 = vrot.slane %v8867_v53, %v479_v13  ;;  %v613_v62 = vadd.f32 %v7702_v29, %v8878_v63  ;;  %v3632_v29 = vld [vmem:[%s11391_s5 + $0x270] sm:$0xff] }
 0x8c5   : > { %3758 = vmatprep.subr.mxu1 %v11435_v1  ;;  %3958 = vmatprep.subr.mxu0 %v11435_v1 }
 0x8c6   : > { %3759 = vmatpush2.msra.mxu1 %v3571_v7  ;;  %3959 = vmatpush2.msra.mxu0 %v3603_v28  ;;  %v619_v7 = vadd.f32 %v7712_v35, %v9051_v48  ;;  %v736_v28 = vmax.f32 %v627_v12, 0.0  ;;  %v922_v24 = vadd.f32 %v7822_v56, %v9051_v48  ;;  %v1044_v21 = vmax.f32 %v930_v54, 0.0 }
 0x8c7   : > { %3760 = vmatprep.subr.mxu1 %v11435_v1  ;;  %3960 = vmatprep.subr.mxu0 %v11435_v1  ;;  %v605_v35 = vadd.f32 %v7694_v23, %v9051_v48  ;;  %v1239_v56 = vadd.f32 %v7950_v5, %v9051_v48  ;;  %v3631_v23 = vld [vmem:[%s11391_s5 + $0x268] sm:$0xff]  ;;  %v1243_v12 = vadd.f32 %v7956_v9, %v9051_v48  ;;  %v3662_v9 = vld [vmem:[%s11391_s5 + $0x360] sm:$0xff] }
 0x8c8   : > { %3761 = vmatpush2.msra.mxu1 %v3570_v3  ;;  %3961 = vmatpush2.msra.mxu0 %v3602_v42  ;;  %v727_v3 = vmax.f32 %v613_v62, 0.0  ;;  %v1361_v42 = vmax.f32 %v1247_v51, 0.0  ;;  %v731_v13 = vmax.f32 %v619_v7, 0.0  ;;  %v1039_v58 = vmax.f32 %v922_v24, 0.0  ;;  %v3663_v5 = vld [vmem:[%s11391_s5 + $0x368] sm:$0xff] }
 0x8c9   : > { %3763 = vmatmul.mubr.f32.vlgmr.msra.gmra.mxu1 %v721_v37  ;;  %3963 = vmatmul.mubr.f32.vlgmr.msra.gmra.mxu0 %v1355_v57  ;;  %v625_v37 = vadd.f32 %v7718_v39, %v9051_v48  ;;  %v926_v57 = vadd.f32 %v7828_v60, %v9051_v48  ;;  %v722_v39 = vmax.f32 %v605_v35, 0.0  ;;  %v609_v60 = vadd.f32 %v7700_v27, %v9051_v48  ;;  %v3630_v27 = vld [vmem:[%s11391_s5 + $0x260] sm:$0xff] }
 0x8ca   : > { %3767 = vmatprep.mubr.f32.mxu1 %v1041_v4  ;;  %3967 = vmatprep.mubr.f32.mxu0 %v733_v26  ;;  %v1356_v26 = vmax.f32 %v1239_v56, 0.0  ;;  %v629_v54 = vadd.f32 %v7724_v43, %v9051_v48  ;;  %v932_v17 = vadd.f32 %v7834_v0, %v9051_v48  ;;  %v615_v0 = vadd.f32 %v7706_v31, %v9051_v48  ;;  %v3629_v31 = vld [vmem:[%s11391_s5 + $0x258] sm:$0xff]  ;;  %v11573_v56 = vld [vmem:[#allocation20_spill] sm:$0xff] }
 0x8cb   : > { %4098 = vmatprep.subr.mxu1 %v11435_v1  ;;  %4298 = vmatprep.subr.mxu0 %v11435_v1  ;;  %v734_v4 = vmax.f32 %v625_v37, 0.0  ;;  %v725_v43 = vmax.f32 %v609_v60, 0.0  ;;  %v1249_v62 = vadd.f32 %v7962_v40, %v9051_v48  ;;  %v3661_v40 = vld [vmem:[%s11391_s5 + $0x358] sm:$0xff] }
 0x8cc   : > { %4099 = vmatpush1.msra.mxu1 %v3633_v25  ;;  %4299 = vmatpush1.msra.mxu0 %v3665_v8  ;;  %v1042_v25 = vmax.f32 %v926_v57, 0.0  ;;  %v9103_v8 = vrot.slane %v8867_v53, %v483_v44  ;;  %v737_v51 = vmax.f32 %v629_v54, 0.0  ;;  %v1045_v7 = vmax.f32 %v932_v17, 0.0  ;;  %v11576_v60 = vld [vmem:[#allocation10_spill] sm:$0xff]  ;;  %v3659_v17 = vld [vmem:[%s11391_s5 + $0x348] sm:$0xff] }
 0x8cd   : > { %3768 = vmatmul.mubr.f32.gmra.mxu1 %v724_v41  ;;  %3968 = vmatmul.mubr.f32.gmra.mxu0 %v1358_v33  ;;  %v1359_v41 = vmax.f32 %v1243_v12, 0.0 }
 0x8ce   : > { %3772 = vmatprep.mubr.f32.mxu1 %v1044_v21  ;;  %3972 = vmatprep.mubr.f32.mxu0 %v736_v28  ;;  %v695_v33 = vadd.f32 %v7710_v34, %v9103_v8  ;;  %v1001_v53 = vadd.f32 %v7820_v52, %v9103_v8  ;;  %v684_v34 = vadd.f32 %v7692_v22, %v9103_v8  ;;  %v728_v28 = vmax.f32 %v615_v0, 0.0  ;;  %v11571_v52 = vld [vmem:[#allocation40_spill] sm:$0xff]  ;;  %v3628_v22 = vld [vmem:[%s11391_s5 + $0x250] sm:$0xff] }
 0x8cf   : > { %4100 = vmatprep.subr.mxu1 %v11435_v1  ;;  %4300 = vmatprep.subr.mxu0 %v11435_v1  ;;  %v1318_v24 = vadd.f32 %v11571_v52, %v9103_v8  ;;  %v1362_v21 = vmax.f32 %v1249_v62, 0.0 }
 0x8d0   : > { %4101 = vmatpush1.msra.mxu1 %v3632_v29  ;;  %4301 = vmatpush1.msra.mxu0 %v3664_v36  ;;  %v732_v29 = vmax.f32 %v695_v33, 0.0  ;;  %v11572_v36 = vld [vmem:[#allocation9_spill] sm:$0xff]  ;;  %v723_v37 = vmax.f32 %v684_v34, 0.0  ;;  %v3626_v34 = vld [vmem:[%s11391_s5 + $0x240] sm:$0xff] }
 0x8d1   : > { %3773 = vmatmul.mubr.f32.gmra.mxu1 %v727_v3  ;;  %3973 = vmatmul.mubr.f32.gmra.mxu0 %v1361_v42  ;;  %v700_v35 = vadd.f32 %v11572_v36, %v9103_v8  ;;  %v1040_v3 = vmax.f32 %v1001_v53, 0.0  ;;  %v1004_v42 = vadd.f32 %v11573_v56, %v9103_v8  ;;  %v11580_v53 = vld [vmem:[#allocation70_spill] sm:$0xff]  ;;  %v11583_v36 = vld [vmem:[#allocation115_spill] sm:$0xff]  ;;  %v11584_v56 = vld [vmem:[#allocation73_spill] sm:$0xff] }
 0x8d2   : > { %3777 = vmatprep.mubr.f32.mxu1 %v1039_v58  ;;  %3977 = vmatprep.mubr.f32.mxu0 %v731_v13  ;;  %v3660_v13 = vld [vmem:[%s11391_s5 + $0x350] sm:$0xff]  ;;  %v11574_v58 = vld [vmem:[#allocation7_spill] sm:$0xff] }
 0x8d3   : > { %4102 = vmatprep.subr.mxu1 %v11435_v1  ;;  %4302 = vmatprep.subr.mxu0 %v11435_v1  ;;  %v687_v57 = vadd.f32 %v11574_v58, %v9103_v8  ;;  %v1043_v12 = vmax.f32 %v1004_v42, 0.0  ;;  %v1574_v42 = vadd.f32 %v11584_v56, %v8878_v63  ;;  %v3625_v58 = vld [vmem:[%s11391_s5 + $0x238] sm:$0xff] }
 0x8d4   : > { %4103 = vmatpush1.msra.mxu1 %v3631_v23  ;;  %4303 = vmatpush1.msra.mxu0 %v3663_v5  ;;  %v1357_v23 = vmax.f32 %v1318_v24, 0.0  ;;  %v11575_v5 = vld [vmem:[#allocation41_spill] sm:$0xff] }
 0x8d5   : > { %3778 = vmatmul.mubr.f32.gmra.mxu1 %v722_v39  ;;  %3978 = vmatmul.mubr.f32.gmra.mxu0 %v1356_v26  ;;  %v1321_v44 = vadd.f32 %v11575_v5, %v9103_v8  ;;  %v735_v39 = vmax.f32 %v700_v35, 0.0  ;;  %v703_v26 = vadd.f32 %v11576_v60, %v9103_v8  ;;  %v2188_v35 = vadd.f32 %v11583_v36, %v8878_v63  ;;  %v11586_v5 = vld [vmem:[#allocation64_spill] sm:$0xff]  ;;  %v11587_v60 = vld [vmem:[#allocation118_spill] sm:$0xff] }
 0x8d6   : > { %3782 = vmatprep.mubr.f32.mxu1 %v1042_v25  ;;  %3982 = vmatprep.mubr.f32.mxu0 %v734_v4  ;;  %v11577_v4 = vld [vmem:[#allocation21_spill] sm:$0xff]  ;;  %v3627_v25 = vld [vmem:[%s11391_s5 + $0x248] sm:$0xff] }
 0x8d7   : > { %4104 = vmatprep.subr.mxu1 %v11435_v1  ;;  %4304 = vmatprep.subr.mxu0 %v11435_v1  ;;  %v1009_v54 = vadd.f32 %v11577_v4, %v9103_v8  ;;  %v1360_v0 = vmax.f32 %v1321_v44, 0.0  ;;  %v738_v33 = vmax.f32 %v703_v26, 0.0  ;;  %v1558_v44 = vadd.f32 %v11586_v5, %v8878_v63  ;;  %v11588_v4 = vld [vmem:[#allocation76_spill] sm:$0xff]  ;;  %v3622_v5 = vld [vmem:[%s11391_s5 + $0x220] sm:$0xff] }
 0x8d8   : > { %4105 = vmatpush1.msra.mxu1 %v3630_v27  ;;  %4305 = vmatpush1.msra.mxu0 %v3662_v9  ;;  %v726_v27 = vmax.f32 %v687_v57, 0.0  ;;  %v11578_v9 = vld [vmem:[#allocation8_spill] sm:$0xff]  ;;  %v3657_v57 = vld [vmem:[%s11391_s5 + $0x338] sm:$0xff]  ;;  %v2192_v26 = vadd.f32 %v11587_v60, %v8878_v63 }
 0x8d9   : > { %3783 = vmatmul.mubr.f32.gmra.mxu1 %v725_v43  ;;  %3983 = vmatmul.mubr.f32.gmra.mxu0 %v1359_v41  ;;  %v692_v43 = vadd.f32 %v11578_v9, %v9103_v8  ;;  %v11579_v41 = vld [vmem:[#allocation42_spill] sm:$0xff]  ;;  %v3624_v9 = vld [vmem:[%s11391_s5 + $0x230] sm:$0xff] }
 0x8da   : > { %3787 = vmatprep.mubr.f32.mxu1 %v1045_v7  ;;  %3987 = vmatprep.mubr.f32.mxu0 %v737_v51  ;;  %v1326_v62 = vadd.f32 %v11579_v41, %v9103_v8  ;;  %v1046_v51 = vmax.f32 %v1009_v54, 0.0  ;;  %v1568_v7 = vadd.f32 %v11580_v53, %v8878_v63  ;;  %v1578_v54 = vadd.f32 %v11588_v4, %v8878_v63  ;;  %v11590_v41 = vld [vmem:[#allocation67_spill] sm:$0xff]  ;;  %v11598_v60 = vld [vmem:[#allocation66_spill] sm:$0xff]  ;;  %v11599_v4 = vld [vmem:[#allocation120_spill] sm:$0xff] }
 0x8db   : > { %4106 = vmatprep.subr.mxu1 %v11435_v1  ;;  %4306 = vmatprep.subr.mxu0 %v11435_v1  ;;  %v729_v52 = vmax.f32 %v692_v43, 0.0  ;;  %v3656_v43 = vld [vmem:[%s11391_s5 + $0x330] sm:$0xff] }
 0x8dc   : > { %4107 = vmatpush1.msra.mxu1 %v3629_v31  ;;  %4307 = vmatpush1.msra.mxu0 %v3661_v40  ;;  %v11581_v31 = vld [vmem:[#allocation88_spill] sm:$0xff]  ;;  %v1363_v24 = vmax.f32 %v1326_v62, 0.0  ;;  %v1564_v62 = vadd.f32 %v11590_v41, %v8878_v63  ;;  %v3621_v41 = vld [vmem:[%s11391_s5 + $0x218] sm:$0xff] }
 0x8dd   : > { %3788 = vmatmul.mubr.f32.gmra.mxu1 %v728_v28  ;;  %3988 = vmatmul.mubr.f32.gmra.mxu0 %v1362_v21  ;;  %v1871_v40 = vadd.f32 %v11581_v31, %v8878_v63  ;;  %v3658_v28 = vld [vmem:[%s11391_s5 + $0x340] sm:$0xff]  ;;  %v11582_v21 = vld [vmem:[#allocation61_spill] sm:$0xff] }
 0x8de   : > { %3792 = vmatprep.mubr.f32.mxu1 %v1040_v3  ;;  %3992 = vmatprep.mubr.f32.mxu0 %v732_v29  ;;  %v1554_v29 = vadd.f32 %v11582_v21, %v8878_v63  ;;  %v1681_v3 = vmax.f32 %v1568_v7, 0.0  ;;  %v11592_v7 = vld [vmem:[#allocation72_spill] sm:$0xff] }
 0x8df   : > { %4108 = vmatprep.subr.mxu1 %v11435_v1  ;;  %4308 = vmatprep.subr.mxu0 %v11435_v1  ;;  %v1570_v31 = vadd.f32 %v11592_v7, %v9051_v48  ;;  %v3655_v21 = vld [vmem:[%s11391_s5 + $0x328] sm:$0xff] }
 0x8e0   : > { %4109 = vmatpush1.msra.mxu1 %v3628_v22  ;;  %4309 = vmatpush1.msra.mxu0 %v3660_v13  ;;  %v1989_v22 = vmax.f32 %v1871_v40, 0.0  ;;  %v11585_v13 = vld [vmem:[#allocation91_spill] sm:$0xff]  ;;  %v1687_v40 = vmax.f32 %v1578_v54, 0.0  ;;  %v2194_v54 = vadd.f32 %v11599_v4, %v9051_v48  ;;  %v11610_v4 = vld [vmem:[#allocation65_spill] sm:$0xff] }
 0x8e1   : > { %3793 = vmatmul.mubr.f32.gmra.mxu1 %v723_v37  ;;  %3993 = vmatmul.mubr.f32.gmra.mxu0 %v1357_v23  ;;  %v1875_v37 = vadd.f32 %v11585_v13, %v8878_v63  ;;  %v1672_v23 = vmax.f32 %v1554_v29, 0.0  ;;  %v11594_v29 = vld [vmem:[#allocation63_spill] sm:$0xff] }
 0x8e2   : > { %3797 = vmatprep.mubr.f32.mxu1 %v1043_v12  ;;  %3997 = vmatprep.mubr.f32.mxu0 %v735_v39  ;;  %v2306_v39 = vmax.f32 %v2188_v35, 0.0  ;;  %v1684_v12 = vmax.f32 %v1574_v42, 0.0  ;;  %v1556_v36 = vadd.f32 %v11594_v29, %v9051_v48  ;;  %v1678_v35 = vmax.f32 %v1564_v62, 0.0  ;;  %v11596_v13 = vld [vmem:[#allocation75_spill] sm:$0xff]  ;;  %v3653_v62 = vld [vmem:[%s11391_s5 + $0x318] sm:$0xff] }
 0x8e3   : > { %4110 = vmatprep.subr.mxu1 %v11435_v1  ;;  %4310 = vmatprep.subr.mxu0 %v11435_v1  ;;  %v2310_v7 = vmax.f32 %v2194_v54, 0.0  ;;  %v1638_v54 = vadd.f32 %v11610_v4, %v9103_v8  ;;  %v3678_v4 = vld [vmem:[%s11391_s5 + $0x3e0] sm:$0xff] }
 0x8e4   : > { %4111 = vmatpush1.msra.mxu1 %v3627_v25  ;;  %4311 = vmatpush1.msra.mxu0 %v3659_v17  ;;  %v1992_v25 = vmax.f32 %v1875_v37, 0.0  ;;  %v11589_v17 = vld [vmem:[#allocation94_spill] sm:$0xff]  ;;  %v1576_v37 = vadd.f32 %v11596_v13, %v9051_v48 }
 0x8e5   : > { %3798 = vmatmul.mubr.f32.gmra.mxu1 %v726_v27  ;;  %3998 = vmatmul.mubr.f32.gmra.mxu0 %v1360_v0  ;;  %v1881_v27 = vadd.f32 %v11589_v17, %v8878_v63  ;;  %v1675_v0 = vmax.f32 %v1558_v44, 0.0  ;;  %v3654_v44 = vld [vmem:[%s11391_s5 + $0x320] sm:$0xff]  ;;  %v11600_v17 = vld [vmem:[#allocation78_spill] sm:$0xff] }
 0x8e6   : > { %3802 = vmatprep.mubr.f32.mxu1 %v1046_v51  ;;  %4002 = vmatprep.mubr.f32.mxu0 %v738_v33  ;;  %v2309_v33 = vmax.f32 %v2192_v26, 0.0  ;;  %v11591_v51 = vld [vmem:[#allocation121_spill] sm:$0xff]  ;;  %v1560_v26 = vadd.f32 %v11598_v60, %v9051_v48  ;;  %v3619_v60 = vld [vmem:[%s11391_s5 + $0x208] sm:$0xff] }
 0x8e7   : > { %4112 = vmatprep.subr.mxu1 %v11435_v1  ;;  %4312 = vmatprep.subr.mxu0 %v11435_v1  ;;  %v2198_v53 = vadd.f32 %v11591_v51, %v8878_v63  ;;  %v11602_v51 = vld [vmem:[#allocation69_spill] sm:$0xff] }
 0x8e8   : > { %4113 = vmatpush1.msra.mxu1 %v3626_v34  ;;  %4313 = vmatpush1.msra.mxu0 %v3658_v28  ;;  %v11593_v34 = vld [vmem:[#allocation90_spill] sm:$0xff] }
 0x8e9   : > { %3803 = vmatmul.mubr.f32.gmra.mxu1 %v729_v52  ;;  %4003 = vmatmul.mubr.f32.gmra.mxu0 %v1363_v24  ;;  %v1873_v28 = vadd.f32 %v11593_v34, %v9051_v48  ;;  %v1995_v52 = vmax.f32 %v1881_v27, 0.0  ;;  %v3623_v24 = vld [vmem:[%s11391_s5 + $0x228] sm:$0xff]  ;;  %v2312_v42 = vmax.f32 %v2198_v53, 0.0  ;;  %v1580_v27 = vadd.f32 %v11600_v17, %v9051_v48  ;;  %v11604_v34 = vld [vmem:[#allocation71_spill] sm:$0xff] }
 0x8ea   : > { %3807 = vmatprep.mubr.f32.mxu1 %v1989_v22  ;;  %4007 = vmatprep.mubr.f32.mxu0 %v1681_v3  ;;  %v11595_v3 = vld [vmem:[#allocation117_spill] sm:$0xff]  ;;  %v1682_v22 = vmax.f32 %v1570_v31, 0.0  ;;  %v1566_v53 = vadd.f32 %v11602_v51, %v9051_v48  ;;  %v11603_v31 = vld [vmem:[#allocation123_spill] sm:$0xff] }
 0x8eb   : > { %4114 = vmatprep.subr.mxu1 %v11435_v1  ;;  %4314 = vmatprep.subr.mxu0 %v11435_v1  ;;  %v2190_v56 = vadd.f32 %v11595_v3, %v9051_v48  ;;  %v11606_v3 = vld [vmem:[#allocation62_spill] sm:$0xff]  ;;  %v11611_v17 = vld [vmem:[#allocation119_spill] sm:$0xff] }
 0x8ec   : > { %4115 = vmatpush1.msra.mxu1 %v3625_v58  ;;  %4315 = vmatpush1.msra.mxu0 %v3657_v57  ;;  %v1990_v58 = vmax.f32 %v1873_v28, 0.0  ;;  %v11597_v57 = vld [vmem:[#allocation93_spill] sm:$0xff]  ;;  %v1646_v28 = vadd.f32 %v11604_v34, %v9103_v8  ;;  %v3618_v51 = vld [vmem:[%s11391_s5 + $0x200] sm:$0xff] }
 0x8ed   : > { %3808 = vmatmul.mubr.f32.gmra.mxu1 %v1672_v23  ;;  %4008 = vmatmul.mubr.f32.gmra.mxu0 %v2306_v39  ;;  %v1877_v23 = vadd.f32 %v11597_v57, %v9051_v48  ;;  %v1673_v39 = vmax.f32 %v1556_v36, 0.0  ;;  %v3620_v36 = vld [vmem:[%s11391_s5 + $0x210] sm:$0xff]  ;;  %v11608_v57 = vld [vmem:[#allocation74_spill] sm:$0xff] }
 0x8ee   : > { %3812 = vmatprep.mubr.f32.mxu1 %v1992_v25  ;;  %4012 = vmatprep.mubr.f32.mxu0 %v1684_v12  ;;  %v2307_v12 = vmax.f32 %v2190_v56, 0.0  ;;  %v1685_v25 = vmax.f32 %v1576_v37, 0.0  ;;  %v1635_v56 = vadd.f32 %v11606_v3, %v9103_v8  ;;  %v3681_v3 = vld [vmem:[%s11391_s5 + $0x3f8] sm:$0xff] }
 0x8ef   : > { %4116 = vmatprep.subr.mxu1 %v11435_v1  ;;  %4316 = vmatprep.subr.mxu0 %v11435_v1 }
 0x8f0   : > { %4117 = vmatpush1.msra.mxu1 %v3624_v9  ;;  %4317 = vmatpush1.msra.mxu0 %v3656_v43  ;;  %v1993_v9 = vmax.f32 %v1877_v23, 0.0  ;;  %v11601_v43 = vld [vmem:[#allocation96_spill] sm:$0xff]  ;;  %v1651_v23 = vadd.f32 %v11608_v57, %v9103_v8  ;;  %v2509_v57 = vadd.f32 %v8544_v11, %v8878_v63  ;;  %v3646_v11 = vld [vmem:[%s11391_s5 + $0x2e0] sm:$0xff] }
 0x8f1   : > { %3813 = vmatmul.mubr.f32.gmra.mxu1 %v1675_v0  ;;  %4013 = vmatmul.mubr.f32.gmra.mxu0 %v2309_v33  ;;  %v1883_v0 = vadd.f32 %v11601_v43, %v9051_v48  ;;  %v1676_v33 = vmax.f32 %v1560_v26, 0.0  ;;  %v3651_v26 = vld [vmem:[%s11391_s5 + $0x308] sm:$0xff]  ;;  %v11612_v43 = vld [vmem:[#allocation77_spill] sm:$0xff] }
 0x8f2   : > { %3817 = vmatprep.mubr.f32.mxu1 %v1995_v52  ;;  %4017 = vmatprep.mubr.f32.mxu0 %v1687_v40  ;;  %v2200_v40 = vadd.f32 %v11603_v31, %v9051_v48  ;;  %v1688_v52 = vmax.f32 %v1580_v27, 0.0  ;;  %v2272_v27 = vadd.f32 %v11611_v17, %v9103_v8  ;;  %v11614_v31 = vld [vmem:[#allocation68_spill] sm:$0xff] }
 0x8f3   : > { %4118 = vmatprep.subr.mxu1 %v11435_v1  ;;  %4318 = vmatprep.subr.mxu0 %v11435_v1  ;;  %v1996_v29 = vmax.f32 %v1883_v0, 0.0  ;;  %v1654_v0 = vadd.f32 %v11612_v43, %v9103_v8 }
 0x8f4   : > { %4119 = vmatpush1.msra.mxu1 %v3623_v24  ;;  %4319 = vmatpush1.msra.mxu0 %v3655_v21  ;;  %v11605_v24 = vld [vmem:[#allocation89_spill] sm:$0xff]  ;;  %v2313_v37 = vmax.f32 %v2200_v40, 0.0  ;;  %v1643_v40 = vadd.f32 %v11614_v31, %v9103_v8  ;;  %v2311_v34 = vmax.f32 %v2272_v27, 0.0  ;;  %v2828_v27 = vadd.f32 %v8678_v2, %v9051_v48  ;;  %v3641_v2 = vld [vmem:[%s11391_s5 + $0x2b8] sm:$0xff] }
 0x8f5   : > { %3818 = vmatmul.mubr.f32.gmra.mxu1 %v1678_v35  ;;  %4018 = vmatmul.mubr.f32.gmra.mxu0 %v2312_v42  ;;  %v1952_v21 = vadd.f32 %v11605_v24, %v9103_v8  ;;  %v3652_v35 = vld [vmem:[%s11391_s5 + $0x310] sm:$0xff]  ;;  %v1679_v42 = vmax.f32 %v1566_v53, 0.0  ;;  %v3650_v53 = vld [vmem:[%s11391_s5 + $0x300] sm:$0xff]  ;;  %v1689_v24 = vmax.f32 %v1654_v0, 0.0  ;;  %v2511_v0 = vadd.f32 %v8548_v15, %v9051_v48 }
 0x8f6   : > { %3822 = vmatprep.mubr.f32.mxu1 %v1990_v58  ;;  %4022 = vmatprep.mubr.f32.mxu0 %v1682_v22  ;;  %v11607_v22 = vld [vmem:[#allocation116_spill] sm:$0xff]  ;;  %v1683_v58 = vmax.f32 %v1646_v28, 0.0  ;;  %v11615_v28 = vld [vmem:[#allocation122_spill] sm:$0xff]  ;;  %v3640_v15 = vld [vmem:[%s11391_s5 + $0x2b0] sm:$0xff] }
 0x8f7   : > { %4120 = vmatprep.subr.mxu1 %v11435_v1  ;;  %4320 = vmatprep.subr.mxu0 %v11435_v1  ;;  %v2269_v13 = vadd.f32 %v11607_v22, %v9103_v8 }
 0x8f8   : > { %4121 = vmatpush1.msra.mxu1 %v3622_v5  ;;  %4321 = vmatpush1.msra.mxu0 %v3654_v44  ;;  %v1991_v5 = vmax.f32 %v1952_v21, 0.0  ;;  %v11609_v44 = vld [vmem:[#allocation92_spill] sm:$0xff] }
 0x8f9   : > { %3823 = vmatmul.mubr.f32.gmra.mxu1 %v1673_v39  ;;  %4023 = vmatmul.mubr.f32.gmra.mxu0 %v2307_v12  ;;  %v1955_v39 = vadd.f32 %v11609_v44, %v9103_v8  ;;  %v1674_v12 = vmax.f32 %v1635_v56, 0.0  ;;  %v1680_v56 = vmax.f32 %v1643_v40, 0.0  ;;  %v3679_v44 = vld [vmem:[%s11391_s5 + $0x3e8] sm:$0xff] }
 0x8fa   : > { %3827 = vmatprep.mubr.f32.mxu1 %v1993_v9  ;;  %4027 = vmatprep.mubr.f32.mxu0 %v1685_v25  ;;  %v2308_v25 = vmax.f32 %v2269_v13, 0.0  ;;  %v1686_v9 = vmax.f32 %v1651_v23, 0.0  ;;  %v2826_v13 = vadd.f32 %v8674_v14, %v8878_v63  ;;  %v3647_v14 = vld [vmem:[%s11391_s5 + $0x2e8] sm:$0xff] }
 0x8fb   : > { %4122 = vmatprep.subr.mxu1 %v11435_v1  ;;  %4322 = vmatprep.subr.mxu0 %v11435_v1  ;;  %v3675_v40 = vld [vmem:[%s11391_s5 + $0x3c8] sm:$0xff] }
 0x8fc   : > { %4123 = vmatpush1.msra.mxu1 %v3621_v41  ;;  %4323 = vmatpush1.msra.mxu0 %v3653_v62  ;;  %v1994_v41 = vmax.f32 %v1955_v39, 0.0  ;;  %v11613_v62 = vld [vmem:[#allocation95_spill] sm:$0xff]  ;;  %v2943_v23 = vmax.f32 %v2826_v13, 0.0  ;;  %v2626_v39 = vmax.f32 %v2509_v57, 0.0 }
 0x8fd   : > { %3828 = vmatmul.mubr.f32.gmra.mxu1 %v1676_v33  ;;  %4028 = vmatmul.mubr.f32.gmra.mxu0 %v2310_v7  ;;  %v1960_v33 = vadd.f32 %v11613_v62, %v9103_v8  ;;  %v1677_v7 = vmax.f32 %v1638_v54, 0.0  ;;  %v2507_v54 = vadd.f32 %v8542_v6, %v9051_v48  ;;  %v3642_v6 = vld [vmem:[%s11391_s5 + $0x2c0] sm:$0xff]  ;;  %v2834_v62 = vadd.f32 %v8684_v45, %v9051_v48  ;;  %v3639_v45 = vld [vmem:[%s11391_s5 + $0x2a8] sm:$0xff] }
 0x8fe   : > { %3832 = vmatprep.mubr.f32.mxu1 %v1996_v29  ;;  %4032 = vmatprep.mubr.f32.mxu0 %v1688_v52  ;;  %v2277_v52 = vadd.f32 %v11615_v28, %v9103_v8  ;;  %v2519_v29 = vadd.f32 %v8556_v59, %v8878_v63  ;;  %v2505_v59 = vadd.f32 %v8538_v20, %v8878_v63  ;;  %v3680_v20 = vld [vmem:[%s11391_s5 + $0x3f0] sm:$0xff] }
 0x8ff   : > { %4124 = vmatprep.subr.mxu1 %v11435_v1  ;;  %4324 = vmatprep.subr.mxu0 %v11435_v1  ;;  %v1997_v21 = vmax.f32 %v1960_v33, 0.0  ;;  %v2624_v43 = vmax.f32 %v2507_v54, 0.0  ;;  %v3676_v33 = vld [vmem:[%s11391_s5 + $0x3d0] sm:$0xff]  ;;  %v2947_v31 = vmax.f32 %v2834_v62, 0.0 }
 0x900   : > { %4125 = vmatpush1.msra.mxu1 %v3620_v36  ;;  %4325 = vmatpush1.msra.mxu0 %v3652_v35  ;;  %v2822_v36 = vadd.f32 %v8668_v61, %v8878_v63  ;;  %v3649_v35 = vld [vmem:[%s11391_s5 + $0x2f8] sm:$0xff]  ;;  %v2632_v61 = vmax.f32 %v2519_v29, 0.0  ;;  %v3636_v29 = vld [vmem:[%s11391_s5 + $0x290] sm:$0xff] }
 0x901   : > { %3833 = vmatmul.mubr.f32.gmra.mxu1 %v1679_v42  ;;  %4033 = vmatmul.mubr.f32.gmra.mxu0 %v2313_v37  ;;  %v2314_v42 = vmax.f32 %v2277_v52, 0.0  ;;  %v3648_v37 = vld [vmem:[%s11391_s5 + $0x2f0] sm:$0xff]  ;;  %v3637_v52 = vld [vmem:[%s11391_s5 + $0x298] sm:$0xff] }
 0x902   : > { %3837 = vmatprep.mubr.f32.mxu1 %v1991_v5  ;;  %4037 = vmatprep.mubr.f32.mxu0 %v1683_v58  ;;  %v2940_v22 = vmax.f32 %v2822_v36, 0.0  ;;  %v2623_v58 = vmax.f32 %v2505_v59, 0.0  ;;  %v2832_v5 = vadd.f32 %v8680_v46, %v8878_v63  ;;  %v3645_v46 = vld [vmem:[%s11391_s5 + $0x2d8] sm:$0xff]  ;;  %v3674_v36 = vld [vmem:[%s11391_s5 + $0x3c0] sm:$0xff]  ;;  %v2911_v59 = vadd.f32 %v8682_v47, %v9103_v8  ;;  %v11625_v62 = vld [vmem:[#allocation45_spill] sm:$0xff] }
 0x903   : > { %4126 = vmatprep.subr.mxu1 %v11435_v1  ;;  %4326 = vmatprep.subr.mxu0 %v11435_v1  ;;  %v11619_v47 = vld [vmem:[#allocation43_spill] sm:$0xff] }
 0x904   : > { %4127 = vmatpush1.msra.mxu1 %v3619_v60  ;;  %4327 = vmatpush1.msra.mxu0 %v3651_v26  ;;  %v2515_v60 = vadd.f32 %v8550_v38, %v8878_v63  ;;  %v2824_v26 = vadd.f32 %v8672_v50, %v9051_v48  ;;  %v3644_v38 = vld [vmem:[%s11391_s5 + $0x2d0] sm:$0xff]  ;;  %v2948_v57 = vmax.f32 %v2911_v59, 0.0 }
 0x905   : > { %3838 = vmatmul.mubr.f32.gmra.mxu1 %v1674_v12  ;;  %4038 = vmatmul.mubr.f32.gmra.mxu0 %v2308_v25  ;;  %v2946_v12 = vmax.f32 %v2832_v5, 0.0  ;;  %v3643_v25 = vld [vmem:[%s11391_s5 + $0x2c8] sm:$0xff]  ;;  %v11620_v5 = vld [vmem:[#allocation22_spill] sm:$0xff] }
 0x906   : > { %3842 = vmatprep.mubr.f32.mxu1 %v1994_v41  ;;  %4042 = vmatprep.mubr.f32.mxu0 %v1686_v9  ;;  %v2629_v50 = vmax.f32 %v2515_v60, 0.0  ;;  %v2941_v17 = vmax.f32 %v2824_v26, 0.0  ;;  %v3677_v9 = vld [vmem:[%s11391_s5 + $0x3d8] sm:$0xff]  ;;  %v2944_v41 = vmax.f32 %v2828_v27, 0.0  ;;  %v3670_v26 = vld [vmem:[%s11391_s5 + $0x3a0] sm:$0xff] }
 0x907   : > { %4128 = vmatprep.subr.mxu1 %v11435_v1  ;;  %4328 = vmatprep.subr.mxu0 %v11435_v1  ;;  %v11621_v60 = vld [vmem:[#allocation46_spill] sm:$0xff] }
 0x908   : > { %4129 = vmatpush1.msra.mxu1 %v3618_v51  ;;  %4329 = vmatpush1.msra.mxu0 %v3650_v53  ;;  %v2627_v51 = vmax.f32 %v2511_v0, 0.0  ;;  %v2517_v53 = vadd.f32 %v8554_v16, %v9051_v48  ;;  %v3638_v16 = vld [vmem:[%s11391_s5 + $0x2a0] sm:$0xff]  ;;  %v11624_v0 = vld [vmem:[#allocation28_spill] sm:$0xff] }
 0x909   : > { %3843 = vmatmul.mubr.f32.gmra.mxu1 %v1677_v7  ;;  %4043 = vmatmul.mubr.f32.gmra.mxu0 %v2311_v34  ;;  %v2903_v7 = vadd.f32 %v8670_v30, %v9103_v8  ;;  %v11616_v34 = vld [vmem:[#allocation142_spill] sm:$0xff] }
 0x90a   : > { %3847 = vmatprep.mubr.f32.mxu1 %v1997_v21  ;;  %4047 = vmatprep.mubr.f32.mxu0 %v1689_v24  ;;  %v2586_v28 = vadd.f32 %v11616_v34, %v9103_v8  ;;  %v2630_v30 = vmax.f32 %v2517_v53, 0.0  ;;  %v2906_v21 = vadd.f32 %v8676_v10, %v9103_v8  ;;  %v3635_v10 = vld [vmem:[%s11391_s5 + $0x288] sm:$0xff]  ;;  %v3694_v53 = vld [vmem:[%s11391_s5 + $0x460] sm:$0xff] }
 0x90b   : > { %4130 = vmatprep.subr.mxu1 %v11435_v1  ;;  %4330 = vmatprep.subr.mxu0 %v11435_v1  ;;  %v2942_v24 = vmax.f32 %v2903_v7, 0.0  ;;  %v11627_v34 = vld [vmem:[#allocation48_spill] sm:$0xff] }
 0x90c   : > { %4131 = vmatpush2.msra.mxu1 %v3649_v35  ;;  %4331 = vmatpush2.msra.mxu0 %v3681_v3  ;;  %v2625_v35 = vmax.f32 %v2586_v28, 0.0  ;;  %v11617_v3 = vld [vmem:[#allocation143_spill] sm:$0xff]  ;;  %v1259_v28 = vadd.f32 %v11627_v34, %v9051_v48 }
 0x90d   : > { %3848 = vmatmul.mubr.f32.gmra.mxu1 %v1680_v56  ;;  %4048 = vmatmul.mubr.f32.gmra.mxu0 %v2314_v42  ;;  %v2589_v56 = vadd.f32 %v11617_v3, %v9103_v8  ;;  %v2945_v42 = vmax.f32 %v2906_v21, 0.0 }
 0x90e   : > { %3852 = vmatprep.mubr.f32.mxu1 %v2940_v22  ;;  %4052 = vmatprep.mubr.f32.mxu0 %v2632_v61  ;;  %v3634_v61 = vld [vmem:[%s11391_s5 + $0x280] sm:$0xff]  ;;  %v3673_v22 = vld [vmem:[%s11391_s5 + $0x3b8] sm:$0xff] }
 0x90f   : > { %4132 = vmatprep.subr.mxu1 %v11435_v1  ;;  %4332 = vmatprep.subr.mxu0 %v11435_v1  ;;  %v2628_v13 = vmax.f32 %v2589_v56, 0.0  ;;  %v11630_v56 = vld [vmem:[#allocation147_spill] sm:$0xff] }
 0x910   : > { %4133 = vmatpush2.msra.mxu1 %v3648_v37  ;;  %4333 = vmatpush2.msra.mxu0 %v3680_v20  ;;  %v11618_v37 = vld [vmem:[#allocation144_spill] sm:$0xff] }
 0x911   : > { %3853 = vmatmul.mubr.f32.gmra.mxu1 %v2623_v58  ;;  %4134 = vmatprep.subr.mxu1 %v11435_v1  ;;  %v2594_v20 = vadd.f32 %v11618_v37, %v9103_v8  ;;  %v1251_v58 = vadd.f32 %v11619_v47, %v8878_v63  ;;  %v11631_v47 = vld [vmem:[#allocation30_spill] sm:$0xff] }
 0x912   : > { %3857 = vmatprep.mubr.f32.mxu1 %v2943_v23  ;;  %4135 = vmatpush2.msra.mxu1 %v3647_v14  ;;  %v3672_v14 = vld [vmem:[%s11391_s5 + $0x3b0] sm:$0xff]  ;;  %v3671_v23 = vld [vmem:[%s11391_s5 + $0x3a8] sm:$0xff] }
 0x913   : > { %4136 = vmatprep.subr.mxu1 %v11435_v1  ;;  %4334 = vmatprep.subr.mxu0 %v11435_v1 }
 0x914   : > { %4137 = vmatpush2.msra.mxu1 %v3646_v11  ;;  %4335 = vmatpush2.msra.mxu0 %v3679_v44  ;;  %v934_v11 = vadd.f32 %v11620_v5, %v8878_v63  ;;  %v2631_v44 = vmax.f32 %v2594_v20, 0.0 }
 0x915   : > { %3858 = vmatmul.mubr.f32.gmra.mxu1 %v2626_v39  ;;  %4138 = vmatprep.subr.mxu1 %v11435_v1  ;;  %v1364_v39 = vmax.f32 %v1251_v58, 0.0  ;;  %v946_v58 = vadd.f32 %v11631_v47, %v9051_v48 }
 0x916   : > { %3862 = vmatprep.mubr.f32.mxu1 %v2946_v12  ;;  %4139 = vmatpush2.msra.mxu1 %v3645_v46  ;;  %v1257_v46 = vadd.f32 %v11621_v60, %v8878_v63  ;;  %v3669_v12 = vld [vmem:[%s11391_s5 + $0x398] sm:$0xff] }
 0x917   : > { %4140 = vmatprep.subr.mxu1 %v11435_v1  ;;  %4336 = vmatprep.subr.mxu0 %v11435_v1 }
 0x918   : > { %4141 = vmatpush2.msra.mxu1 %v3644_v38  ;;  %4337 = vmatpush2.msra.mxu0 %v3678_v4  ;;  %v1047_v38 = vmax.f32 %v934_v11, 0.0  ;;  %v11622_v4 = vld [vmem:[#allocation25_spill] sm:$0xff] }
 0x919   : > { %3863 = vmatmul.mubr.f32.gmra.mxu1 %v2629_v50  ;;  %4142 = vmatprep.subr.mxu1 %v11435_v1  ;;  %v940_v54 = vadd.f32 %v11622_v4, %v8878_v63  ;;  %v3697_v50 = vld [vmem:[%s11391_s5 + $0x478] sm:$0xff] }
 0x91a   : > { %3867 = vmatprep.mubr.f32.mxu1 %v2941_v17  ;;  %4143 = vmatpush2.msra.mxu1 %v3643_v25  ;;  %v1367_v25 = vmax.f32 %v1257_v46, 0.0  ;;  %v11623_v17 = vld [vmem:[#allocation49_spill] sm:$0xff] }
 0x91b   : > { %4144 = vmatprep.subr.mxu1 %v11435_v1  ;;  %4338 = vmatprep.subr.mxu0 %v11435_v1  ;;  %v1261_v27 = vadd.f32 %v11623_v17, %v8878_v63 }
 0x91c   : > { %4145 = vmatpush2.msra.mxu1 %v3642_v6  ;;  %4339 = vmatpush2.msra.mxu0 %v3677_v9  ;;  %v3696_v6 = vld [vmem:[%s11391_s5 + $0x470] sm:$0xff] }
 0x91d   : > { %3868 = vmatmul.mubr.f32.gmra.mxu1 %v2624_v43  ;;  %4146 = vmatprep.subr.mxu1 %v11435_v1  ;;  %v3668_v9 = vld [vmem:[%s11391_s5 + $0x390] sm:$0xff]  ;;  %v1050_v43 = vmax.f32 %v940_v54, 0.0  ;;  %v11634_v54 = vld [vmem:[#allocation23_spill] sm:$0xff] }
 0x91e   : > { %3872 = vmatprep.mubr.f32.mxu1 %v2944_v41  ;;  %4147 = vmatpush2.msra.mxu1 %v3641_v2  ;;  %v944_v2 = vadd.f32 %v11624_v0, %v8878_v63  ;;  %v3695_v41 = vld [vmem:[%s11391_s5 + $0x468] sm:$0xff]  ;;  %v3689_v0 = vld [vmem:[%s11391_s5 + $0x438] sm:$0xff] }
 0x91f   : > { %4148 = vmatprep.subr.mxu1 %v11435_v1  ;;  %4340 = vmatprep.subr.mxu0 %v11435_v1 }
 0x920   : > { %4149 = vmatpush2.msra.mxu1 %v3640_v15  ;;  %4341 = vmatpush2.msra.mxu0 %v3676_v33  ;;  %v1253_v15 = vadd.f32 %v11625_v62, %v9051_v48  ;;  %v1370_v33 = vmax.f32 %v1261_v27, 0.0 }
 0x921   : > { %3873 = vmatmul.mubr.f32.gmra.mxu1 %v2627_v51  ;;  %4150 = vmatprep.subr.mxu1 %v11435_v1  ;;  %v3667_v51 = vld [vmem:[%s11391_s5 + $0x388] sm:$0xff] }
 0x922   : > { %3877 = vmatprep.mubr.f32.mxu1 %v2947_v31  ;;  %4151 = vmatpush2.msra.mxu1 %v3639_v45  ;;  %v11626_v45 = vld [vmem:[#allocation24_spill] sm:$0xff]  ;;  %v1053_v31 = vmax.f32 %v944_v2, 0.0  ;;  %v11636_v2 = vld [vmem:[#allocation146_spill] sm:$0xff] }
 0x923   : > { %4152 = vmatprep.subr.mxu1 %v11435_v1  ;;  %4342 = vmatprep.subr.mxu0 %v11435_v1  ;;  %v936_v7 = vadd.f32 %v11626_v45, %v9051_v48 }
 0x924   : > { %4153 = vmatpush2.msra.mxu1 %v3638_v16  ;;  %4343 = vmatpush2.msra.mxu0 %v3675_v40  ;;  %v3666_v16 = vld [vmem:[%s11391_s5 + $0x380] sm:$0xff]  ;;  %v1365_v40 = vmax.f32 %v1253_v15, 0.0 }
 0x925   : > { %3878 = vmatmul.mubr.f32.gmra.mxu1 %v2630_v30  ;;  %4154 = vmatprep.subr.mxu1 %v11435_v1  ;;  %v3693_v30 = vld [vmem:[%s11391_s5 + $0x458] sm:$0xff] }
 0x926   : > { %3882 = vmatprep.mubr.f32.mxu1 %v2942_v24  ;;  %4155 = vmatpush2.msra.mxu1 %v3637_v52  ;;  %v1048_v52 = vmax.f32 %v936_v7, 0.0  ;;  %v11628_v24 = vld [vmem:[#allocation27_spill] sm:$0xff]  ;;  %v3688_v7 = vld [vmem:[%s11391_s5 + $0x430] sm:$0xff] }
 0x927   : > { %4156 = vmatprep.subr.mxu1 %v11435_v1  ;;  %4344 = vmatprep.subr.mxu0 %v11435_v1  ;;  %v942_v21 = vadd.f32 %v11628_v24, %v9051_v48  ;;  %v3687_v24 = vld [vmem:[%s11391_s5 + $0x428] sm:$0xff] }
 0x928   : > { %4157 = vmatpush2.msra.mxu1 %v3636_v29  ;;  %4345 = vmatpush2.msra.mxu0 %v3674_v36  ;;  %v3692_v29 = vld [vmem:[%s11391_s5 + $0x450] sm:$0xff]  ;;  %v1368_v36 = vmax.f32 %v1259_v28, 0.0 }
 0x929   : > { %3883 = vmatmul.mubr.f32.gmra.mxu1 %v2625_v35  ;;  %4158 = vmatprep.subr.mxu1 %v11435_v1  ;;  %v11629_v35 = vld [vmem:[#allocation51_spill] sm:$0xff]  ;;  %v1051_v20 = vmax.f32 %v942_v21, 0.0 }
 0x92a   : > { %3887 = vmatprep.mubr.f32.mxu1 %v2945_v42  ;;  %4159 = vmatpush2.msra.mxu1 %v3635_v10  ;;  %v1263_v3 = vadd.f32 %v11629_v35, %v9051_v48  ;;  %v2525_v10 = vadd.f32 %v11630_v56, %v8878_v63 }
 0x92b   : > { %4160 = vmatprep.subr.mxu1 %v11435_v1  ;;  %4346 = vmatprep.subr.mxu0 %v11435_v1 }
 0x92c   : > { %4161 = vmatpush2.msra.mxu1 %v3634_v61  ;;  %4347 = vmatpush2.msra.mxu0 %v3673_v22  ;;  %v3691_v22 = vld [vmem:[%s11391_s5 + $0x448] sm:$0xff]  ;;  %v1371_v5 = vmax.f32 %v1263_v3, 0.0  ;;  %v2635_v11 = vmax.f32 %v2525_v10, 0.0  ;;  %v11640_v10 = vld [vmem:[#allocation29_spill] sm:$0xff] }
 0x92d   : > { %3888 = vmatmul.mubr.f32.gmra.mxu1 %v2628_v13  ;;  %7098 = vmatprep.subr.mxu1 %v11435_v1 }
 0x92e   : > { %3892 = vmatprep.mubr.f32.mxu1 %v2948_v57  ;;  %4348 = vmatprep.subr.mxu0 %v11435_v1 }
 0x92f   : > { %4349 = vmatpush2.msra.mxu0 %v3672_v14  ;;  %v11632_v14 = vld [vmem:[#allocation44_spill] sm:$0xff] }
 0x930   : > { %4350 = vmatprep.subr.mxu0 %v11435_v1 }
 0x931   : > { %3893 = vmatmul.mubr.f32.gmra.mxu1 %v2631_v44  ;;  %4351 = vmatpush2.msra.mxu0 %v3671_v23  ;;  %v1329_v23 = vadd.f32 %v11632_v14, %v9103_v8  ;;  %v11633_v44 = vld [vmem:[#allocation150_spill] sm:$0xff] }
 0x932   : > { %4162 = vmatprep.mubr.f32.mxu1 %v1364_v39  ;;  %4352 = vmatprep.subr.mxu0 %v11435_v1  ;;  %v2529_v39 = vadd.f32 %v11633_v44, %v8878_v63  ;;  %v3685_v14 = vld [vmem:[%s11391_s5 + $0x418] sm:$0xff] }
 0x933   : > { %4353 = vmatpush2.msra.mxu0 %v3670_v26  ;;  %v1366_v27 = vmax.f32 %v1329_v23, 0.0 }
 0x934   : > { %4354 = vmatprep.subr.mxu0 %v11435_v1 }
 0x935   : > { %4163 = vmatmul.mubr.f32.vlgmr.msra.gmra.mxu1 %v1047_v38  ;;  %4355 = vmatpush2.msra.mxu0 %v3669_v12  ;;  %v3690_v12 = vld [vmem:[%s11391_s5 + $0x440] sm:$0xff] }
 0x936   : > { %4167 = vmatprep.mubr.f32.mxu1 %v1367_v25  ;;  %7099 = vmatpush3.msra.mxu1 %v3697_v50  ;;  %v1012_v50 = vadd.f32 %v11634_v54, %v9103_v8  ;;  %v1054_v25 = vmax.f32 %v946_v58, 0.0 }
 0x937   : > { %7100 = vmatprep.subr.mxu1 %v11435_v1  ;;  %4356 = vmatprep.subr.mxu0 %v11435_v1 }
 0x938   : > { %7101 = vmatpush3.msra.mxu1 %v3696_v6  ;;  %4357 = vmatpush2.msra.mxu0 %v3668_v9  ;;  %v11635_v6 = vld [vmem:[#allocation47_spill] sm:$0xff] }
 0x939   : > { %4168 = vmatmul.mubr.f32.gmra.mxu1 %v1050_v43  ;;  %7102 = vmatprep.subr.mxu1 %v11435_v1  ;;  %v1334_v9 = vadd.f32 %v11635_v6, %v9103_v8  ;;  %v2638_v43 = vmax.f32 %v2529_v39, 0.0  ;;  %v11643_v39 = vld [vmem:[#allocation97_spill] sm:$0xff] }
 0x93a   : > { %4172 = vmatprep.mubr.f32.mxu1 %v1370_v33  ;;  %7103 = vmatpush3.msra.mxu1 %v3695_v41  ;;  %v2521_v41 = vadd.f32 %v11636_v2, %v9051_v48  ;;  %v1049_v33 = vmax.f32 %v1012_v50, 0.0  ;;  %v11645_v6 = vld [vmem:[#allocation145_spill] sm:$0xff] }
 0x93b   : > { %4358 = vmatprep.subr.mxu0 %v11435_v1  ;;  %7104 = vmatprep.subr.mxu1 %v11435_v1 }
 0x93c   : > { %4359 = vmatpush2.msra.mxu0 %v3667_v51  ;;  %7105 = vmatpush3.msra.mxu1 %v3694_v53  ;;  %v11637_v51 = vld [vmem:[#allocation26_spill] sm:$0xff]  ;;  %v2633_v21 = vmax.f32 %v2521_v41, 0.0 }
 0x93d   : > { %4173 = vmatmul.mubr.f32.gmra.mxu1 %v1053_v31  ;;  %4360 = vmatprep.subr.mxu0 %v11435_v1  ;;  %v1017_v53 = vadd.f32 %v11637_v51, %v9103_v8  ;;  %v1369_v31 = vmax.f32 %v1334_v9, 0.0  ;;  %v2597_v9 = vadd.f32 %v11645_v6, %v9103_v8 }
 0x93e   : > { %4177 = vmatprep.mubr.f32.mxu1 %v1365_v40  ;;  %4361 = vmatpush2.msra.mxu0 %v3666_v16  ;;  %v11638_v16 = vld [vmem:[#allocation50_spill] sm:$0xff] }
 0x93f   : > { %7106 = vmatprep.subr.mxu1 %v11435_v1  ;;  %5004 = vmatprep.subr.mxu0 %v11435_v1  ;;  %v1337_v40 = vadd.f32 %v11638_v16, %v9103_v8  ;;  %v1052_v56 = vmax.f32 %v1017_v53, 0.0  ;;  %v3682_v53 = vld [vmem:[%s11391_s5 + $0x400] sm:$0xff] }
 0x940   : > { %v3138_v42 = vpop.f32.mrf.mxu1  ;;  %v9517_v59 = vpop.f32.mrf.mxu0  ;;  %7107 = vmatpush3.msra.mxu1 %v3693_v30 }
 0x941   : > { %4178 = vmatmul.mubr.f32.gmra.mxu1 %v1048_v52  ;;  %v3139_v61 = vadd.f32 %v3138_v42, %v8878_v63  ;;  %7108 = vmatprep.subr.mxu1 %v11435_v1  ;;  %v1020_v42 = vadd.f32 %v11640_v10, %v9103_v8 }
 0x942   : > { %4182 = vmatprep.mubr.f32.mxu1 %v1368_v36  ;;  %v3140_v13 = vpop.f32.mrf.mxu1  ;;  %v7080_v37 = vpop.f32.mrf.mxu0  ;;  %7109 = vmatpush3.msra.mxu1 %v3692_v29  ;;  %v11639_v29 = vld [vmem:[#allocation149_spill] sm:$0xff] }
 0x943   : > { %v3257_v57 = vmax.f32 %v3139_v61, 0.0  ;;  %7110 = vmatprep.subr.mxu1 %v11435_v1  ;;  %v3141_v30 = vadd.f32 %v3140_v13, %v9051_v48  ;;  %v2527_v36 = vadd.f32 %v11639_v29, %v9051_v48  ;;  %v3686_v61 = vld [vmem:[%s11391_s5 + $0x420] sm:$0xff]  ;;  %v11641_v13 = vld [vmem:[#allocation124_spill] sm:$0xff]  ;;  %v1055_v44 = vmax.f32 %v1020_v42, 0.0 }
 0x944   : > { %v3142_v60 = vpop.f32.mrf.mxu1  ;;  %v9531_v46 = vpop.f32.mrf.mxu0  ;;  %7111 = vmatpush3.msra.mxu1 %v3691_v22  ;;  %v1372_v22 = vmax.f32 %v1337_v40, 0.0  ;;  %v2202_v37 = vadd.f32 %v11641_v13, %v8878_v63 }
 0x945   : > { %4183 = vmatmul.mubr.f32.gmra.mxu1 %v1051_v20  ;;  %v3143_v26 = vadd.f32 %v3142_v60, %v8878_v63  ;;  %4053 = vmatmul.mubr.f32.gmra.mxu0 %v3257_v57  ;;  %v3258_v58 = vmax.f32 %v3141_v30, 0.0  ;;  %v2636_v23 = vmax.f32 %v2527_v36, 0.0  ;;  %v1885_v60 = vadd.f32 %v11643_v39, %v8878_v63  ;;  %v11648_v30 = vld [vmem:[#allocation148_spill] sm:$0xff]  ;;  %v11649_v36 = vld [vmem:[#allocation103_spill] sm:$0xff] }
 0x946   : > { %4187 = vmatprep.mubr.f32.mxu1 %v1371_v5  ;;  %v3144_v38 = vpop.f32.mrf.mxu1  ;;  %v7081_v4 = vpop.f32.mrf.mxu0  ;;  %4057 = vmatprep.mubr.f32.mxu0 %v2635_v11  ;;  %v11642_v5 = vld [vmem:[#allocation152_spill] sm:$0xff] }
 0x947   : > { %v3260_v17 = vmax.f32 %v3143_v26, 0.0  ;;  %7112 = vmatprep.subr.mxu1 %v11435_v1  ;;  %v3145_v57 = vadd.f32 %v3144_v38, %v9051_v48  ;;  %v2531_v11 = vadd.f32 %v11642_v5, %v9051_v48  ;;  %v2315_v38 = vmax.f32 %v2202_v37, 0.0  ;;  %v11644_v4 = vld [vmem:[#allocation127_spill] sm:$0xff] }
 0x948   : > { %7113 = vmatpush3.msra.mxu1 %v3690_v12  ;;  %v3684_v12 = vld [vmem:[%s11391_s5 + $0x410] sm:$0xff]  ;;  %v2208_v54 = vadd.f32 %v11644_v4, %v8878_v63  ;;  %v1998_v41 = vmax.f32 %v1885_v60, 0.0  ;;  %v11651_v37 = vld [vmem:[#allocation151_spill] sm:$0xff] }
 0x949   : > { %4188 = vmatmul.mubr.f32.gmra.mxu1 %v1054_v25  ;;  %4058 = vmatmul.mubr.f32.gmra.mxu0 %v3260_v17  ;;  %v3261_v17 = vmax.f32 %v3145_v57, 0.0 }
 0x94a   : > { %4192 = vmatprep.mubr.f32.mxu1 %v1366_v27  ;;  %v3148_v62 = vpop.f32.mrf.mxu1  ;;  %4062 = vmatprep.mubr.f32.mxu0 %v2638_v43  ;;  %v9547_v15 = vpop.f32.mrf.mxu0  ;;  %v3683_v27 = vld [vmem:[%s11391_s5 + $0x408] sm:$0xff]  ;;  %v2639_v43 = vmax.f32 %v2531_v11, 0.0 }
 0x94b   : > { %v3149_v45 = vadd.f32 %v3148_v62, %v8878_v63  ;;  %7114 = vmatprep.subr.mxu1 %v11435_v1  ;;  %v11646_v62 = vld [vmem:[#allocation100_spill] sm:$0xff] }
 0x94c   : > { %v3150_v34 = vpop.f32.mrf.mxu1  ;;  %v7084_v28 = vpop.f32.mrf.mxu0  ;;  %7115 = vmatpush3.msra.mxu1 %v3689_v0 }
 0x94d   : > { %4193 = vmatmul.mubr.f32.gmra.mxu1 %v1049_v33  ;;  %v3263_v52 = vmax.f32 %v3149_v45, 0.0  ;;  %7116 = vmatprep.subr.mxu1 %v11435_v1  ;;  %v3151_v26 = vadd.f32 %v3150_v34, %v9051_v48  ;;  %v1891_v33 = vadd.f32 %v11646_v62, %v8878_v63  ;;  %v2318_v45 = vmax.f32 %v2208_v54, 0.0 }
 0x94e   : > { %4197 = vmatprep.mubr.f32.mxu1 %v1369_v31  ;;  %v9565_v35 = vpop.f32.mrf.mxu1  ;;  %v9567_v3 = vpop.f32.mrf.mxu0  ;;  %7117 = vmatpush3.msra.mxu1 %v3688_v7  ;;  %v11647_v7 = vld [vmem:[#allocation130_spill] sm:$0xff]  ;;  %v3220_v34 = vadd.f32 %v9517_v59, %v9103_v8  ;;  %v2634_v28 = vmax.f32 %v2597_v9, 0.0 }
 0x94f   : > { %4063 = vmatmul.mubr.f32.gmra.mxu0 %v3263_v52  ;;  %7118 = vmatprep.subr.mxu1 %v11435_v1  ;;  %v3264_v51 = vmax.f32 %v3151_v26, 0.0  ;;  %v2212_v31 = vadd.f32 %v11647_v7, %v8878_v63  ;;  %v2602_v52 = vadd.f32 %v11648_v30, %v9103_v8  ;;  %v2001_v29 = vmax.f32 %v1891_v33, 0.0  ;;  %v11650_v59 = vld [vmem:[#allocation126_spill] sm:$0xff]  ;;  %v11657_v33 = vld [vmem:[#allocation11_spill] sm:$0xff]  ;;  %v11659_v30 = vld [vmem:[#allocation105_spill] sm:$0xff] }
 0x950   : > { %4067 = vmatprep.mubr.f32.mxu0 %v2633_v21  ;;  %v9577_v20 = vpop.f32.mrf.mxu1  ;;  %v7085_v47 = vpop.f32.mrf.mxu0  ;;  %7119 = vmatpush3.msra.mxu1 %v3687_v24  ;;  %v2204_v10 = vadd.f32 %v11650_v59, %v9051_v48  ;;  %v11655_v9 = vld [vmem:[#allocation102_spill] sm:$0xff] }
 0x951   : > { %4198 = vmatmul.mubr.f32.gmra.mxu1 %v1052_v56  ;;  %7120 = vmatprep.subr.mxu1 %v11435_v1  ;;  %v1895_v56 = vadd.f32 %v11649_v36, %v8878_v63  ;;  %v2321_v42 = vmax.f32 %v2212_v31, 0.0  ;;  %v2637_v13 = vmax.f32 %v2602_v52, 0.0  ;;  %v2605_v47 = vadd.f32 %v11651_v37, %v9103_v8  ;;  %v11658_v7 = vld [vmem:[#allocation34_spill] sm:$0xff] }
 0x952   : > { %4202 = vmatprep.mubr.f32.mxu1 %v1372_v22  ;;  %7121 = vmatpush3.msra.mxu1 %v3686_v61  ;;  %v3259_v61 = vmax.f32 %v3220_v34, 0.0  ;;  %v3223_v22 = vadd.f32 %v9531_v46, %v9103_v8  ;;  %v2316_v11 = vmax.f32 %v2204_v10, 0.0  ;;  %v954_v31 = vadd.f32 %v11658_v7, %v8878_v63  ;;  %v11669_v7 = vld [vmem:[#allocation13_spill] sm:$0xff] }
 0x953   : > { %4068 = vmatmul.mubr.f32.gmra.mxu0 %v3258_v58  ;;  %7122 = vmatprep.subr.mxu1 %v11435_v1  ;;  %v2004_v5 = vmax.f32 %v1895_v56, 0.0  ;;  %v2640_v54 = vmax.f32 %v2605_v47, 0.0  ;;  %v1897_v52 = vadd.f32 %v11659_v30, %v9051_v48 }
 0x954   : > { %4072 = vmatprep.mubr.f32.mxu0 %v2636_v23  ;;  %v9595_v50 = vpop.f32.mrf.mxu1  ;;  %v9597_v25 = vpop.f32.mrf.mxu0  ;;  %7123 = vmatpush3.msra.mxu1 %v3685_v14  ;;  %v11652_v14 = vld [vmem:[#allocation99_spill] sm:$0xff]  ;;  %v3262_v26 = vmax.f32 %v3223_v22, 0.0  ;;  %v1059_v22 = vmax.f32 %v954_v31, 0.0  ;;  %v635_v31 = vadd.f32 %v11669_v7, %v9051_v48 }
 0x955   : > { %4203 = vmatmul.mubr.f32.gmra.mxu1 %v1055_v44  ;;  %7124 = vmatprep.subr.mxu1 %v11435_v1  ;;  %v1887_v23 = vadd.f32 %v11652_v14, %v9051_v48  ;;  %v11653_v44 = vld [vmem:[#allocation129_spill] sm:$0xff]  ;;  %v11678_v7 = vld [vmem:[#allocation15_spill] sm:$0xff] }
 0x956   : > { %4207 = vmatprep.mubr.f32.mxu1 %v2315_v38  ;;  %v9605_v0 = vpop.f32.mrf.mxu1  ;;  %v7088_v2 = vpop.f32.mrf.mxu0  ;;  %7125 = vmatpush3.msra.mxu1 %v3684_v12  ;;  %v2210_v39 = vadd.f32 %v11653_v44, %v9051_v48  ;;  %v3228_v12 = vadd.f32 %v9547_v15, %v9103_v8  ;;  %v11654_v38 = vld [vmem:[#allocation31_spill] sm:$0xff] }
 0x957   : > { %4073 = vmatmul.mubr.f32.gmra.mxu0 %v3261_v17  ;;  %7126 = vmatprep.subr.mxu1 %v11435_v1  ;;  %v950_v4 = vadd.f32 %v11654_v38, %v8878_v63  ;;  %v1999_v6 = vmax.f32 %v1887_v23, 0.0  ;;  %v11663_v23 = vld [vmem:[#allocation98_spill] sm:$0xff] }
 0x958   : > { %4077 = vmatprep.mubr.f32.mxu0 %v2639_v43  ;;  %v9615_v16 = vpop.f32.mrf.mxu1  ;;  %v9617_v40 = vpop.f32.mrf.mxu0  ;;  %7127 = vmatpush3.msra.mxu1 %v3683_v27  ;;  %v1893_v43 = vadd.f32 %v11655_v9, %v9051_v48  ;;  %v2319_v2 = vmax.f32 %v2210_v39, 0.0  ;;  %v11664_v39 = vld [vmem:[#allocation128_spill] sm:$0xff] }
 0x959   : > { %4208 = vmatmul.mubr.f32.gmra.mxu1 %v1998_v41  ;;  %7128 = vmatprep.subr.mxu1 %v11435_v1  ;;  %v11656_v41 = vld [vmem:[#allocation132_spill] sm:$0xff] }
 0x95a   : > { %4212 = vmatprep.mubr.f32.mxu1 %v2318_v45  ;;  %v9624_v24 = vpop.f32.mrf.mxu1  ;;  %v7089_v21 = vpop.f32.mrf.mxu0  ;;  %7129 = vmatpush3.msra.mxu1 %v3682_v53  ;;  %v2214_v62 = vadd.f32 %v11656_v41, %v9051_v48  ;;  %v3265_v53 = vmax.f32 %v3228_v12, 0.0  ;;  %v1056_v45 = vmax.f32 %v950_v4, 0.0  ;;  %v11665_v4 = vld [vmem:[#allocation17_spill] sm:$0xff] }
 0x95b   : > { %4078 = vmatmul.mubr.f32.gmra.mxu0 %v3264_v51  ;;  %5293 = vmatprep.subr.mxu1 %v11435_v1  ;;  %v633_v51 = vadd.f32 %v11657_v33, %v8878_v63  ;;  %v11660_v21 = vld [vmem:[#allocation125_spill] sm:$0xff] }
 0x95c   : > { %4082 = vmatprep.mubr.f32.mxu0 %v2634_v28  ;;  %v2002_v28 = vmax.f32 %v1893_v43, 0.0  ;;  %v2322_v36 = vmax.f32 %v2214_v62, 0.0 }
 0x95d   : > { %4213 = vmatmul.mubr.f32.gmra.mxu1 %v2001_v29  ;;  %v2280_v29 = vadd.f32 %v11660_v21, %v9103_v8  ;;  %v739_v10 = vmax.f32 %v633_v51, 0.0 }
 0x95e   : > { %4217 = vmatprep.mubr.f32.mxu1 %v2321_v42  ;;  %v9635_v58 = vpop.f32.mrf.mxu1  ;;  %v9637_v57 = vpop.f32.mrf.mxu0  ;;  %v11661_v42 = vld [vmem:[#allocation14_spill] sm:$0xff] }
 0x95f   : > { %4083 = vmatmul.mubr.f32.gmra.mxu0 %v3259_v61  ;;  %v637_v61 = vadd.f32 %v11661_v42, %v8878_v63  ;;  %v2317_v44 = vmax.f32 %v2280_v29, 0.0 }
 0x960   : > { %4087 = vmatprep.mubr.f32.mxu0 %v2637_v13  ;;  %v9643_v46 = vpop.f32.mrf.mxu1  ;;  %v7092_v60 = vpop.f32.mrf.mxu0  ;;  %v11662_v13 = vld [vmem:[#allocation37_spill] sm:$0xff] }
 0x961   : > { %4218 = vmatmul.mubr.f32.gmra.mxu1 %v2004_v5  ;;  %v960_v37 = vadd.f32 %v11662_v13, %v8878_v63  ;;  %v1963_v5 = vadd.f32 %v11663_v23, %v9103_v8  ;;  %v2285_v60 = vadd.f32 %v11664_v39, %v9103_v8  ;;  %v742_v38 = vmax.f32 %v637_v61, 0.0  ;;  %v11672_v13 = vld [vmem:[#allocation16_spill] sm:$0xff]  ;;  %v11673_v23 = vld [vmem:[#allocation39_spill] sm:$0xff] }
 0x962   : > { %4222 = vmatprep.mubr.f32.mxu1 %v2316_v11  ;;  %v9649_v17 = vpop.f32.mrf.mxu1  ;;  %v9651_v27 = vpop.f32.mrf.mxu0  ;;  %v2005_v11 = vmax.f32 %v1897_v52, 0.0  ;;  %v11670_v52 = vld [vmem:[#allocation36_spill] sm:$0xff]  ;;  %v3153_v61 = vadd.f32 %v9565_v35, %v8878_v63  ;;  %v3159_v35 = vadd.f32 %v9595_v50, %v8878_v63  ;;  %v3163_v50 = vadd.f32 %v9615_v16, %v8878_v63 }
 0x963   : > { %4088 = vmatmul.mubr.f32.gmra.mxu0 %v3262_v26  ;;  %v1062_v43 = vmax.f32 %v960_v37, 0.0  ;;  %v2000_v62 = vmax.f32 %v1963_v5, 0.0  ;;  %v2320_v51 = vmax.f32 %v2285_v60, 0.0  ;;  %v956_v21 = vadd.f32 %v11670_v52, %v9051_v48 }
 0x964   : > { %4092 = vmatprep.mubr.f32.mxu0 %v2640_v54  ;;  %v7093_v15 = vpop.f32.mrf.mxu0  ;;  %v9661_v34 = vpop.f32.mrf.mxu1  ;;  %v643_v54 = vadd.f32 %v11665_v4, %v8878_v63  ;;  %v639_v37 = vadd.f32 %v11672_v13, %v9051_v48  ;;  %v962_v5 = vadd.f32 %v11673_v23, %v9051_v48  ;;  %v3266_v39 = vmax.f32 %v3153_v61, 0.0 }
 0x965   : > { %4223 = vmatmul.mubr.f32.gmra.mxu1 %v1999_v6  ;;  %v11666_v6 = vld [vmem:[#allocation33_spill] sm:$0xff]  ;;  %v3272_v16 = vmax.f32 %v3163_v50, 0.0  ;;  %v11685_v50 = vld [vmem:[#allocation82_spill] sm:$0xff] }
 0x966   : > { %4227 = vmatprep.mubr.f32.mxu1 %v2319_v2  ;;  %v952_v9 = vadd.f32 %v11666_v6, %v9051_v48  ;;  %v11667_v15 = vld [vmem:[#allocation101_spill] sm:$0xff]  ;;  %v743_v60 = vmax.f32 %v639_v37, 0.0 }
 0x967   : > { %4093 = vmatmul.mubr.f32.gmra.mxu0 %v3265_v53  ;;  %v1968_v33 = vadd.f32 %v11667_v15, %v9103_v8  ;;  %v11668_v53 = vld [vmem:[#allocation131_spill] sm:$0xff] }
 0x968   : > { %4362 = vmatprep.mubr.f32.mxu0 %v1056_v45  ;;  %v9667_v56 = vpop.f32.mrf.mxu1  ;;  %v9669_v59 = vpop.f32.mrf.mxu0  ;;  %v2288_v45 = vadd.f32 %v11668_v53, %v9103_v8  ;;  %v1057_v30 = vmax.f32 %v952_v9, 0.0  ;;  %v3269_v9 = vmax.f32 %v3159_v35, 0.0  ;;  %v11677_v15 = vld [vmem:[#allocation35_spill] sm:$0xff]  ;;  %v3155_v53 = vadd.f32 %v9577_v20, %v9051_v48 }
 0x969   : > { %4228 = vmatmul.mubr.f32.gmra.mxu1 %v2002_v28  ;;  %v745_v28 = vmax.f32 %v643_v54, 0.0  ;;  %v2003_v29 = vmax.f32 %v1968_v33, 0.0  ;;  %v1063_v54 = vmax.f32 %v962_v5, 0.0  ;;  %v1028_v33 = vadd.f32 %v11677_v15, %v9103_v8  ;;  %v11682_v5 = vld [vmem:[#allocation79_spill] sm:$0xff]  ;;  %v11686_v15 = vld [vmem:[#allocation112_spill] sm:$0xff] }
 0x96a   : > { %4232 = vmatprep.mubr.f32.mxu1 %v2322_v36  ;;  %v9675_v47 = vpop.f32.mrf.mxu1  ;;  %v7096_v14 = vpop.f32.mrf.mxu0  ;;  %v11671_v36 = vld [vmem:[#allocation104_spill] sm:$0xff]  ;;  %v2323_v42 = vmax.f32 %v2288_v45, 0.0  ;;  %v3161_v20 = vadd.f32 %v9605_v0, %v9051_v48  ;;  %v3165_v0 = vadd.f32 %v9624_v24, %v9051_v48 }
 0x96b   : > { %4363 = vmatmul.mubr.f32.vlgmr.msra.gmra.mxu0 %v739_v10  ;;  %v1971_v10 = vadd.f32 %v11671_v36, %v9103_v8  ;;  %v1060_v14 = vmax.f32 %v956_v21, 0.0  ;;  %v2838_v21 = vadd.f32 %v8690_v32, %v9051_v48  ;;  %v2844_v32 = vadd.f32 %v8696_v55, %v9051_v48 }
 0x96c   : > { %4367 = vmatprep.mubr.f32.mxu0 %v1059_v22  ;;  %v3182_v26 = vpop.f32.mrf.mxu1  ;;  %v3254_v12 = vpop.f32.mrf.mxu0  ;;  %v740_v22 = vmax.f32 %v635_v31, 0.0  ;;  %v711_v31 = vadd.f32 %v11678_v7, %v9103_v8 }
 0x96d   : > { %4233 = vmatmul.mubr.f32.gmra.mxu1 %v2005_v11  ;;  %v2006_v11 = vmax.f32 %v1971_v10, 0.0  ;;  %v11674_v26 = vld [vmem:[#allocation19_spill] sm:$0xff]  ;;  %v11680_v10 = vld [vmem:[#allocation18_spill] sm:$0xff]  ;;  %v2950_v37 = vmax.f32 %v2838_v21, 0.0  ;;  %v2953_v55 = vmax.f32 %v2844_v32, 0.0  ;;  %v3239_v32 = vadd.f32 %v9617_v40, %v9103_v8 }
 0x96e   : > { %4237 = vmatprep.mubr.f32.mxu1 %v2317_v44  ;;  %v3183_v2 = vpop.f32.mrf.mxu1  ;;  %v7097_v41 = vpop.f32.mrf.mxu0  ;;  %v2836_v44 = vadd.f32 %v8686_v18, %v8878_v63  ;;  %v645_v12 = vadd.f32 %v11674_v26, %v9051_v48  ;;  %v2842_v18 = vadd.f32 %v8692_v19, %v8878_v63  ;;  %v2846_v19 = vadd.f32 %v8698_v49, %v8878_v63 }
 0x96f   : > { %4368 = vmatmul.mubr.f32.gmra.mxu0 %v742_v38  ;;  %v11675_v38 = vld [vmem:[#allocation32_spill] sm:$0xff]  ;;  %v744_v36 = vmax.f32 %v711_v31, 0.0  ;;  %v3236_v31 = vadd.f32 %v9597_v25, %v9103_v8 }
 0x970   : > { %4372 = vmatprep.mubr.f32.mxu0 %v1062_v43  ;;  %v1025_v4 = vadd.f32 %v11675_v38, %v9103_v8  ;;  %v2949_v6 = vmax.f32 %v2836_v44, 0.0  ;;  %v11676_v43 = vld [vmem:[#allocation12_spill] sm:$0xff]  ;;  %v746_v41 = vmax.f32 %v645_v12, 0.0  ;;  %v2955_v49 = vmax.f32 %v2846_v19, 0.0  ;;  %v11684_v38 = vld [vmem:[#allocation165_spill] sm:$0xff]  ;;  %v11687_v19 = vld [vmem:[#allocation162_spill] sm:$0xff] }
 0x971   : > { %4238 = vmatmul.mubr.f32.gmra.mxu1 %v2000_v62  ;;  %v708_v2 = vadd.f32 %v11676_v43, %v9103_v8  ;;  %v1588_v43 = vadd.f32 %v11685_v50, %v8878_v63 }
 0x972   : > { %4242 = vmatprep.mubr.f32.mxu1 %v2320_v51  ;;  %v1058_v62 = vmax.f32 %v1025_v4, 0.0  ;;  %v2952_v51 = vmax.f32 %v2842_v18, 0.0  ;;  %v2848_v4 = vadd.f32 %v11684_v38, %v9051_v48  ;;  %v3273_v18 = vmax.f32 %v3165_v0, 0.0 }
 0x973   : > { %4373 = vmatmul.mubr.f32.gmra.mxu0 %v745_v28  ;;  %v741_v45 = vmax.f32 %v708_v2, 0.0  ;;  %v1061_v28 = vmax.f32 %v1028_v33, 0.0  ;;  %v1911_v33 = vadd.f32 %v11686_v15, %v8878_v63  ;;  %v11696_v15 = vld [vmem:[#allocation52_spill] sm:$0xff] }
 0x974   : > { %4377 = vmatprep.mubr.f32.mxu0 %v1057_v30  ;;  %v11679_v30 = vld [vmem:[#allocation38_spill] sm:$0xff] }
 0x975   : > { %4243 = vmatmul.mubr.f32.gmra.mxu1 %v2003_v29  ;;  %v1033_v52 = vadd.f32 %v11679_v30, %v9103_v8  ;;  %v3267_v29 = vmax.f32 %v3155_v53, 0.0  ;;  %v2914_v53 = vadd.f32 %v11687_v19, %v9103_v8  ;;  %v11688_v30 = vld [vmem:[#allocation85_spill] sm:$0xff] }
 0x976   : > { %4247 = vmatprep.mubr.f32.mxu1 %v2323_v42  ;;  %v716_v42 = vadd.f32 %v11680_v10, %v9103_v8 }
 0x977   : > { %4378 = vmatmul.mubr.f32.gmra.mxu0 %v740_v22  ;;  %v1064_v61 = vmax.f32 %v1033_v52, 0.0  ;;  %v11681_v22 = vld [vmem:[#allocation106_spill] sm:$0xff]  ;;  %v1594_v52 = vadd.f32 %v11688_v30, %v8878_v63  ;;  %v11698_v30 = vld [vmem:[#allocation107_spill] sm:$0xff] }
 0x978   : > { %4382 = vmatprep.mubr.f32.mxu0 %v1060_v14  ;;  %v1901_v13 = vadd.f32 %v11681_v22, %v8878_v63  ;;  %v3270_v14 = vmax.f32 %v3161_v20, 0.0  ;;  %v747_v23 = vmax.f32 %v716_v42, 0.0  ;;  %v2951_v42 = vmax.f32 %v2914_v53, 0.0 }
 0x979   : > { %4248 = vmatmul.mubr.f32.gmra.mxu1 %v2006_v11  ;;  %v1584_v11 = vadd.f32 %v11682_v5, %v8878_v63 }
 0x97a   : > { %4252 = vmatprep.mubr.f32.mxu1 %v3266_v39  ;;  %v2007_v35 = vmax.f32 %v1901_v13, 0.0 }
 0x97b   : > { %4383 = vmatmul.mubr.f32.gmra.mxu0 %v743_v60  ;;  %v11683_v60 = vld [vmem:[#allocation109_spill] sm:$0xff] }
 0x97c   : > { %4387 = vmatprep.mubr.f32.mxu0 %v1063_v54  ;;  %v1905_v26 = vadd.f32 %v11683_v60, %v8878_v63 }
 0x97d   : > { %4253 = vmatmul.mubr.f32.gmra.mxu1 %v2949_v6  ;;  %v3231_v6 = vadd.f32 %v9567_v3, %v9103_v8  ;;  %v2956_v3 = vmax.f32 %v2848_v4, 0.0 }
 0x97e   : > { %4257 = vmatprep.mubr.f32.mxu1 %v3269_v9  ;;  %v1690_v9 = vmax.f32 %v1584_v11, 0.0 }
 0x97f   : > { %4388 = vmatmul.mubr.f32.gmra.mxu0 %v746_v41  ;;  %v3268_v7 = vmax.f32 %v3231_v6, 0.0  ;;  %v11694_v6 = vld [vmem:[#allocation84_spill] sm:$0xff] }
 0x980   : > { %4392 = vmatprep.mubr.f32.mxu0 %v1058_v62  ;;  %v2010_v62 = vmax.f32 %v1905_v26, 0.0 }
 0x981   : > { %4258 = vmatmul.mubr.f32.gmra.mxu1 %v2952_v51 }
 0x982   : > { %4262 = vmatprep.mubr.f32.mxu1 %v3272_v16 }
 0x983   : > { %4393 = vmatmul.mubr.f32.gmra.mxu0 %v741_v45 }
 0x984   : > { %4397 = vmatprep.mubr.f32.mxu0 %v1061_v28  ;;  %v1693_v28 = vmax.f32 %v1588_v43, 0.0 }
 0x985   : > { %4263 = vmatmul.mubr.f32.gmra.mxu1 %v2955_v49 }
 0x986   : > { %4267 = vmatprep.mubr.f32.mxu1 %v3267_v29  ;;  %v11689_v29 = vld [vmem:[#allocation108_spill] sm:$0xff] }
 0x987   : > { %4398 = vmatmul.mubr.f32.gmra.mxu0 %v744_v36  ;;  %v1903_v20 = vadd.f32 %v11689_v29, %v9051_v48  ;;  %v2013_v36 = vmax.f32 %v1911_v33, 0.0  ;;  %v1267_v33 = vadd.f32 %v11696_v15, %v8878_v63 }
 0x988   : > { %4402 = vmatprep.mubr.f32.mxu0 %v1064_v61  ;;  %v11690_v61 = vld [vmem:[#allocation163_spill] sm:$0xff] }
 0x989   : > { %v3764_v44 = vpop.f32.mrf.mxu1  ;;  %v3964_v39 = vpop.f32.mrf.mxu0  ;;  %4268 = vmatmul.mubr.f32.gmra.mxu1 %v2950_v37  ;;  %v2919_v22 = vadd.f32 %v11690_v61, %v9103_v8  ;;  %v3271_v37 = vmax.f32 %v3236_v31, 0.0  ;;  %v1373_v29 = vmax.f32 %v1267_v33, 0.0 }
 0x98a   : > { %v9741_v12 = vadd.f32 %v3964_v39, %v3764_v44  ;;  %4272 = vmatprep.mubr.f32.mxu1 %v3270_v14  ;;  %v11691_v14 = vld [vmem:[#allocation81_spill] sm:$0xff]  ;;  %v2008_v44 = vmax.f32 %v1903_v20, 0.0  ;;  %v11692_v39 = vld [vmem:[#allocation111_spill] sm:$0xff] }
 0x98b   : > { %v3766_v24 = vpop.f32.mrf.mxu1  ;;  %v3966_v54 = vpop.f32.mrf.mxu0  ;;  %4403 = vmatmul.mubr.f32.gmra.mxu0 %v747_v23  ;;  %v1586_v0 = vadd.f32 %v11691_v14, %v9051_v48  ;;  %v1696_v23 = vmax.f32 %v1594_v52, 0.0  ;;  %v2954_v26 = vmax.f32 %v2919_v22, 0.0  ;;  %v1976_v52 = vadd.f32 %v11698_v30, %v9103_v8  ;;  %v11699_v20 = vld [vmem:[#allocation55_spill] sm:$0xff]  ;;  %v11700_v22 = vld [vmem:[#allocation80_spill] sm:$0xff] }
 0x98c   : > { %4407 = vmatprep.mubr.f32.mxu0 %v2007_v35  ;;  %v1907_v35 = vadd.f32 %v11692_v39, %v9051_v48  ;;  %v3274_v24 = vmax.f32 %v3239_v32, 0.0 }
 0x98d   : > { %v3769_v2 = vpop.f32.mrf.mxu1  ;;  %v3969_v41 = vpop.f32.mrf.mxu0  ;;  %4273 = vmatmul.mubr.f32.gmra.mxu1 %v2953_v55  ;;  %v11693_v55 = vld [vmem:[#allocation164_spill] sm:$0xff]  ;;  %v1691_v54 = vmax.f32 %v1586_v0, 0.0  ;;  %v2009_v14 = vmax.f32 %v1976_v52, 0.0  ;;  %v11701_v0 = vld [vmem:[#allocation110_spill] sm:$0xff]  ;;  %v11708_v52 = vld [vmem:[#allocation57_spill] sm:$0xff] }
 0x98e   : > { %v9751_v51 = vadd.f32 %v3969_v41, %v3769_v2  ;;  %4277 = vmatprep.mubr.f32.mxu1 %v3273_v18  ;;  %v2922_v38 = vadd.f32 %v11693_v55, %v9103_v8  ;;  %v1590_v18 = vadd.f32 %v11694_v6, %v9051_v48  ;;  %v2011_v43 = vmax.f32 %v1907_v35, 0.0  ;;  %v11695_v2 = vld [vmem:[#allocation114_spill] sm:$0xff]  ;;  %v11704_v6 = vld [vmem:[#allocation113_spill] sm:$0xff] }
 0x98f   : > { %v3771_v16 = vpop.f32.mrf.mxu1  ;;  %v3971_v45 = vpop.f32.mrf.mxu0  ;;  %4408 = vmatmul.mubr.f32.gmra.mxu0 %v1690_v9  ;;  %v1913_v41 = vadd.f32 %v11695_v2, %v9051_v48 }
 0x990   : > { %4412 = vmatprep.mubr.f32.mxu0 %v2010_v62  ;;  %v2957_v19 = vmax.f32 %v2922_v38, 0.0  ;;  %v1694_v16 = vmax.f32 %v1590_v18, 0.0  ;;  %v11697_v45 = vld [vmem:[#allocation87_spill] sm:$0xff]  ;;  %v1984_v18 = vadd.f32 %v11704_v6, %v9103_v8 }
 0x991   : > { %v3774_v21 = vpop.f32.mrf.mxu1  ;;  %v3974_v49 = vpop.f32.mrf.mxu0  ;;  %4278 = vmatmul.mubr.f32.gmra.mxu1 %v2956_v3  ;;  %v11703_v38 = vld [vmem:[#allocation83_spill] sm:$0xff] }
 0x992   : > { %v9761_v10 = vadd.f32 %v3974_v49, %v3774_v21  ;;  %4282 = vmatprep.mubr.f32.mxu1 %v3268_v7  ;;  %v1596_v7 = vadd.f32 %v11697_v45, %v9051_v48  ;;  %v2014_v21 = vmax.f32 %v1913_v41, 0.0  ;;  %v2015_v45 = vmax.f32 %v1984_v18, 0.0  ;;  %v11714_v18 = vld [vmem:[#allocation53_spill] sm:$0xff] }
 0x993   : > { %v3776_v25 = vpop.f32.mrf.mxu1  ;;  %v3976_v13 = vpop.f32.mrf.mxu0  ;;  %4413 = vmatmul.mubr.f32.gmra.mxu0 %v1693_v28 }
 0x994   : > { %4417 = vmatprep.mubr.f32.mxu0 %v2013_v36  ;;  %v1271_v36 = vadd.f32 %v11699_v20, %v8878_v63  ;;  %v1659_v25 = vadd.f32 %v11700_v22, %v9103_v8  ;;  %v1697_v13 = vmax.f32 %v1596_v7, 0.0  ;;  %v11707_v7 = vld [vmem:[#allocation166_spill] sm:$0xff] }
 0x995   : > { %v3779_v5 = vpop.f32.mrf.mxu1  ;;  %v3979_v11 = vpop.f32.mrf.mxu0  ;;  %4283 = vmatmul.mubr.f32.gmra.mxu1 %v2951_v42 }
 0x996   : > { %v9771_v60 = vadd.f32 %v3979_v11, %v3779_v5  ;;  %4287 = vmatprep.mubr.f32.mxu1 %v3271_v37  ;;  %v1376_v11 = vmax.f32 %v1271_v36, 0.0  ;;  %v1692_v55 = vmax.f32 %v1659_v25, 0.0 }
 0x997   : > { %v3781_v40 = vpop.f32.mrf.mxu1  ;;  %v3981_v4 = vpop.f32.mrf.mxu0  ;;  %4418 = vmatmul.mubr.f32.gmra.mxu0 %v1696_v23  ;;  %v1979_v23 = vadd.f32 %v11701_v0, %v9103_v8 }
 0x998   : > { %4422 = vmatprep.mubr.f32.mxu0 %v2008_v44  ;;  %v11702_v44 = vld [vmem:[#allocation58_spill] sm:$0xff]  ;;  %v1662_v40 = vadd.f32 %v11703_v38, %v9103_v8 }
 0x999   : > { %v3784_v9 = vpop.f32.mrf.mxu1  ;;  %v3984_v50 = vpop.f32.mrf.mxu0  ;;  %4288 = vmatmul.mubr.f32.gmra.mxu1 %v2954_v26  ;;  %v1277_v39 = vadd.f32 %v11702_v44, %v8878_v63 }
 0x99a   : > { %v9779_v62 = vadd.f32 %v3984_v50, %v3784_v9  ;;  %4292 = vmatprep.mubr.f32.mxu1 %v3274_v24  ;;  %v11705_v50 = vld [vmem:[#allocation54_spill] sm:$0xff]  ;;  %v1695_v33 = vmax.f32 %v1662_v40, 0.0 }
 0x99b   : > { %v3786_v53 = vpop.f32.mrf.mxu1  ;;  %v3986_v3 = vpop.f32.mrf.mxu0  ;;  %4423 = vmatmul.mubr.f32.gmra.mxu0 %v1691_v54  ;;  %v2012_v54 = vmax.f32 %v1979_v23, 0.0  ;;  %v1379_v2 = vmax.f32 %v1277_v39, 0.0  ;;  %v11711_v23 = vld [vmem:[#allocation60_spill] sm:$0xff] }
 0x99c   : > { %4427 = vmatprep.mubr.f32.mxu0 %v2011_v43  ;;  %v1269_v43 = vadd.f32 %v11705_v50, %v9051_v48  ;;  %v1342_v50 = vadd.f32 %v11714_v18, %v9103_v8 }
 0x99d   : > { %v3789_v31 = vpop.f32.mrf.mxu1  ;;  %v3989_v28 = vpop.f32.mrf.mxu0  ;;  %4293 = vmatmul.mubr.f32.gmra.mxu1 %v2957_v19  ;;  %v11706_v19 = vld [vmem:[#allocation86_spill] sm:$0xff] }
 0x99e   : > { %v9787_v49 = vadd.f32 %v3989_v28, %v3789_v31  ;;  %7130 = vmatprep.mubr.msk.f32.mxu1 %vm7380_vm0, %v11435_v1  ;;  %v1667_v53 = vadd.f32 %v11706_v19, %v9103_v8  ;;  %v2852_v31 = vadd.f32 %v11707_v7, %v8878_v63  ;;  %v1374_v30 = vmax.f32 %v1269_v43, 0.0 }
 0x99f   : > { %v3791_v42 = vpop.f32.mrf.mxu1  ;;  %v3991_v61 = vpop.f32.mrf.mxu0  ;;  %4428 = vmatmul.mubr.f32.gmra.mxu0 %v1694_v16 }
 0x9a0   : > { %4432 = vmatprep.mubr.f32.mxu0 %v2014_v21  ;;  %v1273_v21 = vadd.f32 %v11708_v52, %v9051_v48  ;;  %v1698_v36 = vmax.f32 %v1667_v53, 0.0  ;;  %v11709_v42 = vld [vmem:[#allocation153_spill] sm:$0xff]  ;;  %v11717_v52 = vld [vmem:[#allocation56_spill] sm:$0xff] }
 0x9a1   : > { %v3794_v37 = vpop.f32.mrf.mxu1  ;;  %v3994_v32 = vpop.f32.mrf.mxu0  ;;  %7131 = vmatmul.mubr.f32.vlgmr.msra.gmra.mxu1 %v1373_v29  ;;  %v2535_v61 = vadd.f32 %v11709_v42, %v8878_v63 }
 0x9a2   : > { %v9797_v5 = vadd.f32 %v3994_v32, %v3794_v37  ;;  %7133 = vmatprep.mubr.msk.f32.mxu1 %vm7380_vm0, %v11435_v1  ;;  %v11710_v37 = vld [vmem:[#allocation169_spill] sm:$0xff]  ;;  %v1377_v0 = vmax.f32 %v1273_v21, 0.0  ;;  %v1345_v21 = vadd.f32 %v11717_v52, %v9103_v8 }
 0x9a3   : > { %v3796_v35 = vpop.f32.mrf.mxu1  ;;  %v3996_v26 = vpop.f32.mrf.mxu0  ;;  %4433 = vmatmul.mubr.f32.gmra.mxu0 %v1697_v13  ;;  %v2958_v13 = vmax.f32 %v2852_v31, 0.0  ;;  %v2856_v32 = vadd.f32 %v11710_v37, %v8878_v63  ;;  %v11719_v37 = vld [vmem:[#allocation171_spill] sm:$0xff] }
 0x9a4   : > { %4437 = vmatprep.mubr.f32.mxu0 %v2009_v14  ;;  %v2641_v35 = vmax.f32 %v2535_v61, 0.0  ;;  %v11712_v26 = vld [vmem:[#allocation156_spill] sm:$0xff] }
 0x9a5   : > { %v3799_v4 = vpop.f32.mrf.mxu1  ;;  %v3999_v24 = vpop.f32.mrf.mxu0  ;;  %7134 = vmatmul.mubr.f32.gmra.mxu1 %v1376_v11  ;;  %v1279_v11 = vadd.f32 %v11711_v23, %v9051_v48  ;;  %v1378_v23 = vmax.f32 %v1345_v21, 0.0 }
 0x9a6   : > { %v9807_v9 = vadd.f32 %v3999_v24, %v3799_v4  ;;  %7136 = vmatprep.mubr.msk.f32.mxu1 %vm7380_vm0, %v11435_v1  ;;  %v2961_v4 = vmax.f32 %v2856_v32, 0.0  ;;  %v11713_v24 = vld [vmem:[#allocation172_spill] sm:$0xff]  ;;  %v2858_v32 = vadd.f32 %v11719_v37, %v9051_v48 }
 0x9a7   : > { %v3801_v41 = vpop.f32.mrf.mxu1  ;;  %v4001_v15 = vpop.f32.mrf.mxu0  ;;  %4438 = vmatmul.mubr.f32.gmra.mxu0 %v1692_v55  ;;  %v2539_v55 = vadd.f32 %v11712_v26, %v8878_v63  ;;  %v1380_v43 = vmax.f32 %v1279_v11, 0.0  ;;  %v11720_v11 = vld [vmem:[#allocation59_spill] sm:$0xff] }
 0x9a8   : > { %4442 = vmatprep.mubr.f32.mxu0 %v2012_v54  ;;  %v2862_v54 = vadd.f32 %v11713_v24, %v8878_v63  ;;  %v2962_v24 = vmax.f32 %v2858_v32, 0.0 }
 0x9a9   : > { %v3804_v3 = vpop.f32.mrf.mxu1  ;;  %v4004_v16 = vpop.f32.mrf.mxu0  ;;  %7137 = vmatmul.mubr.f32.gmra.mxu1 %v1379_v2  ;;  %v2644_v15 = vmax.f32 %v2539_v55, 0.0  ;;  %v11721_v55 = vld [vmem:[#allocation158_spill] sm:$0xff] }
 0x9aa   : > { %v9817_v28 = vadd.f32 %v4004_v16, %v3804_v3  ;;  %7139 = vmatprep.mubr.msk.f32.mxu1 %vm7380_vm0, %v11435_v1  ;;  %v11716_v16 = vld [vmem:[#allocation168_spill] sm:$0xff]  ;;  %v2964_v7 = vmax.f32 %v2862_v54, 0.0  ;;  %v11722_v54 = vld [vmem:[#allocation174_spill] sm:$0xff] }
 0x9ab   : > { %v3806_v29 = vpop.f32.mrf.mxu1  ;;  %v4006_v20 = vpop.f32.mrf.mxu0  ;;  %4443 = vmatmul.mubr.f32.gmra.mxu0 %v1695_v33  ;;  %v11715_v33 = vld [vmem:[#allocation159_spill] sm:$0xff]  ;;  %v2864_v18 = vadd.f32 %v11722_v54, %v9051_v48 }
 0x9ac   : > { %4447 = vmatprep.mubr.f32.mxu0 %v2015_v45  ;;  %v2545_v19 = vadd.f32 %v11715_v33, %v8878_v63  ;;  %v2854_v45 = vadd.f32 %v11716_v16, %v9051_v48 }
 0x9ad   : > { %v3809_v22 = vpop.f32.mrf.mxu1  ;;  %v4009_v25 = vpop.f32.mrf.mxu0  ;;  %7140 = vmatmul.mubr.f32.gmra.mxu1 %v1374_v30  ;;  %v1375_v30 = vmax.f32 %v1342_v50, 0.0  ;;  %v2965_v52 = vmax.f32 %v2864_v18, 0.0 }
 0x9ae   : > { %v9827_v14 = vadd.f32 %v4009_v25, %v3809_v22  ;;  %7142 = vmatprep.mubr.msk.f32.mxu1 %vm7380_vm0, %v11435_v1  ;;  %v2647_v61 = vmax.f32 %v2545_v19, 0.0 }
 0x9af   : > { %v3811_v44 = vpop.f32.mrf.mxu1  ;;  %v4011_v39 = vpop.f32.mrf.mxu0  ;;  %4448 = vmatmul.mubr.f32.gmra.mxu0 %v1698_v36  ;;  %v11718_v36 = vld [vmem:[#allocation155_spill] sm:$0xff] }
 0x9b0   : > { %4452 = vmatprep.mubr.f32.mxu0 %v2958_v13  ;;  %v2537_v42 = vadd.f32 %v11718_v36, %v9051_v48  ;;  %v2959_v13 = vmax.f32 %v2854_v45, 0.0  ;;  %v1350_v44 = vadd.f32 %v11720_v11, %v9103_v8  ;;  %v11728_v11 = vld [vmem:[#allocation170_spill] sm:$0xff] }
 0x9b1   : > { %v3814_v38 = vpop.f32.mrf.mxu1  ;;  %v4014_v40 = vpop.f32.mrf.mxu0  ;;  %7143 = vmatmul.mubr.f32.gmra.mxu1 %v1377_v0 }
 0x9b2   : > { %v9837_v6 = vadd.f32 %v4014_v40, %v3814_v38  ;;  %7145 = vmatprep.mubr.msk.f32.mxu1 %vm7380_vm0, %v11435_v1  ;;  %v2642_v26 = vmax.f32 %v2537_v42, 0.0  ;;  %v2541_v38 = vadd.f32 %v11721_v55, %v9051_v48 }
 0x9b3   : > { %v3816_v2 = vpop.f32.mrf.mxu1  ;;  %v4016_v41 = vpop.f32.mrf.mxu0  ;;  %4453 = vmatmul.mubr.f32.gmra.mxu0 %v2641_v35 }
 0x9b4   : > { %4457 = vmatprep.mubr.f32.mxu0 %v2961_v4  ;;  %v11723_v2 = vld [vmem:[#allocation133_spill] sm:$0xff]  ;;  %v2645_v19 = vmax.f32 %v2541_v38, 0.0 }
 0x9b5   : > { %v3819_v53 = vpop.f32.mrf.mxu1  ;;  %v4019_v3 = vpop.f32.mrf.mxu0  ;;  %7146 = vmatmul.mubr.f32.gmra.mxu1 %v1380_v43  ;;  %v1381_v43 = vmax.f32 %v1350_v44, 0.0  ;;  %v2218_v41 = vadd.f32 %v11723_v2, %v8878_v63  ;;  %v2930_v44 = vadd.f32 %v11728_v11, %v9103_v8 }
 0x9b6   : > { %v9847_v31 = vadd.f32 %v4019_v3, %v3819_v53  ;;  %7148 = vmatprep.mubr.msk.f32.mxu1 %vm7380_vm0, %v11435_v1  ;;  %v11724_v53 = vld [vmem:[#allocation161_spill] sm:$0xff] }
 0x9b7   : > { %v3821_v29 = vpop.f32.mrf.mxu1  ;;  %v4021_v20 = vpop.f32.mrf.mxu0  ;;  %4458 = vmatmul.mubr.f32.gmra.mxu0 %v2644_v15  ;;  %v2547_v3 = vadd.f32 %v11724_v53, %v9051_v48  ;;  %v2963_v2 = vmax.f32 %v2930_v44, 0.0  ;;  %v11735_v44 = vld [vmem:[#allocation141_spill] sm:$0xff] }
 0x9b8   : > { %4462 = vmatprep.mubr.f32.mxu0 %v2964_v7  ;;  %v11725_v7 = vld [vmem:[#allocation167_spill] sm:$0xff]  ;;  %v2324_v29 = vmax.f32 %v2218_v41, 0.0  ;;  %v11726_v20 = vld [vmem:[#allocation136_spill] sm:$0xff]  ;;  %v11731_v41 = vld [vmem:[#allocation173_spill] sm:$0xff] }
 0x9b9   : > { %v3824_v22 = vpop.f32.mrf.mxu1  ;;  %v4024_v25 = vpop.f32.mrf.mxu0  ;;  %7149 = vmatmul.mubr.f32.gmra.mxu1 %v1375_v30  ;;  %v2927_v30 = vadd.f32 %v11725_v7, %v9103_v8  ;;  %v2222_v36 = vadd.f32 %v11726_v20, %v8878_v63 }
 0x9ba   : > { %v9857_v0 = vadd.f32 %v4024_v25, %v3824_v22  ;;  %7151 = vmatprep.mubr.msk.f32.mxu1 %vm7380_vm0, %v11435_v1  ;;  %v11727_v22 = vld [vmem:[#allocation154_spill] sm:$0xff] }
 0x9bb   : > { %v3826_v39 = vpop.f32.mrf.mxu1  ;;  %v4026_v35 = vpop.f32.mrf.mxu0  ;;  %4463 = vmatmul.mubr.f32.gmra.mxu0 %v2647_v61  ;;  %v2610_v25 = vadd.f32 %v11727_v22, %v9103_v8  ;;  %v11734_v22 = vld [vmem:[#allocation138_spill] sm:$0xff] }
 0x9bc   : > { %4467 = vmatprep.mubr.f32.mxu0 %v2959_v13  ;;  %v2648_v13 = vmax.f32 %v2547_v3, 0.0  ;;  %v2327_v35 = vmax.f32 %v2222_v36, 0.0 }
 0x9bd   : > { %v3829_v40 = vpop.f32.mrf.mxu1  ;;  %v4029_v4 = vpop.f32.mrf.mxu0  ;;  %7152 = vmatmul.mubr.f32.gmra.mxu1 %v1378_v23  ;;  %v2960_v23 = vmax.f32 %v2927_v30, 0.0  ;;  %v11733_v30 = vld [vmem:[#allocation160_spill] sm:$0xff] }
 0x9be   : > { %v9867_v50 = vadd.f32 %v4029_v4, %v3829_v40  ;;  %7154 = vmatprep.mubr.msk.f32.mxu1 %vm7380_vm0, %v11435_v1  ;;  %v2643_v4 = vmax.f32 %v2610_v25, 0.0  ;;  %v2224_v25 = vadd.f32 %v11734_v22, %v9051_v48 }
 0x9bf   : > { %v3831_v15 = vpop.f32.mrf.mxu1  ;;  %v4031_v33 = vpop.f32.mrf.mxu0  ;;  %4468 = vmatmul.mubr.f32.gmra.mxu0 %v2642_v26  ;;  %v11729_v26 = vld [vmem:[#allocation139_spill] sm:$0xff] }
 0x9c0   : > { %4472 = vmatprep.mubr.f32.mxu0 %v2962_v24  ;;  %v2228_v55 = vadd.f32 %v11729_v26, %v8878_v63  ;;  %v11730_v24 = vld [vmem:[#allocation157_spill] sm:$0xff]  ;;  %v2935_v15 = vadd.f32 %v11731_v41, %v9103_v8  ;;  %v2328_v11 = vmax.f32 %v2224_v25, 0.0 }
 0x9c1   : > { %v3834_v16 = vpop.f32.mrf.mxu1  ;;  %v4034_v45 = vpop.f32.mrf.mxu0  ;;  %7155 = vmatmul.mubr.f32.gmra.mxu1 %v1381_v43  ;;  %v2613_v54 = vadd.f32 %v11730_v24, %v9103_v8 }
 0x9c2   : > { %v9877_v21 = vadd.f32 %v4034_v45, %v3834_v16  ;;  %7157 = vmatprep.mubr.msk.f32.mxu1 %vm7380_vm0, %v11435_v1  ;;  %v2330_v3 = vmax.f32 %v2228_v55, 0.0  ;;  %v2966_v36 = vmax.f32 %v2935_v15, 0.0 }
 0x9c3   : > { %v3836_v42 = vpop.f32.mrf.mxu1  ;;  %v4036_v61 = vpop.f32.mrf.mxu0  ;;  %4473 = vmatmul.mubr.f32.gmra.mxu0 %v2645_v19  ;;  %v11732_v19 = vld [vmem:[#allocation135_spill] sm:$0xff]  ;;  %v2646_v7 = vmax.f32 %v2613_v54, 0.0 }
 0x9c4   : > { %4477 = vmatprep.mubr.f32.mxu0 %v2965_v52  ;;  %v2220_v53 = vadd.f32 %v11732_v19, %v9051_v48  ;;  %v2618_v52 = vadd.f32 %v11733_v30, %v9103_v8  ;;  %v3169_v30 = vadd.f32 %v9635_v58, %v8878_v63  ;;  %v3179_v58 = vadd.f32 %v9667_v56, %v8878_v63 }
 0x9c5   : > { %v3839_v37 = vpop.f32.mrf.mxu1  ;;  %v4039_v32 = vpop.f32.mrf.mxu0  ;;  %7158 = vmatmul.mubr.f32.gmra.mxu1 %v2324_v29 }
 0x9c6   : > { %v9887_v39 = vadd.f32 %v4039_v32, %v3839_v37  ;;  %7160 = vmatprep.mubr.msk.f32.mxu1 %vm7380_vm0, %v11435_v1  ;;  %v2325_v61 = vmax.f32 %v2220_v53, 0.0  ;;  %v2649_v32 = vmax.f32 %v2618_v52, 0.0  ;;  %v11738_v53 = vld [vmem:[#allocation140_spill] sm:$0xff] }
 0x9c7   : > { %v3841_v38 = vpop.f32.mrf.mxu1  ;;  %v4041_v40 = vpop.f32.mrf.mxu0  ;;  %4478 = vmatmul.mubr.f32.gmra.mxu0 %v2648_v13 }
 0x9c8   : > { %4482 = vmatprep.mubr.f32.mxu0 %v2960_v23  ;;  %v11736_v38 = vld [vmem:[#allocation134_spill] sm:$0xff] }
 0x9c9   : > { %v3844_v18 = vpop.f32.mrf.mxu1  ;;  %v4044_v43 = vpop.f32.mrf.mxu0  ;;  %7161 = vmatmul.mubr.f32.gmra.mxu1 %v2327_v35  ;;  %v2230_v35 = vadd.f32 %v11735_v44, %v9051_v48  ;;  %v2293_v40 = vadd.f32 %v11736_v38, %v9103_v8 }
 0x9ca   : > { %v9897_v33 = vadd.f32 %v4044_v43, %v3844_v18  ;;  %7163 = vmatprep.mubr.msk.f32.mxu1 %vm7380_vm0, %v11435_v1  ;;  %v11737_v43 = vld [vmem:[#allocation137_spill] sm:$0xff] }
 0x9cb   : > { %v3846_v16 = vpop.f32.mrf.mxu1  ;;  %v4046_v45 = vpop.f32.mrf.mxu0  ;;  %4483 = vmatmul.mubr.f32.gmra.mxu0 %v2643_v4  ;;  %v2331_v4 = vmax.f32 %v2230_v35, 0.0  ;;  %v2326_v18 = vmax.f32 %v2293_v40, 0.0  ;;  %v3181_v40 = vadd.f32 %v9675_v47, %v9051_v48  ;;  %v3247_v47 = vadd.f32 %v9651_v27, %v9103_v8 }
 0x9cc   : > { %4487 = vmatprep.mubr.f32.mxu0 %v2963_v2  ;;  %v2296_v2 = vadd.f32 %v11737_v43, %v9103_v8 }
 0x9cd   : > { %v3849_v29 = vpop.f32.mrf.mxu1  ;;  %v4049_v20 = vpop.f32.mrf.mxu0  ;;  %7164 = vmatmul.mubr.f32.gmra.mxu1 %v2330_v3  ;;  %v2301_v3 = vadd.f32 %v11738_v53, %v9103_v8 }
 0x9ce   : > { %v9905_v42 = vadd.f32 %v4049_v20, %v3849_v29  ;;  %7166 = vmatprep.mubr.msk.f32.mxu1 %vm7380_vm0, %v11435_v1  ;;  %v2329_v19 = vmax.f32 %v2296_v2, 0.0  ;;  %v3275_v20 = vmax.f32 %v3169_v30, 0.0 }
 0x9cf   : > { %v3851_v13 = vpop.f32.mrf.mxu1  ;;  %v4051_v37 = vpop.f32.mrf.mxu0  ;;  %4488 = vmatmul.mubr.f32.gmra.mxu0 %v2646_v7  ;;  %v2332_v7 = vmax.f32 %v2301_v3, 0.0 }
 0x9d0   : > { %4492 = vmatprep.mubr.f32.mxu0 %v2966_v36  ;;  %v3173_v36 = vadd.f32 %v9649_v17, %v8878_v63  ;;  %v3171_v17 = vadd.f32 %v9643_v46, %v9051_v48  ;;  %v3175_v63 = vadd.f32 %v9661_v34, %v9051_v48  ;;  %v3244_v34 = vadd.f32 %v9637_v57, %v9103_v8 }
 0x9d1   : > { %v9911_v23 = vpop.f32.mrf.mxu1  ;;  %7167 = vmatmul.mubr.f32.gmra.mxu1 %v2325_v61  ;;  %v3280_v57 = vmax.f32 %v3247_v47, 0.0 }
 0x9d2   : > { %7169 = vmatprep.mubr.msk.f32.mxu1 %vm7380_vm0, %v11435_v1  ;;  %v3278_v25 = vmax.f32 %v3173_v36, 0.0  ;;  %v3276_v35 = vmax.f32 %v3171_v17, 0.0  ;;  %v3279_v46 = vmax.f32 %v3175_v63, 0.0  ;;  %v3277_v48 = vmax.f32 %v3244_v34, 0.0 }
 0x9d3   : > { %v3856_v26 = vpop.f32.mrf.mxu1  ;;  %4493 = vmatmul.mubr.f32.gmra.mxu0 %v2649_v32  ;;  %v3281_v32 = vmax.f32 %v3179_v58, 0.0 }
 0x9d5   : > { %v9917_v55 = vpop.f32.mrf.mxu1  ;;  %7170 = vmatmul.mubr.f32.gmra.mxu1 %v2328_v11 }
 0x9d6   : > { %7172 = vmatprep.mubr.msk.f32.mxu1 %vm7380_vm0, %v11435_v1 }
 0x9d7   : > { %v3861_v24 = vpop.f32.mrf.mxu1 }
 0x9d9   : > { %v9923_v54 = vpop.f32.mrf.mxu1  ;;  %7173 = vmatmul.mubr.f32.gmra.mxu1 %v2331_v4 }
 0x9da   : > { %7175 = vmatprep.mubr.msk.f32.mxu1 %vm7380_vm0, %v11435_v1 }
 0x9db   : > { %v3866_v41 = vpop.f32.mrf.mxu1 }
 0x9dd   : > { %v9929_v15 = vpop.f32.mrf.mxu1  ;;  %7176 = vmatmul.mubr.f32.gmra.mxu1 %v2326_v18 }
 0x9de   : > { %7178 = vmatprep.mubr.msk.f32.mxu1 %vm7380_vm0, %v11435_v1 }
 0x9df   : > { %v3871_v16 = vpop.f32.mrf.mxu1 }
 0x9e1   : > { %v9935_v45 = vpop.f32.mrf.mxu1  ;;  %7179 = vmatmul.mubr.f32.gmra.mxu1 %v2329_v19 }
 0x9e2   : > { %7181 = vmatprep.mubr.msk.f32.mxu1 %vm7380_vm0, %v11435_v1 }
 0x9e3   : > { %v3876_v52 = vpop.f32.mrf.mxu1 }
 0x9e5   : > { %v9941_v29 = vpop.f32.mrf.mxu1  ;;  %7182 = vmatmul.mubr.f32.gmra.mxu1 %v2332_v7 }
 0x9e6   : > { %7184 = vmatprep.mubr.msk.f32.mxu1 %vm7380_vm0, %v11435_v1 }
 0x9e7   : > { %v3881_v61 = vpop.f32.mrf.mxu1 }
 0x9e9   : > { %v9947_v22 = vpop.f32.mrf.mxu1  ;;  %7185 = vmatmul.mubr.f32.gmra.mxu1 %v3275_v20 }
 0x9ea   : > { %7187 = vmatprep.mubr.msk.f32.mxu1 %vm7380_vm0, %v11435_v1 }
 0x9eb   : > { %v3886_v13 = vpop.f32.mrf.mxu1 }
 0x9ed   : > { %v9953_v37 = vpop.f32.mrf.mxu1  ;;  %7188 = vmatmul.mubr.f32.gmra.mxu1 %v3278_v25 }
 0x9ee   : > { %7190 = vmatprep.mubr.msk.f32.mxu1 %vm7380_vm0, %v11435_v1 }
 0x9ef   : > { %v3891_v11 = vpop.f32.mrf.mxu1 }
 0x9f1   : > { %v9959_v44 = vpop.f32.mrf.mxu1  ;;  %7191 = vmatmul.mubr.f32.gmra.mxu1 %v3281_v32 }
 0x9f2   : > { %7193 = vmatprep.mubr.msk.f32.mxu1 %vm7380_vm0, %v11435_v1 }
 0x9f3   : > { %v3896_v56 = vpop.f32.mrf.mxu1 }
 0x9f5   : > { %v4164_v26 = vpop.f32.mrf.mxu1  ;;  %7194 = vmatmul.mubr.f32.gmra.mxu1 %v3276_v35 }
 0x9f6   : > { %v9966_v38 = vadd.f32 %v4164_v26, %v9741_v12  ;;  %7196 = vmatprep.mubr.msk.f32.mxu1 %vm7380_vm0, %v11435_v1  ;;  %v3282_v12 = vmax.f32 %v3181_v40, 0.0 }
 0x9f7   : > { %v4166_v4 = vpop.f32.mrf.mxu1 }
 0x9f9   : > { %v4169_v24 = vpop.f32.mrf.mxu1  ;;  %7197 = vmatmul.mubr.f32.gmra.mxu1 %v3279_v46 }
 0x9fa   : > { %v9973_v18 = vadd.f32 %v4169_v24, %v9751_v51  ;;  %7199 = vmatprep.mubr.msk.f32.mxu1 %vm7380_vm0, %v11435_v1 }
 0x9fb   : > { %v4171_v43 = vpop.f32.mrf.mxu1 }
 0x9fd   : > { %v4174_v2 = vpop.f32.mrf.mxu1  ;;  %7200 = vmatmul.mubr.f32.gmra.mxu1 %v3282_v12 }
 0x9fe   : > { %v9980_v41 = vadd.f32 %v4174_v2, %v9761_v10  ;;  %7202 = vmatprep.mubr.msk.f32.mxu1 %vm7380_vm0, %v11435_v1  ;;  %v3252_v10 = vadd.f32 %v9669_v59, %v9103_v8 }
 0x9ff   : > { %v4176_v51 = vpop.f32.mrf.mxu1 }
 0xa01   : > { %v4179_v19 = vpop.f32.mrf.mxu1  ;;  %7203 = vmatmul.mubr.f32.gmra.mxu1 %v3277_v48 }
 0xa02   : > { %v9987_v53 = vadd.f32 %v4179_v19, %v9771_v60  ;;  %7205 = vmatprep.mubr.msk.f32.mxu1 %vm7380_vm0, %v11435_v1  ;;  %v3283_v60 = vmax.f32 %v3252_v10, 0.0 }
 0xa03   : > { %v4181_v3 = vpop.f32.mrf.mxu1 }
 0xa05   : > { %v4184_v16 = vpop.f32.mrf.mxu1  ;;  %7206 = vmatmul.mubr.f32.gmra.mxu1 %v3280_v57  ;;  %v4054_v7 = vpop.f32.mrf.mxu0 }
 0xa06   : > { %v9994_v30 = vadd.f32 %v4184_v16, %v9779_v62  ;;  %7208 = vmatprep.mubr.msk.f32.mxu1 %vm7380_vm0, %v11435_v1  ;;  %v9999_v27 = vadd.f32 %v4054_v7, %v9911_v23 }
 0xa07   : > { %v4186_v52 = vpop.f32.mrf.mxu1  ;;  %v4056_v20 = vpop.f32.mrf.mxu0 }
 0xa09   : > { %v4189_v36 = vpop.f32.mrf.mxu1  ;;  %7209 = vmatmul.mubr.f32.gmra.mxu1 %v3283_v60  ;;  %v4059_v61 = vpop.f32.mrf.mxu0 }
 0xa0a   : > { %v10002_v8 = vadd.f32 %v4189_v36, %v9787_v49  ;;  %v10005_v59 = vadd.f32 %v4059_v61, %v9917_v55 }
 0xa0b   : > { %v4191_v62 = vpop.f32.mrf.mxu1  ;;  %v4061_v25 = vpop.f32.mrf.mxu0 }
 0xa0d   : > { %v4194_v58 = vpop.f32.mrf.mxu1 }
 0xa0e   : > { %v10008_v13 = vadd.f32 %v4194_v58, %v9797_v5 }
 0xa0f   : > { %v4196_v23 = vpop.f32.mrf.mxu1  ;;  %v4064_v17 = vpop.f32.mrf.mxu0 }
 0xa10   : > { %v10011_v32 = vadd.f32 %v4064_v17, %v9923_v54 }
 0xa11   : > { %v4199_v11 = vpop.f32.mrf.mxu1  ;;  %v4066_v35 = vpop.f32.mrf.mxu0 }
 0xa12   : > { %v10014_v63 = vadd.f32 %v4199_v11, %v9807_v9 }
 0xa13   : > { %v4201_v49 = vpop.f32.mrf.mxu1  ;;  %v4069_v56 = vpop.f32.mrf.mxu0 }
 0xa14   : > { %v10017_v55 = vadd.f32 %v4069_v56, %v9929_v15 }
 0xa15   : > { %v4204_v26 = vpop.f32.mrf.mxu1  ;;  %v4071_v46 = vpop.f32.mrf.mxu0 }
 0xa16   : > { %v10020_v5 = vadd.f32 %v4204_v26, %v9817_v28 }
 0xa17   : > { %v4206_v40 = vpop.f32.mrf.mxu1  ;;  %v4074_v4 = vpop.f32.mrf.mxu0 }
 0xa18   : > { %v10023_v54 = vadd.f32 %v4074_v4, %v9935_v45 }
 0xa19   : > { %v4209_v24 = vpop.f32.mrf.mxu1  ;;  %v4076_v34 = vpop.f32.mrf.mxu0 }
 0xa1a   : > { %v10026_v9 = vadd.f32 %v4209_v24, %v9827_v14 }
 0xa1b   : > { %v4211_v12 = vpop.f32.mrf.mxu1  ;;  %v4079_v43 = vpop.f32.mrf.mxu0 }
 0xa1c   : > { %v10029_v15 = vadd.f32 %v4079_v43, %v9941_v29 }
 0xa1d   : > { %v4214_v2 = vpop.f32.mrf.mxu1  ;;  %v4081_v48 = vpop.f32.mrf.mxu0 }
 0xa1e   : > { %v10032_v28 = vadd.f32 %v4214_v2, %v9837_v6 }
 0xa1f   : > { %v4216_v47 = vpop.f32.mrf.mxu1  ;;  %v4084_v51 = vpop.f32.mrf.mxu0 }
 0xa20   : > { %v10035_v45 = vadd.f32 %v4084_v51, %v9947_v22 }
 0xa21   : > { %v4219_v19 = vpop.f32.mrf.mxu1  ;;  %v4086_v57 = vpop.f32.mrf.mxu0 }
 0xa22   : > { %v10038_v14 = vadd.f32 %v4219_v19, %v9847_v31 }
 0xa23   : > { %v4221_v10 = vpop.f32.mrf.mxu1  ;;  %v4089_v3 = vpop.f32.mrf.mxu0 }
 0xa24   : > { %v10041_v29 = vadd.f32 %v4089_v3, %v9953_v37 }
 0xa25   : > { %v4224_v16 = vpop.f32.mrf.mxu1  ;;  %v4091_v7 = vpop.f32.mrf.mxu0 }
 0xa26   : > { %v10044_v6 = vadd.f32 %v4224_v16, %v9857_v0 }
 0xa27   : > { %v4226_v60 = vpop.f32.mrf.mxu1  ;;  %v4094_v52 = vpop.f32.mrf.mxu0 }
 0xa28   : > { %v10047_v22 = vadd.f32 %v4094_v52, %v9959_v44 }
 0xa29   : > { %v4229_v20 = vpop.f32.mrf.mxu1  ;;  %v4096_v36 = vpop.f32.mrf.mxu0 }
 0xa2a   : > { %v10050_v31 = vadd.f32 %v4229_v20, %v9867_v50 }
 0xa2b   : > { %v4231_v61 = vpop.f32.mrf.mxu1  ;;  %v4364_v62 = vpop.f32.mrf.mxu0 }
 0xa2c   : > { %v10053_v37 = vadd.f32 %v4364_v62, %v9966_v38 }
 0xa2d   : > { %v4234_v25 = vpop.f32.mrf.mxu1  ;;  %v4366_v58 = vpop.f32.mrf.mxu0 }
 0xa2e   : > { %v10056_v0 = vadd.f32 %v4234_v25, %v9877_v21 }
 0xa2f   : > { %v4236_v23 = vpop.f32.mrf.mxu1  ;;  %v4369_v17 = vpop.f32.mrf.mxu0 }
 0xa30   : > { %v10059_v44 = vadd.f32 %v4369_v17, %v9973_v18 }
 0xa31   : > { %v4239_v11 = vpop.f32.mrf.mxu1  ;;  %v4371_v35 = vpop.f32.mrf.mxu0 }
 0xa32   : > { %v10062_v50 = vadd.f32 %v4239_v11, %v9887_v39 }
 0xa33   : > { %v4241_v49 = vpop.f32.mrf.mxu1  ;;  %v4374_v56 = vpop.f32.mrf.mxu0 }
 0xa34   : > { %v10065_v38 = vadd.f32 %v4374_v56, %v9980_v41 }
 0xa35   : > { %v4244_v26 = vpop.f32.mrf.mxu1  ;;  %v4376_v46 = vpop.f32.mrf.mxu0 }
 0xa36   : > { %v10068_v21 = vadd.f32 %v4244_v26, %v9897_v33 }
 0xa37   : > { %v4246_v40 = vpop.f32.mrf.mxu1  ;;  %v4379_v4 = vpop.f32.mrf.mxu0 }
 0xa38   : > { %v10071_v18 = vadd.f32 %v4379_v4, %v9987_v53 }
 0xa39   : > { %v4249_v24 = vpop.f32.mrf.mxu1  ;;  %v4381_v34 = vpop.f32.mrf.mxu0 }
 0xa3a   : > { %v10074_v39 = vadd.f32 %v4249_v24, %v9905_v42 }
 0xa3b   : > { %v4251_v12 = vpop.f32.mrf.mxu1  ;;  %v4384_v43 = vpop.f32.mrf.mxu0 }
 0xa3c   : > { %v10077_v41 = vadd.f32 %v4384_v43, %v9994_v30 }
 0xa3d   : > { %v4254_v2 = vpop.f32.mrf.mxu1  ;;  %v4386_v48 = vpop.f32.mrf.mxu0 }
 0xa3e   : > { %v10080_v33 = vadd.f32 %v4254_v2, %v9999_v27 }
 0xa3f   : > { %v4256_v47 = vpop.f32.mrf.mxu1  ;;  %v4389_v51 = vpop.f32.mrf.mxu0 }
 0xa40   : > { %v10083_v53 = vadd.f32 %v4389_v51, %v10002_v8 }
 0xa41   : > { %v4259_v19 = vpop.f32.mrf.mxu1  ;;  %v4391_v57 = vpop.f32.mrf.mxu0 }
 0xa42   : > { %v10086_v42 = vadd.f32 %v4259_v19, %v10005_v59 }
 0xa43   : > { %v4261_v10 = vpop.f32.mrf.mxu1  ;;  %v4394_v3 = vpop.f32.mrf.mxu0 }
 0xa44   : > { %v10089_v30 = vadd.f32 %v4394_v3, %v10008_v13 }
 0xa45   : > { %v4264_v16 = vpop.f32.mrf.mxu1  ;;  %v4396_v7 = vpop.f32.mrf.mxu0 }
 0xa46   : > { %v10092_v27 = vadd.f32 %v4264_v16, %v10011_v32 }
 0xa47   : > { %v4266_v60 = vpop.f32.mrf.mxu1  ;;  %v4399_v52 = vpop.f32.mrf.mxu0 }
 0xa48   : > { %v10095_v8 = vadd.f32 %v4399_v52, %v10014_v63 }
 0xa49   : > { %v4269_v20 = vpop.f32.mrf.mxu1  ;;  %v4401_v36 = vpop.f32.mrf.mxu0 }
 0xa4a   : > { %v10098_v59 = vadd.f32 %v4269_v20, %v10017_v55 }
 0xa4b   : > { %v4271_v61 = vpop.f32.mrf.mxu1  ;;  %v4404_v62 = vpop.f32.mrf.mxu0 }
 0xa4c   : > { %v10101_v13 = vadd.f32 %v4404_v62, %v10020_v5 }
 0xa4d   : > { %v4274_v25 = vpop.f32.mrf.mxu1  ;;  %v4406_v58 = vpop.f32.mrf.mxu0 }
 0xa4e   : > { %v10104_v32 = vadd.f32 %v4274_v25, %v10023_v54 }
 0xa4f   : > { %v4276_v23 = vpop.f32.mrf.mxu1  ;;  %v4409_v17 = vpop.f32.mrf.mxu0 }
 0xa50   : > { %v10107_v63 = vadd.f32 %v4409_v17, %v10026_v9 }
 0xa51   : > { %v4279_v11 = vpop.f32.mrf.mxu1  ;;  %v4411_v35 = vpop.f32.mrf.mxu0 }
 0xa52   : > { %v10110_v55 = vadd.f32 %v4279_v11, %v10029_v15 }
 0xa53   : > { %v4281_v49 = vpop.f32.mrf.mxu1  ;;  %v4414_v56 = vpop.f32.mrf.mxu0 }
 0xa54   : > { %v10113_v5 = vadd.f32 %v4414_v56, %v10032_v28 }
 0xa55   : > { %v4284_v26 = vpop.f32.mrf.mxu1  ;;  %v4416_v46 = vpop.f32.mrf.mxu0 }
 0xa56   : > { %v10116_v54 = vadd.f32 %v4284_v26, %v10035_v45 }
 0xa57   : > { %v4286_v40 = vpop.f32.mrf.mxu1  ;;  %v4419_v4 = vpop.f32.mrf.mxu0 }
 0xa58   : > { %v10119_v9 = vadd.f32 %v4419_v4, %v10038_v14 }
 0xa59   : > { %v4289_v24 = vpop.f32.mrf.mxu1  ;;  %v4421_v34 = vpop.f32.mrf.mxu0 }
 0xa5a   : > { %v10122_v15 = vadd.f32 %v4289_v24, %v10041_v29 }
 0xa5b   : > { %v4291_v12 = vpop.f32.mrf.mxu1  ;;  %v10124_v43 = vpop.f32.mrf.mxu0 }
 0xa5d   : > { %v4294_v28 = vpop.f32.mrf.mxu1  ;;  %v4426_v2 = vpop.f32.mrf.mxu0 }
 0xa5e   : > { %v10127_v48 = vadd.f32 %v4294_v28, %v10047_v22 }
 0xa5f   : > { %v4296_v45 = vpop.f32.mrf.mxu1  ;;  %v10129_v47 = vpop.f32.mrf.mxu0 }
 0xa61   : > { %v4564_v51 = vpop.f32.mrf.mxu1  ;;  %v4431_v19 = vpop.f32.mrf.mxu0 }
 0xa62   : > { %v10132_v14 = vadd.f32 %v4564_v51, %v10053_v37 }
 0xa63   : > { %v7132_v57 = vpop.f32.mrf.mxu1  ;;  %v10134_v10 = vpop.f32.mrf.mxu0 }
 0xa65   : > { %v4569_v29 = vpop.f32.mrf.mxu1  ;;  %v4436_v3 = vpop.f32.mrf.mxu0 }
 0xa66   : > { %v10137_v16 = vadd.f32 %v4569_v29, %v10059_v44 }
 0xa67   : > { %v7135_v7 = vpop.f32.mrf.mxu1  ;;  %v10139_v60 = vpop.f32.mrf.mxu0 }
 0xa69   : > { %v4574_v22 = vpop.f32.mrf.mxu1  ;;  %v4441_v52 = vpop.f32.mrf.mxu0 }
 0xa6a   : > { %v10142_v20 = vadd.f32 %v4574_v22, %v10065_v38 }
 0xa6b   : > { %v7138_v36 = vpop.f32.mrf.mxu1  ;;  %v4444_v61 = vpop.f32.mrf.mxu0 }
 0xa6c   : > { %v10145_v37 = vadd.f32 %v4444_v61, %v10068_v21 }
 0xa6d   : > { %v4579_v62 = vpop.f32.mrf.mxu1  ;;  %v4446_v25 = vpop.f32.mrf.mxu0 }
 0xa6e   : > { %v10148_v58 = vadd.f32 %v4579_v62, %v10071_v18 }
 0xa6f   : > { %v7141_v44 = vpop.f32.mrf.mxu1  ;;  %v4449_v23 = vpop.f32.mrf.mxu0 }
 0xa70   : > { %v10151_v17 = vadd.f32 %v4449_v23, %v10074_v39 }
 0xa71   : > { %v10153_v11 = vpop.f32.mrf.mxu1  ;;  %v4451_v35 = vpop.f32.mrf.mxu0 }
 0xa73   : > { %v7144_v38 = vpop.f32.mrf.mxu1  ;;  %v4454_v49 = vpop.f32.mrf.mxu0 }
 0xa74   : > { %v10156_v56 = vadd.f32 %v4454_v49, %v10080_v33 }
 0xa75   : > { %v10158_v21 = vpop.f32.mrf.mxu1  ;;  %v4456_v26 = vpop.f32.mrf.mxu0 }
 0xa77   : > { %v7147_v46 = vpop.f32.mrf.mxu1  ;;  %v4459_v40 = vpop.f32.mrf.mxu0 }
 0xa78   : > { %v10161_v18 = vadd.f32 %v4459_v40, %v10086_v42 }
 0xa79   : > { %v10163_v4 = vpop.f32.mrf.mxu1  ;;  %v4461_v39 = vpop.f32.mrf.mxu0 }
 0xa7b   : > { %v7150_v24 = vpop.f32.mrf.mxu1  ;;  %v4464_v34 = vpop.f32.mrf.mxu0 }
 0xa7c   : > { %v10166_v12 = vadd.f32 %v4464_v34, %v10092_v27 }
 0xa7d   : > { %v10168_v28 = vpop.f32.mrf.mxu1  ;;  %v4466_v33 = vpop.f32.mrf.mxu0 }
 0xa7f   : > { %v7153_v2 = vpop.f32.mrf.mxu1  ;;  %v4469_v45 = vpop.f32.mrf.mxu0 }
 0xa80   : > { %v10171_v51 = vadd.f32 %v4469_v45, %v10098_v59 }
 0xa81   : > { %v4604_v19 = vpop.f32.mrf.mxu1  ;;  %v4471_v57 = vpop.f32.mrf.mxu0 }
 0xa83   : > { %v7156_v42 = vpop.f32.mrf.mxu1  ;;  %v4474_v29 = vpop.f32.mrf.mxu0 }
 0xa84   : > { %v10174_v3 = vadd.f32 %v4474_v29, %v10104_v32  ;;  %v4440_v42 = vadd.f32 %v10139_v60, %v10062_v50 }
 0xa85   : > { %v4609_v7 = vpop.f32.mrf.mxu1  ;;  %v4476_v22 = vpop.f32.mrf.mxu0 }
 0xa87   : > { %v7159_v52 = vpop.f32.mrf.mxu1  ;;  %v4479_v27 = vpop.f32.mrf.mxu0 }
 0xa88   : > { %v10177_v36 = vadd.f32 %v4479_v27, %v10110_v55  ;;  %v4430_v55 = vadd.f32 %v10129_v47, %v10050_v31  ;;  %v4435_v47 = vadd.f32 %v10134_v10, %v10056_v0  ;;  %v10219_v0 = vadd.f32 %v4604_v19, %v10101_v13 }
 0xa89   : > { %v4614_v61 = vpop.f32.mrf.mxu1  ;;  %v4481_v62 = vpop.f32.mrf.mxu0  ;;  %v10236_v13 = vadd.f32 %v10163_v4, %v10089_v30  ;;  %v10253_v30 = vadd.f32 %v10153_v11, %v10077_v41 }
 0xa8b   : > { %v7162_v25 = vpop.f32.mrf.mxu1  ;;  %v4484_v44 = vpop.f32.mrf.mxu0 }
 0xa8c   : > { %v10180_v59 = vadd.f32 %v4484_v44, %v10116_v54  ;;  %v4425_v54 = vadd.f32 %v10124_v43, %v10044_v6  ;;  %v10205_v6 = vadd.f32 %v4614_v61, %v10113_v5 }
 0xa8d   : > { %v4619_v23 = vpop.f32.mrf.mxu1  ;;  %v4486_v35 = vpop.f32.mrf.mxu0 }
 0xa8e   : > { %v10231_v60 = vadd.f32 %v4619_v23, %v10119_v9  ;;  %v10248_v9 = vadd.f32 %v4609_v7, %v10107_v63  ;;  %v10264_v63 = vadd.f32 %v10168_v28, %v10095_v8  ;;  %v10276_v8 = vadd.f32 %v10158_v21, %v10083_v53 }
 0xa8f   : > { %v7165_v38 = vpop.f32.mrf.mxu1  ;;  %v10182_v49 = vpop.f32.mrf.mxu0 }
 0xa90   : > { %v4490_v35 = vadd.f32 %v10182_v49, %v10122_v15 }
 0xa91   : > { %v4624_v32 = vpop.f32.mrf.mxu1  ;;  %v4491_v26 = vpop.f32.mrf.mxu0 }
 0xa92   : > { %v10194_v45 = vadd.f32 %v4624_v32, %v4425_v54  ;;  %v4703_v54 = vld [vmem:[%s11392_s6 + $0x28] sm:$0xff] }
 0xa93   : > { %v7168_v46 = vpop.f32.mrf.mxu1  ;;  %v10184_v40 = vpop.f32.mrf.mxu0 }
 0xa94   : > { %v4495_v46 = vadd.f32 %v10184_v40, %v10127_v48  ;;  %v4701_v40 = vld [vmem:[%s11392_s6 + $0x18] sm:$0xff] }
 0xa95   : > { %v4629_v39 = vpop.f32.mrf.mxu1  ;;  %v4496_v24 = vpop.f32.mrf.mxu0 }
 0xa96   : > { %v10188_v34 = vadd.f32 %v4629_v39, %v4430_v55 }
 0xa97   : > { %v7171_v33 = vpop.f32.mrf.mxu1 }
 0xa98   : > { %4864 = vrot.lane.b32.xlu1 %v10188_v34, %s7382_s27 }
 0xa99   : > { %v4634_v2 = vpop.f32.mrf.mxu1 }
 0xa9a   : > { %v10207_v22 = vadd.f32 %v4634_v2, %v4435_v47  ;;  %v4705_v2 = vld [vmem:[%s11392_s6 + $0x38] sm:$0xff]  ;;  %v4708_v47 = vld [vmem:[%s11392_s6 + $0x50] sm:$0xff] }
 0xa9b   : > { %v7174_v57 = vpop.f32.mrf.mxu1 }
 0xa9c   : > { %4862 = vrot.lane.b32.xlu1 %v10194_v45, %s7382_s27  ;;  %v4704_v57 = vld [vmem:[%s11392_s6 + $0x30] sm:$0xff] }
 0xa9d   : > { %v4639_v31 = vpop.f32.mrf.mxu1 }
 0xa9e   : > { %v10202_v29 = vadd.f32 %v4639_v31, %v4440_v42  ;;  %v4706_v42 = vld [vmem:[%s11392_s6 + $0x40] sm:$0xff]  ;;  %v4709_v31 = vld [vmem:[%s11392_s6 + $0x58] sm:$0xff] }
 0xa9f   : > { %v7177_v43 = vpop.f32.mrf.mxu1 }
 0xaa0   : > { %4868 = vrot.lane.b32.xlu0 %v10202_v29, %s7382_s27  ;;  %5294 = vmatpush1.msra.mxu1 %v10202_v29  ;;  %v4713_v43 = vld [vmem:[%s11392_s6 + $0x78] sm:$0xff] }
 0xaa1   : > { %4858 = vrot.lane.b32.xlu1 %v10205_v6, %s7382_s27  ;;  %v10214_v50 = vpop.f32.mrf.mxu1  ;;  %5295 = vmatprep.subr.mxu1 %v11435_v1 }
 0xaa2   : > { %5296 = vmatpush1.msra.mxu1 %v10207_v22 }
 0xaa3   : > { %v7180_v5 = vpop.f32.mrf.mxu1  ;;  %5297 = vmatprep.subr.mxu1 %v11435_v1 }
 0xaa4   : > { %4866 = vrot.lane.b32.xlu0 %v10207_v22, %s7382_s27  ;;  %5298 = vmatpush1.msra.mxu1 %v10188_v34  ;;  %v4721_v5 = vld [vmem:[%s11392_s6 + $0xb8] sm:$0xff] }
 0xaa5   : > { %4854 = vrot.lane.b32.xlu1 %v10219_v0, %s7382_s27  ;;  %v10227_v10 = vpop.f32.mrf.mxu1  ;;  %5299 = vmatprep.subr.mxu1 %v11435_v1 }
 0xaa6   : > { %5300 = vmatpush1.msra.mxu1 %v10194_v45  ;;  %v10359_v49 = vadd.f32 %v10227_v10, %v10151_v17  ;;  %v10383_v17 = vadd.f32 %v10214_v50, %v10145_v37  ;;  %v4700_v37 = vld [vmem:[%s11392_s6 + $0x10] sm:$0xff] }
 0xaa7   : > { %v7183_v19 = vpop.f32.mrf.mxu1  ;;  %5301 = vmatprep.subr.mxu1 %v11435_v1  ;;  %v4716_v50 = vld [vmem:[%s11392_s6 + $0x90] sm:$0xff] }
 0xaa8   : > { %4860 = vrot.lane.b32.xlu0 %v10231_v60, %s7382_s27  ;;  %5302 = vmatpush1.msra.mxu1 %v10231_v60 }
 0xaa9   : > { %4850 = vrot.lane.b32.xlu1 %v10236_v13, %s7382_s27  ;;  %v10244_v52 = vpop.f32.mrf.mxu1  ;;  %5303 = vmatprep.subr.mxu1 %v11435_v1 }
 0xaaa   : > { %5304 = vmatpush1.msra.mxu1 %v10205_v6 }
 0xaab   : > { %v7186_v4 = vpop.f32.mrf.mxu1  ;;  %5305 = vmatprep.subr.mxu1 %v11435_v1 }
 0xaac   : > { %4856 = vrot.lane.b32.xlu0 %v10248_v9, %s7382_s27  ;;  %5306 = vmatpush1.msra.mxu1 %v10248_v9  ;;  %v4724_v4 = vld [vmem:[%s11392_s6 + $0xd0] sm:$0xff] }
 0xaad   : > { %4846 = vrot.lane.b32.xlu1 %v10253_v30, %s7382_s27  ;;  %v4659_v27 = vpop.f32.mrf.mxu1  ;;  %5307 = vmatprep.subr.mxu1 %v11435_v1 }
 0xaae   : > { %5308 = vmatpush1.msra.mxu1 %v10219_v0 }
 0xaaf   : > { %v7189_v41 = vpop.f32.mrf.mxu1  ;;  %5309 = vmatprep.subr.mxu1 %v11435_v1 }
 0xab0   : > { %4852 = vrot.lane.b32.xlu0 %v10264_v63, %s7382_s27  ;;  %5310 = vmatpush1.msra.mxu1 %v10264_v63 }
 0xab1   : > { %4842 = vrot.lane.b32.xlu1 %v10142_v20, %s7382_s27  ;;  %v4664_v11 = vpop.f32.mrf.mxu1  ;;  %5311 = vmatprep.subr.mxu1 %v11435_v1 }
 0xab2   : > { %5312 = vmatpush1.msra.mxu1 %v10236_v13 }
 0xab3   : > { %v7192_v28 = vpop.f32.mrf.mxu1  ;;  %5313 = vmatprep.subr.mxu1 %v11435_v1 }
 0xab4   : > { %4848 = vrot.lane.b32.xlu0 %v10276_v8, %s7382_s27  ;;  %5314 = vmatpush1.msra.mxu1 %v10276_v8 }
 0xab5   : > { %4838 = vrot.lane.b32.xlu1 %v10132_v14, %s7382_s27  ;;  %v4669_v7 = vpop.f32.mrf.mxu1  ;;  %5315 = vmatprep.subr.mxu1 %v11435_v1 }
 0xab6   : > { %5316 = vmatpush1.msra.mxu1 %v10253_v30  ;;  %v10323_v48 = vadd.f32 %v4669_v7, %v10171_v51  ;;  %v10337_v51 = vadd.f32 %v4659_v27, %v10161_v18  ;;  %v10353_v18 = vadd.f32 %v4664_v11, %v10166_v12  ;;  %v10371_v12 = vadd.f32 %v10244_v52, %v10156_v56  ;;  %v4698_v56 = vld [vmem:[%s11392_s6] sm:$0xff] }
 0xab7   : > { %v7195_v53 = vpop.f32.mrf.mxu1  ;;  %5317 = vmatprep.subr.mxu1 %v11435_v1  ;;  %v4722_v52 = vld [vmem:[%s11392_s6 + $0xc0] sm:$0xff] }
 0xab8   : > { %4844 = vrot.lane.b32.xlu0 %v10148_v58, %s7382_s27  ;;  %5318 = vmatpush1.msra.mxu1 %v10148_v58  ;;  %v4726_v11 = vld [vmem:[%s11392_s6 + $0xe0] sm:$0xff]  ;;  %v4728_v53 = vld [vmem:[%s11392_s6 + $0xf0] sm:$0xff] }
 0xab9   : > { %v4674_v21 = vpop.f32.mrf.mxu1  ;;  %5319 = vmatprep.subr.mxu1 %v11435_v1 }
 0xaba   : > { %5320 = vmatpush1.msra.mxu1 %v10142_v20 }
 0xabb   : > { %v7198_v61 = vpop.f32.mrf.mxu1  ;;  %5321 = vmatprep.subr.mxu1 %v11435_v1 }
 0xabc   : > { %4840 = vrot.lane.b32.xlu0 %v10137_v16, %s7382_s27  ;;  %5322 = vmatpush1.msra.mxu1 %v10137_v16 }
 0xabd   : > { %v4679_v62 = vpop.f32.mrf.mxu1  ;;  %5323 = vmatprep.subr.mxu1 %v11435_v1 }
 0xabe   : > { %5324 = vmatpush1.msra.mxu1 %v10132_v14  ;;  %v10309_v39 = vadd.f32 %v4679_v62, %v10177_v36  ;;  %v10333_v36 = vadd.f32 %v4674_v21, %v10174_v3  ;;  %v4699_v3 = vld [vmem:[%s11392_s6 + $0x8] sm:$0xff]  ;;  %v4730_v62 = vld [vmem:[%s11392_s6 + $0x100] sm:$0xff] }
 0xabf   : > { %v7201_v25 = vpop.f32.mrf.mxu1  ;;  %5335 = vmatprep.subr.mxu1 %v11435_v1  ;;  %6355 = vmatprep.mubr.msk.f32.mxu1 %vm4919_vm3, %v4699_v3  ;;  %v4731_v21 = vld [vmem:[%s11392_s6 + $0x108] sm:$0xff]  ;;  %v4740_v3 = vld [vmem:[%s11392_s6 + $0x150] sm:$0xff] }
 0xac1   : > { %v4684_v44 = vpop.f32.mrf.mxu1 }
 0xac2   : > { %v10319_v15 = vadd.f32 %v4684_v44, %v10180_v59  ;;  %v6272_v59 = vld [vmem:[%s11392_s6 + $0x1c8] sm:$0xff]  ;;  %v4733_v44 = vld [vmem:[%s11392_s6 + $0x118] sm:$0xff] }
 0xac3   : > { %v7204_v23 = vpop.f32.mrf.mxu1  ;;  %6327 = vmatprep.mubr.msk.f32.mxu0 %vm4919_vm3, %v6272_v59 }
 0xac5   : > { %v4689_v38 = vpop.f32.mrf.mxu1 }
 0xac6   : > { %v10302_v32 = vadd.f32 %v4689_v38, %v4490_v35  ;;  %v4732_v35 = vld [vmem:[%s11392_s6 + $0x110] sm:$0xff]  ;;  %v4735_v38 = vld [vmem:[%s11392_s6 + $0x128] sm:$0xff] }
 0xac7   : > { %v7207_v26 = vpop.f32.mrf.mxu1 }
 0xac8   : > { %4888 = vrot.lane.b32.xlu1 %v10302_v32, %s7382_s27 }
 0xac9   : > { %v4694_v55 = vpop.f32.mrf.mxu1 }
 0xaca   : > { %v10311_v24 = vadd.f32 %v4694_v55, %v4495_v46  ;;  %v4734_v46 = vld [vmem:[%s11392_s6 + $0x120] sm:$0xff]  ;;  %v4737_v55 = vld [vmem:[%s11392_s6 + $0x138] sm:$0xff] }
 0xacb   : > { %v7210_v33 = vpop.f32.mrf.mxu1 }
 0xacc   : > { %4890 = vrot.lane.b32.xlu0 %v10311_v24, %s7382_s27  ;;  %4884 = vrot.lane.b32.xlu1 %v10309_v39, %s7382_s27 }
 0xacd   : > { %5336 = vmatpush2.msra.mxu1 %v10311_v24 }
 0xace   : > { %5337 = vmatprep.subr.mxu1 %v11435_v1 }
 0xacf   : > { %5338 = vmatpush2.msra.mxu1 %v10302_v32 }
 0xad0   : > { %5339 = vmatprep.subr.mxu1 %v11435_v1  ;;  %4886 = vrot.lane.b32.xlu0 %v10319_v15, %s7382_s27 }
 0xad1   : > { %4880 = vrot.lane.b32.xlu1 %v10323_v48, %s7382_s27  ;;  %5340 = vmatpush2.msra.mxu1 %v10319_v15 }
 0xad2   : > { %5341 = vmatprep.subr.mxu1 %v11435_v1 }
 0xad3   : > { %5342 = vmatpush2.msra.mxu1 %v10309_v39 }
 0xad4   : > { %5343 = vmatprep.subr.mxu1 %v11435_v1  ;;  %4882 = vrot.lane.b32.xlu0 %v10333_v36, %s7382_s27 }
 0xad5   : > { %4876 = vrot.lane.b32.xlu1 %v10337_v51, %s7382_s27  ;;  %5344 = vmatpush2.msra.mxu1 %v10333_v36 }
 0xad6   : > { %5345 = vmatprep.subr.mxu1 %v11435_v1 }
 0xad7   : > { %5346 = vmatpush2.msra.mxu1 %v10323_v48 }
 0xad8   : > { %5347 = vmatprep.subr.mxu1 %v11435_v1  ;;  %4878 = vrot.lane.b32.xlu0 %v10353_v18, %s7382_s27 }
 0xad9   : > { %4872 = vrot.lane.b32.xlu1 %v10359_v49, %s7382_s27  ;;  %5348 = vmatpush2.msra.mxu1 %v10353_v18 }
 0xada   : > { %5349 = vmatprep.subr.mxu1 %v11435_v1 }
 0xadb   : > { %5350 = vmatpush2.msra.mxu1 %v10337_v51 }
 0xadc   : > { %5351 = vmatprep.subr.mxu1 %v11435_v1  ;;  %4874 = vrot.lane.b32.xlu0 %v10371_v12, %s7382_s27 }
 0xadd   : > { %5585 = vrot.lane.b32.xlu1 %v10202_v29, %s7383_s18  ;;  %5352 = vmatpush2.msra.mxu1 %v10371_v12  ;;  %v4711_v29 = vld [vmem:[%s11392_s6 + $0x68] sm:$0xff] }
 0xade   : > { %5353 = vmatprep.subr.mxu1 %v11435_v1 }
 0xadf   : > { %5354 = vmatpush2.msra.mxu1 %v10359_v49 }
 0xae0   : > { %5355 = vmatprep.subr.mxu1 %v11435_v1  ;;  %4870 = vrot.lane.b32.xlu0 %v10383_v17, %s7382_s27  ;;  %s7317_s27 = scalar_lea.vmem %s11340_s24, 3584 }
 0xae1   : > { %5581 = vrot.lane.b32.xlu1 %v10188_v34, %s7383_s18  ;;  %5356 = vmatpush2.msra.mxu1 %v10383_v17  ;;  %v4702_v34 = vld [vmem:[%s11392_s6 + $0x20] sm:$0xff]  ;;  %p7318_p11 = scmp.ne.s32.totalorder %s11340_s24, %s7317_s27  ;;  %p7325_p1 = scmp.lt.s32.totalorder %s7323_s13, %s7317_s27 }
 0xae2   : > { %5358 = vmatmul.mubr.f32.vlgmr.msra.gmra.mxu1 %v4698_v56  ;;  %v4744_v56 = vld [vmem:[%s11392_s6 + $0x170] sm:$0xff] }
 0xae3   : > { %6356 = vmatprep.mubr.msk.f32.mxu1 %vm4919_vm3, %v4701_v40  ;;  %v4747_v40 = vld [vmem:[%s11392_s6 + $0x188] sm:$0xff]  ;;  %p7319_p12 = pnand %p7318_p11, %p7473_p5  ;;  %p7326_p2 = por %p7325_p1, %p7324_p0 }
 0xae4   : > { %5583 = vrot.lane.b32.xlu0 %v10207_v22, %s7383_s18  ;;  %v4715_v22 = vld [vmem:[%s11392_s6 + $0x88] sm:$0xff] }
 0xae5   : > { %5577 = vrot.lane.b32.xlu1 %v10231_v60, %s7383_s18  ;;  %v4720_v60 = vld [vmem:[%s11392_s6 + $0xb0] sm:$0xff]  ;;  %p7320_p13 = pneg %p7319_p12 }
 0xae6   : > { %5363 = vmatmul.mubr.f32.gmra.mxu1 %v4700_v37 }
 0xae7   : > { %6357 = vmatprep.mubr.msk.f32.mxu1 %vm4919_vm3, %v4703_v54  ;;  %p7327_p3 = pnand %p7326_p2, %p7320_p13 }
 0xae8   : > { %5579 = vrot.lane.b32.xlu0 %v10194_v45, %s7383_s18  ;;  %v4707_v45 = vld [vmem:[%s11392_s6 + $0x48] sm:$0xff] }
 0xae9   : > { %5573 = vrot.lane.b32.xlu1 %v10248_v9, %s7383_s18  ;;  %v4725_v9 = vld [vmem:[%s11392_s6 + $0xd8] sm:$0xff] }
 0xaea   : > { %5368 = vmatmul.mubr.f32.gmra.mxu1 %v4702_v34  ;;  %v4746_v34 = vld [vmem:[%s11392_s6 + $0x180] sm:$0xff] }
 0xaeb   : > { %6358 = vmatprep.mubr.msk.f32.mxu1 %vm4919_vm3, %v4705_v2  ;;  %v4749_v2 = vld [vmem:[%s11392_s6 + $0x198] sm:$0xff] }
 0xaec   : > { %5575 = vrot.lane.b32.xlu0 %v10205_v6, %s7383_s18  ;;  %v4710_v6 = vld [vmem:[%s11392_s6 + $0x60] sm:$0xff] }
 0xaed   : > { %5569 = vrot.lane.b32.xlu1 %v10264_v63, %s7383_s18  ;;  %v4727_v63 = vld [vmem:[%s11392_s6 + $0xe8] sm:$0xff] }
 0xaee   : > { %5373 = vmatmul.mubr.f32.gmra.mxu1 %v4704_v57 }
 0xaef   : > { %6359 = vmatprep.mubr.msk.f32.mxu1 %vm4919_vm3, %v4707_v45 }
 0xaf0   : > { %5571 = vrot.lane.b32.xlu0 %v10219_v0, %s7383_s18  ;;  %v4718_v0 = vld [vmem:[%s11392_s6 + $0xa0] sm:$0xff] }
 0xaf1   : > { %5565 = vrot.lane.b32.xlu1 %v10276_v8, %s7383_s18  ;;  %v4729_v8 = vld [vmem:[%s11392_s6 + $0xf8] sm:$0xff] }
 0xaf2   : > { %5378 = vmatmul.mubr.f32.gmra.mxu1 %v4706_v42  ;;  %v4748_v42 = vld [vmem:[%s11392_s6 + $0x190] sm:$0xff] }
 0xaf3   : > { %6360 = vmatprep.mubr.msk.f32.mxu1 %vm4919_vm3, %v4709_v31  ;;  %v4751_v31 = vld [vmem:[%s11392_s6 + $0x1a8] sm:$0xff] }
 0xaf4   : > { %5567 = vrot.lane.b32.xlu0 %v10236_v13, %s7383_s18  ;;  %v4723_v13 = vld [vmem:[%s11392_s6 + $0xc8] sm:$0xff] }
 0xaf5   : > { %5561 = vrot.lane.b32.xlu1 %v10148_v58, %s7383_s18  ;;  %v4712_v58 = vld [vmem:[%s11392_s6 + $0x70] sm:$0xff] }
 0xaf6   : > { %5383 = vmatmul.mubr.f32.gmra.mxu1 %v4708_v47 }
 0xaf7   : > { %6361 = vmatprep.mubr.msk.f32.mxu1 %vm4919_vm3, %v4711_v29 }
 0xaf8   : > { %5563 = vrot.lane.b32.xlu0 %v10253_v30, %s7383_s18 }
 0xaf9   : > { %5557 = vrot.lane.b32.xlu1 %v10137_v16, %s7383_s18  ;;  %v4714_v16 = vld [vmem:[%s11392_s6 + $0x80] sm:$0xff] }
 0xafa   : > { %5388 = vmatmul.mubr.f32.gmra.mxu1 %v4710_v6  ;;  %v4750_v6 = vld [vmem:[%s11392_s6 + $0x1a0] sm:$0xff] }
 0xafb   : > { %6362 = vmatprep.mubr.msk.f32.mxu1 %vm4919_vm3, %v4713_v43  ;;  %v4753_v43 = vld [vmem:[%s11392_s6 + $0x1b8] sm:$0xff] }
 0xafc   : > { %5559 = vrot.lane.b32.xlu0 %v10142_v20, %s7383_s18  ;;  %v4717_v20 = vld [vmem:[%s11392_s6 + $0x98] sm:$0xff] }
 0xafd   : > { %5607 = vrot.lane.b32.xlu1 %v10311_v24, %s7383_s18  ;;  %v4736_v24 = vld [vmem:[%s11392_s6 + $0x130] sm:$0xff] }
 0xafe   : > { %5393 = vmatmul.mubr.f32.gmra.mxu1 %v4712_v58 }
 0xaff   : > { %6363 = vmatprep.mubr.msk.f32.mxu1 %vm4919_vm3, %v4715_v22 }
 0xb00   : > { %5555 = vrot.lane.b32.xlu0 %v10132_v14, %s7383_s18  ;;  %v4719_v14 = vld [vmem:[%s11392_s6 + $0xa8] sm:$0xff] }
 0xb01   : > { %5603 = vrot.lane.b32.xlu1 %v10319_v15, %s7383_s18  ;;  %v4739_v15 = vld [vmem:[%s11392_s6 + $0x148] sm:$0xff] }
 0xb02   : > { %5398 = vmatmul.mubr.f32.gmra.mxu1 %v4714_v16  ;;  %v4752_v16 = vld [vmem:[%s11392_s6 + $0x1b0] sm:$0xff] }
 0xb03   : > { %6364 = vmatprep.mubr.msk.f32.mxu1 %vm4919_vm3, %v4717_v20 }
 0xb04   : > { %5605 = vrot.lane.b32.xlu0 %v10302_v32, %s7383_s18 }
 0xb05   : > { %5599 = vrot.lane.b32.xlu1 %v10333_v36, %s7383_s18 }
 0xb06   : > { %5403 = vmatmul.mubr.f32.gmra.mxu1 %v4716_v50 }
 0xb07   : > { %6365 = vmatprep.mubr.msk.f32.mxu1 %vm4919_vm3, %v4719_v14  ;;  %v6271_v14 = vld [vmem:[%s11392_s6 + $0x1c0] sm:$0xff] }
 0xb08   : > { %5601 = vrot.lane.b32.xlu0 %v10309_v39, %s7383_s18 }
 0xb09   : > { %5595 = vrot.lane.b32.xlu1 %v10353_v18, %s7383_s18  ;;  %v4743_v18 = vld [vmem:[%s11392_s6 + $0x168] sm:$0xff] }
 0xb0a   : > { %v4865_v10 = vpop.permute.xlu1 %4864  ;;  %5408 = vmatmul.mubr.f32.gmra.mxu1 %v4718_v0 }
 0xb0b   : > { %6366 = vmatprep.mubr.msk.f32.mxu1 %vm4919_vm3, %v4721_v5  ;;  %v6274_v5 = vld [vmem:[%s11392_s6 + $0x1d8] sm:$0xff] }
 0xb0c   : > { %5597 = vrot.lane.b32.xlu0 %v10323_v48, %s7383_s18  ;;  %v4738_v48 = vld [vmem:[%s11392_s6 + $0x140] sm:$0xff] }
 0xb0d   : > { %5591 = vrot.lane.b32.xlu1 %v10371_v12, %s7383_s18  ;;  %v4745_v12 = vld [vmem:[%s11392_s6 + $0x178] sm:$0xff] }
 0xb0e   : > { %v4863_v19 = vpop.permute.xlu1 %4862  ;;  %5413 = vmatmul.mubr.f32.gmra.mxu1 %v4720_v60  ;;  %v6273_v60 = vld [vmem:[%s11392_s6 + $0x1d0] sm:$0xff] }
 0xb0f   : > { %6367 = vmatprep.mubr.msk.f32.mxu1 %vm4919_vm3, %v4723_v13 }
 0xb10   : > { %5593 = vrot.lane.b32.xlu0 %v10337_v51, %s7383_s18  ;;  %v4741_v51 = vld [vmem:[%s11392_s6 + $0x158] sm:$0xff] }
 0xb11   : > { %5587 = vrot.lane.b32.xlu1 %v10383_v17, %s7383_s18 }
 0xb12   : > { %v4869_v30 = vpop.permute.xlu0 %4868  ;;  %5418 = vmatmul.mubr.f32.gmra.mxu1 %v4722_v52 }
 0xb13   : > { %5005 = vmatpush1.msra.mxu0 %v4869_v30  ;;  %6368 = vmatprep.mubr.msk.f32.mxu1 %vm4919_vm3, %v4725_v9  ;;  %v4859_v27 = vpop.permute.xlu1 %4858  ;;  %v6275_v9 = vld [vmem:[%s11392_s6 + $0x1e0] sm:$0xff] }
 0xb14   : > { %5589 = vrot.lane.b32.xlu0 %v10359_v49, %s7383_s18  ;;  %5006 = vmatprep.subr.mxu0 %v11435_v1  ;;  %v4742_v49 = vld [vmem:[%s11392_s6 + $0x160] sm:$0xff]  ;;  %s11337_s18 = scalar_lea.hbm %s11394_s8, %s7215_s23 }
 0xb16   : > { %v4867_v41 = vpop.permute.xlu0 %4866  ;;  %5423 = vmatmul.mubr.f32.gmra.mxu1 %v4724_v4  ;;  %v6278_v4 = vld [vmem:[%s11392_s6 + $0x1f8] sm:$0xff] }
 0xb17   : > { %5007 = vmatpush1.msra.mxu0 %v4867_v41  ;;  %6369 = vmatprep.mubr.msk.f32.mxu1 %vm4919_vm3, %v4727_v63  ;;  %v4855_v28 = vpop.permute.xlu1 %4854  ;;  %v6277_v63 = vld [vmem:[%s11392_s6 + $0x1f0] sm:$0xff] }
 0xb18   : > { %5008 = vmatprep.subr.mxu0 %v11435_v1 }
 0xb19   : > { %5009 = vmatpush1.msra.mxu0 %v4865_v10 }
 0xb1a   : > { %5010 = vmatprep.subr.mxu0 %v11435_v1  ;;  %v4861_v7 = vpop.permute.xlu0 %4860  ;;  %5428 = vmatmul.mubr.f32.gmra.mxu1 %v4726_v11  ;;  %v6280_v11 = vld [vmem:[%s11392_s6 + $0x208] sm:$0xff] }
 0xb1b   : > { %5011 = vmatpush1.msra.mxu0 %v4863_v19  ;;  %6370 = vmatprep.mubr.msk.f32.mxu1 %vm4919_vm3, %v4729_v8  ;;  %v4851_v25 = vpop.permute.xlu1 %4850  ;;  %v6276_v19 = vld [vmem:[%s11392_s6 + $0x1e8] sm:$0xff] }
 0xb1c   : > { %5012 = vmatprep.subr.mxu0 %v11435_v1 }
 0xb1d   : > { %5013 = vmatpush1.msra.mxu0 %v4861_v7 }
 0xb1e   : > { %5014 = vmatprep.subr.mxu0 %v11435_v1  ;;  %v4857_v61 = vpop.permute.xlu0 %4856  ;;  %5433 = vmatmul.mubr.f32.gmra.mxu1 %v4728_v53  ;;  %v6282_v53 = vld [vmem:[%s11392_s6 + $0x218] sm:$0xff] }
 0xb1f   : > { %5015 = vmatpush1.msra.mxu0 %v4859_v27  ;;  %6371 = vmatprep.mubr.msk.f32.mxu1 %vm4919_vm3, %v4731_v21  ;;  %v4847_v32 = vpop.permute.xlu1 %4846 }
 0xb20   : > { %5016 = vmatprep.subr.mxu0 %v11435_v1 }
 0xb21   : > { %5017 = vmatpush1.msra.mxu0 %v4857_v61  ;;  %v6281_v61 = vld [vmem:[%s11392_s6 + $0x210] sm:$0xff] }
 0xb22   : > { %5018 = vmatprep.subr.mxu0 %v11435_v1  ;;  %v4853_v23 = vpop.permute.xlu0 %4852  ;;  %5438 = vmatmul.mubr.f32.gmra.mxu1 %v4730_v62 }
 0xb23   : > { %5019 = vmatpush1.msra.mxu0 %v4855_v28  ;;  %6372 = vmatprep.mubr.msk.f32.mxu1 %vm4919_vm3, %v4733_v44  ;;  %v4843_v33 = vpop.permute.xlu1 %4842  ;;  %v6279_v28 = vld [vmem:[%s11392_s6 + $0x200] sm:$0xff] }
 0xb24   : > { %5020 = vmatprep.subr.mxu0 %v11435_v1 }
 0xb25   : > { %5021 = vmatpush1.msra.mxu0 %v4853_v23  ;;  %v6283_v23 = vld [vmem:[%s11392_s6 + $0x220] sm:$0xff] }
 0xb26   : > { %5022 = vmatprep.subr.mxu0 %v11435_v1  ;;  %v4849_v26 = vpop.permute.xlu0 %4848  ;;  %5443 = vmatmul.mubr.f32.gmra.mxu1 %v4732_v35 }
 0xb27   : > { %5023 = vmatpush1.msra.mxu0 %v4851_v25  ;;  %6373 = vmatprep.mubr.msk.f32.mxu1 %vm4919_vm3, %v4735_v38  ;;  %v4839_v59 = vpop.permute.xlu1 %4838  ;;  %v6284_v25 = vld [vmem:[%s11392_s6 + $0x228] sm:$0xff]  ;;  %v6286_v38 = vld [vmem:[%s11392_s6 + $0x238] sm:$0xff] }
 0xb28   : > { %5024 = vmatprep.subr.mxu0 %v11435_v1 }
 0xb29   : > { %5025 = vmatpush1.msra.mxu0 %v4849_v26  ;;  %v6285_v26 = vld [vmem:[%s11392_s6 + $0x230] sm:$0xff] }
 0xb2a   : > { %5026 = vmatprep.subr.mxu0 %v11435_v1  ;;  %v4845_v39 = vpop.permute.xlu0 %4844  ;;  %5448 = vmatmul.mubr.f32.gmra.mxu1 %v4734_v46 }
 0xb2b   : > { %5027 = vmatpush1.msra.mxu0 %v4847_v32  ;;  %6374 = vmatprep.mubr.msk.f32.mxu1 %vm4919_vm3, %v4737_v55  ;;  %v6288_v55 = vld [vmem:[%s11392_s6 + $0x248] sm:$0xff] }
 0xb2c   : > { %5028 = vmatprep.subr.mxu0 %v11435_v1 }
 0xb2d   : > { %5029 = vmatpush1.msra.mxu0 %v4845_v39 }
 0xb2e   : > { %5030 = vmatprep.subr.mxu0 %v11435_v1  ;;  %5453 = vmatmul.mubr.f32.gmra.mxu1 %v4736_v24  ;;  %v4841_v36 = vpop.permute.xlu0 %4840  ;;  %v6287_v24 = vld [vmem:[%s11392_s6 + $0x240] sm:$0xff] }
 0xb2f   : > { %5031 = vmatpush1.msra.mxu0 %v4843_v33  ;;  %6375 = vmatprep.mubr.msk.f32.mxu1 %vm4919_vm3, %v4739_v15  ;;  %v6290_v15 = vld [vmem:[%s11392_s6 + $0x258] sm:$0xff] }
 0xb30   : > { %5032 = vmatprep.subr.mxu0 %v11435_v1 }
 0xb31   : > { %5033 = vmatpush1.msra.mxu0 %v4841_v36  ;;  %v6289_v36 = vld [vmem:[%s11392_s6 + $0x250] sm:$0xff] }
 0xb32   : > { %5034 = vmatprep.subr.mxu0 %v11435_v1  ;;  %5458 = vmatmul.mubr.f32.gmra.mxu1 %v4738_v48 }
 0xb33   : > { %5035 = vmatpush1.msra.mxu0 %v4839_v59  ;;  %6376 = vmatprep.mubr.msk.f32.mxu1 %vm4919_vm3, %v4741_v51  ;;  %v6292_v59 = vld [vmem:[%s11392_s6 + $0x268] sm:$0xff] }
 0xb34   : > { %5046 = vmatprep.subr.mxu0 %v11435_v1 }
 0xb36   : > { %5463 = vmatmul.mubr.f32.gmra.mxu1 %v4740_v3 }
 0xb37   : > { %6377 = vmatprep.mubr.msk.f32.mxu1 %vm4919_vm3, %v4743_v18  ;;  %v6291_v18 = vld [vmem:[%s11392_s6 + $0x260] sm:$0xff] }
 0xb3a   : > { %v4889_v17 = vpop.permute.xlu1 %4888  ;;  %5468 = vmatmul.mubr.f32.gmra.mxu1 %v4742_v49 }
 0xb3b   : > { %6378 = vmatprep.mubr.msk.f32.mxu1 %vm4919_vm3, %v4745_v12  ;;  %v6294_v12 = vld [vmem:[%s11392_s6 + $0x278] sm:$0xff] }
 0xb3e   : > { %v4891_v37 = vpop.permute.xlu0 %4890  ;;  %v4885_v54 = vpop.permute.xlu1 %4884  ;;  %5473 = vmatmul.mubr.f32.gmra.mxu1 %v4744_v56  ;;  %v6293_v56 = vld [vmem:[%s11392_s6 + $0x270] sm:$0xff] }
 0xb3f   : > { %5047 = vmatpush2.msra.mxu0 %v4891_v37  ;;  %6379 = vmatprep.mubr.msk.f32.mxu1 %vm4919_vm3, %v4747_v40  ;;  %v6296_v37 = vld [vmem:[%s11392_s6 + $0x288] sm:$0xff] }
 0xb40   : > { %5048 = vmatprep.subr.mxu0 %v11435_v1 }
 0xb41   : > { %5049 = vmatpush2.msra.mxu0 %v4889_v17 }
 0xb42   : > { %v4887_v57 = vpop.permute.xlu0 %4886  ;;  %5050 = vmatprep.subr.mxu0 %v11435_v1  ;;  %5478 = vmatmul.mubr.f32.gmra.mxu1 %v4746_v34 }
 0xb43   : > { %v4881_v45 = vpop.permute.xlu1 %4880  ;;  %5051 = vmatpush2.msra.mxu0 %v4887_v57  ;;  %6380 = vmatprep.mubr.msk.f32.mxu1 %vm4919_vm3, %v4749_v2  ;;  %v6298_v57 = vld [vmem:[%s11392_s6 + $0x298] sm:$0xff] }
 0xb44   : > { %5052 = vmatprep.subr.mxu0 %v11435_v1 }
 0xb45   : > { %5053 = vmatpush2.msra.mxu0 %v4885_v54  ;;  %v6295_v54 = vld [vmem:[%s11392_s6 + $0x280] sm:$0xff] }
 0xb46   : > { %v4883_v47 = vpop.permute.xlu0 %4882  ;;  %5054 = vmatprep.subr.mxu0 %v11435_v1  ;;  %5483 = vmatmul.mubr.f32.gmra.mxu1 %v4748_v42 }
 0xb47   : > { %v4877_v29 = vpop.permute.xlu1 %4876  ;;  %5055 = vmatpush2.msra.mxu0 %v4883_v47  ;;  %6381 = vmatprep.mubr.msk.f32.mxu1 %vm4919_vm3, %v4751_v31  ;;  %v6300_v31 = vld [vmem:[%s11392_s6 + $0x2a8] sm:$0xff] }
 0xb48   : > { %5056 = vmatprep.subr.mxu0 %v11435_v1 }
 0xb49   : > { %5057 = vmatpush2.msra.mxu0 %v4881_v45  ;;  %v6297_v45 = vld [vmem:[%s11392_s6 + $0x290] sm:$0xff] }
 0xb4a   : > { %v4879_v58 = vpop.permute.xlu0 %4878  ;;  %5058 = vmatprep.subr.mxu0 %v11435_v1  ;;  %5488 = vmatmul.mubr.f32.gmra.mxu1 %v4750_v6  ;;  %v6302_v6 = vld [vmem:[%s11392_s6 + $0x2b8] sm:$0xff] }
 0xb4b   : > { %v4873_v22 = vpop.permute.xlu1 %4872  ;;  %5059 = vmatpush2.msra.mxu0 %v4879_v58  ;;  %6382 = vmatprep.mubr.msk.f32.mxu1 %vm4919_vm3, %v4753_v43  ;;  %v6301_v43 = vld [vmem:[%s11392_s6 + $0x2b0] sm:$0xff]  ;;  %v6303_v58 = vld [vmem:[%s11392_s6 + $0x2c0] sm:$0xff] }
 0xb4c   : > { %5060 = vmatprep.subr.mxu0 %v11435_v1 }
 0xb4d   : > { %5061 = vmatpush2.msra.mxu0 %v4877_v29  ;;  %v6299_v29 = vld [vmem:[%s11392_s6 + $0x2a0] sm:$0xff] }
 0xb4e   : > { %v4875_v20 = vpop.permute.xlu0 %4874  ;;  %5062 = vmatprep.subr.mxu0 %v11435_v1  ;;  %5493 = vmatmul.mubr.f32.gmra.mxu1 %v4752_v16  ;;  %v6305_v16 = vld [vmem:[%s11392_s6 + $0x2d0] sm:$0xff] }
 0xb4f   : > { %v5586_v50 = vpop.permute.xlu1 %5585  ;;  %5063 = vmatpush2.msra.mxu0 %v4875_v20  ;;  %v6308_v20 = vld [vmem:[%s11392_s6 + $0x2e8] sm:$0xff] }
 0xb50   : > { %5064 = vmatprep.subr.mxu0 %v11435_v1 }
 0xb51   : > { %5065 = vmatpush2.msra.mxu0 %v4873_v22  ;;  %v6306_v22 = vld [vmem:[%s11392_s6 + $0x2d8] sm:$0xff] }
 0xb52   : > { %v4871_v0 = vpop.permute.xlu0 %4870  ;;  %5066 = vmatprep.subr.mxu0 %v11435_v1 }
 0xb53   : > { %v5582_v10 = vpop.permute.xlu1 %5581  ;;  %5067 = vmatpush2.msra.mxu0 %v4871_v0  ;;  %v6309_v0 = vld [vmem:[%s11392_s6 + $0x2f0] sm:$0xff] }
 0xb54   : > { %5069 = vmatmul.mubr.f32.vlgmr.msra.gmra.mxu0 %v6271_v14  ;;  %5720 = vmatprep.subr.mxu0 %v11435_v1  ;;  %v6310_v14 = vld [vmem:[%s11392_s6 + $0x2f8] sm:$0xff] }
 0xb55   : > { %5721 = vmatpush1.msra.mxu0 %v5586_v50  ;;  %6328 = vmatprep.mubr.msk.f32.mxu0 %vm4919_vm3, %v6274_v5  ;;  %v6307_v50 = vld [vmem:[%s11392_s6 + $0x2e0] sm:$0xff]  ;;  %v6312_v5 = vld [vmem:[%s11392_s6 + $0x308] sm:$0xff] }
 0xb56   : > { %v5584_v13 = vpop.permute.xlu0 %5583  ;;  %5722 = vmatprep.subr.mxu0 %v11435_v1 }
 0xb57   : > { %v5578_v52 = vpop.permute.xlu1 %5577  ;;  %5723 = vmatpush1.msra.mxu0 %v5584_v13 }
 0xb58   : > { %5074 = vmatmul.mubr.f32.gmra.mxu0 %v6273_v60  ;;  %5724 = vmatprep.subr.mxu0 %v11435_v1  ;;  %v6314_v60 = vld [vmem:[%s11392_s6 + $0x318] sm:$0xff] }
 0xb59   : > { %5725 = vmatpush1.msra.mxu0 %v5582_v10  ;;  %6329 = vmatprep.mubr.msk.f32.mxu0 %vm4919_vm3, %v6276_v19  ;;  %v6311_v10 = vld [vmem:[%s11392_s6 + $0x300] sm:$0xff] }
 0xb5a   : > { %v5580_v30 = vpop.permute.xlu0 %5579  ;;  %5726 = vmatprep.subr.mxu0 %v11435_v1 }
 0xb5b   : > { %v5574_v27 = vpop.permute.xlu1 %5573  ;;  %5727 = vmatpush1.msra.mxu0 %v5580_v30 }
 0xb5c   : > { %5079 = vmatmul.mubr.f32.gmra.mxu0 %v6275_v9  ;;  %5728 = vmatprep.subr.mxu0 %v11435_v1  ;;  %v6316_v9 = vld [vmem:[%s11392_s6 + $0x328] sm:$0xff] }
 0xb5d   : > { %5729 = vmatpush1.msra.mxu0 %v5578_v52  ;;  %6330 = vmatprep.mubr.msk.f32.mxu0 %vm4919_vm3, %v6278_v4  ;;  %v6313_v52 = vld [vmem:[%s11392_s6 + $0x310] sm:$0xff] }
 0xb5e   : > { %v5576_v41 = vpop.permute.xlu0 %5575  ;;  %5730 = vmatprep.subr.mxu0 %v11435_v1 }
 0xb5f   : > { %v5570_v8 = vpop.permute.xlu1 %5569  ;;  %5731 = vmatpush1.msra.mxu0 %v5576_v41 }
 0xb60   : > { %5084 = vmatmul.mubr.f32.gmra.mxu0 %v6277_v63  ;;  %5732 = vmatprep.subr.mxu0 %v11435_v1  ;;  %v6318_v63 = vld [vmem:[%s11392_s6 + $0x338] sm:$0xff] }
 0xb61   : > { %5733 = vmatpush1.msra.mxu0 %v5574_v27  ;;  %6331 = vmatprep.mubr.msk.f32.mxu0 %vm4919_vm3, %v6280_v11  ;;  %v6315_v27 = vld [vmem:[%s11392_s6 + $0x320] sm:$0xff] }
 0xb62   : > { %v5572_v7 = vpop.permute.xlu0 %5571  ;;  %5734 = vmatprep.subr.mxu0 %v11435_v1 }
 0xb63   : > { %v5566_v21 = vpop.permute.xlu1 %5565  ;;  %5735 = vmatpush1.msra.mxu0 %v5572_v7 }
 0xb64   : > { %5089 = vmatmul.mubr.f32.gmra.mxu0 %v6279_v28  ;;  %5736 = vmatprep.subr.mxu0 %v11435_v1  ;;  %v6320_v28 = vld [vmem:[%s11392_s6 + $0x348] sm:$0xff] }
 0xb65   : > { %5737 = vmatpush1.msra.mxu0 %v5570_v8  ;;  %6332 = vmatprep.mubr.msk.f32.mxu0 %vm4919_vm3, %v6282_v53  ;;  %v6317_v8 = vld [vmem:[%s11392_s6 + $0x330] sm:$0xff] }
 0xb66   : > { %v5568_v62 = vpop.permute.xlu0 %5567  ;;  %5738 = vmatprep.subr.mxu0 %v11435_v1 }
 0xb67   : > { %v5562_v44 = vpop.permute.xlu1 %5561  ;;  %5739 = vmatpush1.msra.mxu0 %v5568_v62 }
 0xb68   : > { %5094 = vmatmul.mubr.f32.gmra.mxu0 %v6281_v61  ;;  %5740 = vmatprep.subr.mxu0 %v11435_v1  ;;  %v6322_v61 = vld [vmem:[%s11392_s6 + $0x358] sm:$0xff] }
 0xb69   : > { %5741 = vmatpush1.msra.mxu0 %v5566_v21  ;;  %6333 = vmatprep.mubr.msk.f32.mxu0 %vm4919_vm3, %v6284_v25  ;;  %v6319_v21 = vld [vmem:[%s11392_s6 + $0x340] sm:$0xff] }
 0xb6a   : > { %v5564_v35 = vpop.permute.xlu0 %5563  ;;  %5742 = vmatprep.subr.mxu0 %v11435_v1 }
 0xb6b   : > { %v5558_v32 = vpop.permute.xlu1 %5557  ;;  %5743 = vmatpush1.msra.mxu0 %v5564_v35 }
 0xb6c   : > { %5099 = vmatmul.mubr.f32.gmra.mxu0 %v6283_v23  ;;  %5744 = vmatprep.subr.mxu0 %v11435_v1  ;;  %v6324_v23 = vld [vmem:[%s11392_s6 + $0x368] sm:$0xff] }
 0xb6d   : > { %5745 = vmatpush1.msra.mxu0 %v5562_v44  ;;  %6334 = vmatprep.mubr.msk.f32.mxu0 %vm4919_vm3, %v6286_v38  ;;  %v6321_v44 = vld [vmem:[%s11392_s6 + $0x350] sm:$0xff] }
 0xb6e   : > { %v5560_v46 = vpop.permute.xlu0 %5559  ;;  %5746 = vmatprep.subr.mxu0 %v11435_v1 }
 0xb6f   : > { %v5608_v39 = vpop.permute.xlu1 %5607  ;;  %5747 = vmatpush1.msra.mxu0 %v5560_v46 }
 0xb70   : > { %5104 = vmatmul.mubr.f32.gmra.mxu0 %v6285_v26  ;;  %5748 = vmatprep.subr.mxu0 %v11435_v1  ;;  %v6326_v26 = vld [vmem:[%s11392_s6 + $0x378] sm:$0xff] }
 0xb71   : > { %5749 = vmatpush1.msra.mxu0 %v5558_v32  ;;  %6335 = vmatprep.mubr.msk.f32.mxu0 %vm4919_vm3, %v6288_v55  ;;  %v6323_v32 = vld [vmem:[%s11392_s6 + $0x360] sm:$0xff] }
 0xb72   : > { %v5556_v33 = vpop.permute.xlu0 %5555  ;;  %5750 = vmatprep.subr.mxu0 %v11435_v1 }
 0xb73   : > { %v5604_v48 = vpop.permute.xlu1 %5603  ;;  %5751 = vmatpush1.msra.mxu0 %v5556_v33 }
 0xb74   : > { %5109 = vmatmul.mubr.f32.gmra.mxu0 %v6287_v24  ;;  %5762 = vmatprep.subr.mxu0 %v11435_v1  ;;  %v6384_v24 = vld [vmem:[%s11392_s6 + $0x388] sm:$0xff] }
 0xb75   : > { %5763 = vmatpush2.msra.mxu0 %v5608_v39  ;;  %6336 = vmatprep.mubr.msk.f32.mxu0 %vm4919_vm3, %v6290_v15  ;;  %v6325_v39 = vld [vmem:[%s11392_s6 + $0x370] sm:$0xff] }
 0xb76   : > { %v5606_v51 = vpop.permute.xlu0 %5605  ;;  %5764 = vmatprep.subr.mxu0 %v11435_v1 }
 0xb77   : > { %v5600_v3 = vpop.permute.xlu1 %5599  ;;  %5765 = vmatpush2.msra.mxu0 %v5606_v51 }
 0xb78   : > { %5114 = vmatmul.mubr.f32.gmra.mxu0 %v6289_v36  ;;  %5766 = vmatprep.subr.mxu0 %v11435_v1  ;;  %v6386_v36 = vld [vmem:[%s11392_s6 + $0x398] sm:$0xff] }
 0xb79   : > { %5767 = vmatpush2.msra.mxu0 %v5604_v48  ;;  %6337 = vmatprep.mubr.msk.f32.mxu0 %vm4919_vm3, %v6292_v59  ;;  %v6383_v48 = vld [vmem:[%s11392_s6 + $0x380] sm:$0xff] }
 0xb7a   : > { %v5602_v49 = vpop.permute.xlu0 %5601  ;;  %5768 = vmatprep.subr.mxu0 %v11435_v1 }
 0xb7b   : > { %5769 = vmatpush2.msra.mxu0 %v5602_v49  ;;  %v5596_v17 = vpop.permute.xlu1 %5595 }
 0xb7c   : > { %5119 = vmatmul.mubr.f32.gmra.mxu0 %v6291_v18  ;;  %5770 = vmatprep.subr.mxu0 %v11435_v1  ;;  %v6388_v18 = vld [vmem:[%s11392_s6 + $0x3a8] sm:$0xff] }
 0xb7d   : > { %5771 = vmatpush2.msra.mxu0 %v5600_v3  ;;  %6338 = vmatprep.mubr.msk.f32.mxu0 %vm4919_vm3, %v6294_v12  ;;  %v6385_v3 = vld [vmem:[%s11392_s6 + $0x390] sm:$0xff] }
 0xb7e   : > { %v5598_v40 = vpop.permute.xlu0 %5597  ;;  %5772 = vmatprep.subr.mxu0 %v11435_v1 }
 0xb7f   : > { %5773 = vmatpush2.msra.mxu0 %v5598_v40  ;;  %v5592_v34 = vpop.permute.xlu1 %5591 }
 0xb80   : > { %5124 = vmatmul.mubr.f32.gmra.mxu0 %v6293_v56  ;;  %5774 = vmatprep.subr.mxu0 %v11435_v1  ;;  %v6390_v56 = vld [vmem:[%s11392_s6 + $0x3b8] sm:$0xff] }
 0xb81   : > { %5775 = vmatpush2.msra.mxu0 %v5596_v17  ;;  %6339 = vmatprep.mubr.msk.f32.mxu0 %vm4919_vm3, %v6296_v37  ;;  %v6387_v17 = vld [vmem:[%s11392_s6 + $0x3a0] sm:$0xff] }
 0xb82   : > { %v5594_v2 = vpop.permute.xlu0 %5593  ;;  %5776 = vmatprep.subr.mxu0 %v11435_v1 }
 0xb83   : > { %5777 = vmatpush2.msra.mxu0 %v5594_v2  ;;  %v5588_v47 = vpop.permute.xlu1 %5587 }
 0xb84   : > { %5129 = vmatmul.mubr.f32.gmra.mxu0 %v6295_v54  ;;  %5778 = vmatprep.subr.mxu0 %v11435_v1  ;;  %v6389_v54 = vld [vmem:[%s11392_s6 + $0x3b0] sm:$0xff] }
 0xb85   : > { %5779 = vmatpush2.msra.mxu0 %v5592_v34  ;;  %6340 = vmatprep.mubr.msk.f32.mxu0 %vm4919_vm3, %v6298_v57  ;;  %v6392_v34 = vld [vmem:[%s11392_s6 + $0x3c8] sm:$0xff] }
 0xb86   : > { %v5590_v42 = vpop.permute.xlu0 %5589  ;;  %5780 = vmatprep.subr.mxu0 %v11435_v1 }
 0xb87   : > { %5781 = vmatpush2.msra.mxu0 %v5590_v42  ;;  %v6394_v42 = vld [vmem:[%s11392_s6 + $0x3d8] sm:$0xff] }
 0xb88   : > { %5134 = vmatmul.mubr.f32.gmra.mxu0 %v6297_v45  ;;  %5782 = vmatprep.subr.mxu0 %v11435_v1  ;;  %v6304_v1 = vld [vmem:[%s11392_s6 + $0x2c8] sm:$0xff]  ;;  %v6391_v45 = vld [vmem:[%s11392_s6 + $0x3c0] sm:$0xff] }
 0xb89   : > { %5783 = vmatpush2.msra.mxu0 %v5588_v47  ;;  %6341 = vmatprep.mubr.msk.f32.mxu0 %vm4919_vm3, %v6300_v31 }
 0xb8c   : > { %5139 = vmatmul.mubr.f32.gmra.mxu0 %v6299_v29  ;;  %v6393_v29 = vld [vmem:[%s11392_s6 + $0x3d0] sm:$0xff] }
 0xb8d   : > { %6342 = vmatprep.mubr.msk.f32.mxu0 %vm4919_vm3, %v6302_v6  ;;  %v6396_v6 = vld [vmem:[%s11392_s6 + $0x3e8] sm:$0xff] }
 0xb90   : > { %5144 = vmatmul.mubr.f32.gmra.mxu0 %v6301_v43 }
 0xb91   : > { %6343 = vmatprep.mubr.msk.f32.mxu0 %vm4919_vm3, %v6304_v1 }
 0xb94   : > { %5149 = vmatmul.mubr.f32.gmra.mxu0 %v6303_v58  ;;  %v6395_v58 = vld [vmem:[%s11392_s6 + $0x3e0] sm:$0xff] }
 0xb95   : > { %6344 = vmatprep.mubr.msk.f32.mxu0 %vm4919_vm3, %v6306_v22  ;;  %v6398_v22 = vld [vmem:[%s11392_s6 + $0x3f8] sm:$0xff] }
 0xb98   : > { %5154 = vmatmul.mubr.f32.gmra.mxu0 %v6305_v16 }
 0xb99   : > { %6345 = vmatprep.mubr.msk.f32.mxu0 %vm4919_vm3, %v6308_v20 }
 0xb9c   : > { %5159 = vmatmul.mubr.f32.gmra.mxu0 %v6307_v50  ;;  %v6397_v50 = vld [vmem:[%s11392_s6 + $0x3f0] sm:$0xff] }
 0xb9d   : > { %6346 = vmatprep.mubr.msk.f32.mxu0 %vm4919_vm3, %v6310_v14  ;;  %v6400_v14 = vld [vmem:[%s11392_s6 + $0x408] sm:$0xff] }
 0xba0   : > { %5164 = vmatmul.mubr.f32.gmra.mxu0 %v6309_v0 }
 0xba1   : > { %6347 = vmatprep.mubr.msk.f32.mxu0 %vm4919_vm3, %v6312_v5 }
 0xba2   : > { %v10834_v13 = vpop.f32.mrf.mxu1 }
 0xba4   : > { %5169 = vmatmul.mubr.f32.gmra.mxu0 %v6311_v10  ;;  %v5361_v19 = vpop.f32.mrf.mxu1  ;;  %v6399_v10 = vld [vmem:[%s11392_s6 + $0x400] sm:$0xff] }
 0xba5   : > { %6348 = vmatprep.mubr.msk.f32.mxu0 %vm4919_vm3, %v6314_v60  ;;  %v6402_v60 = vld [vmem:[%s11392_s6 + $0x418] sm:$0xff] }
 0xba6   : > { %v10843_v30 = vpop.f32.mrf.mxu1 }
 0xba8   : > { %5174 = vmatmul.mubr.f32.gmra.mxu0 %v6313_v52  ;;  %v5366_v4 = vpop.f32.mrf.mxu1 }
 0xba9   : > { %6349 = vmatprep.mubr.msk.f32.mxu0 %vm4919_vm3, %v6316_v9  ;;  %v6401_v9 = vld [vmem:[%s11392_s6 + $0x410] sm:$0xff]  ;;  %v6404_v4 = vld [vmem:[%s11392_s6 + $0x428] sm:$0xff] }
 0xbaa   : > { %v10852_v41 = vpop.f32.mrf.mxu1 }
 0xbac   : > { %5179 = vmatmul.mubr.f32.gmra.mxu0 %v6315_v27  ;;  %v5371_v11 = vpop.f32.mrf.mxu1 }
 0xbad   : > { %6350 = vmatprep.mubr.msk.f32.mxu0 %vm4919_vm3, %v6318_v63  ;;  %v6403_v11 = vld [vmem:[%s11392_s6 + $0x420] sm:$0xff] }
 0xbae   : > { %v10861_v7 = vpop.f32.mrf.mxu1 }
 0xbb0   : > { %5184 = vmatmul.mubr.f32.gmra.mxu0 %v6317_v8  ;;  %v5376_v53 = vpop.f32.mrf.mxu1  ;;  %v6406_v8 = vld [vmem:[%s11392_s6 + $0x438] sm:$0xff] }
 0xbb1   : > { %6351 = vmatprep.mubr.msk.f32.mxu0 %vm4919_vm3, %v6320_v28 }
 0xbb2   : > { %v10870_v62 = vpop.f32.mrf.mxu1 }
 0xbb4   : > { %5189 = vmatmul.mubr.f32.gmra.mxu0 %v6319_v21  ;;  %v5381_v25 = vpop.f32.mrf.mxu1  ;;  %v6405_v21 = vld [vmem:[%s11392_s6 + $0x430] sm:$0xff] }
 0xbb5   : > { %6352 = vmatprep.mubr.msk.f32.mxu0 %vm4919_vm3, %v6322_v61  ;;  %v6408_v61 = vld [vmem:[%s11392_s6 + $0x448] sm:$0xff] }
 0xbb6   : > { %v10879_v35 = vpop.f32.mrf.mxu1 }
 0xbb8   : > { %5194 = vmatmul.mubr.f32.gmra.mxu0 %v6321_v44  ;;  %v5386_v38 = vpop.f32.mrf.mxu1 }
 0xbb9   : > { %6353 = vmatprep.mubr.msk.f32.mxu0 %vm4919_vm3, %v6324_v23  ;;  %v6407_v23 = vld [vmem:[%s11392_s6 + $0x440] sm:$0xff]  ;;  %v6410_v38 = vld [vmem:[%s11392_s6 + $0x458] sm:$0xff] }
 0xbba   : > { %v10888_v46 = vpop.f32.mrf.mxu1 }
 0xbbc   : > { %5199 = vmatmul.mubr.f32.gmra.mxu0 %v6323_v32  ;;  %v5391_v55 = vpop.f32.mrf.mxu1 }
 0xbbd   : > { %6354 = vmatprep.mubr.msk.f32.mxu0 %vm4919_vm3, %v6326_v26  ;;  %v6409_v55 = vld [vmem:[%s11392_s6 + $0x450] sm:$0xff] }
 0xbbe   : > { %v10897_v33 = vpop.f32.mrf.mxu1 }
 0xbc0   : > { %5204 = vmatmul.mubr.f32.gmra.mxu0 %v6325_v39  ;;  %v5396_v15 = vpop.f32.mrf.mxu1  ;;  %v6412_v39 = vld [vmem:[%s11392_s6 + $0x468] sm:$0xff] }
 0xbc1   : > { %6439 = vmatprep.mubr.msk.f32.mxu0 %vm4919_vm3, %v6384_v24 }
 0xbc2   : > { %v10906_v51 = vpop.f32.mrf.mxu1 }
 0xbc4   : > { %5785 = vmatmul.mubr.f32.vlgmr.msra.gmra.mxu0 %v6383_v48  ;;  %v5401_v59 = vpop.f32.mrf.mxu1  ;;  %v6411_v48 = vld [vmem:[%s11392_s6 + $0x460] sm:$0xff] }
 0xbc5   : > { %6440 = vmatprep.mubr.msk.f32.mxu0 %vm4919_vm3, %v6386_v36  ;;  %v6414_v36 = vld [vmem:[%s11392_s6 + $0x478] sm:$0xff] }
 0xbc6   : > { %v10915_v49 = vpop.f32.mrf.mxu1 }
 0xbc8   : > { %5790 = vmatmul.mubr.f32.gmra.mxu0 %v6385_v3  ;;  %v5406_v12 = vpop.f32.mrf.mxu1 }
 0xbc9   : > { %6441 = vmatprep.mubr.msk.f32.mxu0 %vm4919_vm3, %v6388_v18  ;;  %v6413_v18 = vld [vmem:[%s11392_s6 + $0x470] sm:$0xff]  ;;  %v6416_v12 = vld [vmem:[%s11392_s6 + $0x488] sm:$0xff] }
 0xbca   : > { %v10924_v40 = vpop.f32.mrf.mxu1 }
 0xbcc   : > { %5795 = vmatmul.mubr.f32.gmra.mxu0 %v6387_v17  ;;  %v5411_v37 = vpop.f32.mrf.mxu1 }
 0xbcd   : > { %6442 = vmatprep.mubr.msk.f32.mxu0 %vm4919_vm3, %v6390_v56  ;;  %v6415_v37 = vld [vmem:[%s11392_s6 + $0x480] sm:$0xff] }
 0xbce   : > { %v10933_v2 = vpop.f32.mrf.mxu1 }
 0xbd0   : > { %5800 = vmatmul.mubr.f32.gmra.mxu0 %v6389_v54  ;;  %v5416_v57 = vpop.f32.mrf.mxu1  ;;  %v6418_v54 = vld [vmem:[%s11392_s6 + $0x498] sm:$0xff] }
 0xbd1   : > { %6443 = vmatprep.mubr.msk.f32.mxu0 %vm4919_vm3, %v6392_v34 }
 0xbd2   : > { %v10942_v31 = vpop.f32.mrf.mxu1 }
 0xbd4   : > { %5805 = vmatmul.mubr.f32.gmra.mxu0 %v6391_v45  ;;  %v5421_v47 = vpop.f32.mrf.mxu1  ;;  %v6417_v45 = vld [vmem:[%s11392_s6 + $0x490] sm:$0xff] }
 0xbd5   : > { %6444 = vmatprep.mubr.msk.f32.mxu0 %vm4919_vm3, %v6394_v42  ;;  %v6420_v42 = vld [vmem:[%s11392_s6 + $0x4a8] sm:$0xff] }
 0xbd6   : > { %v10951_v43 = vpop.f32.mrf.mxu1 }
 0xbd8   : > { %5810 = vmatmul.mubr.f32.gmra.mxu0 %v6393_v29  ;;  %v5426_v1 = vpop.f32.mrf.mxu1 }
 0xbd9   : > { %6445 = vmatprep.mubr.msk.f32.mxu0 %vm4919_vm3, %v6396_v6  ;;  %v6419_v6 = vld [vmem:[%s11392_s6 + $0x4a0] sm:$0xff]  ;;  %v6422_v1 = vld [vmem:[%s11392_s6 + $0x4b8] sm:$0xff] }
 0xbda   : > { %v10960_v16 = vpop.f32.mrf.mxu1 }
 0xbdc   : > { %5815 = vmatmul.mubr.f32.gmra.mxu0 %v6395_v58  ;;  %v5431_v20 = vpop.f32.mrf.mxu1 }
 0xbdd   : > { %6446 = vmatprep.mubr.msk.f32.mxu0 %vm4919_vm3, %v6398_v22  ;;  %v6421_v20 = vld [vmem:[%s11392_s6 + $0x4b0] sm:$0xff] }
 0xbde   : > { %v10969_v0 = vpop.f32.mrf.mxu1 }
 0xbe0   : > { %5820 = vmatmul.mubr.f32.gmra.mxu0 %v6397_v50  ;;  %v5436_v5 = vpop.f32.mrf.mxu1  ;;  %v6424_v50 = vld [vmem:[%s11392_s6 + $0x4c8] sm:$0xff] }
 0xbe1   : > { %6447 = vmatprep.mubr.msk.f32.mxu0 %vm4919_vm3, %v6400_v14 }
 0xbe2   : > { %v10978_v19 = vpop.f32.mrf.mxu1 }
 0xbe4   : > { %5825 = vmatmul.mubr.f32.gmra.mxu0 %v6399_v10  ;;  %v5441_v52 = vpop.f32.mrf.mxu1  ;;  %v6423_v10 = vld [vmem:[%s11392_s6 + $0x4c0] sm:$0xff] }
 0xbe5   : > { %6448 = vmatprep.mubr.msk.f32.mxu0 %vm4919_vm3, %v6402_v60  ;;  %v6426_v60 = vld [vmem:[%s11392_s6 + $0x4d8] sm:$0xff] }
 0xbe6   : > { %v10987_v27 = vpop.f32.mrf.mxu1 }
 0xbe8   : > { %5830 = vmatmul.mubr.f32.gmra.mxu0 %v6401_v9  ;;  %v5446_v63 = vpop.f32.mrf.mxu1  ;;  %v6425_v9 = vld [vmem:[%s11392_s6 + $0x4d0] sm:$0xff] }
 0xbe9   : > { %6449 = vmatprep.mubr.msk.f32.mxu0 %vm4919_vm3, %v6404_v4  ;;  %v6428_v63 = vld [vmem:[%s11392_s6 + $0x4e8] sm:$0xff] }
 0xbea   : > { %v10996_v28 = vpop.f32.mrf.mxu1 }
 0xbec   : > { %5835 = vmatmul.mubr.f32.gmra.mxu0 %v6403_v11  ;;  %v5451_v53 = vpop.f32.mrf.mxu1 }
 0xbed   : > { %6450 = vmatprep.mubr.msk.f32.mxu0 %vm4919_vm3, %v6406_v8  ;;  %v6427_v8 = vld [vmem:[%s11392_s6 + $0x4e0] sm:$0xff] }
 0xbee   : > { %v11005_v25 = vpop.f32.mrf.mxu1 }
 0xbf0   : > { %5840 = vmatmul.mubr.f32.gmra.mxu0 %v6405_v21  ;;  %v5456_v44 = vpop.f32.mrf.mxu1  ;;  %v6430_v21 = vld [vmem:[%s11392_s6 + $0x4f8] sm:$0xff] }
 0xbf1   : > { %6451 = vmatprep.mubr.msk.f32.mxu0 %vm4919_vm3, %v6408_v61  ;;  %v6429_v44 = vld [vmem:[%s11392_s6 + $0x4f0] sm:$0xff] }
 0xbf2   : > { %v11014_v32 = vpop.f32.mrf.mxu1 }
 0xbf4   : > { %5845 = vmatmul.mubr.f32.gmra.mxu0 %v6407_v23  ;;  %v5461_v26 = vpop.f32.mrf.mxu1 }
 0xbf5   : > { %6452 = vmatprep.mubr.msk.f32.mxu0 %vm4919_vm3, %v6410_v38  ;;  %v6432_v38 = vld [vmem:[%s11392_s6 + $0x508] sm:$0xff] }
 0xbf6   : > { %v11023_v24 = vpop.f32.mrf.mxu1 }
 0xbf8   : > { %5850 = vmatmul.mubr.f32.gmra.mxu0 %v6409_v55  ;;  %v5466_v15 = vpop.f32.mrf.mxu1  ;;  %v6431_v55 = vld [vmem:[%s11392_s6 + $0x500] sm:$0xff] }
 0xbf9   : > { %6453 = vmatprep.mubr.msk.f32.mxu0 %vm4919_vm3, %v6412_v39  ;;  %v6434_v15 = vld [vmem:[%s11392_s6 + $0x518] sm:$0xff] }
 0xbfa   : > { %v11032_v59 = vpop.f32.mrf.mxu1 }
 0xbfc   : > { %5855 = vmatmul.mubr.f32.gmra.mxu0 %v6411_v48  ;;  %v5471_v3 = vpop.f32.mrf.mxu1 }
 0xbfd   : > { %6454 = vmatprep.mubr.msk.f32.mxu0 %vm4919_vm3, %v6414_v36  ;;  %v6433_v36 = vld [vmem:[%s11392_s6 + $0x510] sm:$0xff] }
 0xbfe   : > { %v11041_v17 = vpop.f32.mrf.mxu1 }
 0xc00   : > { %5860 = vmatmul.mubr.f32.gmra.mxu0 %v6413_v18  ;;  %v5476_v56 = vpop.f32.mrf.mxu1  ;;  %v6436_v18 = vld [vmem:[%s11392_s6 + $0x528] sm:$0xff] }
 0xc01   : > { %6455 = vmatprep.mubr.msk.f32.mxu0 %vm4919_vm3, %v6416_v12  ;;  %v6435_v56 = vld [vmem:[%s11392_s6 + $0x520] sm:$0xff] }
 0xc02   : > { %v11050_v34 = vpop.f32.mrf.mxu1 }
 0xc04   : > { %5865 = vmatmul.mubr.f32.gmra.mxu0 %v6415_v37  ;;  %v5481_v57 = vpop.f32.mrf.mxu1 }
 0xc05   : > { %6456 = vmatprep.mubr.msk.f32.mxu0 %vm4919_vm3, %v6418_v54  ;;  %v6438_v54 = vld [vmem:[%s11392_s6 + $0x538] sm:$0xff] }
 0xc06   : > { %v11059_v47 = vpop.f32.mrf.mxu1 }
 0xc08   : > { %5870 = vmatmul.mubr.f32.gmra.mxu0 %v6417_v45  ;;  %v5486_v29 = vpop.f32.mrf.mxu1  ;;  %v6437_v45 = vld [vmem:[%s11392_s6 + $0x530] sm:$0xff] }
 0xc09   : > { %6457 = vmatprep.mubr.msk.f32.mxu0 %vm4919_vm3, %v6420_v42 }
 0xc0a   : > { %v11068_v58 = vpop.f32.mrf.mxu1 }
 0xc0c   : > { %5875 = vmatmul.mubr.f32.gmra.mxu0 %v6419_v6  ;;  %v5491_v22 = vpop.f32.mrf.mxu1 }
 0xc0d   : > { %6458 = vmatprep.mubr.msk.f32.mxu0 %vm4919_vm3, %v6422_v1 }
 0xc0e   : > { %v11077_v14 = vpop.f32.mrf.mxu1 }
 0xc0f   : > { %11739 = vst [vmem:[#allocation40_spill] sm:$0xff] %v11077_v14 }
 0xc10   : > { %5880 = vmatmul.mubr.f32.gmra.mxu0 %v6421_v20  ;;  %v5496_v5 = vpop.f32.mrf.mxu1 }
 0xc11   : > { %6459 = vmatprep.mubr.msk.f32.mxu0 %vm4919_vm3, %v6424_v50 }
 0xc14   : > { %v11086_v52 = vpop.f32.mrf.mxu0  ;;  %5885 = vmatmul.mubr.f32.gmra.mxu0 %v6423_v10 }
 0xc15   : > { %6460 = vmatprep.mubr.msk.f32.mxu0 %vm4919_vm3, %v6426_v60 }
 0xc16   : > { %v5072_v4 = vpop.f32.mrf.mxu0 }
 0xc18   : > { %v11095_v11 = vpop.f32.mrf.mxu0  ;;  %5890 = vmatmul.mubr.f32.gmra.mxu0 %v6425_v9 }
 0xc19   : > { %6461 = vmatprep.mubr.msk.f32.mxu0 %vm4919_vm3, %v6428_v63 }
 0xc1a   : > { %v5077_v53 = vpop.f32.mrf.mxu0 }
 0xc1c   : > { %v11104_v61 = vpop.f32.mrf.mxu0  ;;  %5895 = vmatmul.mubr.f32.gmra.mxu0 %v6427_v8 }
 0xc1d   : > { %6462 = vmatprep.mubr.msk.f32.mxu0 %vm4919_vm3, %v6430_v21 }
 0xc1e   : > { %v5082_v23 = vpop.f32.mrf.mxu0 }
 0xc20   : > { %v11113_v26 = vpop.f32.mrf.mxu0  ;;  %5900 = vmatmul.mubr.f32.gmra.mxu0 %v6429_v44 }
 0xc21   : > { %6463 = vmatprep.mubr.msk.f32.mxu0 %vm4919_vm3, %v6432_v38 }
 0xc22   : > { %v5087_v39 = vpop.f32.mrf.mxu0 }
 0xc24   : > { %v11122_v48 = vpop.f32.mrf.mxu0  ;;  %5905 = vmatmul.mubr.f32.gmra.mxu0 %v6431_v55 }
 0xc25   : > { %6464 = vmatprep.mubr.msk.f32.mxu0 %vm4919_vm3, %v6434_v15 }
 0xc26   : > { %v5092_v3 = vpop.f32.mrf.mxu0 }
 0xc28   : > { %v11131_v12 = vpop.f32.mrf.mxu0  ;;  %5910 = vmatmul.mubr.f32.gmra.mxu0 %v6433_v36 }
 0xc29   : > { %6465 = vmatprep.mubr.msk.f32.mxu0 %vm4919_vm3, %v6436_v18 }
 0xc2a   : > { %v5097_v37 = vpop.f32.mrf.mxu0 }
 0xc2c   : > { %v11140_v57 = vpop.f32.mrf.mxu0  ;;  %5915 = vmatmul.mubr.f32.gmra.mxu0 %v6435_v56 }
 0xc2d   : > { %6466 = vmatprep.mubr.msk.f32.mxu0 %vm4919_vm3, %v6438_v54 }
 0xc2e   : > { %v5102_v42 = vpop.f32.mrf.mxu0 }
 0xc30   : > { %v11146_v29 = vpop.f32.mrf.mxu0  ;;  %5920 = vmatmul.mubr.f32.gmra.mxu0 %v6437_v45 }
 0xc32   : > { %v5107_v6 = vpop.f32.mrf.mxu0 }
 0xc34   : > { %v11148_v1 = vpop.f32.mrf.mxu0 }
 0xc36   : > { %v5112_v22 = vpop.f32.mrf.mxu0 }
 0xc38   : > { %v11150_v20 = vpop.f32.mrf.mxu0 }
 0xc3a   : > { %v5117_v50 = vpop.f32.mrf.mxu0 }
 0xc3c   : > { %v11152_v5 = vpop.f32.mrf.mxu0 }
 0xc3e   : > { %v5122_v10 = vpop.f32.mrf.mxu0 }
 0xc40   : > { %v11154_v60 = vpop.f32.mrf.mxu0 }
 0xc42   : > { %v5127_v9 = vpop.f32.mrf.mxu0 }
 0xc44   : > { %v11156_v4 = vpop.f32.mrf.mxu0 }
 0xc46   : > { %v5132_v63 = vpop.f32.mrf.mxu0 }
 0xc48   : > { %v11158_v8 = vpop.f32.mrf.mxu0 }
 0xc4a   : > { %v5137_v53 = vpop.f32.mrf.mxu0 }
 0xc4c   : > { %v11160_v21 = vpop.f32.mrf.mxu0 }
 0xc4e   : > { %v5142_v44 = vpop.f32.mrf.mxu0 }
 0xc50   : > { %v11162_v23 = vpop.f32.mrf.mxu0 }
 0xc52   : > { %v5147_v38 = vpop.f32.mrf.mxu0 }
 0xc54   : > { %v11164_v55 = vpop.f32.mrf.mxu0 }
 0xc56   : > { %v5152_v39 = vpop.f32.mrf.mxu0 }
 0xc58   : > { %v11166_v15 = vpop.f32.mrf.mxu0 }
 0xc5a   : > { %v5157_v36 = vpop.f32.mrf.mxu0 }
 0xc5c   : > { %v11168_v3 = vpop.f32.mrf.mxu0 }
 0xc5e   : > { %v5162_v18 = vpop.f32.mrf.mxu0 }
 0xc60   : > { %v11170_v56 = vpop.f32.mrf.mxu0 }
 0xc62   : > { %v5167_v37 = vpop.f32.mrf.mxu0 }
 0xc64   : > { %v11172_v54 = vpop.f32.mrf.mxu0 }
 0xc66   : > { %v5172_v45 = vpop.f32.mrf.mxu0 }
 0xc67   : > { %v5360_v45 = vadd.f32 %v10834_v13, %v11086_v52 }
 0xc68   : > { %v11174_v42 = vpop.f32.mrf.mxu0 }
 0xc6a   : > { %v5177_v6 = vpop.f32.mrf.mxu0 }
 0xc6c   : > { %v11176_v22 = vpop.f32.mrf.mxu0 }
 0xc6e   : > { %v5182_v50 = vpop.f32.mrf.mxu0 }
 0xc6f   : > { %v11193_v50 = vstv %s5953_s19 }
 0xc70   : > { %v11178_v10 = vpop.f32.mrf.mxu0 }
 0xc72   : > { %v5187_v9 = vpop.f32.mrf.mxu0 }
 0xc74   : > { %v11180_v63 = vpop.f32.mrf.mxu0 }
 0xc76   : > { %v5192_v53 = vpop.f32.mrf.mxu0 }
 0xc78   : > { %v11182_v44 = vpop.f32.mrf.mxu0 }
 0xc7a   : > { %v5197_v38 = vpop.f32.mrf.mxu0 }
 0xc7b   : > { %v5365_v38 = vadd.f32 %v10843_v30, %v11095_v11 }
 0xc7c   : > { %v11184_v39 = vpop.f32.mrf.mxu0 }
 0xc7e   : > { %v5202_v36 = vpop.f32.mrf.mxu0 }
 0xc80   : > { %v11187_v18 = vpop.f32.mrf.mxu0 }
 0xc82   : > { %v5207_v37 = vpop.f32.mrf.mxu0 }
 0xc83   : > { %v5370_v37 = vadd.f32 %v10852_v41, %v11104_v61  ;;  %v5380_v41 = vadd.f32 %v10870_v62, %v11122_v48  ;;  %v5390_v62 = vadd.f32 %v10888_v46, %v11140_v57  ;;  %v5400_v46 = vadd.f32 %v10906_v51, %v11148_v1 }
 0xc84   : > { %v5786_v6 = vpop.f32.mrf.mxu0  ;;  %v5410_v51 = vadd.f32 %v10924_v40, %v11152_v5  ;;  %v5420_v40 = vadd.f32 %v10942_v31, %v11156_v4  ;;  %v5430_v31 = vadd.f32 %v10960_v16, %v11160_v21  ;;  %v5440_v16 = vadd.f32 %v10978_v19, %v11164_v55 }
 0xc85   : > { %v5925_v9 = vadd.f32 %v5786_v6, %v5360_v45  ;;  %v5450_v19 = vadd.f32 %v10996_v28, %v11168_v3  ;;  %v5460_v28 = vadd.f32 %v11014_v32, %v11172_v54  ;;  %v5470_v32 = vadd.f32 %v11032_v59, %v11176_v22 }
 0xc86   : > { %v5788_v53 = vpop.f32.mrf.mxu0  ;;  %v5480_v59 = vadd.f32 %v11050_v34, %v11180_v63  ;;  %v5490_v63 = vadd.f32 %v11068_v58, %v11184_v39 }
 0xc87   : > { %v5955_v36 = vadd.f32 %v11193_v50, %v5925_v9  ;;  %v5375_v9 = vadd.f32 %v10861_v7, %v11113_v26  ;;  %v5385_v7 = vadd.f32 %v10879_v35, %v11131_v12  ;;  %v5395_v35 = vadd.f32 %v10897_v33, %v11146_v29 }
 0xc88   : > { %v5791_v14 = vpop.f32.mrf.mxu0  ;;  %v5405_v33 = vadd.f32 %v10915_v49, %v11150_v20  ;;  %v5415_v49 = vadd.f32 %v10933_v2, %v11154_v60  ;;  %v5425_v2 = vadd.f32 %v10951_v43, %v11158_v8  ;;  %v5435_v43 = vadd.f32 %v10969_v0, %v11162_v23 }
 0xc89   : > { %5984 = vst.msk [vmem:[%s11198_s22] sm:$0xff] %vm5983_vm4, %v5955_v36  ;;  %v5926_v13 = vadd.f32 %v5791_v14, %v5365_v38  ;;  %v5445_v0 = vadd.f32 %v10987_v27, %v11166_v15  ;;  %v5455_v27 = vadd.f32 %v11005_v25, %v11170_v56  ;;  %v5465_v25 = vadd.f32 %v11023_v24, %v11174_v42 }
 0xc8a   : > { %v5793_v52 = vpop.f32.mrf.mxu0  ;;  %v5475_v24 = vadd.f32 %v11041_v17, %v11178_v10  ;;  %v5485_v17 = vadd.f32 %v11059_v47, %v11182_v44 }
 0xc8b   : > { %v5956_v45 = vadd.f32 %v11193_v50, %v5926_v13 }
 0xc8c   : > { %v5796_v6 = vpop.f32.mrf.mxu0 }
 0xc8d   : > { %5985 = vst.msk [vmem:[%s11198_s22 + $0x8] sm:$0xff] %vm5983_vm4, %v5956_v45  ;;  %v5927_v30 = vadd.f32 %v5796_v6, %v5370_v37 }
 0xc8e   : > { %v5798_v11 = vpop.f32.mrf.mxu0 }
 0xc8f   : > { %v5957_v53 = vadd.f32 %v11193_v50, %v5927_v30 }
 0xc90   : > { %v5801_v36 = vpop.f32.mrf.mxu0 }
 0xc91   : > { %5986 = vst.msk [vmem:[%s11198_s22 + $0x10] sm:$0xff] %vm5983_vm4, %v5957_v53  ;;  %v5928_v14 = vadd.f32 %v5801_v36, %v5375_v9 }
 0xc92   : > { %v5803_v38 = vpop.f32.mrf.mxu0 }
 0xc93   : > { %v5958_v61 = vadd.f32 %v11193_v50, %v5928_v14 }
 0xc94   : > { %v5806_v13 = vpop.f32.mrf.mxu0 }
 0xc95   : > { %5987 = vst.msk [vmem:[%s11198_s22 + $0x18] sm:$0xff] %vm5983_vm4, %v5958_v61  ;;  %v5929_v52 = vadd.f32 %v5806_v13, %v5380_v41 }
 0xc96   : > { %v5808_v37 = vpop.f32.mrf.mxu0 }
 0xc97   : > { %v5959_v26 = vadd.f32 %v11193_v50, %v5929_v52 }
 0xc98   : > { %v5811_v45 = vpop.f32.mrf.mxu0 }
 0xc99   : > { %5988 = vst.msk [vmem:[%s11198_s22 + $0x20] sm:$0xff] %vm5983_vm4, %v5959_v26  ;;  %v5930_v6 = vadd.f32 %v5811_v45, %v5385_v7 }
 0xc9a   : > { %v5813_v30 = vpop.f32.mrf.mxu0 }
 0xc9b   : > { %v5960_v48 = vadd.f32 %v11193_v50, %v5930_v6 }
 0xc9c   : > { %v5816_v11 = vpop.f32.mrf.mxu0 }
 0xc9d   : > { %5989 = vst.msk [vmem:[%s11198_s22 + $0x28] sm:$0xff] %vm5983_vm4, %v5960_v48  ;;  %v5931_v9 = vadd.f32 %v5816_v11, %v5390_v62 }
 0xc9e   : > { %v5818_v53 = vpop.f32.mrf.mxu0 }
 0xc9f   : > { %v5961_v12 = vadd.f32 %v11193_v50, %v5931_v9 }
 0xca0   : > { %v5821_v36 = vpop.f32.mrf.mxu0 }
 0xca1   : > { %5990 = vst.msk [vmem:[%s11198_s22 + $0x30] sm:$0xff] %vm5983_vm4, %v5961_v12  ;;  %v5932_v14 = vadd.f32 %v5821_v36, %v5395_v35 }
 0xca2   : > { %v5823_v38 = vpop.f32.mrf.mxu0 }
 0xca3   : > { %v5962_v57 = vadd.f32 %v11193_v50, %v5932_v14 }
 0xca4   : > { %v5826_v41 = vpop.f32.mrf.mxu0 }
 0xca5   : > { %5991 = vst.msk [vmem:[%s11198_s22 + $0x38] sm:$0xff] %vm5983_vm4, %v5962_v57  ;;  %v5933_v61 = vadd.f32 %v5826_v41, %v5400_v46 }
 0xca6   : > { %v5828_v13 = vpop.f32.mrf.mxu0 }
 0xca7   : > { %v5963_v29 = vadd.f32 %v11193_v50, %v5933_v61 }
 0xca8   : > { %v5831_v52 = vpop.f32.mrf.mxu0 }
 0xca9   : > { %5992 = vst.msk [vmem:[%s11198_s22 + $0x40] sm:$0xff] %vm5983_vm4, %v5963_v29  ;;  %v5934_v37 = vadd.f32 %v5831_v52, %v5405_v33 }
 0xcaa   : > { %v5833_v7 = vpop.f32.mrf.mxu0 }
 0xcab   : > { %v5964_v1 = vadd.f32 %v11193_v50, %v5934_v37 }
 0xcac   : > { %v5836_v26 = vpop.f32.mrf.mxu0 }
 0xcad   : > { %5993 = vst.msk [vmem:[%s11198_s22 + $0x48] sm:$0xff] %vm5983_vm4, %v5964_v1  ;;  %v5935_v45 = vadd.f32 %v5836_v26, %v5410_v51 }
 0xcae   : > { %v5838_v6 = vpop.f32.mrf.mxu0 }
 0xcaf   : > { %v5965_v20 = vadd.f32 %v11193_v50, %v5935_v45 }
 0xcb0   : > { %v5841_v30 = vpop.f32.mrf.mxu0 }
 0xcb1   : > { %5994 = vst.msk [vmem:[%s11198_s22 + $0x50] sm:$0xff] %vm5983_vm4, %v5965_v20  ;;  %v5936_v62 = vadd.f32 %v5841_v30, %v5415_v49 }
 0xcb2   : > { %v5843_v48 = vpop.f32.mrf.mxu0 }
 0xcb3   : > { %v5966_v5 = vadd.f32 %v11193_v50, %v5936_v62 }
 0xcb4   : > { %v5846_v11 = vpop.f32.mrf.mxu0 }
 0xcb5   : > { %5995 = vst.msk [vmem:[%s11198_s22 + $0x58] sm:$0xff] %vm5983_vm4, %v5966_v5  ;;  %v5937_v9 = vadd.f32 %v5846_v11, %v5420_v40 }
 0xcb6   : > { %v5848_v53 = vpop.f32.mrf.mxu0 }
 0xcb7   : > { %v5967_v60 = vadd.f32 %v11193_v50, %v5937_v9 }
 0xcb8   : > { %v5851_v35 = vpop.f32.mrf.mxu0 }
 0xcb9   : > { %5996 = vst.msk [vmem:[%s11198_s22 + $0x60] sm:$0xff] %vm5983_vm4, %v5967_v60  ;;  %v5938_v12 = vadd.f32 %v5851_v35, %v5425_v2 }
 0xcba   : > { %v5853_v36 = vpop.f32.mrf.mxu0 }
 0xcbb   : > { %v5968_v4 = vadd.f32 %v11193_v50, %v5938_v12 }
 0xcbc   : > { %v5856_v14 = vpop.f32.mrf.mxu0 }
 0xcbd   : > { %5997 = vst.msk [vmem:[%s11198_s22 + $0x68] sm:$0xff] %vm5983_vm4, %v5968_v4  ;;  %v5939_v38 = vadd.f32 %v5856_v14, %v5430_v31 }
 0xcbe   : > { %v5858_v46 = vpop.f32.mrf.mxu0 }
 0xcbf   : > { %v5969_v8 = vadd.f32 %v11193_v50, %v5939_v38 }
 0xcc0   : > { %v5861_v57 = vpop.f32.mrf.mxu0 }
 0xcc1   : > { %5998 = vst.msk [vmem:[%s11198_s22 + $0x70] sm:$0xff] %vm5983_vm4, %v5969_v8  ;;  %v5940_v41 = vadd.f32 %v5861_v57, %v5435_v43  ;;  %v11740_v43 = vld [vmem:[#allocation40_spill] sm:$0xff] }
 0xcc2   : > { %v5863_v61 = vpop.f32.mrf.mxu0  ;;  %v5495_v8 = vadd.f32 %v11740_v43, %v11187_v18 }
 0xcc3   : > { %v5970_v21 = vadd.f32 %v11193_v50, %v5940_v41 }
 0xcc4   : > { %v5866_v13 = vpop.f32.mrf.mxu0 }
 0xcc5   : > { %5999 = vst.msk [vmem:[%s11198_s22 + $0x78] sm:$0xff] %vm5983_vm4, %v5970_v21  ;;  %v5941_v33 = vadd.f32 %v5866_v13, %v5440_v16 }
 0xcc6   : > { %v5868_v29 = vpop.f32.mrf.mxu0 }
 0xcc7   : > { %v5971_v23 = vadd.f32 %v11193_v50, %v5941_v33 }
 0xcc8   : > { %v5871_v52 = vpop.f32.mrf.mxu0 }
 0xcc9   : > { %6000 = vst.msk [vmem:[%s11198_s22 + $0x80] sm:$0xff] %vm5983_vm4, %v5971_v23  ;;  %v5942_v37 = vadd.f32 %v5871_v52, %v5445_v0 }
 0xcca   : > { %v5873_v7 = vpop.f32.mrf.mxu0 }
 0xccb   : > { %v5972_v55 = vadd.f32 %v11193_v50, %v5942_v37 }
 0xccc   : > { %v5876_v51 = vpop.f32.mrf.mxu0 }
 0xccd   : > { %6001 = vst.msk [vmem:[%s11198_s22 + $0x88] sm:$0xff] %vm5983_vm4, %v5972_v55  ;;  %v5943_v1 = vadd.f32 %v5876_v51, %v5450_v19 }
 0xcce   : > { %v5878_v26 = vpop.f32.mrf.mxu0 }
 0xccf   : > { %v5973_v15 = vadd.f32 %v11193_v50, %v5943_v1 }
 0xcd0   : > { %v5881_v45 = vpop.f32.mrf.mxu0 }
 0xcd1   : > { %6002 = vst.msk [vmem:[%s11198_s22 + $0x90] sm:$0xff] %vm5983_vm4, %v5973_v15  ;;  %v5944_v6 = vadd.f32 %v5881_v45, %v5455_v27 }
 0xcd2   : > { %v5883_v49 = vpop.f32.mrf.mxu0 }
 0xcd3   : > { %v5974_v3 = vadd.f32 %v11193_v50, %v5944_v6 }
 0xcd4   : > { %v5886_v20 = vpop.f32.mrf.mxu0 }
 0xcd5   : > { %6003 = vst.msk [vmem:[%s11198_s22 + $0x98] sm:$0xff] %vm5983_vm4, %v5974_v3  ;;  %v5945_v30 = vadd.f32 %v5886_v20, %v5460_v28 }
 0xcd6   : > { %v5888_v62 = vpop.f32.mrf.mxu0 }
 0xcd7   : > { %v5975_v56 = vadd.f32 %v11193_v50, %v5945_v30 }
 0xcd8   : > { %v5891_v48 = vpop.f32.mrf.mxu0 }
 0xcd9   : > { %6004 = vst.msk [vmem:[%s11198_s22 + $0xa0] sm:$0xff] %vm5983_vm4, %v5975_v56  ;;  %v5946_v40 = vadd.f32 %v5891_v48, %v5465_v25 }
 0xcda   : > { %v5893_v5 = vpop.f32.mrf.mxu0 }
 0xcdb   : > { %v5976_v54 = vadd.f32 %v11193_v50, %v5946_v40 }
 0xcdc   : > { %v5896_v11 = vpop.f32.mrf.mxu0 }
 0xcdd   : > { %6005 = vst.msk [vmem:[%s11198_s22 + $0xa8] sm:$0xff] %vm5983_vm4, %v5976_v54  ;;  %v5947_v9 = vadd.f32 %v5896_v11, %v5470_v32 }
 0xcde   : > { %v5898_v53 = vpop.f32.mrf.mxu0 }
 0xcdf   : > { %v5977_v42 = vadd.f32 %v11193_v50, %v5947_v9 }
 0xce0   : > { %v5901_v2 = vpop.f32.mrf.mxu0 }
 0xce1   : > { %6006 = vst.msk [vmem:[%s11198_s22 + $0xb0] sm:$0xff] %vm5983_vm4, %v5977_v42  ;;  %v5948_v60 = vadd.f32 %v5901_v2, %v5475_v24 }
 0xce2   : > { %v5903_v35 = vpop.f32.mrf.mxu0 }
 0xce3   : > { %v5978_v22 = vadd.f32 %v11193_v50, %v5948_v60 }
 0xce4   : > { %v5906_v12 = vpop.f32.mrf.mxu0 }
 0xce5   : > { %6007 = vst.msk [vmem:[%s11198_s22 + $0xb8] sm:$0xff] %vm5983_vm4, %v5978_v22  ;;  %v5949_v36 = vadd.f32 %v5906_v12, %v5480_v59 }
 0xce6   : > { %v5908_v31 = vpop.f32.mrf.mxu0 }
 0xce7   : > { %v5979_v10 = vadd.f32 %v11193_v50, %v5949_v36 }
 0xce8   : > { %v5911_v4 = vpop.f32.mrf.mxu0 }
 0xce9   : > { %6008 = vst.msk [vmem:[%s11198_s22 + $0xc0] sm:$0xff] %vm5983_vm4, %v5979_v10  ;;  %v5950_v14 = vadd.f32 %v5911_v4, %v5485_v17 }
 0xcea   : > { %v5913_v34 = vpop.f32.mrf.mxu0 }
 0xceb   : > { %v5980_v38 = vadd.f32 %v11193_v50, %v5950_v14 }
 0xcec   : > { %v5916_v46 = vpop.f32.mrf.mxu0 }
 0xced   : > { %6009 = vst.msk [vmem:[%s11198_s22 + $0xc8] sm:$0xff] %vm5983_vm4, %v5980_v38  ;;  %v5951_v47 = vadd.f32 %v5916_v46, %v5490_v63 }
 0xcee   : > { %v5918_v44 = vpop.f32.mrf.mxu0 }
 0xcef   : > { %v5981_v57 = vadd.f32 %v11193_v50, %v5951_v47 }
 0xcf0   : > { %v5921_v41 = vpop.f32.mrf.mxu0 }
 0xcf1   : > { %6010 = vst.msk [vmem:[%s11198_s22 + $0xd0] sm:$0xff] %vm5983_vm4, %v5981_v57  ;;  %v5952_v58 = vadd.f32 %v5921_v41, %v5495_v8 }
 0xcf2   : > { %v5923_v39 = vpop.f32.mrf.mxu0 }
 0xcf3   : > { %v5982_v61 = vadd.f32 %v11193_v50, %v5952_v58 }
 0xcf5   : > { %6011 = vst.msk [vmem:[%s11198_s22 + $0xd8] sm:$0xff] %vm5983_vm4, %v5982_v61 }
 0xcf6   : > { %7330 = shalt.err (!%p7327_p3)
}
 0xcf7   : > { %s7331_s14 = scalar_lea.hbm %s11337_s18, 3584  ;;  %s7335_s21 = scalar_lea.hbm %s11394_s8, 7168 }
 0xcf8   : > { %p7332_p4 = scmp.ne.s32.totalorder %s11337_s18, %s7331_s14  ;;  %p7336_p9 = scmp.lt.s32.totalorder %s11337_s18, %s11394_s8 }
 0xcf9   : > { %p7337_p10 = scmp.lt.s32.totalorder %s7335_s21, %s7331_s14 }
 0xcfa   : > { %p7333_p7 = pnand %p7332_p4, %p7473_p5 }
 0xcfb   : > { %p7338_p11 = por %p7337_p10, %p7336_p9 }
 0xcfc   : > { %p7334_p8 = pneg %p7333_p7 }
 0xcfe   : > { %p7339_p12 = pnand %p7338_p11, %p7334_p8 }
 0xd00   : > { %7342 = shalt.err (!%p7339_p12)
}
 0xd01   : > { %s7385_s25 = smov 128   ;;  %s7386_s26 = smov 8  }
 0xd02   : > { %7216 = dma.vmem_to_hbm [thread:$0]  (%p7473_p5), %s11340_s24, 3584, %s11337_s18, %s11346_s7, %s7385_s25, %s7385_s25, %s7386_s26  }
 0xd03 PF: > { %p7222_p13 = scmp.ge.s32.totalorder %s7377_s10, 2  ;;  %s6041_s27 = sand.u32 1, %s7365_s29  }
 0xd04   : > { %s6042_s11 = scalar_lea.sflag [#allocation5], %s6041_s27 }
 0xd05   : > { %p7219_p0 = pnand %p7222_p13, %p7477_p6 }
 0xd07   : > { %p7220_p1 = pneg %p7219_p0 }
 0xd09   : > { %7360 = dma.done.wait (%p7220_p1), %s6042_s11, 3584  }
 0xd0a   : > { %7362 = vsyncadd (%p7220_p1), %s6042_s11, 4294963712  ;;  %p19_p2 = scmp.ge.s32.totalorder %s7460_s12, 4   ;;  %s11741_s29 = smov %s7369_s30 }
 0xd0b   : > { %s11742_s30 = smov %s7373_s9  ;;  %s11743_s9 = smov %s7471_s15 }
 0xd0c   : > { %s11744_s10 = smov %s7460_s12  ;;  %21 = sbr.rel (!%p19_p2) target bundleno = 5 (0x5), region = 97 }
 0xd11   :  { %6047 = vsyncpa [#allocation5], 1 }
 0xd12   :  { %6049 = vsyncpa [#allocation5 + $0x1], 1 }

</bundles_post_ra>
